<compile_context>
chip_gen: v7x
topology: tpu7x:2x2x1
jax: 0.10.0
libtpu: 0.0.40
codegen_flags: <defaults>
</compile_context>

<pallas_src>
import functools

import jax
import jax.numpy as jnp
from jax import lax
from jax.experimental import pallas as pl
from jax.experimental.pallas import tpu as pltpu

HEAD_WIDTH = 128          # lane-dense fused (logits | value | zero-pad) width

# Geometry of the 'large' CnnPolicy (84x84 input is forced by fc = 64*7*7).
#   conv1: 8x8/s4, 4->32,  84x84 -> 20x20
#   conv2: 4x4/s2, 32->64, 20x20 -> 9x9
#   conv3: 3x3/s1, 64->64,  9x9  -> 7x7
# conv1 output is stored parity-split: 4 blocks of a 10x10 grid, each padded
# to A1_STRIDE rows.  conv2/conv3 outputs are stored on width-10 padded grids
# (columns >= valid width are garbage and get zero fc-weight rows).
A1_STRIDE = 104           # 100 valid rows (10x10) + pad rows per parity block
A1_ROWS = 4 * A1_STRIDE   # 416
A2_ROWS = 96              # 90 valid rows (9x10 padded grid) + pad rows
A3_ROWS = 70              # 7x10 padded grid (valid cols 0..6)
FC_IN = A3_ROWS * 64      # 4480 (garbage columns hit zero weight rows)


# ------------------------------ small helpers --------------------------------

def _round_up(x, m):
    return ((x + m - 1) // m) * m


def _pad_rows(a, m_pad):
    m = a.shape[0]
    return a if m == m_pad else jnp.pad(a, ((0, m_pad - m), (0, 0)))


# ------------------------------ Pallas kernels --------------------------------

def _conv_tower_kernel(p1_ref, w1_ref, b1_ref, w2_ref, b2_ref, w3_ref, b3_ref,
                       out_ref, a1_ref, a2_ref):
    """conv1+conv2+conv3 for one sample; a1/a2 never leave VMEM.

    p1_ref : [1, 400, 256] bf16  conv1 patches, parity-major rows
             row = (p*2+q)*100 + a*10 + b  <->  conv1 output (2a+p, 2b+q)
    a1_ref : [416, 32]  bf16 scratch, parity blocks of stride 104
    a2_ref : [96, 64]   bf16 scratch, conv2 output on a 9x10 padded grid
    out    : [1, 70, 64] bf16, conv3 output on a 7x10 padded grid
    """
    # Zero scratch so pad rows read by the shifted matmuls are finite (they
    # only ever feed garbage columns, which are killed by zero fc rows).
    a1_ref[...] = jnp.zeros_like(a1_ref)
    a2_ref[...] = jnp.zeros_like(a2_ref)

    # ---- conv1: 4 per-parity matmuls [100,256] @ [256,32] (1/255 folded) ----
    b1 = b1_ref[...]
    for par in range(4):
        lhs = p1_ref[0, pl.ds(par * 100, 100), :]
        y = jnp.dot(lhs, w1_ref[...], preferred_element_type=jnp.float32)
        y = jnp.maximum(y + b1, 0.0)
        a1_ref[pl.ds(par * A1_STRIDE, 100), :] = y.astype(a1_ref.dtype)

    # ---- conv2: 16 shifted matmuls [90,32] @ [32,64] over parity blocks ----
    acc2 = jnp.zeros((90, 64), jnp.float32)
    for ki in range(4):
        for kj in range(4):
            par = (ki % 2) * 2 + (kj % 2)
            start = par * A1_STRIDE + (ki // 2) * 10 + (kj // 2)
            acc2 = acc2 + jnp.dot(a1_ref[pl.ds(start, 90), :],
                                  w2_ref[ki * 4 + kj],
                                  preferred_element_type=jnp.float32)
    a2 = jnp.maximum(acc2 + b2_ref[...], 0.0)
    a2_ref[pl.ds(0, 90), :] = a2.astype(a2_ref.dtype)

    # ---- conv3: 9 shifted matmuls [70,64] @ [64,64] ----
    acc3 = jnp.zeros((A3_ROWS, 64), jnp.float32)
    for ki in range(3):
        for kj in range(3):
            acc3 = acc3 + jnp.dot(a2_ref[pl.ds(ki * 10 + kj, A3_ROWS), :],
                                  w3_ref[ki * 3 + kj],
                                  preferred_element_type=jnp.float32)
    out_ref[0, :, :] = jnp.maximum(acc3 + b3_ref[...], 0.0).astype(out_ref.dtype)


def _fused_head_kernel(h_ref, fcw_ref, fcb_ref, hw_ref, hb_ref, o_ref):
    """o = relu(h @ fc_w + fc_b) @ head_w + head_b (hidden stays in VMEM)."""
    z = jnp.dot(h_ref[...], fcw_ref[...], preferred_element_type=jnp.float32)
    z = jnp.maximum(z + fcb_ref[...], 0.0)
    o_ref[...] = jnp.dot(z.astype(jnp.bfloat16), hw_ref[...],
                         preferred_element_type=jnp.float32) + hb_ref[...]


# ------------------------------ kernel wrappers --------------------------------

_COMPILER_PARAMS = pltpu.CompilerParams(
    dimension_semantics=("parallel",),       # batch / M tiles independent
    vmem_limit_bytes=32 * 1024 * 1024,       # safe for v5e/v6e (128 MiB) & v7x (64 MiB)
)


def conv_tower(patches, w1, b1, w2, b2, w3, b3):
    """Fused conv1/conv2/conv3. patches: [N, 400, 256] bf16 -> [N, 70, 64] bf16."""
    n = patches.shape[0]
    return pl.pallas_call(
        _conv_tower_kernel,
        out_shape=jax.ShapeDtypeStruct((n, A3_ROWS, 64), jnp.bfloat16),
        grid_spec=pltpu.PrefetchScalarGridSpec(
            num_scalar_prefetch=0,
            grid=(n,),
            in_specs=[
                pl.BlockSpec((1, 400, 256), lambda i: (i, 0, 0)),
                pl.BlockSpec((256, 32), lambda i: (0, 0)),       # resident
                pl.BlockSpec((1, 32), lambda i: (0, 0)),
                pl.BlockSpec((16, 32, 64), lambda i: (0, 0, 0)),  # resident
                pl.BlockSpec((1, 64), lambda i: (0, 0)),
                pl.BlockSpec((9, 64, 64), lambda i: (0, 0, 0)),   # resident
                pl.BlockSpec((1, 64), lambda i: (0, 0)),
            ],
            out_specs=pl.BlockSpec((1, A3_ROWS, 64), lambda i: (i, 0, 0)),
            scratch_shapes=[
                pltpu.VMEM((A1_ROWS, 32), jnp.bfloat16),
                pltpu.VMEM((A2_ROWS, 64), jnp.bfloat16),
            ],
        ),
        compiler_params=_COMPILER_PARAMS,
    )(patches, w1, b1.reshape(1, -1).astype(jnp.float32),
      w2, b2.reshape(1, -1).astype(jnp.float32),
      w3, b3.reshape(1, -1).astype(jnp.float32))


def fused_fc_heads(h, fc_w, fc_b, head_w, head_b):
    """relu(h @ fc_w + fc_b) @ head_w + head_b in one pallas_call."""
    n, k = h.shape
    hidden = fc_w.shape[1]
    width = head_w.shape[1]
    tile_m = min(_round_up(n, 8), 256)       # capped per review (v7x / spill)
    m_pad = _round_up(n, tile_m)
    h = _pad_rows(h.astype(jnp.bfloat16), m_pad)   # tiny: only the [N, 4480] features
    out = pl.pallas_call(
        _fused_head_kernel,
        out_shape=jax.ShapeDtypeStruct((m_pad, width), jnp.float32),
        grid_spec=pltpu.PrefetchScalarGridSpec(
            num_scalar_prefetch=0,
            grid=(m_pad // tile_m,),
            in_specs=[
                pl.BlockSpec((tile_m, k), lambda i: (i, 0)),
                pl.BlockSpec((k, hidden), lambda i: (0, 0)),     # fc_w resident
                pl.BlockSpec((1, hidden), lambda i: (0, 0)),
                pl.BlockSpec((hidden, width), lambda i: (0, 0)),
                pl.BlockSpec((1, width), lambda i: (0, 0)),
            ],
            out_specs=pl.BlockSpec((tile_m, width), lambda i: (i, 0)),
        ),
        compiler_params=_COMPILER_PARAMS,
    )(h, fc_w.astype(jnp.bfloat16), fc_b.reshape(1, hidden).astype(jnp.float32),
      head_w.astype(jnp.bfloat16), head_b.reshape(1, width).astype(jnp.float32))
    return out[:n]


# ----------------------- conv1 patch assembly (wrapper) -----------------------

def conv1_patches(x):
    """x: [N,4,84,84] raw pixels -> [N, 400, 256] bf16 conv1 patches.

    Row order: (p*2+q)*100 + a*10 + b for conv1 output position (2a+p, 2b+q);
    depth order: (di*2+dj)*64 + r*16 + c*4 + ci with kernel offset
    (ki, kj) = (4*di + r, 4*dj + c).
    """
    n = x.shape[0]
    x = jnp.transpose(x, (0, 2, 3, 1))                               # NHWC
    x = x.reshape(n, 21, 4, 21, 4, 4).transpose(0, 1, 3, 2, 4, 5)
    x = x.reshape(n, 21, 21, 64)                                     # space-to-depth /4
    blocks = [x[:, di:di + 20, dj:dj + 20, :] for di in (0, 1) for dj in (0, 1)]
    p = jnp.concatenate(blocks, axis=-1)                             # [N,20,20,256]
    p = p.reshape(n, 10, 2, 10, 2, 256).transpose(0, 2, 4, 1, 3, 5)  # parity-major
    return p.reshape(n, 400, 256).astype(jnp.bfloat16)


# ------------------------------ parameters -----------------------------------

def orthogonal(key, shape, gain):
    """Deterministic orthogonal init (torch.nn.init.orthogonal_ semantics)."""
    rows = shape[0]
    cols = 1
    for s in shape[1:]:
        cols *= s
    a = jax.random.normal(key, (max(rows, cols), min(rows, cols)), jnp.float32)
    q, r = jnp.linalg.qr(a)
    d = jnp.sign(jnp.diagonal(r))
    d = jnp.where(d == 0, 1.0, d)
    q = q * d
    if rows < cols:
        q = q.T
    return (gain * q[:rows, :cols]).reshape(shape)


def init_params(key, num_actions):
    ks = jax.random.split(key, 6)
    p = {}
    p["conv1_w"] = orthogonal(ks[0], (32, 4, 8, 8), 1.0)
    p["conv1_b"] = jnp.zeros((32,), jnp.float32)
    p["conv2_w"] = orthogonal(ks[1], (64, 32, 4, 4), 1.0)
    p["conv2_b"] = jnp.zeros((64,), jnp.float32)
    p["conv3_w"] = orthogonal(ks[2], (64, 64, 3, 3), 1.0)
    p["conv3_b"] = jnp.zeros((64,), jnp.float32)
    # linear weights stored [in, out]; fc_w rows are in torch NCHW-flatten order.
    p["fc_w"] = orthogonal(ks[3], (512, 64 * 7 * 7), 0.01).T
    p["fc_b"] = jnp.zeros((512,), jnp.float32)
    p["logits_w"] = orthogonal(ks[4], (num_actions, 512), 0.01).T
    p["logits_b"] = jnp.zeros((num_actions,), jnp.float32)
    p["value_w"] = orthogonal(ks[5], (1, 512), 0.01).T
    p["value_b"] = jnp.zeros((1,), jnp.float32)
    return p


def prepare_params(params, num_actions):
    """One-time weight transforms: layout permutes, /255 fold, head fuse, bf16."""
    pp = {}

    # conv1: fold 1/255; rows ordered (di, dj, r, c, ci) to match conv1_patches.
    w = params["conv1_w"] * (1.0 / 255.0)            # [32,4,8,8] (co,ci,ki,kj)
    w = jnp.transpose(w, (2, 3, 1, 0))               # (ki,kj,ci,co)
    w = w.reshape(2, 4, 2, 4, 4, 32)                 # (di,r,dj,c,ci,co)
    w = jnp.transpose(w, (0, 2, 1, 3, 4, 5))         # (di,dj,r,c,ci,co)
    pp["w1"] = w.reshape(256, 32).astype(jnp.bfloat16)
    pp["b1"] = params["conv1_b"].astype(jnp.float32)

    pp["w2"] = jnp.transpose(params["conv2_w"], (2, 3, 1, 0)).reshape(
        16, 32, 64).astype(jnp.bfloat16)
    pp["b2"] = params["conv2_b"].astype(jnp.float32)
    pp["w3"] = jnp.transpose(params["conv3_w"], (2, 3, 1, 0)).reshape(
        9, 64, 64).astype(jnp.bfloat16)
    pp["b3"] = params["conv3_b"].astype(jnp.float32)

    # fc: torch NCHW-flatten rows -> (h, w_padded_to_10, c) rows with zero rows
    # at the padded-grid garbage columns (w in 7..9).
    fw = params["fc_w"].reshape(64, 7, 7, 512)       # (c, h, w, o)
    fw = jnp.transpose(fw, (1, 2, 0, 3))             # (h, w, c, o)
    fw = jnp.pad(fw, ((0, 0), (0, 3), (0, 0), (0, 0)))
    pp["fc_w"] = fw.reshape(FC_IN, 512).astype(jnp.bfloat16)
    pp["fc_b"] = params["fc_b"].astype(jnp.float32)

    # Fused heads: [logits | value | zero pad] -> lane-dense width 128.
    assert num_actions + 1 <= HEAD_WIDTH
    hw = jnp.concatenate([params["logits_w"], params["value_w"]], axis=1)
    hb = jnp.concatenate([params["logits_b"], params["value_b"]], axis=0)
    pad = HEAD_WIDTH - (num_actions + 1)
    pp["head_w"] = jnp.pad(hw, ((0, 0), (0, pad))).astype(jnp.bfloat16)
    pp["head_b"] = jnp.pad(hb, ((0, pad),)).astype(jnp.float32)
    return pp


# ------------------------------ forward pass ----------------------------------

def cnn_policy_forward(prepped, x, *, num_actions):
    """x: [N, 4, 84, 84] float32 raw pixels (NCHW). Returns (logits, value)."""
    patches = conv1_patches(x)                                     # [N,400,256]
    a3 = conv_tower(patches, prepped["w1"], prepped["b1"],
                    prepped["w2"], prepped["b2"],
                    prepped["w3"], prepped["b3"])                  # [N,70,64]
    feats = a3.reshape(a3.shape[0], FC_IN)                         # contiguous
    out = fused_fc_heads(feats, prepped["fc_w"], prepped["fc_b"],
                         prepped["head_w"], prepped["head_b"])     # [N,128]
    logits = out[:, :num_actions]
    value = out[:, num_actions]
    return logits, value


# ------------------------- pure-JAX reference (check) -------------------------

def reference_forward(params, x):
    dn = ("NCHW", "OIHW", "NCHW")

    def conv(x, w, b, s):
        y = lax.conv_general_dilated(x, w, (s, s), "VALID", dimension_numbers=dn)
        return jnp.maximum(y + b.reshape(1, -1, 1, 1), 0.0)

    h = conv(x / 255.0, params["conv1_w"], params["conv1_b"], 4)
    h = conv(h, params["conv2_w"], params["conv2_b"], 2)
    h = conv(h, params["conv3_w"], params["conv3_b"], 1)
    h = h.reshape(h.shape[0], -1)
    h = jnp.maximum(h @ params["fc_w"] + params["fc_b"], 0.0)
    logits = h @ params["logits_w"] + params["logits_b"]
    value = (h @ params["value_w"] + params["value_b"])[:, 0]
    return logits, value


# ----------------------------------- main -------------------------------------

if __name__ == "__main__":
    key = jax.random.PRNGKey(0)
    pkey, xkey = jax.random.split(key)

    num_actions = 6
    params = init_params(pkey, num_actions)
    prepped = prepare_params(params, num_actions)

    # 84x84 spatial size is dictated by fc = Linear(64*7*7, 512); batch = 2.
    x = jax.random.uniform(xkey, (2, 4, 84, 84), jnp.float32, 0.0, 255.0)

    fwd = jax.jit(functools.partial(cnn_policy_forward, num_actions=num_actions))
    logits, value = fwd(prepped, x)
    jax.block_until_ready((logits, value))

    ref_logits, ref_value = reference_forward(params, x)
    assert logits.shape == (2, num_actions) and value.shape == (2,)
    assert jnp.allclose(logits, ref_logits, rtol=3e-2, atol=3e-3)
    assert jnp.allclose(value, ref_value, rtol=3e-2, atol=3e-3)

    print("KERNEL_OK")
</pallas_src>

<mosaic_0001>
module attributes {stable_mosaic.version = 11 : i64} {
  func.func @_conv_tower_kernel(%arg0: i32, %arg1: memref<1x400x256xbf16, #tpu.memory_space<vmem>>, %arg2: memref<256x32xbf16, #tpu.memory_space<vmem>>, %arg3: memref<1x32xf32, #tpu.memory_space<vmem>>, %arg4: memref<16x32x64xbf16, #tpu.memory_space<vmem>>, %arg5: memref<1x64xf32, #tpu.memory_space<vmem>>, %arg6: memref<9x64x64xbf16, #tpu.memory_space<vmem>>, %arg7: memref<1x64xf32, #tpu.memory_space<vmem>>, %arg8: memref<1x70x64xbf16, #tpu.memory_space<vmem>>, %arg9: memref<416x32xbf16, #tpu.memory_space<vmem>>, %arg10: memref<96x64xbf16, #tpu.memory_space<vmem>>) attributes {dimension_semantics = [#tpu.dimension_semantics<parallel>], iteration_bounds = array<i64: 2>, scalar_prefetch = 0 : i64, scratch_operands = 2 : i64, tpu.core_type = #tpu.core_type<tc>, window_params = [{transform_indices = @transform_0, window_bounds = array<i64: 1, 400, 256>}, {pipeline_mode = #tpu.pipeline_mode<synchronous>, transform_indices = @transform_1, window_bounds = array<i64: 256, 32>}, {pipeline_mode = #tpu.pipeline_mode<synchronous>, transform_indices = @transform_2, window_bounds = array<i64: 1, 32>}, {pipeline_mode = #tpu.pipeline_mode<synchronous>, transform_indices = @transform_3, window_bounds = array<i64: 16, 32, 64>}, {pipeline_mode = #tpu.pipeline_mode<synchronous>, transform_indices = @transform_4, window_bounds = array<i64: 1, 64>}, {pipeline_mode = #tpu.pipeline_mode<synchronous>, transform_indices = @transform_5, window_bounds = array<i64: 9, 64, 64>}, {pipeline_mode = #tpu.pipeline_mode<synchronous>, transform_indices = @transform_6, window_bounds = array<i64: 1, 64>}, {transform_indices = @transform_7, window_bounds = array<i64: 1, 70, 64>}]} {
    %cst = arith.constant 0.000000e+00 : bf16
    %0 = vector.broadcast %cst : bf16 to vector<416x32xbf16>
    %c0 = arith.constant 0 : index
    %c0_0 = arith.constant 0 : index
    %1 = vector.load %arg9[%c0, %c0_0] : memref<416x32xbf16, #tpu.memory_space<vmem>>, vector<416x32xbf16>
    tpu.vector_store %arg9[%c0, %c0_0], %0 {strides = array<i32>} : memref<416x32xbf16, #tpu.memory_space<vmem>>, vector<416x32xbf16>,
    %cst_1 = arith.constant 0.000000e+00 : bf16
    %2 = vector.broadcast %cst_1 : bf16 to vector<96x64xbf16>
    %c0_2 = arith.constant 0 : index
    %c0_3 = arith.constant 0 : index
    %3 = vector.load %arg10[%c0_2, %c0_3] : memref<96x64xbf16, #tpu.memory_space<vmem>>, vector<96x64xbf16>
    tpu.vector_store %arg10[%c0_2, %c0_3], %2 {strides = array<i32>} : memref<96x64xbf16, #tpu.memory_space<vmem>>, vector<96x64xbf16>,
    %c0_4 = arith.constant 0 : index
    %c0_5 = arith.constant 0 : index
    %4 = vector.load %arg3[%c0_4, %c0_5] : memref<1x32xf32, #tpu.memory_space<vmem>>, vector<1x32xf32>
    %c0_6 = arith.constant 0 : index
    %c0_7 = arith.constant 0 : index
    %c0_8 = arith.constant 0 : index
    %5 = vector.load %arg1[%c0_6, %c0_7, %c0_8] : memref<1x400x256xbf16, #tpu.memory_space<vmem>>, vector<1x100x256xbf16>
    %6 = vector.shape_cast %5 : vector<1x100x256xbf16> to vector<100x256xbf16>
    %c0_9 = arith.constant 0 : index
    %c0_10 = arith.constant 0 : index
    %7 = vector.load %arg2[%c0_9, %c0_10] : memref<256x32xbf16, #tpu.memory_space<vmem>>, vector<256x32xbf16>
    %cst_11 = arith.constant dense<0.000000e+00> : vector<100x32xf32>
    %8 = tpu.matmul %6, %7, %cst_11 {dimension_numbers = #tpu.dot_dimension_numbers<[1], [0], [0], [1], [0, 0, 1, 1], [], []>} : vector<100x256xbf16>, vector<256x32xbf16>, vector<100x32xf32> -> vector<100x32xf32>
    %9 = vector.broadcast %4 : vector<1x32xf32> to vector<100x32xf32>
    %10 = arith.addf %8, %9 : vector<100x32xf32>
    %cst_12 = arith.constant 0.000000e+00 : f32
    %11 = vector.broadcast %cst_12 : f32 to vector<100x32xf32>
    %12 = arith.maximumf %10, %11 : vector<100x32xf32>
    %13 = arith.truncf %12 : vector<100x32xf32> to vector<100x32xbf16>
    %c0_13 = arith.constant 0 : index
    %c0_14 = arith.constant 0 : index
    %14 = vector.load %arg9[%c0_13, %c0_14] : memref<416x32xbf16, #tpu.memory_space<vmem>>, vector<100x32xbf16>
    tpu.vector_store %arg9[%c0_13, %c0_14], %13 {strides = array<i32>} : memref<416x32xbf16, #tpu.memory_space<vmem>>, vector<100x32xbf16>,
    %c0_15 = arith.constant 0 : index
    %c100 = arith.constant 100 : index
    %c0_16 = arith.constant 0 : index
    %15 = vector.load %arg1[%c0_15, %c100, %c0_16] : memref<1x400x256xbf16, #tpu.memory_space<vmem>>, vector<1x100x256xbf16>
    %16 = vector.shape_cast %15 : vector<1x100x256xbf16> to vector<100x256xbf16>
    %c0_17 = arith.constant 0 : index
    %c0_18 = arith.constant 0 : index
    %17 = vector.load %arg2[%c0_17, %c0_18] : memref<256x32xbf16, #tpu.memory_space<vmem>>, vector<256x32xbf16>
    %cst_19 = arith.constant dense<0.000000e+00> : vector<100x32xf32>
    %18 = tpu.matmul %16, %17, %cst_19 {dimension_numbers = #tpu.dot_dimension_numbers<[1], [0], [0], [1], [0, 0, 1, 1], [], []>} : vector<100x256xbf16>, vector<256x32xbf16>, vector<100x32xf32> -> vector<100x32xf32>
    %19 = vector.broadcast %4 : vector<1x32xf32> to vector<100x32xf32>
    %20 = arith.addf %18, %19 : vector<100x32xf32>
    %cst_20 = arith.constant 0.000000e+00 : f32
    %21 = vector.broadcast %cst_20 : f32 to vector<100x32xf32>
    %22 = arith.maximumf %20, %21 : vector<100x32xf32>
    %23 = arith.truncf %22 : vector<100x32xf32> to vector<100x32xbf16>
    %c104 = arith.constant 104 : index
    %c0_21 = arith.constant 0 : index
    %24 = vector.load %arg9[%c104, %c0_21] : memref<416x32xbf16, #tpu.memory_space<vmem>>, vector<100x32xbf16>
    tpu.vector_store %arg9[%c104, %c0_21], %23 {strides = array<i32>} : memref<416x32xbf16, #tpu.memory_space<vmem>>, vector<100x32xbf16>,
    %c0_22 = arith.constant 0 : index
    %c200 = arith.constant 200 : index
    %c0_23 = arith.constant 0 : index
    %25 = vector.load %arg1[%c0_22, %c200, %c0_23] : memref<1x400x256xbf16, #tpu.memory_space<vmem>>, vector<1x100x256xbf16>
    %26 = vector.shape_cast %25 : vector<1x100x256xbf16> to vector<100x256xbf16>
    %c0_24 = arith.constant 0 : index
    %c0_25 = arith.constant 0 : index
    %27 = vector.load %arg2[%c0_24, %c0_25] : memref<256x32xbf16, #tpu.memory_space<vmem>>, vector<256x32xbf16>
    %cst_26 = arith.constant dense<0.000000e+00> : vector<100x32xf32>
    %28 = tpu.matmul %26, %27, %cst_26 {dimension_numbers = #tpu.dot_dimension_numbers<[1], [0], [0], [1], [0, 0, 1, 1], [], []>} : vector<100x256xbf16>, vector<256x32xbf16>, vector<100x32xf32> -> vector<100x32xf32>
    %29 = vector.broadcast %4 : vector<1x32xf32> to vector<100x32xf32>
    %30 = arith.addf %28, %29 : vector<100x32xf32>
    %cst_27 = arith.constant 0.000000e+00 : f32
    %31 = vector.broadcast %cst_27 : f32 to vector<100x32xf32>
    %32 = arith.maximumf %30, %31 : vector<100x32xf32>
    %33 = arith.truncf %32 : vector<100x32xf32> to vector<100x32xbf16>
    %c208 = arith.constant 208 : index
    %c0_28 = arith.constant 0 : index
    %34 = vector.load %arg9[%c208, %c0_28] : memref<416x32xbf16, #tpu.memory_space<vmem>>, vector<100x32xbf16>
    tpu.vector_store %arg9[%c208, %c0_28], %33 {strides = array<i32>} : memref<416x32xbf16, #tpu.memory_space<vmem>>, vector<100x32xbf16>,
    %c0_29 = arith.constant 0 : index
    %c300 = arith.constant 300 : index
    %c0_30 = arith.constant 0 : index
    %35 = vector.load %arg1[%c0_29, %c300, %c0_30] : memref<1x400x256xbf16, #tpu.memory_space<vmem>>, vector<1x100x256xbf16>
    %36 = vector.shape_cast %35 : vector<1x100x256xbf16> to vector<100x256xbf16>
    %c0_31 = arith.constant 0 : index
    %c0_32 = arith.constant 0 : index
    %37 = vector.load %arg2[%c0_31, %c0_32] : memref<256x32xbf16, #tpu.memory_space<vmem>>, vector<256x32xbf16>
    %cst_33 = arith.constant dense<0.000000e+00> : vector<100x32xf32>
    %38 = tpu.matmul %36, %37, %cst_33 {dimension_numbers = #tpu.dot_dimension_numbers<[1], [0], [0], [1], [0, 0, 1, 1], [], []>} : vector<100x256xbf16>, vector<256x32xbf16>, vector<100x32xf32> -> vector<100x32xf32>
    %39 = vector.broadcast %4 : vector<1x32xf32> to vector<100x32xf32>
    %40 = arith.addf %38, %39 : vector<100x32xf32>
    %cst_34 = arith.constant 0.000000e+00 : f32
    %41 = vector.broadcast %cst_34 : f32 to vector<100x32xf32>
    %42 = arith.maximumf %40, %41 : vector<100x32xf32>
    %43 = arith.truncf %42 : vector<100x32xf32> to vector<100x32xbf16>
    %c312 = arith.constant 312 : index
    %c0_35 = arith.constant 0 : index
    %44 = vector.load %arg9[%c312, %c0_35] : memref<416x32xbf16, #tpu.memory_space<vmem>>, vector<100x32xbf16>
    tpu.vector_store %arg9[%c312, %c0_35], %43 {strides = array<i32>} : memref<416x32xbf16, #tpu.memory_space<vmem>>, vector<100x32xbf16>,
    %cst_36 = arith.constant 0.000000e+00 : f32
    %45 = vector.broadcast %cst_36 : f32 to vector<90x64xf32>
    %c0_37 = arith.constant 0 : index
    %c0_38 = arith.constant 0 : index
    %46 = vector.load %arg9[%c0_37, %c0_38] : memref<416x32xbf16, #tpu.memory_space<vmem>>, vector<90x32xbf16>
    %c0_39 = arith.constant 0 : index
    %c0_40 = arith.constant 0 : index
    %c0_41 = arith.constant 0 : index
    %47 = vector.load %arg4[%c0_39, %c0_40, %c0_41] : memref<16x32x64xbf16, #tpu.memory_space<vmem>>, vector<1x32x64xbf16>
    %48 = vector.shape_cast %47 : vector<1x32x64xbf16> to vector<32x64xbf16>
    %cst_42 = arith.constant dense<0.000000e+00> : vector<90x64xf32>
    %49 = tpu.matmul %46, %48, %cst_42 {dimension_numbers = #tpu.dot_dimension_numbers<[1], [0], [0], [1], [0, 0, 1, 1], [], []>} : vector<90x32xbf16>, vector<32x64xbf16>, vector<90x64xf32> -> vector<90x64xf32>
    %50 = arith.addf %45, %49 : vector<90x64xf32>
    %c104_43 = arith.constant 104 : index
    %c0_44 = arith.constant 0 : index
    %51 = vector.load %arg9[%c104_43, %c0_44] : memref<416x32xbf16, #tpu.memory_space<vmem>>, vector<90x32xbf16>
    %c1 = arith.constant 1 : index
    %c0_45 = arith.constant 0 : index
    %c0_46 = arith.constant 0 : index
    %52 = vector.load %arg4[%c1, %c0_45, %c0_46] : memref<16x32x64xbf16, #tpu.memory_space<vmem>>, vector<1x32x64xbf16>
    %53 = vector.shape_cast %52 : vector<1x32x64xbf16> to vector<32x64xbf16>
    %cst_47 = arith.constant dense<0.000000e+00> : vector<90x64xf32>
    %54 = tpu.matmul %51, %53, %cst_47 {dimension_numbers = #tpu.dot_dimension_numbers<[1], [0], [0], [1], [0, 0, 1, 1], [], []>} : vector<90x32xbf16>, vector<32x64xbf16>, vector<90x64xf32> -> vector<90x64xf32>
    %55 = arith.addf %50, %54 : vector<90x64xf32>
    %c1_48 = arith.constant 1 : index
    %c0_49 = arith.constant 0 : index
    %56 = vector.load %arg9[%c1_48, %c0_49] : memref<416x32xbf16, #tpu.memory_space<vmem>>, vector<90x32xbf16>
    %c2 = arith.constant 2 : index
    %c0_50 = arith.constant 0 : index
    %c0_51 = arith.constant 0 : index
    %57 = vector.load %arg4[%c2, %c0_50, %c0_51] : memref<16x32x64xbf16, #tpu.memory_space<vmem>>, vector<1x32x64xbf16>
    %58 = vector.shape_cast %57 : vector<1x32x64xbf16> to vector<32x64xbf16>
    %cst_52 = arith.constant dense<0.000000e+00> : vector<90x64xf32>
    %59 = tpu.matmul %56, %58, %cst_52 {dimension_numbers = #tpu.dot_dimension_numbers<[1], [0], [0], [1], [0, 0, 1, 1], [], []>} : vector<90x32xbf16>, vector<32x64xbf16>, vector<90x64xf32> -> vector<90x64xf32>
    %60 = arith.addf %55, %59 : vector<90x64xf32>
    %c105 = arith.constant 105 : index
    %c0_53 = arith.constant 0 : index
    %61 = vector.load %arg9[%c105, %c0_53] : memref<416x32xbf16, #tpu.memory_space<vmem>>, vector<90x32xbf16>
    %c3 = arith.constant 3 : index
    %c0_54 = arith.constant 0 : index
    %c0_55 = arith.constant 0 : index
    %62 = vector.load %arg4[%c3, %c0_54, %c0_55] : memref<16x32x64xbf16, #tpu.memory_space<vmem>>, vector<1x32x64xbf16>
    %63 = vector.shape_cast %62 : vector<1x32x64xbf16> to vector<32x64xbf16>
    %cst_56 = arith.constant dense<0.000000e+00> : vector<90x64xf32>
    %64 = tpu.matmul %61, %63, %cst_56 {dimension_numbers = #tpu.dot_dimension_numbers<[1], [0], [0], [1], [0, 0, 1, 1], [], []>} : vector<90x32xbf16>, vector<32x64xbf16>, vector<90x64xf32> -> vector<90x64xf32>
    %65 = arith.addf %60, %64 : vector<90x64xf32>
    %c208_57 = arith.constant 208 : index
    %c0_58 = arith.constant 0 : index
    %66 = vector.load %arg9[%c208_57, %c0_58] : memref<416x32xbf16, #tpu.memory_space<vmem>>, vector<90x32xbf16>
    %c4 = arith.constant 4 : index
    %c0_59 = arith.constant 0 : index
    %c0_60 = arith.constant 0 : index
    %67 = vector.load %arg4[%c4, %c0_59, %c0_60] : memref<16x32x64xbf16, #tpu.memory_space<vmem>>, vector<1x32x64xbf16>
    %68 = vector.shape_cast %67 : vector<1x32x64xbf16> to vector<32x64xbf16>
    %cst_61 = arith.constant dense<0.000000e+00> : vector<90x64xf32>
    %69 = tpu.matmul %66, %68, %cst_61 {dimension_numbers = #tpu.dot_dimension_numbers<[1], [0], [0], [1], [0, 0, 1, 1], [], []>} : vector<90x32xbf16>, vector<32x64xbf16>, vector<90x64xf32> -> vector<90x64xf32>
    %70 = arith.addf %65, %69 : vector<90x64xf32>
    %c312_62 = arith.constant 312 : index
    %c0_63 = arith.constant 0 : index
    %71 = vector.load %arg9[%c312_62, %c0_63] : memref<416x32xbf16, #tpu.memory_space<vmem>>, vector<90x32xbf16>
    %c5 = arith.constant 5 : index
    %c0_64 = arith.constant 0 : index
    %c0_65 = arith.constant 0 : index
    %72 = vector.load %arg4[%c5, %c0_64, %c0_65] : memref<16x32x64xbf16, #tpu.memory_space<vmem>>, vector<1x32x64xbf16>
    %73 = vector.shape_cast %72 : vector<1x32x64xbf16> to vector<32x64xbf16>
    %cst_66 = arith.constant dense<0.000000e+00> : vector<90x64xf32>
    %74 = tpu.matmul %71, %73, %cst_66 {dimension_numbers = #tpu.dot_dimension_numbers<[1], [0], [0], [1], [0, 0, 1, 1], [], []>} : vector<90x32xbf16>, vector<32x64xbf16>, vector<90x64xf32> -> vector<90x64xf32>
    %75 = arith.addf %70, %74 : vector<90x64xf32>
    %c209 = arith.constant 209 : index
    %c0_67 = arith.constant 0 : index
    %76 = vector.load %arg9[%c209, %c0_67] : memref<416x32xbf16, #tpu.memory_space<vmem>>, vector<90x32xbf16>
    %c6 = arith.constant 6 : index
    %c0_68 = arith.constant 0 : index
    %c0_69 = arith.constant 0 : index
    %77 = vector.load %arg4[%c6, %c0_68, %c0_69] : memref<16x32x64xbf16, #tpu.memory_space<vmem>>, vector<1x32x64xbf16>
    %78 = vector.shape_cast %77 : vector<1x32x64xbf16> to vector<32x64xbf16>
    %cst_70 = arith.constant dense<0.000000e+00> : vector<90x64xf32>
    %79 = tpu.matmul %76, %78, %cst_70 {dimension_numbers = #tpu.dot_dimension_numbers<[1], [0], [0], [1], [0, 0, 1, 1], [], []>} : vector<90x32xbf16>, vector<32x64xbf16>, vector<90x64xf32> -> vector<90x64xf32>
    %80 = arith.addf %75, %79 : vector<90x64xf32>
    %c313 = arith.constant 313 : index
    %c0_71 = arith.constant 0 : index
    %81 = vector.load %arg9[%c313, %c0_71] : memref<416x32xbf16, #tpu.memory_space<vmem>>, vector<90x32xbf16>
    %c7 = arith.constant 7 : index
    %c0_72 = arith.constant 0 : index
    %c0_73 = arith.constant 0 : index
    %82 = vector.load %arg4[%c7, %c0_72, %c0_73] : memref<16x32x64xbf16, #tpu.memory_space<vmem>>, vector<1x32x64xbf16>
    %83 = vector.shape_cast %82 : vector<1x32x64xbf16> to vector<32x64xbf16>
    %cst_74 = arith.constant dense<0.000000e+00> : vector<90x64xf32>
    %84 = tpu.matmul %81, %83, %cst_74 {dimension_numbers = #tpu.dot_dimension_numbers<[1], [0], [0], [1], [0, 0, 1, 1], [], []>} : vector<90x32xbf16>, vector<32x64xbf16>, vector<90x64xf32> -> vector<90x64xf32>
    %85 = arith.addf %80, %84 : vector<90x64xf32>
    %c10 = arith.constant 10 : index
    %c0_75 = arith.constant 0 : index
    %86 = vector.load %arg9[%c10, %c0_75] : memref<416x32xbf16, #tpu.memory_space<vmem>>, vector<90x32xbf16>
    %c8 = arith.constant 8 : index
    %c0_76 = arith.constant 0 : index
    %c0_77 = arith.constant 0 : index
    %87 = vector.load %arg4[%c8, %c0_76, %c0_77] : memref<16x32x64xbf16, #tpu.memory_space<vmem>>, vector<1x32x64xbf16>
    %88 = vector.shape_cast %87 : vector<1x32x64xbf16> to vector<32x64xbf16>
    %cst_78 = arith.constant dense<0.000000e+00> : vector<90x64xf32>
    %89 = tpu.matmul %86, %88, %cst_78 {dimension_numbers = #tpu.dot_dimension_numbers<[1], [0], [0], [1], [0, 0, 1, 1], [], []>} : vector<90x32xbf16>, vector<32x64xbf16>, vector<90x64xf32> -> vector<90x64xf32>
    %90 = arith.addf %85, %89 : vector<90x64xf32>
    %c114 = arith.constant 114 : index
    %c0_79 = arith.constant 0 : index
    %91 = vector.load %arg9[%c114, %c0_79] : memref<416x32xbf16, #tpu.memory_space<vmem>>, vector<90x32xbf16>
    %c9 = arith.constant 9 : index
    %c0_80 = arith.constant 0 : index
    %c0_81 = arith.constant 0 : index
    %92 = vector.load %arg4[%c9, %c0_80, %c0_81] : memref<16x32x64xbf16, #tpu.memory_space<vmem>>, vector<1x32x64xbf16>
    %93 = vector.shape_cast %92 : vector<1x32x64xbf16> to vector<32x64xbf16>
    %cst_82 = arith.constant dense<0.000000e+00> : vector<90x64xf32>
    %94 = tpu.matmul %91, %93, %cst_82 {dimension_numbers = #tpu.dot_dimension_numbers<[1], [0], [0], [1], [0, 0, 1, 1], [], []>} : vector<90x32xbf16>, vector<32x64xbf16>, vector<90x64xf32> -> vector<90x64xf32>
    %95 = arith.addf %90, %94 : vector<90x64xf32>
    %c11 = arith.constant 11 : index
    %c0_83 = arith.constant 0 : index
    %96 = vector.load %arg9[%c11, %c0_83] : memref<416x32xbf16, #tpu.memory_space<vmem>>, vector<90x32xbf16>
    %c10_84 = arith.constant 10 : index
    %c0_85 = arith.constant 0 : index
    %c0_86 = arith.constant 0 : index
    %97 = vector.load %arg4[%c10_84, %c0_85, %c0_86] : memref<16x32x64xbf16, #tpu.memory_space<vmem>>, vector<1x32x64xbf16>
    %98 = vector.shape_cast %97 : vector<1x32x64xbf16> to vector<32x64xbf16>
    %cst_87 = arith.constant dense<0.000000e+00> : vector<90x64xf32>
    %99 = tpu.matmul %96, %98, %cst_87 {dimension_numbers = #tpu.dot_dimension_numbers<[1], [0], [0], [1], [0, 0, 1, 1], [], []>} : vector<90x32xbf16>, vector<32x64xbf16>, vector<90x64xf32> -> vector<90x64xf32>
    %100 = arith.addf %95, %99 : vector<90x64xf32>
    %c115 = arith.constant 115 : index
    %c0_88 = arith.constant 0 : index
    %101 = vector.load %arg9[%c115, %c0_88] : memref<416x32xbf16, #tpu.memory_space<vmem>>, vector<90x32xbf16>
    %c11_89 = arith.constant 11 : index
    %c0_90 = arith.constant 0 : index
    %c0_91 = arith.constant 0 : index
    %102 = vector.load %arg4[%c11_89, %c0_90, %c0_91] : memref<16x32x64xbf16, #tpu.memory_space<vmem>>, vector<1x32x64xbf16>
    %103 = vector.shape_cast %102 : vector<1x32x64xbf16> to vector<32x64xbf16>
    %cst_92 = arith.constant dense<0.000000e+00> : vector<90x64xf32>
    %104 = tpu.matmul %101, %103, %cst_92 {dimension_numbers = #tpu.dot_dimension_numbers<[1], [0], [0], [1], [0, 0, 1, 1], [], []>} : vector<90x32xbf16>, vector<32x64xbf16>, vector<90x64xf32> -> vector<90x64xf32>
    %105 = arith.addf %100, %104 : vector<90x64xf32>
    %c218 = arith.constant 218 : index
    %c0_93 = arith.constant 0 : index
    %106 = vector.load %arg9[%c218, %c0_93] : memref<416x32xbf16, #tpu.memory_space<vmem>>, vector<90x32xbf16>
    %c12 = arith.constant 12 : index
    %c0_94 = arith.constant 0 : index
    %c0_95 = arith.constant 0 : index
    %107 = vector.load %arg4[%c12, %c0_94, %c0_95] : memref<16x32x64xbf16, #tpu.memory_space<vmem>>, vector<1x32x64xbf16>
    %108 = vector.shape_cast %107 : vector<1x32x64xbf16> to vector<32x64xbf16>
    %cst_96 = arith.constant dense<0.000000e+00> : vector<90x64xf32>
    %109 = tpu.matmul %106, %108, %cst_96 {dimension_numbers = #tpu.dot_dimension_numbers<[1], [0], [0], [1], [0, 0, 1, 1], [], []>} : vector<90x32xbf16>, vector<32x64xbf16>, vector<90x64xf32> -> vector<90x64xf32>
    %110 = arith.addf %105, %109 : vector<90x64xf32>
    %c322 = arith.constant 322 : index
    %c0_97 = arith.constant 0 : index
    %111 = vector.load %arg9[%c322, %c0_97] : memref<416x32xbf16, #tpu.memory_space<vmem>>, vector<90x32xbf16>
    %c13 = arith.constant 13 : index
    %c0_98 = arith.constant 0 : index
    %c0_99 = arith.constant 0 : index
    %112 = vector.load %arg4[%c13, %c0_98, %c0_99] : memref<16x32x64xbf16, #tpu.memory_space<vmem>>, vector<1x32x64xbf16>
    %113 = vector.shape_cast %112 : vector<1x32x64xbf16> to vector<32x64xbf16>
    %cst_100 = arith.constant dense<0.000000e+00> : vector<90x64xf32>
    %114 = tpu.matmul %111, %113, %cst_100 {dimension_numbers = #tpu.dot_dimension_numbers<[1], [0], [0], [1], [0, 0, 1, 1], [], []>} : vector<90x32xbf16>, vector<32x64xbf16>, vector<90x64xf32> -> vector<90x64xf32>
    %115 = arith.addf %110, %114 : vector<90x64xf32>
    %c219 = arith.constant 219 : index
    %c0_101 = arith.constant 0 : index
    %116 = vector.load %arg9[%c219, %c0_101] : memref<416x32xbf16, #tpu.memory_space<vmem>>, vector<90x32xbf16>
    %c14 = arith.constant 14 : index
    %c0_102 = arith.constant 0 : index
    %c0_103 = arith.constant 0 : index
    %117 = vector.load %arg4[%c14, %c0_102, %c0_103] : memref<16x32x64xbf16, #tpu.memory_space<vmem>>, vector<1x32x64xbf16>
    %118 = vector.shape_cast %117 : vector<1x32x64xbf16> to vector<32x64xbf16>
    %cst_104 = arith.constant dense<0.000000e+00> : vector<90x64xf32>
    %119 = tpu.matmul %116, %118, %cst_104 {dimension_numbers = #tpu.dot_dimension_numbers<[1], [0], [0], [1], [0, 0, 1, 1], [], []>} : vector<90x32xbf16>, vector<32x64xbf16>, vector<90x64xf32> -> vector<90x64xf32>
    %120 = arith.addf %115, %119 : vector<90x64xf32>
    %c323 = arith.constant 323 : index
    %c0_105 = arith.constant 0 : index
    %121 = vector.load %arg9[%c323, %c0_105] : memref<416x32xbf16, #tpu.memory_space<vmem>>, vector<90x32xbf16>
    %c15 = arith.constant 15 : index
    %c0_106 = arith.constant 0 : index
    %c0_107 = arith.constant 0 : index
    %122 = vector.load %arg4[%c15, %c0_106, %c0_107] : memref<16x32x64xbf16, #tpu.memory_space<vmem>>, vector<1x32x64xbf16>
    %123 = vector.shape_cast %122 : vector<1x32x64xbf16> to vector<32x64xbf16>
    %cst_108 = arith.constant dense<0.000000e+00> : vector<90x64xf32>
    %124 = tpu.matmul %121, %123, %cst_108 {dimension_numbers = #tpu.dot_dimension_numbers<[1], [0], [0], [1], [0, 0, 1, 1], [], []>} : vector<90x32xbf16>, vector<32x64xbf16>, vector<90x64xf32> -> vector<90x64xf32>
    %125 = arith.addf %120, %124 : vector<90x64xf32>
    %c0_109 = arith.constant 0 : index
    %c0_110 = arith.constant 0 : index
    %126 = vector.load %arg5[%c0_109, %c0_110] : memref<1x64xf32, #tpu.memory_space<vmem>>, vector<1x64xf32>
    %127 = vector.broadcast %126 : vector<1x64xf32> to vector<90x64xf32>
    %128 = arith.addf %125, %127 : vector<90x64xf32>
    %cst_111 = arith.constant 0.000000e+00 : f32
    %129 = vector.broadcast %cst_111 : f32 to vector<90x64xf32>
    %130 = arith.maximumf %128, %129 : vector<90x64xf32>
    %131 = arith.truncf %130 : vector<90x64xf32> to vector<90x64xbf16>
    %c0_112 = arith.constant 0 : index
    %c0_113 = arith.constant 0 : index
    %132 = vector.load %arg10[%c0_112, %c0_113] : memref<96x64xbf16, #tpu.memory_space<vmem>>, vector<90x64xbf16>
    tpu.vector_store %arg10[%c0_112, %c0_113], %131 {strides = array<i32>} : memref<96x64xbf16, #tpu.memory_space<vmem>>, vector<90x64xbf16>,
    %cst_114 = arith.constant 0.000000e+00 : f32
    %133 = vector.broadcast %cst_114 : f32 to vector<70x64xf32>
    %c0_115 = arith.constant 0 : index
    %c0_116 = arith.constant 0 : index
    %134 = vector.load %arg10[%c0_115, %c0_116] : memref<96x64xbf16, #tpu.memory_space<vmem>>, vector<70x64xbf16>
    %c0_117 = arith.constant 0 : index
    %c0_118 = arith.constant 0 : index
    %c0_119 = arith.constant 0 : index
    %135 = vector.load %arg6[%c0_117, %c0_118, %c0_119] : memref<9x64x64xbf16, #tpu.memory_space<vmem>>, vector<1x64x64xbf16>
    %136 = vector.shape_cast %135 : vector<1x64x64xbf16> to vector<64x64xbf16>
    %cst_120 = arith.constant dense<0.000000e+00> : vector<70x64xf32>
    %137 = tpu.matmul %134, %136, %cst_120 {dimension_numbers = #tpu.dot_dimension_numbers<[1], [0], [0], [1], [0, 0, 1, 1], [], []>} : vector<70x64xbf16>, vector<64x64xbf16>, vector<70x64xf32> -> vector<70x64xf32>
    %138 = arith.addf %133, %137 : vector<70x64xf32>
    %c1_121 = arith.constant 1 : index
    %c0_122 = arith.constant 0 : index
    %139 = vector.load %arg10[%c1_121, %c0_122] : memref<96x64xbf16, #tpu.memory_space<vmem>>, vector<70x64xbf16>
    %c1_123 = arith.constant 1 : index
    %c0_124 = arith.constant 0 : index
    %c0_125 = arith.constant 0 : index
    %140 = vector.load %arg6[%c1_123, %c0_124, %c0_125] : memref<9x64x64xbf16, #tpu.memory_space<vmem>>, vector<1x64x64xbf16>
    %141 = vector.shape_cast %140 : vector<1x64x64xbf16> to vector<64x64xbf16>
    %cst_126 = arith.constant dense<0.000000e+00> : vector<70x64xf32>
    %142 = tpu.matmul %139, %141, %cst_126 {dimension_numbers = #tpu.dot_dimension_numbers<[1], [0], [0], [1], [0, 0, 1, 1], [], []>} : vector<70x64xbf16>, vector<64x64xbf16>, vector<70x64xf32> -> vector<70x64xf32>
    %143 = arith.addf %138, %142 : vector<70x64xf32>
    %c2_127 = arith.constant 2 : index
    %c0_128 = arith.constant 0 : index
    %144 = vector.load %arg10[%c2_127, %c0_128] : memref<96x64xbf16, #tpu.memory_space<vmem>>, vector<70x64xbf16>
    %c2_129 = arith.constant 2 : index
    %c0_130 = arith.constant 0 : index
    %c0_131 = arith.constant 0 : index
    %145 = vector.load %arg6[%c2_129, %c0_130, %c0_131] : memref<9x64x64xbf16, #tpu.memory_space<vmem>>, vector<1x64x64xbf16>
    %146 = vector.shape_cast %145 : vector<1x64x64xbf16> to vector<64x64xbf16>
    %cst_132 = arith.constant dense<0.000000e+00> : vector<70x64xf32>
    %147 = tpu.matmul %144, %146, %cst_132 {dimension_numbers = #tpu.dot_dimension_numbers<[1], [0], [0], [1], [0, 0, 1, 1], [], []>} : vector<70x64xbf16>, vector<64x64xbf16>, vector<70x64xf32> -> vector<70x64xf32>
    %148 = arith.addf %143, %147 : vector<70x64xf32>
    %c10_133 = arith.constant 10 : index
    %c0_134 = arith.constant 0 : index
    %149 = vector.load %arg10[%c10_133, %c0_134] : memref<96x64xbf16, #tpu.memory_space<vmem>>, vector<70x64xbf16>
    %c3_135 = arith.constant 3 : index
    %c0_136 = arith.constant 0 : index
    %c0_137 = arith.constant 0 : index
    %150 = vector.load %arg6[%c3_135, %c0_136, %c0_137] : memref<9x64x64xbf16, #tpu.memory_space<vmem>>, vector<1x64x64xbf16>
    %151 = vector.shape_cast %150 : vector<1x64x64xbf16> to vector<64x64xbf16>
    %cst_138 = arith.constant dense<0.000000e+00> : vector<70x64xf32>
    %152 = tpu.matmul %149, %151, %cst_138 {dimension_numbers = #tpu.dot_dimension_numbers<[1], [0], [0], [1], [0, 0, 1, 1], [], []>} : vector<70x64xbf16>, vector<64x64xbf16>, vector<70x64xf32> -> vector<70x64xf32>
    %153 = arith.addf %148, %152 : vector<70x64xf32>
    %c11_139 = arith.constant 11 : index
    %c0_140 = arith.constant 0 : index
    %154 = vector.load %arg10[%c11_139, %c0_140] : memref<96x64xbf16, #tpu.memory_space<vmem>>, vector<70x64xbf16>
    %c4_141 = arith.constant 4 : index
    %c0_142 = arith.constant 0 : index
    %c0_143 = arith.constant 0 : index
    %155 = vector.load %arg6[%c4_141, %c0_142, %c0_143] : memref<9x64x64xbf16, #tpu.memory_space<vmem>>, vector<1x64x64xbf16>
    %156 = vector.shape_cast %155 : vector<1x64x64xbf16> to vector<64x64xbf16>
    %cst_144 = arith.constant dense<0.000000e+00> : vector<70x64xf32>
    %157 = tpu.matmul %154, %156, %cst_144 {dimension_numbers = #tpu.dot_dimension_numbers<[1], [0], [0], [1], [0, 0, 1, 1], [], []>} : vector<70x64xbf16>, vector<64x64xbf16>, vector<70x64xf32> -> vector<70x64xf32>
    %158 = arith.addf %153, %157 : vector<70x64xf32>
    %c12_145 = arith.constant 12 : index
    %c0_146 = arith.constant 0 : index
    %159 = vector.load %arg10[%c12_145, %c0_146] : memref<96x64xbf16, #tpu.memory_space<vmem>>, vector<70x64xbf16>
    %c5_147 = arith.constant 5 : index
    %c0_148 = arith.constant 0 : index
    %c0_149 = arith.constant 0 : index
    %160 = vector.load %arg6[%c5_147, %c0_148, %c0_149] : memref<9x64x64xbf16, #tpu.memory_space<vmem>>, vector<1x64x64xbf16>
    %161 = vector.shape_cast %160 : vector<1x64x64xbf16> to vector<64x64xbf16>
    %cst_150 = arith.constant dense<0.000000e+00> : vector<70x64xf32>
    %162 = tpu.matmul %159, %161, %cst_150 {dimension_numbers = #tpu.dot_dimension_numbers<[1], [0], [0], [1], [0, 0, 1, 1], [], []>} : vector<70x64xbf16>, vector<64x64xbf16>, vector<70x64xf32> -> vector<70x64xf32>
    %163 = arith.addf %158, %162 : vector<70x64xf32>
    %c20 = arith.constant 20 : index
    %c0_151 = arith.constant 0 : index
    %164 = vector.load %arg10[%c20, %c0_151] : memref<96x64xbf16, #tpu.memory_space<vmem>>, vector<70x64xbf16>
    %c6_152 = arith.constant 6 : index
    %c0_153 = arith.constant 0 : index
    %c0_154 = arith.constant 0 : index
    %165 = vector.load %arg6[%c6_152, %c0_153, %c0_154] : memref<9x64x64xbf16, #tpu.memory_space<vmem>>, vector<1x64x64xbf16>
    %166 = vector.shape_cast %165 : vector<1x64x64xbf16> to vector<64x64xbf16>
    %cst_155 = arith.constant dense<0.000000e+00> : vector<70x64xf32>
    %167 = tpu.matmul %164, %166, %cst_155 {dimension_numbers = #tpu.dot_dimension_numbers<[1], [0], [0], [1], [0, 0, 1, 1], [], []>} : vector<70x64xbf16>, vector<64x64xbf16>, vector<70x64xf32> -> vector<70x64xf32>
    %168 = arith.addf %163, %167 : vector<70x64xf32>
    %c21 = arith.constant 21 : index
    %c0_156 = arith.constant 0 : index
    %169 = vector.load %arg10[%c21, %c0_156] : memref<96x64xbf16, #tpu.memory_space<vmem>>, vector<70x64xbf16>
    %c7_157 = arith.constant 7 : index
    %c0_158 = arith.constant 0 : index
    %c0_159 = arith.constant 0 : index
    %170 = vector.load %arg6[%c7_157, %c0_158, %c0_159] : memref<9x64x64xbf16, #tpu.memory_space<vmem>>, vector<1x64x64xbf16>
    %171 = vector.shape_cast %170 : vector<1x64x64xbf16> to vector<64x64xbf16>
    %cst_160 = arith.constant dense<0.000000e+00> : vector<70x64xf32>
    %172 = tpu.matmul %169, %171, %cst_160 {dimension_numbers = #tpu.dot_dimension_numbers<[1], [0], [0], [1], [0, 0, 1, 1], [], []>} : vector<70x64xbf16>, vector<64x64xbf16>, vector<70x64xf32> -> vector<70x64xf32>
    %173 = arith.addf %168, %172 : vector<70x64xf32>
    %c22 = arith.constant 22 : index
    %c0_161 = arith.constant 0 : index
    %174 = vector.load %arg10[%c22, %c0_161] : memref<96x64xbf16, #tpu.memory_space<vmem>>, vector<70x64xbf16>
    %c8_162 = arith.constant 8 : index
    %c0_163 = arith.constant 0 : index
    %c0_164 = arith.constant 0 : index
    %175 = vector.load %arg6[%c8_162, %c0_163, %c0_164] : memref<9x64x64xbf16, #tpu.memory_space<vmem>>, vector<1x64x64xbf16>
    %176 = vector.shape_cast %175 : vector<1x64x64xbf16> to vector<64x64xbf16>
    %cst_165 = arith.constant dense<0.000000e+00> : vector<70x64xf32>
    %177 = tpu.matmul %174, %176, %cst_165 {dimension_numbers = #tpu.dot_dimension_numbers<[1], [0], [0], [1], [0, 0, 1, 1], [], []>} : vector<70x64xbf16>, vector<64x64xbf16>, vector<70x64xf32> -> vector<70x64xf32>
    %178 = arith.addf %173, %177 : vector<70x64xf32>
    %c0_166 = arith.constant 0 : index
    %c0_167 = arith.constant 0 : index
    %179 = vector.load %arg7[%c0_166, %c0_167] : memref<1x64xf32, #tpu.memory_space<vmem>>, vector<1x64xf32>
    %180 = vector.broadcast %179 : vector<1x64xf32> to vector<70x64xf32>
    %181 = arith.addf %178, %180 : vector<70x64xf32>
    %cst_168 = arith.constant 0.000000e+00 : f32
    %182 = vector.broadcast %cst_168 : f32 to vector<70x64xf32>
    %183 = arith.maximumf %181, %182 : vector<70x64xf32>
    %184 = arith.truncf %183 : vector<70x64xf32> to vector<70x64xbf16>
    %c0_169 = arith.constant 0 : index
    %c0_170 = arith.constant 0 : index
    %c0_171 = arith.constant 0 : index
    %185 = vector.load %arg8[%c0_169, %c0_170, %c0_171] : memref<1x70x64xbf16, #tpu.memory_space<vmem>>, vector<1x70x64xbf16>
    %186 = vector.shape_cast %185 : vector<1x70x64xbf16> to vector<70x64xbf16>
    %187 = vector.shape_cast %184 : vector<70x64xbf16> to vector<1x70x64xbf16>
    tpu.vector_store %arg8[%c0_169, %c0_170, %c0_171], %187 {strides = array<i32>} : memref<1x70x64xbf16, #tpu.memory_space<vmem>>, vector<1x70x64xbf16>,
    return
  }
  func.func @transform_0(%arg0: i32) -> (i32, i32, i32) {
    %c0_i32 = arith.constant 0 : i32
    %c0_i32_0 = arith.constant 0 : i32
    %c0_i32_1 = arith.constant 0 : i32
    return %arg0, %c0_i32, %c0_i32_0 : i32, i32, i32
  }
  func.func @transform_1(%arg0: i32) -> (i32, i32) {
    %c0_i32 = arith.constant 0 : i32
    %c0_i32_0 = arith.constant 0 : i32
    %c0_i32_1 = arith.constant 0 : i32
    return %c0_i32, %c0_i32_0 : i32, i32
  }
  func.func @transform_2(%arg0: i32) -> (i32, i32) {
    %c0_i32 = arith.constant 0 : i32
    %c0_i32_0 = arith.constant 0 : i32
    %c0_i32_1 = arith.constant 0 : i32
    return %c0_i32, %c0_i32_0 : i32, i32
  }
  func.func @transform_3(%arg0: i32) -> (i32, i32, i32) {
    %c0_i32 = arith.constant 0 : i32
    %c0_i32_0 = arith.constant 0 : i32
    %c0_i32_1 = arith.constant 0 : i32
    %c0_i32_2 = arith.constant 0 : i32
    return %c0_i32, %c0_i32_0, %c0_i32_1 : i32, i32, i32
  }
  func.func @transform_4(%arg0: i32) -> (i32, i32) {
    %c0_i32 = arith.constant 0 : i32
    %c0_i32_0 = arith.constant 0 : i32
    %c0_i32_1 = arith.constant 0 : i32
    return %c0_i32, %c0_i32_0 : i32, i32
  }
  func.func @transform_5(%arg0: i32) -> (i32, i32, i32) {
    %c0_i32 = arith.constant 0 : i32
    %c0_i32_0 = arith.constant 0 : i32
    %c0_i32_1 = arith.constant 0 : i32
    %c0_i32_2 = arith.constant 0 : i32
    return %c0_i32, %c0_i32_0, %c0_i32_1 : i32, i32, i32
  }
  func.func @transform_6(%arg0: i32) -> (i32, i32) {
    %c0_i32 = arith.constant 0 : i32
    %c0_i32_0 = arith.constant 0 : i32
    %c0_i32_1 = arith.constant 0 : i32
    return %c0_i32, %c0_i32_0 : i32, i32
  }
  func.func @transform_7(%arg0: i32) -> (i32, i32, i32) {
    %c0_i32 = arith.constant 0 : i32
    %c0_i32_0 = arith.constant 0 : i32
    %c0_i32_1 = arith.constant 0 : i32
    return %arg0, %c0_i32, %c0_i32_0 : i32, i32, i32
  }
}

module attributes {stable_mosaic.version = 11 : i64} {
  func.func @_fused_head_kernel(%arg0: i32, %arg1: memref<8x4480xbf16, #tpu.memory_space<vmem>>, %arg2: memref<4480x512xbf16, #tpu.memory_space<vmem>>, %arg3: memref<1x512xf32, #tpu.memory_space<vmem>>, %arg4: memref<512x128xbf16, #tpu.memory_space<vmem>>, %arg5: memref<1x128xf32, #tpu.memory_space<vmem>>, %arg6: memref<8x128xf32, #tpu.memory_space<vmem>>) attributes {dimension_semantics = [#tpu.dimension_semantics<parallel>], iteration_bounds = array<i64: 1>, scalar_prefetch = 0 : i64, scratch_operands = 0 : i64, tpu.core_type = #tpu.core_type<tc>, window_params = [{transform_indices = @transform_0, window_bounds = array<i64: 8, 4480>}, {pipeline_mode = #tpu.pipeline_mode<synchronous>, transform_indices = @transform_1, window_bounds = array<i64: 4480, 512>}, {pipeline_mode = #tpu.pipeline_mode<synchronous>, transform_indices = @transform_2, window_bounds = array<i64: 1, 512>}, {pipeline_mode = #tpu.pipeline_mode<synchronous>, transform_indices = @transform_3, window_bounds = array<i64: 512, 128>}, {pipeline_mode = #tpu.pipeline_mode<synchronous>, transform_indices = @transform_4, window_bounds = array<i64: 1, 128>}, {transform_indices = @transform_5, window_bounds = array<i64: 8, 128>}]} {
    %c0 = arith.constant 0 : index
    %c0_0 = arith.constant 0 : index
    %0 = vector.load %arg1[%c0, %c0_0] : memref<8x4480xbf16, #tpu.memory_space<vmem>>, vector<8x4480xbf16>
    %c0_1 = arith.constant 0 : index
    %c0_2 = arith.constant 0 : index
    %1 = vector.load %arg2[%c0_1, %c0_2] : memref<4480x512xbf16, #tpu.memory_space<vmem>>, vector<4480x512xbf16>
    %cst = arith.constant dense<0.000000e+00> : vector<8x512xf32>
    %2 = tpu.matmul %0, %1, %cst {dimension_numbers = #tpu.dot_dimension_numbers<[1], [0], [0], [1], [0, 0, 1, 1], [], []>} : vector<8x4480xbf16>, vector<4480x512xbf16>, vector<8x512xf32> -> vector<8x512xf32>
    %c0_3 = arith.constant 0 : index
    %c0_4 = arith.constant 0 : index
    %3 = vector.load %arg3[%c0_3, %c0_4] : memref<1x512xf32, #tpu.memory_space<vmem>>, vector<1x512xf32>
    %4 = vector.broadcast %3 : vector<1x512xf32> to vector<8x512xf32>
    %5 = arith.addf %2, %4 : vector<8x512xf32>
    %cst_5 = arith.constant 0.000000e+00 : f32
    %6 = vector.broadcast %cst_5 : f32 to vector<8x512xf32>
    %7 = arith.maximumf %5, %6 : vector<8x512xf32>
    %8 = arith.truncf %7 : vector<8x512xf32> to vector<8x512xbf16>
    %c0_6 = arith.constant 0 : index
    %c0_7 = arith.constant 0 : index
    %9 = vector.load %arg4[%c0_6, %c0_7] : memref<512x128xbf16, #tpu.memory_space<vmem>>, vector<512x128xbf16>
    %cst_8 = arith.constant dense<0.000000e+00> : vector<8x128xf32>
    %10 = tpu.matmul %8, %9, %cst_8 {dimension_numbers = #tpu.dot_dimension_numbers<[1], [0], [0], [1], [0, 0, 1, 1], [], []>} : vector<8x512xbf16>, vector<512x128xbf16>, vector<8x128xf32> -> vector<8x128xf32>
    %c0_9 = arith.constant 0 : index
    %c0_10 = arith.constant 0 : index
    %11 = vector.load %arg5[%c0_9, %c0_10] : memref<1x128xf32, #tpu.memory_space<vmem>>, vector<1x128xf32>
    %12 = vector.broadcast %11 : vector<1x128xf32> to vector<8x128xf32>
    %13 = arith.addf %10, %12 : vector<8x128xf32>
    %c0_11 = arith.constant 0 : index
    %c0_12 = arith.constant 0 : index
    %14 = vector.load %arg6[%c0_11, %c0_12] : memref<8x128xf32, #tpu.memory_space<vmem>>, vector<8x128xf32>
    tpu.vector_store %arg6[%c0_11, %c0_12], %13 {strides = array<i32>} : memref<8x128xf32, #tpu.memory_space<vmem>>, vector<8x128xf32>,
    return
  }
  func.func @transform_0(%arg0: i32) -> (i32, i32) {
    %c0_i32 = arith.constant 0 : i32
    %c0_i32_0 = arith.constant 0 : i32
    return %arg0, %c0_i32 : i32, i32
  }
  func.func @transform_1(%arg0: i32) -> (i32, i32) {
    %c0_i32 = arith.constant 0 : i32
    %c0_i32_0 = arith.constant 0 : i32
    %c0_i32_1 = arith.constant 0 : i32
    return %c0_i32, %c0_i32_0 : i32, i32
  }
  func.func @transform_2(%arg0: i32) -> (i32, i32) {
    %c0_i32 = arith.constant 0 : i32
    %c0_i32_0 = arith.constant 0 : i32
    %c0_i32_1 = arith.constant 0 : i32
    return %c0_i32, %c0_i32_0 : i32, i32
  }
  func.func @transform_3(%arg0: i32) -> (i32, i32) {
    %c0_i32 = arith.constant 0 : i32
    %c0_i32_0 = arith.constant 0 : i32
    %c0_i32_1 = arith.constant 0 : i32
    return %c0_i32, %c0_i32_0 : i32, i32
  }
  func.func @transform_4(%arg0: i32) -> (i32, i32) {
    %c0_i32 = arith.constant 0 : i32
    %c0_i32_0 = arith.constant 0 : i32
    %c0_i32_1 = arith.constant 0 : i32
    return %c0_i32, %c0_i32_0 : i32, i32
  }
  func.func @transform_5(%arg0: i32) -> (i32, i32) {
    %c0_i32 = arith.constant 0 : i32
    %c0_i32_0 = arith.constant 0 : i32
    return %arg0, %c0_i32 : i32, i32
  }
}

</mosaic_0001>

<bundles_post_ra>
// kernel: cnn_policy_forward.2
= control target key start
LH: loop header
LB: loop body
LE: loop exit
PB: predicated region body
PF: predicated region fallthrough
CT: control target
= control target key end

     0   :  { %s7716_s24 = smov 0   ;;  %s9478_s0 = inlined_call_operand.vmem [shape: bf16[2,400,256], index: 0, kind: input, shape index: {}]   ;;  %s9479_s1 = inlined_call_operand.vmem [shape: bf16[256,32], index: 1, kind: input, shape index: {}]   ;;  %s9480_s2 = inlined_call_operand.vmem [shape: f32[1,32], index: 2, kind: input, shape index: {}]   ;;  %s9481_s3 = inlined_call_operand.vmem [shape: bf16[16,32,64], index: 3, kind: input, shape index: {}]   ;;  %s9482_s4 = inlined_call_operand.vmem [shape: f32[1,64], index: 4, kind: input, shape index: {}]   ;;  %s9483_s5 = inlined_call_operand.vmem [shape: bf16[9,64,64], index: 5, kind: input, shape index: {}]   ;;  %s9484_s6 = inlined_call_operand.vmem [shape: f32[1,64], index: 6, kind: input, shape index: {}]   ;;  %s9485_s7 = inlined_call_operand.vmem [shape: bf16[2,70,64], index: 7, kind: output, shape index: {}]  }
   0x1 LB: > { %s5823_s25 = sadd.s32 4294967295, %s7671_s24   ;;  %p5827_p0 = scmp.ge.s32.totalorder %s7671_s24, 1  ;;  %s7671_s24 = sphi %s7716_s24, %s17_s24  }
   0x2   : > { %p237_p1 = scmp.lt.s32.totalorder %s7671_s24, 3 }
   0x4   : > { %p238_p2 = pnand %p5827_p0, %p237_p1 }
   0x6   : > { %241 = sbr.rel (%p238_p2) target bundleno = 1458 (0x5b2), region = 48 }
   0xd   : > { %v7452_v0 = vld [vmem:[%s9479_s1 + $0x40] sm:$0xff]   ;;  %v7456_v4 = vld [vmem:[%s9479_s1 + $0x48] sm:$0xff]   ;;  %v7460_v8 = vld [vmem:[%s9479_s1 + $0x50] sm:$0xff]   ;;  %p269_p3 = scmp.lt.s32.totalorder %s5823_s25, 1  ;;  %vm743_vm0 = vcmask 1045504   ;;  %vm280_vm1 = vcmask 261120  }
   0xe   : > { %v7453_v1 = vld [vmem:[%s9479_s1 + $0x40] sm:$0xff]   ;;  %6306 = vmatprep.subr.bf16.mxu0 %v7452_v0  ;;  %v7457_v5 = vld [vmem:[%s9479_s1 + $0x48] sm:$0xff]   ;;  %v7461_v9 = vld [vmem:[%s9479_s1 + $0x50] sm:$0xff]   ;;  %vm1016_vm2 = vcmask 261124   ;;  %vm995_vm3 = vcmask 1043456   ;;  %vm3022_vm4 = vcmask 1042432  }
   0xf   : > { %v7454_v2 = vld [vmem:[%s9479_s1] sm:$0xff]   ;;  %6364 = vmatprep.subr.bf16.mxu1 %v7453_v1  ;;  %v7458_v6 = vld [vmem:[%s9479_s1 + $0x8] sm:$0xff]   ;;  %v7462_v10 = vld [vmem:[%s9479_s1 + $0x10] sm:$0xff]   ;;  %s9547_s25 = smov (!%p269_p3, %s5823_s25), 1  ;;  %vm643_vm5 = vcmask 254976   ;;  %vm3168_vm6 = vcmask 1046528  }
  0x10   : > { %v7455_v3 = vld [vmem:[%s9479_s1] sm:$0xff]   ;;  %6307 = vmatpush3.bf16.msra.mxu0 %v7454_v2  ;;  %v7459_v7 = vld [vmem:[%s9479_s1 + $0x8] sm:$0xff]   ;;  %v7463_v11 = vld [vmem:[%s9479_s1 + $0x10] sm:$0xff]   ;;  %s7439_s17 = smul.u32 400, %s9547_s25  ;;  %vm1023_vm7 = vcmask 259072   ;;  %vm307_vm12 = vcmask 523264  }
  0x11   : > { %6365 = vmatpush3.bf16.msra.mxu1 %v7455_v3  ;;  %6308 = vmatprep.subr.bf16.mxu0 %v7456_v4  ;;  %v7464_v12 = vld [vmem:[%s9479_s1 + $0x58] sm:$0xff]   ;;  %v7468_v16 = vld [vmem:[%s9479_s1 + $0x60] sm:$0xff]   ;;  %v7472_v20 = vld [vmem:[%s9479_s1 + $0x68] sm:$0xff]   ;;  %vm1994_vm8 = vsmask.f32 7424  ;;  %vm7675_vm13 = vmmov 0  }
  0x12   : > { %6366 = vmatprep.subr.bf16.mxu1 %v7457_v5  ;;  %v7465_v13 = vld [vmem:[%s9479_s1 + $0x58] sm:$0xff]   ;;  %v7469_v17 = vld [vmem:[%s9479_s1 + $0x60] sm:$0xff]   ;;  %v7473_v21 = vld [vmem:[%s9479_s1 + $0x68] sm:$0xff]   ;;  %s7830_s30 = scalar_lea.vmem %s9478_s0, %s7439_s17  ;;  %vm3309_vm9 = vsmask.f32 2304  ;;  %vm4351_vm14 = vcmask 520192  }
  0x13   : > { %v7466_v14 = vld [vmem:[%s9479_s1 + $0x18] sm:$0xff]   ;;  %v7470_v18 = vld [vmem:[%s9479_s1 + $0x20] sm:$0xff]   ;;  %v7474_v22 = vld [vmem:[%s9479_s1 + $0x28] sm:$0xff]   ;;  %vm2166_vm10 = vsmask.f32 3328  ;;  %vm5119_vm15 = vcmask 1041408  }
  0x14   : > { %6309 = vmatpush3.bf16.msra.mxu0 %v7458_v6  ;;  %v7467_v15 = vld [vmem:[%s9479_s1 + $0x18] sm:$0xff]   ;;  %v7471_v19 = vld [vmem:[%s9479_s1 + $0x20] sm:$0xff]   ;;  %v7475_v23 = vld [vmem:[%s9479_s1 + $0x28] sm:$0xff]   ;;  %vm3501_vm11 = vsmask.f32 6400  ;;  %s7440_s9 = smul.u32 36, %s9547_s25 }
  0x15   : > { %6367 = vmatpush3.bf16.msra.mxu1 %v7459_v7  ;;  %6310 = vmatprep.subr.bf16.mxu0 %v7460_v8  ;;  %v7476_v24 = vld [vmem:[%s9479_s1 + $0x70] sm:$0xff]   ;;  %v7480_v28 = vld [vmem:[%s9479_s1 + $0x78] sm:$0xff]   ;;  %v7484_v32 = vld [vmem:[%s7830_s30] ss:$8 sps:$4 sm:$0xff]  }
  0x16   : > { %6368 = vmatprep.subr.bf16.mxu1 %v7461_v9  ;;  %v7477_v25 = vld [vmem:[%s9479_s1 + $0x70] sm:$0xff]   ;;  %v7481_v29 = vld [vmem:[%s9479_s1 + $0x78] sm:$0xff]   ;;  %v7486_v33 = vld [vmem:[%s7830_s30 + $0x4] ss:$8 sps:$4 sm:$0xff]   ;;  %s9448_s12 = scalar_lea.vmem %s9485_s7, %s7440_s9 }
  0x17   : > { %v7478_v26 = vld [vmem:[%s9479_s1 + $0x30] sm:$0xff]   ;;  %v7482_v30 = vld [vmem:[%s9479_s1 + $0x38] sm:$0xff]   ;;  %v7487_v34 = vld [vmem:[%s7830_s30 + $0x64] ss:$8 sps:$4 sm:$0xfc]   ;;  %561 = vmatprep.mubr.bf16.mxu0 %v7486_v33 }
  0x18   : > { %6311 = vmatpush3.bf16.msra.mxu0 %v7462_v10  ;;  %v7479_v27 = vld [vmem:[%s9479_s1 + $0x30] sm:$0xff]   ;;  %v7483_v31 = vld [vmem:[%s9479_s1 + $0x38] sm:$0xff]   ;;  %v7491_v36 = vld [vmem:[%s7830_s30 + $0x60] ss:$8 sps:$4 sm:$0xfc]   ;;  %v747_v37 = vrot.slane %v7487_v34, 2 }
  0x19   : > { %6369 = vmatpush3.bf16.msra.mxu1 %v7463_v11  ;;  %6312 = vmatprep.subr.bf16.mxu0 %v7464_v12  ;;  %v7489_v35 = vld [vmem:[%s7830_s30 + $0x74] ss:$8 sps:$4 sm:$0xff]   ;;  %v7492_v38 = vld [vmem:[%s7830_s30 + $0x70] ss:$8 sps:$4 sm:$0xff]   ;;  %v744_v41 = vrot.slane %v7491_v36, 2  ;;  %v7511_v54 = vld [vmem:[%s9479_s1 + $0x40] sm:$0xff]  }
  0x1a   : > { %6370 = vmatprep.subr.bf16.mxu1 %v7465_v13  ;;  %v7493_v39 = vld [vmem:[%s7830_s30 + $0x14] ss:$8 sps:$4 sm:$0xff]   ;;  %v748_v40 = vrot.slane %v7489_v35, 2  ;;  %v7495_v42 = vld [vmem:[%s7830_s30 + $0x84] ss:$8 sps:$4 sm:$0xff]   ;;  %v745_v43 = vrot.slane %v7492_v38, 2 }
  0x1b   : > { %v7498_v44 = vld [vmem:[%s7830_s30 + $0x80] ss:$8 sps:$4 sm:$0xff]   ;;  %v752_v46 = vrot.slane %v7495_v42, 2  ;;  %v7497_v48 = vld [vmem:[%s7830_s30 + $0x10] ss:$8 sps:$4 sm:$0xff]  }
  0x1c   : > { %6313 = vmatpush3.bf16.msra.mxu0 %v7466_v14  ;;  %v749_v45 = vsel %vm743_vm0, %v747_v37, %v748_v40  ;;  %v746_v47 = vsel %vm743_vm0, %v744_v41, %v745_v43  ;;  %v7501_v49 = vld [vmem:[%s7830_s30 + $0x94] ss:$8 sps:$4 sm:$0xff]   ;;  %v7499_v51 = vld [vmem:[%s7830_s30 + $0x24] ss:$8 sps:$4 sm:$0xff]   ;;  %v750_v52 = vrot.slane %v7498_v44, 2 }
  0x1d   : > { %6371 = vmatpush3.bf16.msra.mxu1 %v7467_v15  ;;  %6314 = vmatprep.subr.bf16.mxu0 %v7468_v16  ;;  %v753_v50 = vsel %vm743_vm0, %v748_v40, %v752_v46  ;;  %v756_v53 = vrot.slane %v7501_v49, 2  ;;  %v7512_v55 = vld [vmem:[%s9479_s1] sm:$0xff]   ;;  %v7504_v57 = vld [vmem:[%s7830_s30 + $0x90] ss:$8 sps:$4 sm:$0xff]   ;;  %v7505_v61 = vld [vmem:[%s7830_s30 + $0x34] ss:$8 sps:$4 sm:$0xff]  }
  0x1e   : > { %6372 = vmatprep.subr.bf16.mxu1 %v7469_v17  ;;  %912 = vmatprep.mubr.bf16.mxu1 %v749_v45  ;;  %v751_v56 = vsel %vm743_vm0, %v745_v43, %v750_v52  ;;  %v7507_v59 = vld [vmem:[%s7830_s30 + $0xa4] ss:$8 sps:$4 sm:$0xff]   ;;  %v7503_v60 = vld [vmem:[%s7830_s30 + $0x20] ss:$8 sps:$4 sm:$0xff]   ;;  %v754_v63 = vrot.slane %v7504_v57, 2  ;;  %v7525_v8 = vld [vmem:[%s9479_s1 + $0x50] sm:$0xff]  }
  0x1f   : > { %v757_v58 = vsel %vm743_vm0, %v752_v46, %v756_v53  ;;  %v7519_v62 = vld [vmem:[%s9479_s1 + $0x48] sm:$0xff]   ;;  %v760_v1 = vrot.slane %v7507_v59, 2  ;;  %v7521_v2 = vld [vmem:[%s9479_s1 + $0x40] sm:$0xff]   ;;  %v7509_v6 = vld [vmem:[%s7830_s30 + $0x30] ss:$8 sps:$4 sm:$0xff]  }
  0x20   : > { %6315 = vmatpush3.bf16.msra.mxu0 %v7470_v18  ;;  %v7520_v0 = vld [vmem:[%s9479_s1 + $0x8] sm:$0xff]   ;;  %v7522_v3 = vld [vmem:[%s9479_s1] sm:$0xff]   ;;  %v755_v5 = vsel %vm743_vm0, %v750_v52, %v754_v63  ;;  %v7515_v7 = vld [vmem:[%s7830_s30 + $0xb4] ss:$8 sps:$4 sm:$0xff]  }
  0x21   : > { %6373 = vmatpush3.bf16.msra.mxu1 %v7471_v19  ;;  %6316 = vmatprep.subr.bf16.mxu0 %v7472_v20  ;;  %v7510_v4 = vld [vmem:[%s7830_s30 + $0xa0] ss:$8 sps:$4 sm:$0xff]   ;;  %v761_v9 = vsel %vm743_vm0, %v756_v53, %v760_v1  ;;  %v7513_v10 = vld [vmem:[%s7830_s30 + $0x44] ss:$8 sps:$4 sm:$0xff]   ;;  %v7527_v11 = vld [vmem:[%s9479_s1 + $0x10] sm:$0xff]   ;;  %v764_v16 = vrot.slane %v7515_v7, 2 }
  0x22   : > { %6374 = vmatprep.subr.bf16.mxu1 %v7473_v21  ;;  %v7528_v12 = vld [vmem:[%s9479_s1 + $0x48] sm:$0xff]   ;;  %v758_v14 = vrot.slane %v7510_v4, 2  ;;  %v7530_v15 = vld [vmem:[%s9479_s1 + $0x58] sm:$0xff]   ;;  %v7534_v19 = vld [vmem:[%s9479_s1 + $0x50] sm:$0xff]  }
  0x23   : > { %v7529_v13 = vld [vmem:[%s9479_s1 + $0x8] sm:$0xff]   ;;  %v7531_v17 = vld [vmem:[%s9479_s1 + $0x18] sm:$0xff]   ;;  %v327_v33 = vld [vmem:[%s7830_s30 + $0x60] sm:$0x33] }
  0x24   : > { %6317 = vmatpush3.bf16.msra.mxu0 %v7474_v22  ;;  %v7518_v18 = vld [vmem:[%s7830_s30 + $0xb0] ss:$8 sps:$4 sm:$0xff]   ;;  %v759_v20 = vsel %vm743_vm0, %v754_v63, %v758_v14  ;;  %v7517_v21 = vld [vmem:[%s7830_s30 + $0x40] ss:$8 sps:$4 sm:$0xff]   ;;  %v5844_v44 = vcombine.high %v327_v33, %v327_v33  ;;  %v7556_v53 = vld [vmem:[%s7830_s30 + $0xcc] ss:$8 sps:$4 sm:$0xff]  }
  0x25   : > { %6375 = vmatpush3.bf16.msra.mxu1 %v7475_v23  ;;  %6318 = vmatprep.subr.bf16.mxu0 %v7476_v24  ;;  %v7535_v22 = vld [vmem:[%s9479_s1 + $0x10] sm:$0xff]   ;;  %v765_v23 = vsel %vm743_vm0, %v760_v1, %v764_v16  ;;  %v7543_v34 = vld [vmem:[%s9479_s1 + $0x60] sm:$0xff]   ;;  %v7544_v36 = vld [vmem:[%s9479_s1 + $0x28] sm:$0xff]  }
  0x26   : > { %6376 = vmatprep.subr.bf16.mxu1 %v7477_v25  ;;  %v7523_v24 = vld [vmem:[%s7830_s30 + $0x54] ss:$8 sps:$4 sm:$0xff]   ;;  %v7536_v25 = vld [vmem:[%s9479_s1 + $0x60] sm:$0xff]   ;;  %v7547_v43 = vld [vmem:[%s9479_s1 + $0x68] sm:$0xff]  }
  0x27   : > { %v7545_v37 = vld [vmem:[%s9479_s1 + $0x20] sm:$0xff]   ;;  %v7546_v42 = vld [vmem:[%s9479_s1 + $0x70] sm:$0xff]  }
  0x28   : > { %6319 = vmatpush3.bf16.msra.mxu0 %v7478_v26  ;;  %v7537_v26 = vld [vmem:[%s9479_s1 + $0x20] sm:$0xff]   ;;  %v7548_v45 = vld [vmem:[%s9479_s1 + $0x30] sm:$0xff]  }
  0x29   : > { %6377 = vmatpush3.bf16.msra.mxu1 %v7479_v27  ;;  %6320 = vmatprep.subr.bf16.mxu0 %v7480_v28  ;;  %v7538_v27 = vld [vmem:[%s9479_s1 + $0x58] sm:$0xff]   ;;  %v762_v28 = vrot.slane %v7518_v18, 2  ;;  %v7551_v49 = vld [vmem:[%s9479_s1 + $0x70] sm:$0xff]  }
  0x2a   : > { %6378 = vmatprep.subr.bf16.mxu1 %v7481_v29  ;;  %v7539_v29 = vld [vmem:[%s9479_s1 + $0x18] sm:$0xff]   ;;  %v7553_v52 = vld [vmem:[%s9479_s1 + $0x30] sm:$0xff]  }
  0x2b   : > { %v763_v38 = vsel %vm743_vm0, %v758_v14, %v762_v28  ;;  %v7561_v57 = vld [vmem:[%s7830_s30 + $0x12c] ss:$8 sps:$4 sm:$0xfc]   ;;  %v7559_v59 = vld [vmem:[%s7830_s30 + $0x128] ss:$8 sps:$4 sm:$0xfc]  }
  0x2c   : > { %6321 = vmatpush3.bf16.msra.mxu0 %v7482_v30  ;;  %v657_v30 = vld [vmem:[%s7830_s30 + $0xc0] sm:$0xff]  ;;  %v7568_v63 = vld [vmem:[%s7830_s30 + $0x14c] ss:$8 sps:$4 sm:$0xff]  }
  0x2d   : > { %6379 = vmatpush3.bf16.msra.mxu1 %v7483_v31  ;;  %6422 = vmatprep.subr.bf16.mxu0 %v7511_v54  ;;  %v5874_v31 = vcombine.high %v657_v30, %v657_v30  ;;  %v5873_v40 = vcombine.low %v657_v30, %v657_v30  ;;  %v5843_v54 = vcombine.low %v327_v33, %v327_v33  ;;  %v7574_v7 = vld [vmem:[%s7830_s30 + $0x15c] ss:$8 sps:$4 sm:$0xff]   ;;  %v7579_v33 = vld [vmem:[%s7830_s30 + $0xf8] ss:$8 sps:$4 sm:$0xff]  }
  0x2e   : > { %6480 = vmatprep.subr.bf16.mxu1 %v7521_v2  ;;  %v7565_v2 = vld [vmem:[%s7830_s30 + $0xdc] ss:$8 sps:$4 sm:$0xff]   ;;  %v1458_v18 = vrot.slane %v7574_v7, 2 }
  0x2f   : > { %562 = vmatmul.mubr.bf16.vlgmr.msra.gmra.mrb[0].mxu0 %v7484_v32  ;;  %v7542_v32 = vld [vmem:[%s9479_s1 + $0x68] sm:$0xff]   ;;  %v768_v35 = vrot.slane %v5874_v31, 2  ;;  %v766_v46 = vrot.slane %v5873_v40, 2  ;;  %v7577_v31 = vld [vmem:[%s7830_s30 + $0xfc] ss:$8 sps:$4 sm:$0xff]  }
  0x30   : > { %569 = vmatprep.mubr.bf16.mxu0 %v7493_v39  ;;  %913 = vmatmul.mubr.bf16.vlgmr.msra.gmra.mrb[0].mxu1 %v746_v47  ;;  %v7526_v39 = vld [vmem:[%s7830_s30 + $0x50] ss:$8 sps:$4 sm:$0xff]   ;;  %v7549_v47 = vld [vmem:[%s9479_s1 + $0x28] sm:$0xff]  }
  0x31   : > { %920 = vmatprep.mubr.bf16.mxu1 %v753_v50  ;;  %6423 = vmatpush3.bf16.msra.mxu0 %v7512_v55  ;;  %v769_v41 = vsel %vm743_vm0, %v764_v16, %v768_v35  ;;  %v7552_v50 = vld [vmem:[%s9479_s1 + $0x38] sm:$0xff]  }
  0x32   : > { %6424 = vmatprep.subr.bf16.mxu0 %v7519_v62  ;;  %6481 = vmatpush3.bf16.msra.mxu1 %v7522_v3  ;;  %v7557_v55 = vld [vmem:[%s9479_s1 + $0x78] sm:$0xff]   ;;  %v1446_v3 = vrot.slane %v7559_v59, 2 }
  0x33   : > { %6482 = vmatprep.subr.bf16.mxu1 %v7528_v12  ;;  %v7567_v12 = vld [vmem:[%s7830_s30 + $0xd8] ss:$8 sps:$4 sm:$0xff]  }
  0x35   : > { %6425 = vmatpush3.bf16.msra.mxu0 %v7520_v0  ;;  %v7554_v0 = vld [vmem:[%s7830_s30 + $0xc8] ss:$8 sps:$4 sm:$0xff]  }
  0x36   : > { %6426 = vmatprep.subr.bf16.mxu0 %v7525_v8  ;;  %6483 = vmatpush3.bf16.msra.mxu1 %v7529_v13  ;;  %v7576_v8 = vld [vmem:[%s7830_s30 + $0x158] ss:$8 sps:$4 sm:$0xff]   ;;  %v7586_v13 = vld [vmem:[%s7830_s30 + $0x17c] ss:$8 sps:$4 sm:$0xff]  }
  0x37   : > { %570 = vmatmul.mubr.bf16.gmra.mrb[4].mxu0 %v7497_v48  ;;  %6484 = vmatprep.subr.bf16.mxu1 %v7534_v19  ;;  %v7550_v48 = vld [vmem:[%s9479_s1 + $0x78] sm:$0xff]   ;;  %v1456_v19 = vrot.slane %v7576_v8, 2 }
  0x38   : > { %577 = vmatprep.mubr.bf16.mxu0 %v7499_v51  ;;  %921 = vmatmul.mubr.bf16.gmra.mrb[4].mxu1 %v751_v56  ;;  %v767_v51 = vsel %vm743_vm0, %v762_v28, %v766_v46  ;;  %v7558_v56 = vld [vmem:[%s9479_s1 + $0x38] sm:$0xff]  }
  0x39   : > { %928 = vmatprep.mubr.bf16.mxu1 %v757_v58  ;;  %6427 = vmatpush3.bf16.msra.mxu0 %v7527_v11  ;;  %v7564_v58 = vld [vmem:[%s7830_s30 + $0x13c] ss:$8 sps:$4 sm:$0xff]  }
  0x3a   : > { %6428 = vmatprep.subr.bf16.mxu0 %v7530_v15  ;;  %6485 = vmatpush3.bf16.msra.mxu1 %v7535_v22  ;;  %v1450_v62 = vrot.slane %v7564_v58, 2  ;;  %v7985_v15 = vld [vmem:[%s7830_s30 + $0x178] ss:$8 sps:$4 sm:$0xff]  }
  0x3b   : > { %6486 = vmatprep.subr.bf16.mxu1 %v7538_v27 }
  0x3d   : > { %6429 = vmatpush3.bf16.msra.mxu0 %v7531_v17  ;;  %v7571_v17 = vld [vmem:[%s7830_s30 + $0xec] ss:$8 sps:$4 sm:$0xff]  }
  0x3e   : > { %6430 = vmatprep.subr.bf16.mxu0 %v7536_v25  ;;  %6487 = vmatpush3.bf16.msra.mxu1 %v7539_v29  ;;  %v7596_v25 = vld [vmem:[%s9481_s3 + $0x10] sm:$0xff]  }
  0x3f   : > { %578 = vmatmul.mubr.bf16.gmra.mrb[8].mxu0 %v7503_v60  ;;  %6488 = vmatprep.subr.bf16.mxu1 %v7543_v34  ;;  %v7562_v60 = vld [vmem:[%s7830_s30 + $0x138] ss:$8 sps:$4 sm:$0xff]   ;;  %v7573_v29 = vld [vmem:[%s7830_s30 + $0xe8] ss:$8 sps:$4 sm:$0xff]  }
  0x40   : > { %585 = vmatprep.mubr.bf16.mxu0 %v7505_v61  ;;  %929 = vmatmul.mubr.bf16.gmra.mrb[8].mxu1 %v755_v5  ;;  %v1449_v61 = vrot.slane %v7561_v57, 2  ;;  %v1447_v4 = vrot.slane %v7562_v60, 2  ;;  %v1454_v5 = vrot.slane %v7568_v63, 2 }
  0x41   : > { %936 = vmatprep.mubr.bf16.mxu1 %v761_v9  ;;  %6431 = vmatpush3.bf16.msra.mxu0 %v7537_v26  ;;  %v7580_v9 = vld [vmem:[%s7830_s30 + $0x16c] ss:$8 sps:$4 sm:$0xff]   ;;  %v1464_v26 = vrot.slane %v7985_v15, 2 }
  0x42   : > { %6432 = vmatprep.subr.bf16.mxu0 %v7542_v32  ;;  %6489 = vmatpush3.bf16.msra.mxu1 %v7545_v37  ;;  %v1451_v1 = vsel %vm743_vm0, %v1449_v61, %v1450_v62  ;;  %v1448_v11 = vsel %vm743_vm0, %v1446_v3, %v1447_v4  ;;  %v1455_v14 = vsel %vm743_vm0, %v1450_v62, %v1454_v5  ;;  %v7585_v37 = vld [vmem:[%s7830_s30 + $0x108] ss:$8 sps:$4 sm:$0xff]  }
  0x43   : > { %6490 = vmatprep.subr.bf16.mxu1 %v7547_v43  ;;  %v1459_v30 = vsel %vm743_vm0, %v1454_v5, %v1458_v18 }
  0x45   : > { %6433 = vmatpush3.bf16.msra.mxu0 %v7544_v36 }
  0x46   : > { %6434 = vmatprep.subr.bf16.mxu0 %v7546_v42  ;;  %6491 = vmatpush3.bf16.msra.mxu1 %v7549_v47  ;;  %v1037_v42 = vld [vmem:[%s7830_s30 + $0x128] sm:$0x33]  ;;  %v9486_v47 = vmov 0  }
  0x47   : > { %586 = vmatmul.mubr.bf16.gmra.mrb[12].mxu0 %v7509_v6  ;;  %6492 = vmatprep.subr.bf16.mxu1 %v7551_v49  ;;  %v7570_v6 = vld [vmem:[%s7830_s30 + $0x148] ss:$8 sps:$4 sm:$0xff]   ;;  %287 = vst.msk [vmem:[#allocation2 + $0x30] sm:$0xff] %vm280_vm1, %v9486_v47  ;;  %281 = vst.msk [vmem:[#allocation2] sm:$0xff] %vm280_vm1, %v9486_v47  ;;  %v5903_v49 = vcombine.low %v1037_v42, %v1037_v42 }
  0x48   : > { %593 = vmatprep.mubr.bf16.mxu0 %v7513_v10  ;;  %937 = vmatmul.mubr.bf16.gmra.mrb[12].mxu1 %v759_v20  ;;  %v7582_v10 = vld [vmem:[%s7830_s30 + $0x168] ss:$8 sps:$4 sm:$0xff]   ;;  %v1452_v16 = vrot.slane %v7570_v6, 2  ;;  %282 = vst.msk [vmem:[#allocation2 + $0x8] sm:$0xff] %vm280_vm1, %v9486_v47  ;;  %283 = vst.msk [vmem:[#allocation2 + $0x10] sm:$0xff] %vm280_vm1, %v9486_v47 }
  0x49   : > { %944 = vmatprep.mubr.bf16.mxu1 %v765_v23  ;;  %6435 = vmatpush3.bf16.msra.mxu0 %v7548_v45  ;;  %v1360_v20 = vld [vmem:[%s7830_s30 + $0x188] sm:$0xff]  ;;  %v1460_v22 = vrot.slane %v7582_v10, 2  ;;  %v1466_v23 = vrot.slane %v7586_v13, 2  ;;  %284 = vst.msk [vmem:[#allocation2 + $0x18] sm:$0xff] %vm280_vm1, %v9486_v47  ;;  %285 = vst.msk [vmem:[#allocation2 + $0x20] sm:$0xff] %vm280_vm1, %v9486_v47 }
  0x4a   : > { %6436 = vmatprep.subr.bf16.mxu0 %v7550_v48  ;;  %6493 = vmatpush3.bf16.msra.mxu1 %v7553_v52  ;;  %v1453_v28 = vsel %vm743_vm0, %v1447_v4, %v1452_v16  ;;  %v1457_v32 = vsel %vm743_vm0, %v1452_v16, %v1456_v19  ;;  %v5933_v40 = vcombine.low %v1360_v20, %v1360_v20 }
  0x4b   : > { %6494 = vmatprep.subr.bf16.mxu1 %v7557_v55  ;;  %v1461_v36 = vsel %vm743_vm0, %v1456_v19, %v1460_v22  ;;  %v1465_v43 = vsel %vm743_vm0, %v1460_v22, %v1464_v26  ;;  %286 = vst.msk [vmem:[#allocation2 + $0x28] sm:$0xff] %vm280_vm1, %v9486_v47  ;;  %288 = vst.msk [vmem:[#allocation2 + $0x38] sm:$0xff] %vm280_vm1, %v9486_v47 }
  0x4c   : > { %289 = vst.msk [vmem:[#allocation2 + $0x40] sm:$0xff] %vm280_vm1, %v9486_v47  ;;  %290 = vst.msk [vmem:[#allocation2 + $0x48] sm:$0xff] %vm280_vm1, %v9486_v47 }
  0x4d   : > { %6437 = vmatpush3.bf16.msra.mxu0 %v7552_v50  ;;  %291 = vst.msk [vmem:[#allocation2 + $0x50] sm:$0xff] %vm280_vm1, %v9486_v47  ;;  %292 = vst.msk [vmem:[#allocation2 + $0x58] sm:$0xff] %vm280_vm1, %v9486_v47  ;;  %v7597_v50 = vld [vmem:[%s9481_s3 + $0x18] sm:$0xff]  }
  0x4e   : > { %6495 = vmatpush3.bf16.msra.mxu1 %v7558_v56  ;;  %6747 = vmatprep.subr.bf16.mxu0 %v7596_v25  ;;  %293 = vst.msk [vmem:[#allocation2 + $0x60] sm:$0xff] %vm280_vm1, %v9486_v47  ;;  %294 = vst.msk [vmem:[#allocation2 + $0x68] sm:$0xff] %vm280_vm1, %v9486_v47  ;;  %v8082_v56 = vld [vmem:[%s9480_s2] ss:$0 sm:$0xff] }
  0x4f   : > { %594 = vmatmul.mubr.bf16.gmra.mrb[16].mxu0 %v7517_v21  ;;  %v1462_v21 = vrot.slane %v7580_v9, 2  ;;  %7255 = vmatprep.subr.bf16.mxu1 %v7596_v25  ;;  %295 = vst.msk [vmem:[#allocation2 + $0x70] sm:$0xff] %vm280_vm1, %v9486_v47  ;;  %296 = vst.msk [vmem:[#allocation2 + $0x78] sm:$0xff] %vm280_vm1, %v9486_v47 }
  0x50   : > { %601 = vmatprep.mubr.bf16.mxu0 %v7523_v24  ;;  %945 = vmatmul.mubr.bf16.gmra.mrb[16].mxu1 %v763_v38  ;;  %v5934_v24 = vcombine.high %v1360_v20, %v1360_v20  ;;  %297 = vst.msk [vmem:[#allocation2 + $0x80] sm:$0xff] %vm280_vm1, %v9486_v47  ;;  %298 = vst.msk [vmem:[#allocation2 + $0x88] sm:$0xff] %vm280_vm1, %v9486_v47 }
  0x51   : > { %952 = vmatprep.mubr.bf16.mxu1 %v769_v41  ;;  %v1463_v34 = vsel %vm743_vm0, %v1458_v18, %v1462_v21  ;;  %v1467_v38 = vsel %vm743_vm0, %v1462_v21, %v1466_v23  ;;  %v1468_v41 = vrot.slane %v5933_v40, 2  ;;  %299 = vst.msk [vmem:[#allocation2 + $0x90] sm:$0xff] %vm280_vm1, %v9486_v47  ;;  %300 = vst.msk [vmem:[#allocation2 + $0x98] sm:$0xff] %vm280_vm1, %v9486_v47 }
  0x52   : > { %v7993_v27 = vrot.slane %v5934_v24, 2  ;;  %301 = vst.msk [vmem:[#allocation2 + $0xa0] sm:$0xff] %vm280_vm1, %v9486_v47  ;;  %302 = vst.msk [vmem:[#allocation2 + $0xa8] sm:$0xff] %vm280_vm1, %v9486_v47 }
  0x53   : > { %303 = vst.msk [vmem:[#allocation2 + $0xb0] sm:$0xff] %vm280_vm1, %v9486_v47  ;;  %304 = vst.msk [vmem:[#allocation2 + $0xb8] sm:$0xff] %vm280_vm1, %v9486_v47  ;;  %v1469_v48 = vsel %vm743_vm0, %v1464_v26, %v1468_v41 }
  0x54   : > { %v1471_v45 = vsel %vm743_vm0, %v1466_v23, %v7993_v27  ;;  %305 = vst.msk [vmem:[#allocation2 + $0xc0] sm:$0xff] %vm280_vm1, %v9486_v47  ;;  %306 = vst.msk [vmem:[#allocation2 + $0xc8] sm:$0xff] %vm280_vm1, %v9486_v47 }
  0x57   : > { %602 = vmatmul.mubr.bf16.gmra.mrb[20].mxu0 %v7526_v39  ;;  %v7589_v39 = vld [vmem:[%s7830_s30 + $0x11c] ss:$8 sps:$4 sm:$0xff]  }
  0x58   : > { %609 = vmatprep.mubr.bf16.mxu0 %v5844_v44  ;;  %953 = vmatmul.mubr.bf16.gmra.mrb[20].mxu1 %v767_v51  ;;  %v7591_v44 = vld [vmem:[%s7830_s30 + $0x118] ss:$8 sps:$4 sm:$0xff]  }
  0x59   : > { %960 = vmatprep.mubr.bf16.mxu1 %v768_v35  ;;  %v7583_v35 = vld [vmem:[%s7830_s30 + $0x10c] ss:$8 sps:$4 sm:$0xff]   ;;  %v8076_v51 = vld [vmem:[%s9481_s3] sm:$0xff]  }
  0x5f   : > { %610 = vmatmul.mubr.bf16.gmra.mrb[24].mxu0 %v5843_v54 }
  0x60   : > { %1265 = vmatprep.mubr.bf16.mxu0 %v7556_v53  ;;  %961 = vmatmul.mubr.bf16.gmra.mrb[24].mxu1 %v766_v46  ;;  %v5904_v46 = vcombine.high %v1037_v42, %v1037_v42 }
  0x61   : > { %1614 = vmatprep.mubr.bf16.mxu1 %v1451_v1 }
  0x67   : > { %1266 = vmatmul.mubr.bf16.vlgmr.msra.gmra.mrb[28].mxu0 %v7554_v0 }
  0x68   : > { %1273 = vmatprep.mubr.bf16.mxu0 %v7565_v2  ;;  %1615 = vmatmul.mubr.bf16.vlgmr.msra.gmra.mrb[28].mxu1 %v1448_v11 }
  0x69   : > { %1622 = vmatprep.mubr.bf16.mxu1 %v1455_v14  ;;  %7257 = vmatpush3.bf16.msra.mxu1 %v7596_v25 }
  0x6a   : > { %6748 = vmatpush3.bf16.msra.mxu0 %v7596_v25  ;;  %7256 = vmatprep.subr.bf16.mxu1 %v7597_v50 }
  0x6b   : > { %6749 = vmatprep.subr.bf16.mxu0 %v7597_v50 }
  0x6d   : > { %7258 = vmatpush3.bf16.msra.mxu1 %v7597_v50 }
  0x6e   : > { %6750 = vmatpush3.bf16.msra.mxu0 %v7597_v50 }
  0x6f   : > { %1274 = vmatmul.mubr.bf16.gmra.mrb[32].mxu0 %v7567_v12  ;;  %6763 = vmatprep.subr.bf16.mxu0 %v8076_v51 }
  0x70   : > { %1281 = vmatprep.mubr.bf16.mxu0 %v7571_v17  ;;  %1623 = vmatmul.mubr.bf16.gmra.mrb[32].mxu1 %v1453_v28 }
  0x71   : > { %1630 = vmatprep.mubr.bf16.mxu1 %v1459_v30 }
  0x77   : > { %1282 = vmatmul.mubr.bf16.gmra.mrb[36].mxu0 %v7573_v29 }
  0x78   : > { %1289 = vmatprep.mubr.bf16.mxu0 %v7577_v31  ;;  %1631 = vmatmul.mubr.bf16.gmra.mrb[36].mxu1 %v1457_v32 }
  0x79   : > { %1638 = vmatprep.mubr.bf16.mxu1 %v1463_v34 }
  0x7f   : > { %1290 = vmatmul.mubr.bf16.gmra.mrb[40].mxu0 %v7579_v33 }
  0x80   : > { %1297 = vmatprep.mubr.bf16.mxu0 %v7583_v35  ;;  %1639 = vmatmul.mubr.bf16.gmra.mrb[40].mxu1 %v1461_v36 }
  0x81   : > { %1646 = vmatprep.mubr.bf16.mxu1 %v1467_v38 }
  0x87   : > { %1298 = vmatmul.mubr.bf16.gmra.mrb[44].mxu0 %v7585_v37 }
  0x88   : > { %1305 = vmatprep.mubr.bf16.mxu0 %v7589_v39  ;;  %1647 = vmatmul.mubr.bf16.gmra.mrb[44].mxu1 %v1465_v43 }
  0x89   : > { %1654 = vmatprep.mubr.bf16.mxu1 %v1471_v45 }
  0x8f   : > { %1306 = vmatmul.mubr.bf16.gmra.mrb[48].mxu0 %v7591_v44 }
  0x90   : > { %1313 = vmatprep.mubr.bf16.mxu0 %v5904_v46  ;;  %1655 = vmatmul.mubr.bf16.gmra.mrb[48].mxu1 %v1469_v48 }
  0x91   : > { %1662 = vmatprep.mubr.bf16.mxu1 %v7993_v27 }
  0x97   : > { %1314 = vmatmul.mubr.bf16.gmra.mrb[52].mxu0 %v5903_v49 }
  0x98   : > { %1663 = vmatmul.mubr.bf16.gmra.mrb[52].mxu1 %v1468_v41 }
 0x102   : > { %v6322_v52 = vpop.f32.mrb[0].mxu0 }
 0x103   : > { %v6323_v53 = vpop.f32.mrb[1].mxu0  ;;  %v6380_v60 = vpop.f32.mrb[0].mxu1 }
 0x104   : > { %v6324_v54 = vadd.f32 %v6323_v53, %v6322_v52  ;;  %v6325_v55 = vpop.f32.mrb[2].mxu0  ;;  %v6381_v61 = vpop.f32.mrb[1].mxu1 }
 0x105   : > { %v6326_v57 = vpop.f32.mrb[3].mxu0  ;;  %v6382_v0 = vadd.f32 %v6381_v61, %v6380_v60  ;;  %v6383_v1 = vpop.f32.mrb[2].mxu1 }
 0x106   : > { %v564_v58 = vadd.f32 %v6324_v54, %v8082_v56  ;;  %v6327_v59 = vadd.f32 %v6326_v57, %v6325_v55  ;;  %v6384_v2 = vpop.f32.mrb[3].mxu1 }
 0x107   : > { %v915_v5 = vadd.f32 %v6382_v0, %v8082_v56  ;;  %v6385_v6 = vadd.f32 %v6384_v2, %v6383_v1 }
 0x108   : > { %v617_v62 = vmax.f32 %v564_v58, 0.0  ;;  %v567_v63 = vadd.f32 %v6327_v59, %v8082_v56 }
 0x109   : > { %v918_v11 = vadd.f32 %v6385_v6, %v8082_v56  ;;  %v968_v15 = vmax.f32 %v915_v5, 0.0 }
 0x10a   : > { %v618_v3 = vmax.f32 %v567_v63, 0.0  ;;  %v6328_v4 = vpop.f32.mrb[4].mxu0 }
 0x10b   : > { %v6329_v7 = vpop.f32.mrb[5].mxu0  ;;  %v969_v16 = vmax.f32 %v918_v11, 0.0  ;;  %v6386_v17 = vpop.f32.mrb[4].mxu1 }
 0x10c   : > { %v630_v8 = vpack.c.bf16 %v618_v3, %v617_v62  ;;  %v6330_v9 = vadd.f32 %v6329_v7, %v6328_v4  ;;  %v6331_v10 = vpop.f32.mrb[6].mxu0  ;;  %v6387_v19 = vpop.f32.mrb[5].mxu1 }
 0x10d   : > { %v6332_v12 = vpop.f32.mrb[7].mxu0  ;;  %v981_v21 = vpack.c.bf16 %v969_v16, %v968_v15  ;;  %v6388_v22 = vadd.f32 %v6387_v19, %v6386_v17  ;;  %v6389_v23 = vpop.f32.mrb[6].mxu1 }
 0x10e   : > { %637 = vst.msk [vmem:[#allocation2] sm:$0xff] %vm280_vm1, %v630_v8  ;;  %v572_v13 = vadd.f32 %v6330_v9, %v8082_v56  ;;  %v6333_v14 = vadd.f32 %v6332_v12, %v6331_v10  ;;  %v6390_v25 = vpop.f32.mrb[7].mxu1 }
 0x10f   : > { %v996_v27 = vrot.slane %v981_v21, 4  ;;  %v923_v28 = vadd.f32 %v6388_v22, %v8082_v56  ;;  %v6391_v29 = vadd.f32 %v6390_v25, %v6389_v23 }
 0x110   : > { %v619_v18 = vmax.f32 %v572_v13, 0.0  ;;  %v575_v20 = vadd.f32 %v6333_v14, %v8082_v56 }
 0x111   : > { %1017 = vst.msk [vmem:[#allocation2 + $0x30] sm:$0xf0] %vm1016_vm2, %v996_v27  ;;  %v926_v34 = vadd.f32 %v6391_v29, %v8082_v56  ;;  %v970_v38 = vmax.f32 %v923_v28, 0.0 }
 0x112   : > { %v620_v24 = vmax.f32 %v575_v20, 0.0  ;;  %v6334_v26 = vpop.f32.mrb[8].mxu0 }
 0x113   : > { %v6335_v30 = vpop.f32.mrb[9].mxu0  ;;  %v971_v39 = vmax.f32 %v926_v34, 0.0  ;;  %v6392_v40 = vpop.f32.mrb[8].mxu1 }
 0x114   : > { %v631_v31 = vpack.c.bf16 %v620_v24, %v619_v18  ;;  %v6336_v32 = vadd.f32 %v6335_v30, %v6334_v26  ;;  %v6337_v33 = vpop.f32.mrb[10].mxu0  ;;  %v6393_v42 = vpop.f32.mrb[9].mxu1 }
 0x115   : > { %v6338_v35 = vpop.f32.mrb[11].mxu0  ;;  %v982_v44 = vpack.c.bf16 %v971_v39, %v970_v38  ;;  %v6394_v45 = vadd.f32 %v6393_v42, %v6392_v40  ;;  %v6395_v46 = vpop.f32.mrb[10].mxu1 }
 0x116   : > { %638 = vst.msk [vmem:[#allocation2 + $0x8] sm:$0xff] %vm280_vm1, %v631_v31  ;;  %v580_v36 = vadd.f32 %v6336_v32, %v8082_v56  ;;  %v6339_v37 = vadd.f32 %v6338_v35, %v6337_v33  ;;  %v6396_v49 = vpop.f32.mrb[11].mxu1 }
 0x117   : > { %v997_v52 = vrot.slane %v982_v44, 4  ;;  %v931_v53 = vadd.f32 %v6394_v45, %v8082_v56  ;;  %v6397_v54 = vadd.f32 %v6396_v49, %v6395_v46 }
 0x118   : > { %v621_v41 = vmax.f32 %v580_v36, 0.0  ;;  %v583_v43 = vadd.f32 %v6339_v37, %v8082_v56  ;;  %v8105_v17 = vld [vmem:[#allocation2 + $0x30] sm:$0xf0] }
 0x119   : > { %v998_v60 = vsel %vm995_vm3, %v996_v27, %v997_v52  ;;  %v934_v61 = vadd.f32 %v6397_v54, %v8082_v56  ;;  %v972_v1 = vmax.f32 %v931_v53, 0.0  ;;  %v1753_v27 = vrot.slane %v8105_v17, 4 }
 0x11a   : > { %v622_v48 = vmax.f32 %v583_v43, 0.0  ;;  %v6340_v50 = vpop.f32.mrb[12].mxu0  ;;  %1018 = vst.msk [vmem:[#allocation2 + $0x38] sm:$0xff] %vm280_vm1, %v998_v60 }
 0x11b   : > { %v6341_v55 = vpop.f32.mrb[13].mxu0  ;;  %v973_v2 = vmax.f32 %v934_v61, 0.0  ;;  %v6398_v3 = vpop.f32.mrb[12].mxu1 }
 0x11c   : > { %v632_v57 = vpack.c.bf16 %v622_v48, %v621_v41  ;;  %v6342_v58 = vadd.f32 %v6341_v55, %v6340_v50  ;;  %v6343_v59 = vpop.f32.mrb[14].mxu0  ;;  %v6399_v5 = vpop.f32.mrb[13].mxu1 }
 0x11d   : > { %v6344_v62 = vpop.f32.mrb[15].mxu0  ;;  %v983_v7 = vpack.c.bf16 %v973_v2, %v972_v1  ;;  %v6400_v8 = vadd.f32 %v6399_v5, %v6398_v3  ;;  %v6401_v9 = vpop.f32.mrb[14].mxu1  ;;  %v8116_v32 = vld [vmem:[#allocation2 + $0x8] sm:$0xff] }
 0x11e   : > { %639 = vst.msk [vmem:[#allocation2 + $0x10] sm:$0xff] %vm280_vm1, %v632_v57  ;;  %v588_v63 = vadd.f32 %v6342_v58, %v8082_v56  ;;  %v6345_v0 = vadd.f32 %v6344_v62, %v6343_v59  ;;  %v6402_v11 = vpop.f32.mrb[15].mxu1  ;;  %v9497_v44 = vrot.slane %v8116_v32, 5  ;;  %v7599_v2 = vld [vmem:[%s9481_s3 + $0x8] sm:$0xff]  }
 0x11f   : > { %v999_v13 = vrot.slane %v983_v7, 4  ;;  %v939_v14 = vadd.f32 %v6400_v8, %v8082_v56  ;;  %v6403_v15 = vadd.f32 %v6402_v11, %v6401_v9 }
 0x120   : > { %v623_v4 = vmax.f32 %v588_v63, 0.0  ;;  %v591_v6 = vadd.f32 %v6345_v0, %v8082_v56 }
 0x121   : > { %v1000_v21 = vsel %vm995_vm3, %v997_v52, %v999_v13  ;;  %v974_v22 = vmax.f32 %v939_v14, 0.0  ;;  %v942_v23 = vadd.f32 %v6403_v15, %v8082_v56  ;;  %v8109_v24 = vld [vmem:[#allocation2 + $0x38] sm:$0xff] }
 0x122   : > { %v624_v10 = vmax.f32 %v591_v6, 0.0  ;;  %v6346_v12 = vpop.f32.mrb[16].mxu0  ;;  %1019 = vst.msk [vmem:[#allocation2 + $0x40] sm:$0xff] %vm280_vm1, %v1000_v21  ;;  %v1754_v28 = vrot.slane %v8109_v24, 4 }
 0x123   : > { %v6347_v16 = vpop.f32.mrb[17].mxu0  ;;  %v975_v30 = vmax.f32 %v942_v23, 0.0  ;;  %v6404_v31 = vpop.f32.mrb[16].mxu1 }
 0x124   : > { %v633_v18 = vpack.c.bf16 %v624_v10, %v623_v4  ;;  %v6348_v19 = vadd.f32 %v6347_v16, %v6346_v12  ;;  %v6349_v20 = vpop.f32.mrb[18].mxu0  ;;  %v6405_v35 = vpop.f32.mrb[17].mxu1  ;;  %v1755_v36 = vsel %vm995_vm3, %v1753_v27, %v1754_v28  ;;  %v8149_v10 = vld [vmem:[#allocation2] sm:$0xff] }
 0x125   : > { %v6350_v25 = vpop.f32.mrb[19].mxu0  ;;  %v8118_v33 = vld [vmem:[#allocation2 + $0x10] sm:$0xff]  ;;  %v984_v38 = vpack.c.bf16 %v975_v30, %v974_v22  ;;  %v6406_v39 = vadd.f32 %v6405_v35, %v6404_v31  ;;  %v6407_v40 = vpop.f32.mrb[18].mxu1  ;;  %6751 = vmatprep.mubr.msk.bf16.mxu0 %vm280_vm1, %v1755_v36 }
 0x126   : > { %640 = vst.msk [vmem:[#allocation2 + $0x18] sm:$0xff] %vm280_vm1, %v633_v18  ;;  %v596_v26 = vadd.f32 %v6348_v19, %v8082_v56  ;;  %v6351_v29 = vadd.f32 %v6350_v25, %v6349_v20  ;;  %v6408_v42 = vpop.f32.mrb[19].mxu1  ;;  %v3026_v45 = vrot.slane %v8118_v33, 5  ;;  %v7600_v20 = vld [vmem:[%s9481_s3 + $0x20] sm:$0xff]  }
 0x127   : > { %v1001_v46 = vrot.slane %v984_v38, 4  ;;  %v947_v48 = vadd.f32 %v6406_v39, %v8082_v56  ;;  %v6409_v49 = vadd.f32 %v6408_v42, %v6407_v40 }
 0x128   : > { %v625_v34 = vmax.f32 %v596_v26, 0.0  ;;  %v599_v37 = vadd.f32 %v6351_v29, %v8082_v56  ;;  %v8129_v55 = vsel %vm3022_vm4, %v9497_v44, %v3026_v45 }
 0x129   : > { %v1002_v57 = vsel %vm995_vm3, %v999_v13, %v1001_v46  ;;  %v976_v58 = vmax.f32 %v947_v48, 0.0  ;;  %v950_v59 = vadd.f32 %v6409_v49, %v8082_v56  ;;  %v8133_v60 = vld [vmem:[#allocation2 + $0x40] sm:$0xff] }
 0x12a   : > { %v626_v41 = vmax.f32 %v599_v37, 0.0  ;;  %v6352_v43 = vpop.f32.mrb[20].mxu0  ;;  %1020 = vst.msk [vmem:[#allocation2 + $0x48] sm:$0xff] %vm280_vm1, %v1002_v57  ;;  %v1756_v63 = vrot.slane %v8133_v60, 4 }
 0x12b   : > { %v6353_v50 = vpop.f32.mrb[21].mxu0  ;;  %v977_v1 = vmax.f32 %v950_v59, 0.0  ;;  %v6410_v3 = vpop.f32.mrb[20].mxu1  ;;  %v7601_v59 = vld [vmem:[%s9481_s3 + $0x28] sm:$0xff]  }
 0x12c   : > { %v634_v52 = vpack.c.bf16 %v626_v41, %v625_v34  ;;  %v6354_v53 = vadd.f32 %v6353_v50, %v6352_v43  ;;  %v6355_v54 = vpop.f32.mrb[22].mxu0  ;;  %v1757_v6 = vsel %vm995_vm3, %v1754_v28, %v1756_v63  ;;  %v6411_v8 = vpop.f32.mrb[21].mxu1 }
 0x12d   : > { %v6356_v61 = vpop.f32.mrb[23].mxu0  ;;  %v8142_v4 = vld [vmem:[#allocation2 + $0x18] sm:$0xff]  ;;  %v8146_v9 = vpack.c.bf16 %v977_v1, %v976_v58  ;;  %6752 = vmatmul.mubr.msk.bf16.vlgmr.msra.gmra.mrb[56].mxu0 %vm280_vm1, %v1757_v6  ;;  %v6412_v11 = vadd.f32 %v6411_v8, %v6410_v3  ;;  %v6413_v12 = vpop.f32.mrb[22].mxu1 }
 0x12e   : > { %641 = vst.msk [vmem:[#allocation2 + $0x20] sm:$0xff] %vm280_vm1, %v634_v52  ;;  %v604_v62 = vadd.f32 %v6354_v53, %v8082_v56  ;;  %v6357_v0 = vadd.f32 %v6356_v61, %v6355_v54  ;;  %6764 = vmatpush3.bf16.msra.mxu0 %v8076_v51  ;;  %6767 = vmatprep.mubr.msk.bf16.mxu0 %vm280_vm1, %v8149_v10  ;;  %v6414_v15 = vpop.f32.mrb[23].mxu1  ;;  %v3028_v16 = vrot.slane %v8142_v4, 5 }
 0x12f   : > { %v1003_v18 = vrot.slane %v8146_v9, 4  ;;  %6765 = vmatprep.subr.bf16.mxu0 %v7599_v2  ;;  %v955_v21 = vadd.f32 %v6412_v11, %v8082_v56  ;;  %v6415_v22 = vadd.f32 %v6414_v15, %v6413_v12  ;;  %v2001_v15 = vshll.u32 %v8116_v32, 16 }
 0x130   : > { %v627_v5 = vmax.f32 %v604_v62, 0.0  ;;  %v607_v7 = vadd.f32 %v6357_v0, %v8082_v56  ;;  %v8161_v26 = vsel %vm3022_vm4, %v3026_v45, %v3028_v16  ;;  %v1995_v0 = vshrl.u32 %v8149_v10, 16 }
 0x131   : > { %v1004_v27 = vsel %vm995_vm3, %v1001_v46, %v1003_v18  ;;  %v8164_v28 = vld [vmem:[#allocation2 + $0x48] sm:$0xff]  ;;  %v978_v29 = vmax.f32 %v955_v21, 0.0  ;;  %v958_v30 = vadd.f32 %v6415_v22, %v8082_v56  ;;  %v1997_v46 = vshll.u32 %v8149_v10, 16 }
 0x132   : > { %v628_v13 = vmax.f32 %v607_v7, 0.0  ;;  %v6358_v14 = vpop.f32.mrb[24].mxu0  ;;  %1021 = vst.msk [vmem:[#allocation2 + $0x50] sm:$0xff] %vm280_vm1, %v1004_v27  ;;  %6766 = vmatpush3.bf16.msra.mxu0 %v7599_v2  ;;  %v1758_v36 = vrot.slane %v8164_v28, 4  ;;  %v2194_v39 = vshrl.u32 %v8164_v28, 16  ;;  %v2197_v40 = vshll.u32 %v8164_v28, 16 }
 0x133   : > { %v6359_v19 = vpop.f32.mrb[25].mxu0  ;;  %6779 = vmatprep.subr.bf16.mxu0 %v7600_v20  ;;  %v979_v37 = vmax.f32 %v958_v30, 0.0  ;;  %v6416_v38 = vpop.f32.mrb[24].mxu1 }
 0x134   : > { %v635_v51 = vpack.c.bf16 %v628_v13, %v627_v5  ;;  %v6360_v23 = vadd.f32 %v6359_v19, %v6358_v14  ;;  %v6361_v25 = vpop.f32.mrb[26].mxu0  ;;  %v1759_v42 = vsel %vm995_vm3, %v1756_v63, %v1758_v36  ;;  %v6417_v43 = vpop.f32.mrb[25].mxu1  ;;  %v3514_v57 = vrot.slane %v2194_v39, 1 }
 0x135   : > { %v8167_v31 = vld [vmem:[#allocation2 + $0x20] sm:$0xff]  ;;  %v6362_v34 = vpop.f32.mrb[27].mxu0  ;;  %6755 = vmatprep.mubr.msk.bf16.mxu1 %vm280_vm1, %v1759_v42  ;;  %v986_v48 = vpack.c.bf16 %v979_v37, %v978_v29  ;;  %v6418_v49 = vadd.f32 %v6417_v43, %v6416_v38  ;;  %v6419_v50 = vpop.f32.mrb[26].mxu1  ;;  %v3515_v63 = vrot.slane %v2197_v40, 2  ;;  %v1999_v5 = vrot.slane %v1997_v46, 1 }
 0x136   : > { %642 = vst.msk [vmem:[#allocation2 + $0x28] sm:$0xff] %vm280_vm1, %v635_v51  ;;  %v612_v35 = vadd.f32 %v6360_v23, %v8082_v56  ;;  %v9496_v45 = vrot.slane %v8167_v31, 5  ;;  %v6420_v54 = vpop.f32.mrb[27].mxu1  ;;  %v3172_v14 = vrot.slane %v8164_v28, 1  ;;  %v9495_v23 = vrot.slane %v8133_v60, 1 }
 0x137   : > { %v1005_v58 = vrot.slane %v986_v48, 4  ;;  %v963_v61 = vadd.f32 %v6418_v49, %v8082_v56  ;;  %v8199_v10 = vor.u32 %v3515_v63, %v3514_v57  ;;  %v2000_v25 = vor.u32 %v1999_v5, %v1995_v0 }
 0x138   : > { %v629_v41 = vmax.f32 %v612_v35, 0.0  ;;  %v8192_v3 = vsel %vm3022_vm4, %v3028_v16, %v9496_v45  ;;  %v2168_v38 = vshrl.u32 %v8105_v17, 16  ;;  %v2003_v43 = vrot.slane %v2001_v15, 1 }
 0x139   : > { %6768 = vmatmul.mubr.msk.bf16.vlgmr.msra.gmra.mrb[56].mxu0 %vm280_vm1, %v8116_v32  ;;  %v8196_v6 = vld [vmem:[#allocation2 + $0x50] sm:$0xff]  ;;  %v1006_v7 = vsel %vm995_vm3, %v1003_v18, %v1005_v58  ;;  %v980_v8 = vmax.f32 %v963_v61, 0.0  ;;  %v2005_v54 = vshrl.u32 %v8116_v32, 16 }
 0x13a   : > { %v636_v52 = vpack.c.bf16 %v629_v41, %v629_v41  ;;  %v6438_v53 = vpop.f32.mrb[28].mxu0  ;;  %6780 = vmatpush3.bf16.msra.mxu0 %v7600_v20  ;;  %6771 = vmatprep.mubr.msk.bf16.mxu0 %vm280_vm1, %v8118_v33  ;;  %v1760_v11 = vrot.slane %v8196_v6, 4  ;;  %1022 = vst.msk [vmem:[#allocation2 + $0x58] sm:$0xff] %vm280_vm1, %v1006_v7  ;;  %v8211_v18 = vld [vmem:[%s9481_s3 + $0x30] sm:$0xff]   ;;  %v8222_v41 = vsel %vm3168_vm6, %v9495_v23, %v3172_v14 }
 0x13b   : > { %v6439_v62 = vpop.f32.mrb[29].mxu0  ;;  %6781 = vmatprep.subr.bf16.mxu0 %v7601_v59  ;;  %v987_v16 = vpack.c.bf16 %v980_v8, %v980_v8  ;;  %v6496_v19 = vpop.f32.mrb[28].mxu1  ;;  %v2004_v5 = vsel %vm1994_vm8, %v2000_v25, %v2003_v43 }
 0x13c   : > { %644 = vst.msk [vmem:[#allocation2 + $0x30] sm:$0x3] %vm643_vm5, %v636_v52  ;;  %v6440_v1 = vadd.f32 %v6439_v62, %v6438_v53  ;;  %v6441_v2 = vpop.f32.mrb[30].mxu0  ;;  %v1761_v20 = vsel %vm995_vm3, %v1758_v36, %v1760_v11  ;;  %v6497_v51 = vpop.f32.mrb[29].mxu1  ;;  %v2171_v36 = vshll.u32 %v8105_v17, 16  ;;  %v3174_v53 = vrot.slane %v8196_v6, 1 }
 0x13d   : > { %v6442_v9 = vpop.f32.mrb[31].mxu0  ;;  %6756 = vmatmul.mubr.msk.bf16.vlgmr.msra.gmra.mrb[56].mxu1 %vm280_vm1, %v1761_v20  ;;  %v1007_v27 = vrot.slane %v987_v16, 4  ;;  %v6498_v29 = vadd.f32 %v6497_v51, %v6496_v19  ;;  %v6499_v30 = vpop.f32.mrb[30].mxu1 }
 0x13e   : > { %v1268_v12 = vadd.f32 %v6440_v1, %v8082_v56  ;;  %v6443_v13 = vadd.f32 %v6442_v9, %v6441_v2  ;;  %6782 = vmatpush3.bf16.msra.mxu0 %v7601_v59  ;;  %v6500_v37 = vpop.f32.mrb[31].mxu1  ;;  %v8242_v1 = vrot.slane %v2168_v38, 4  ;;  %v2008_v2 = vshll.u32 %v8118_v33, 16 }
 0x13f   : > { %v1008_v42 = vsel %vm995_vm3, %v1005_v58, %v1007_v27  ;;  %6795 = vmatprep.subr.bf16.mxu0 %v8211_v18  ;;  %v1617_v48 = vadd.f32 %v6498_v29, %v8082_v56  ;;  %v6501_v49 = vadd.f32 %v6500_v37, %v6499_v30  ;;  %v8246_v9 = vrot.slane %v2171_v36, 5 }
 0x140   : > { %v1321_v21 = vmax.f32 %v1268_v12, 0.0  ;;  %v1271_v22 = vadd.f32 %v6443_v13, %v8082_v56  ;;  %1024 = vst.msk [vmem:[#allocation2 + $0x60] sm:$0x3f] %vm1023_vm7, %v1008_v42  ;;  %v8253_v20 = vsel %vm3168_vm6, %v3172_v14, %v3174_v53  ;;  %v2015_v29 = vshll.u32 %v8142_v4, 16 }
 0x141   : > { %6772 = vmatmul.mubr.msk.bf16.gmra.mrb[60].mxu0 %vm280_vm1, %v8142_v4  ;;  %v1670_v58 = vmax.f32 %v1617_v48, 0.0  ;;  %v8234_v59 = vld [vmem:[#allocation2 + $0x58] sm:$0xff]  ;;  %v1620_v61 = vadd.f32 %v6501_v49, %v8082_v56  ;;  %v2179_v37 = vshll.u32 %v8109_v24, 16  ;;  %v2010_v14 = vrot.slane %v2008_v2, 1  ;;  %v1729_v48 = vld [vmem:[#allocation2 + $0x28] sm:$0x1f] }
 0x142   : > { %v1322_v34 = vmax.f32 %v1271_v22, 0.0  ;;  %v6444_v35 = vpop.f32.mrb[32].mxu0  ;;  %6775 = vmatprep.mubr.msk.bf16.mxu0 %vm280_vm1, %v8167_v31  ;;  %v1762_v0 = vrot.slane %v8234_v59, 4  ;;  %v2007_v22 = vor.u32 %v2005_v54, %v2003_v43 }
 0x143   : > { %v6445_v46 = vpop.f32.mrb[33].mxu0  ;;  %v1671_v7 = vmax.f32 %v1620_v61, 0.0  ;;  %v6502_v8 = vpop.f32.mrb[32].mxu1 }
 0x144   : > { %v1334_v17 = vpack.c.bf16 %v1322_v34, %v1321_v21  ;;  %v6446_v50 = vadd.f32 %v6445_v46, %v6444_v35  ;;  %v6447_v52 = vpop.f32.mrb[34].mxu0  ;;  %v1763_v16 = vsel %vm995_vm3, %v1760_v11, %v1762_v0  ;;  %v6503_v19 = vpop.f32.mrb[33].mxu1  ;;  %v2012_v21 = vshrl.u32 %v8118_v33, 16 }
 0x145   : > { %v6448_v57 = vpop.f32.mrb[35].mxu0  ;;  %6759 = vmatprep.mubr.msk.bf16.mxu1 %vm280_vm1, %v1763_v16  ;;  %v8257_v51 = vpack.c.bf16 %v1671_v7, %v1670_v58  ;;  %v6504_v25 = vadd.f32 %v6503_v19, %v6502_v8  ;;  %v6505_v27 = vpop.f32.mrb[34].mxu1  ;;  %v2176_v35 = vshrl.u32 %v8109_v24, 16  ;;  %v2019_v58 = vshrl.u32 %v8142_v4, 16 }
 0x146   : > { %1341 = vst.msk [vmem:[#allocation2 + $0x68] sm:$0xff] %vm280_vm1, %v1334_v17  ;;  %v1276_v62 = vadd.f32 %v6446_v50, %v8082_v56  ;;  %v6449_v63 = vadd.f32 %v6448_v57, %v6447_v52  ;;  %v6506_v11 = vpop.f32.mrb[35].mxu1  ;;  %v9494_v57 = vrot.slane %v8234_v59, 1  ;;  %v2014_v24 = vor.u32 %v2012_v21, %v2010_v14 }
 0x147   : > { %v1697_v38 = vrot.slane %v8257_v51, 4  ;;  %v1625_v42 = vadd.f32 %v6504_v25, %v8082_v56  ;;  %v6507_v43 = vadd.f32 %v6506_v11, %v6505_v27  ;;  %v1740_v46 = vld [vmem:[#allocation2 + $0x60] sm:$0x1]  ;;  %v2017_v7 = vrot.slane %v2015_v29, 1 }
 0x148   : > { %v1323_v12 = vmax.f32 %v1276_v62, 0.0  ;;  %v1279_v13 = vadd.f32 %v6449_v63, %v8082_v56  ;;  %v1764_v52 = vrot.slane %v1740_v46, 4  ;;  %v2178_v51 = vrot.slane %v2176_v35, 4 }
 0x149   : > { %6776 = vmatmul.mubr.msk.bf16.gmra.mrb[64].mxu0 %vm280_vm1, %v1729_v48  ;;  %1717 = vst.msk [vmem:[#allocation2 + $0x98] sm:$0xf0] %vm1016_vm2, %v1697_v38  ;;  %v1672_v61 = vmax.f32 %v1625_v42, 0.0  ;;  %v1628_v63 = vadd.f32 %v6507_v43, %v8082_v56  ;;  %v8280_v25 = vrot.slane %v2005_v54, 5  ;;  %v2181_v11 = vrot.slane %v2179_v37, 5 }
 0x14a   : > { %v1324_v30 = vmax.f32 %v1279_v13, 0.0  ;;  %v6450_v34 = vpop.f32.mrb[36].mxu0  ;;  %6783 = vmatprep.mubr.msk.bf16.mxu0 %vm280_vm1, %v2004_v5  ;;  %v1765_v13 = vsel %vm995_vm3, %v1762_v0, %v1764_v52  ;;  %v8288_v5 = vsel %vm3168_vm6, %v3174_v53, %v9494_v57  ;;  %v2022_v0 = vshll.u32 %v8167_v31, 16  ;;  %v8292_v42 = vld [vmem:[#allocation2 + $0x28] sm:$0x3f] }
 0x14b   : > { %v6451_v36 = vpop.f32.mrb[37].mxu0  ;;  %v1673_v16 = vmax.f32 %v1628_v63, 0.0  ;;  %6760 = vmatmul.mubr.msk.bf16.gmra.mrb[60].mxu1 %vm280_vm1, %v1765_v13  ;;  %v6508_v19 = vpop.f32.mrb[36].mxu1  ;;  %v2021_v37 = vor.u32 %v2019_v58, %v2017_v7  ;;  %v2018_v46 = vsel %vm1994_vm8, %v2014_v24, %v2017_v7  ;;  %v2026_v53 = vshrl.u32 %v8167_v31, 16 }
 0x14c   : > { %v1335_v49 = vpack.c.bf16 %v1324_v30, %v1323_v12  ;;  %v6452_v17 = vadd.f32 %v6451_v36, %v6450_v34  ;;  %v6453_v50 = vpop.f32.mrb[38].mxu0  ;;  %v6509_v34 = vpop.f32.mrb[37].mxu1  ;;  %v2011_v36 = vsel %vm1994_vm8, %v2007_v22, %v2010_v14  ;;  %v7603_v22 = vld [vmem:[%s9481_s3 + $0x38] sm:$0xff]   ;;  %vm5565_vm2 = vcmask 1044480  }
 0x14d   : > { %v6454_v62 = vpop.f32.mrb[39].mxu0  ;;  %v8294_v54 = vpack.c.bf16 %v1673_v16, %v1672_v61  ;;  %v6510_v35 = vadd.f32 %v6509_v34, %v6508_v19  ;;  %v6511_v43 = vpop.f32.mrb[38].mxu1  ;;  %v3324_v34 = vrot.slane %v2001_v15, 6  ;;  %v3333_v15 = vrot.slane %v2008_v2, 6 }
 0x14e   : > { %1342 = vst.msk [vmem:[#allocation2 + $0x70] sm:$0xff] %vm280_vm1, %v1335_v49  ;;  %v1284_v8 = vadd.f32 %v6452_v17, %v8082_v56  ;;  %v6455_v12 = vadd.f32 %v6454_v62, %v6453_v50  ;;  %v6512_v49 = vpop.f32.mrb[39].mxu1  ;;  %v2030_v62 = vshll.u32 %v8292_v42, 16 }
 0x14f   : > { %v1698_v14 = vrot.slane %v8294_v54, 4  ;;  %v1633_v50 = vadd.f32 %v6510_v35, %v8082_v56  ;;  %v6513_v52 = vadd.f32 %v6512_v49, %v6511_v43  ;;  %v8322_v54 = vor.u32 %v2181_v11, %v2178_v51  ;;  %v8327_v43 = vld [vmem:[%s9481_s3 + $0x40] sm:$0xff]  }
 0x150   : > { %v1325_v27 = vmax.f32 %v1284_v8, 0.0  ;;  %v1287_v30 = vadd.f32 %v6455_v12, %v8082_v56  ;;  %v2024_v8 = vrot.slane %v2022_v0, 1  ;;  %v9493_v11 = vshrl.u32 %v8133_v60, 16 }
 0x151   : > { %6784 = vmatmul.mubr.msk.bf16.vlgmr.msra.gmra.mrb[56].mxu0 %vm280_vm1, %v2011_v36  ;;  %v1699_v12 = vsel %vm995_vm3, %v1697_v38, %v1698_v14  ;;  %v1674_v13 = vmax.f32 %v1633_v50, 0.0  ;;  %v1636_v16 = vadd.f32 %v6513_v52, %v8082_v56  ;;  %v3330_v38 = vrot.slane %v2012_v21, 5 }
 0x152   : > { %v1326_v48 = vmax.f32 %v1287_v30, 0.0  ;;  %v6456_v17 = vpop.f32.mrb[40].mxu0  ;;  %6796 = vmatpush3.bf16.msra.mxu0 %v8211_v18  ;;  %6787 = vmatprep.mubr.msk.bf16.mxu0 %vm280_vm1, %v2018_v46  ;;  %1718 = vst.msk [vmem:[#allocation2 + $0xa0] sm:$0xff] %vm280_vm1, %v1699_v12  ;;  %v2174_v18 = vor.u32 %v8246_v9, %v8242_v1  ;;  %v2028_v21 = vor.u32 %v2026_v53, %v2024_v8  ;;  %v2032_v46 = vrot.slane %v2030_v62, 1 }
 0x153   : > { %v6457_v61 = vpop.f32.mrb[41].mxu0  ;;  %6797 = vmatprep.subr.bf16.mxu0 %v7603_v22  ;;  %v1675_v36 = vmax.f32 %v1636_v16, 0.0  ;;  %v6514_v35 = vpop.f32.mrb[40].mxu1  ;;  %v9492_v50 = vshll.u32 %v8133_v60, 16  ;;  %v2025_v52 = vsel %vm1994_vm8, %v2021_v37, %v2024_v8  ;;  %v8340_v62 = vor.u32 %v3324_v34, %v8280_v25 }
 0x154   : > { %v1336_v63 = vpack.c.bf16 %v1326_v48, %v1325_v27  ;;  %v6458_v24 = vadd.f32 %v6457_v61, %v6456_v17  ;;  %v6459_v7 = vpop.f32.mrb[42].mxu0  ;;  %v6515_v17 = vpop.f32.mrb[41].mxu1  ;;  %v2033_v16 = vsel %vm1994_vm8, %v2028_v21, %v2032_v46 }
 0x155   : > { %v6460_v19 = vpop.f32.mrb[43].mxu0  ;;  %v8334_v1 = vpack.c.bf16 %v1675_v36, %v1674_v13  ;;  %v6516_v9 = vadd.f32 %v6515_v17, %v6514_v35  ;;  %v6517_v51 = vpop.f32.mrb[42].mxu1  ;;  %v2187_v36 = vrot.slane %v9493_v11, 4  ;;  %v3339_v17 = vrot.slane %v2019_v58, 5 }
 0x156   : > { %1343 = vst.msk [vmem:[#allocation2 + $0x78] sm:$0xff] %vm280_vm1, %v1336_v63  ;;  %v1292_v27 = vadd.f32 %v6458_v24, %v8082_v56  ;;  %v6461_v30 = vadd.f32 %v6460_v19, %v6459_v7  ;;  %6798 = vmatpush3.bf16.msra.mxu0 %v7603_v22  ;;  %v6518_v2 = vpop.f32.mrb[43].mxu1  ;;  %v3334_v63 = vor.u32 %v3333_v15, %v3330_v38  ;;  %v2034_v38 = vshrl.u32 %v8292_v42, 16 }
 0x157   : > { %v1700_v24 = vrot.slane %v8334_v1, 4  ;;  %v1641_v7 = vadd.f32 %v6516_v9, %v8082_v56  ;;  %6811 = vmatprep.subr.bf16.mxu0 %v8327_v43  ;;  %v6519_v12 = vadd.f32 %v6518_v2, %v6517_v51  ;;  %v2199_v42 = vrot.slane %v2197_v40, 5 }
 0x158   : > { %v1327_v48 = vmax.f32 %v1292_v27, 0.0  ;;  %v1295_v49 = vadd.f32 %v6461_v30, %v8082_v56  ;;  %v8348_v8 = vsel %vm3309_vm9, %v8340_v62, %v3334_v63 }
 0x159   : > { %6788 = vmatmul.mubr.msk.bf16.gmra.mrb[60].mxu0 %vm280_vm1, %v2025_v52  ;;  %v1701_v25 = vsel %vm995_vm3, %v1698_v14, %v1700_v24  ;;  %v1676_v27 = vmax.f32 %v1641_v7, 0.0  ;;  %v1644_v30 = vadd.f32 %v6519_v12, %v8082_v56  ;;  %v2190_v14 = vrot.slane %v9492_v50, 5 }
 0x15a   : > { %v1328_v33 = vmax.f32 %v1295_v49, 0.0  ;;  %v6462_v61 = vpop.f32.mrb[44].mxu0  ;;  %6791 = vmatprep.mubr.msk.bf16.mxu0 %vm280_vm1, %v2033_v16  ;;  %1719 = vst.msk [vmem:[#allocation2 + $0xa8] sm:$0xff] %vm280_vm1, %v1701_v25  ;;  %v3342_v52 = vrot.slane %v2015_v29, 6  ;;  %v2036_v7 = vor.u32 %v2034_v38, %v2032_v46 }
 0x15b   : > { %v6463_v13 = vpop.f32.mrb[45].mxu0  ;;  %v1677_v21 = vmax.f32 %v1644_v30, 0.0  ;;  %v6520_v49 = vpop.f32.mrb[44].mxu1 }
 0x15c   : > { %v1337_v19 = vpack.c.bf16 %v1328_v33, %v1327_v48  ;;  %v6464_v37 = vadd.f32 %v6463_v13, %v6462_v61  ;;  %v6465_v22 = vpop.f32.mrb[46].mxu0  ;;  %v2196_v48 = vrot.slane %v2194_v39, 4  ;;  %v6521_v51 = vpop.f32.mrb[45].mxu1  ;;  %v2183_v39 = vsel %vm2166_vm10, %v2174_v18, %v8322_v54 }
 0x15d   : > { %v6466_v34 = vpop.f32.mrb[47].mxu0  ;;  %v1686_v33 = vpack.c.bf16 %v1677_v21, %v1676_v27  ;;  %v6522_v2 = vadd.f32 %v6521_v51, %v6520_v49  ;;  %v6523_v61 = vpop.f32.mrb[46].mxu1 }
 0x15e   : > { %1344 = vst.msk [vmem:[#allocation2 + $0x80] sm:$0xff] %vm280_vm1, %v1337_v19  ;;  %v1300_v35 = vadd.f32 %v6464_v37, %v8082_v56  ;;  %v6467_v15 = vadd.f32 %v6466_v34, %v6465_v22  ;;  %v6524_v13 = vpop.f32.mrb[47].mxu1  ;;  %v8374_v37 = vor.u32 %v3342_v52, %v3339_v17  ;;  %v2191_v22 = vor.u32 %v2190_v14, %v2187_v36 }
 0x15f   : > { %v1702_v16 = vrot.slane %v1686_v33, 4  ;;  %v1649_v28 = vadd.f32 %v6522_v2, %v8082_v56  ;;  %v6525_v40 = vadd.f32 %v6524_v13, %v6523_v61  ;;  %v8376_v4 = vor.u32 %v2199_v42, %v2196_v48 }
 0x160   : > { %v1329_v1 = vmax.f32 %v1300_v35, 0.0  ;;  %v1303_v9 = vadd.f32 %v6467_v15, %v8082_v56  ;;  %v8383_v38 = vsel %vm3309_vm9, %v3334_v63, %v8374_v37  ;;  %v2203_v36 = vshrl.u32 %v8196_v6, 16 }
 0x161   : > { %6792 = vmatmul.mubr.msk.bf16.gmra.mrb[64].mxu0 %vm280_vm1, %v2036_v7  ;;  %v1703_v18 = vsel %vm995_vm3, %v1700_v24, %v1702_v16  ;;  %v1678_v46 = vmax.f32 %v1649_v28, 0.0  ;;  %v1652_v30 = vadd.f32 %v6525_v40, %v8082_v56  ;;  %v2206_v35 = vshll.u32 %v8196_v6, 16 }
 0x162   : > { %v1330_v12 = vmax.f32 %v1303_v9, 0.0  ;;  %v6468_v58 = vpop.f32.mrb[48].mxu0  ;;  %6799 = vmatprep.mubr.msk.bf16.mxu0 %vm280_vm1, %v2183_v39  ;;  %1720 = vst.msk [vmem:[#allocation2 + $0xb0] sm:$0xff] %vm280_vm1, %v1703_v18  ;;  %v2212_v14 = vshrl.u32 %v8234_v59, 16  ;;  %v2192_v42 = vsel %vm2166_vm10, %v8322_v54, %v2191_v22  ;;  %v2215_v9 = vshll.u32 %v8234_v59, 16 }
 0x163   : > { %v6469_v19 = vpop.f32.mrb[49].mxu0  ;;  %v1679_v21 = vmax.f32 %v1652_v30, 0.0  ;;  %v6526_v48 = vpop.f32.mrb[48].mxu1  ;;  %v2201_v33 = vsel %vm2166_vm10, %v2191_v22, %v8376_v4  ;;  %v2205_v2 = vrot.slane %v2203_v36, 4  ;;  %v2208_v61 = vrot.slane %v2206_v35, 5 }
 0x164   : > { %v1338_v29 = vpack.c.bf16 %v1330_v12, %v1329_v1  ;;  %v6470_v25 = vadd.f32 %v6469_v19, %v6468_v58  ;;  %v6471_v27 = vpop.f32.mrb[50].mxu0  ;;  %v6527_v17 = vpop.f32.mrb[49].mxu1  ;;  %v2214_v13 = vrot.slane %v2212_v14, 4  ;;  %v7605_v58 = vld [vmem:[%s9481_s3 + $0x48] sm:$0xff]  }
 0x165   : > { %v6472_v34 = vpop.f32.mrb[51].mxu0  ;;  %v8395_v1 = vpack.c.bf16 %v1679_v21, %v1678_v46  ;;  %v6528_v51 = vadd.f32 %v6527_v17, %v6526_v48  ;;  %v6529_v52 = vpop.f32.mrb[50].mxu1  ;;  %v2217_v46 = vrot.slane %v2215_v9, 5  ;;  %v2209_v21 = vor.u32 %v2208_v61, %v2205_v2  ;;  %v7606_v17 = vld [vmem:[%s9481_s3 + $0x50] sm:$0xff]  }
 0x166   : > { %1345 = vst.msk [vmem:[#allocation2 + $0x88] sm:$0xff] %vm280_vm1, %v1338_v29  ;;  %v1308_v24 = vadd.f32 %v6470_v25, %v8082_v56  ;;  %v6473_v15 = vadd.f32 %v6472_v34, %v6471_v27  ;;  %v6530_v39 = vpop.f32.mrb[51].mxu1  ;;  %v2160_v29 = vld [vmem:[#allocation2 + $0x60] sm:$0x3] }
 0x167   : > { %v1704_v54 = vrot.slane %v8395_v1, 4  ;;  %v1657_v28 = vadd.f32 %v6528_v51, %v8082_v56  ;;  %v6531_v40 = vadd.f32 %v6530_v39, %v6529_v52  ;;  %v2224_v1 = vshll.u32 %v2160_v29, 16 }
 0x168   : > { %v1331_v49 = vmax.f32 %v1308_v24, 0.0  ;;  %v1311_v63 = vadd.f32 %v6473_v15, %v8082_v56  ;;  %v2218_v2 = vor.u32 %v2217_v46, %v2214_v13  ;;  %v2210_v13 = vsel %vm2166_vm10, %v8376_v4, %v2209_v21 }
 0x169   : > { %6800 = vmatmul.mubr.msk.bf16.vlgmr.msra.gmra.mrb[56].mxu0 %vm280_vm1, %v2192_v42  ;;  %v1705_v18 = vsel %vm995_vm3, %v1702_v16, %v1704_v54  ;;  %v1680_v30 = vmax.f32 %v1657_v28, 0.0  ;;  %v1660_v34 = vadd.f32 %v6531_v40, %v8082_v56  ;;  %v8416_v24 = vld [vmem:[#allocation2 + $0xb0] sm:$0xff] }
 0x16a   : > { %v1332_v7 = vmax.f32 %v1311_v63, 0.0  ;;  %v6474_v12 = vpop.f32.mrb[52].mxu0  ;;  %6812 = vmatpush3.bf16.msra.mxu0 %v8327_v43  ;;  %6803 = vmatprep.mubr.msk.bf16.mxu0 %vm280_vm1, %v2201_v33  ;;  %1721 = vst.msk [vmem:[#allocation2 + $0xb8] sm:$0xff] %vm280_vm1, %v1705_v18  ;;  %v9499_v42 = vshrl.u32 %v8416_v24, 16  ;;  %v9498_v43 = vshll.u32 %v8416_v24, 16  ;;  %v3348_v33 = vrot.slane %v2026_v53, 5 }
 0x16b   : > { %v6475_v19 = vpop.f32.mrb[53].mxu0  ;;  %6813 = vmatprep.subr.bf16.mxu0 %v7605_v58  ;;  %v1681_v48 = vmax.f32 %v1660_v34, 0.0  ;;  %v6532_v63 = vpop.f32.mrb[52].mxu1 }
 0x16c   : > { %v1339_v22 = vpack.c.bf16 %v1332_v7, %v1331_v49  ;;  %v6476_v25 = vadd.f32 %v6475_v19, %v6474_v12  ;;  %v6477_v27 = vpop.f32.mrb[54].mxu0  ;;  %v2221_v49 = vshrl.u32 %v2160_v29, 16  ;;  %v6533_v52 = vpop.f32.mrb[53].mxu1  ;;  %v4165_v40 = vrot.slane %v9499_v42, 1 }
 0x16d   : > { %v6478_v15 = vpop.f32.mrb[55].mxu0  ;;  %v1688_v61 = vpack.c.bf16 %v1681_v48, %v1680_v30  ;;  %v6534_v7 = vadd.f32 %v6533_v52, %v6532_v63  ;;  %v6535_v39 = vpop.f32.mrb[54].mxu1  ;;  %v2219_v27 = vsel %vm2166_vm10, %v2209_v21, %v2218_v2  ;;  %v3519_v63 = vrot.slane %v2206_v35, 2  ;;  %v8482_v35 = vld [vmem:[#allocation2 + $0x80] sm:$0xff] }
 0x16e   : > { %1346 = vst.msk [vmem:[#allocation2 + $0x90] sm:$0xff] %vm280_vm1, %v1339_v22  ;;  %v1316_v16 = vadd.f32 %v6476_v25, %v8082_v56  ;;  %v3351_v56 = vrot.slane %v2022_v0, 6  ;;  %6814 = vmatpush3.bf16.msra.mxu0 %v7605_v58  ;;  %v6536_v28 = vpop.f32.mrb[55].mxu1  ;;  %v7664_v22 = vld [vmem:[%s9480_s2] ss:$0 sm:$0xff]  ;;  %v4166_v0 = vrot.slane %v9498_v43, 2 }
 0x16f   : > { %v1706_v19 = vrot.slane %v1688_v61, 4  ;;  %6827 = vmatprep.subr.bf16.mxu0 %v7606_v17  ;;  %v1665_v53 = vadd.f32 %v7664_v22, %v6534_v7  ;;  %v2223_v29 = vrot.slane %v2221_v49, 4  ;;  %v2226_v58 = vrot.slane %v2224_v1, 5  ;;  %v8503_v39 = vld [vmem:[%s9481_s3 + $0x60] sm:$0xff]  }
 0x170   : > { %v1333_v51 = vmax.f32 %v1316_v16, 0.0  ;;  %v8442_v25 = vor.u32 %v3351_v56, %v3348_v33  ;;  %v8447_v30 = vor.u32 %v4166_v0, %v4165_v40  ;;  %v3518_v49 = vrot.slane %v2203_v36, 1  ;;  %v8476_v33 = vld [vmem:[#allocation2 + $0x70] sm:$0xff]  ;;  %v8478_v36 = vld [vmem:[#allocation2 + $0x78] sm:$0xff]  ;;  %v8487_v56 = vld [vmem:[#allocation2 + $0x88] sm:$0xff] }
 0x171   : > { %6804 = vmatmul.mubr.msk.bf16.gmra.mrb[60].mxu0 %vm280_vm1, %v2210_v13  ;;  %v1707_v18 = vsel %vm995_vm3, %v1704_v54, %v1706_v19  ;;  %v1682_v46 = vmax.f32 %v1665_v53, 0.0  ;;  %v2227_v15 = vor.u32 %v2226_v58, %v2223_v29  ;;  %v8460_v54 = vld [vmem:[#allocation2 + $0x68] sm:$0xff]  ;;  %v3522_v1 = vrot.slane %v2212_v14, 1  ;;  %v7607_v14 = vld [vmem:[%s9481_s3 + $0x58] sm:$0xff]  }
 0x172   : > { %v1340_v12 = vpack.c.bf16 %v1333_v51, %v1333_v51  ;;  %6807 = vmatprep.mubr.msk.bf16.mxu0 %vm280_vm1, %v2219_v27  ;;  %1722 = vst.msk [vmem:[#allocation2 + $0xc0] sm:$0xff] %vm280_vm1, %v1707_v18  ;;  %v8454_v34 = vsel %vm3309_vm9, %v8374_v37, %v8442_v25  ;;  %v3520_v37 = vor.u32 %v3519_v63, %v3518_v49  ;;  %v3523_v51 = vrot.slane %v2215_v9, 2  ;;  %v8507_v28 = vld [vmem:[#allocation2 + $0xb8] sm:$0xff] }
 0x173   : > { %v1689_v4 = vpack.c.bf16 %v1682_v46, %v1682_v46  ;;  %v2228_v21 = vsel %vm2166_vm10, %v2218_v2, %v2227_v15  ;;  %v9491_v2 = vrot.slane %v8476_v33, 5  ;;  %v3680_v61 = vrot.slane %v8478_v36, 5 }
 0x174   : > { %1347 = vst.msk [vmem:[#allocation2 + $0x98] sm:$0x3] %vm643_vm5, %v1340_v12  ;;  %v8474_v52 = vsel %vm3501_vm11, %v8199_v10, %v3520_v37  ;;  %v8480_v6 = vor.u32 %v3523_v51, %v3522_v1  ;;  %v3682_v7 = vrot.slane %v8482_v35, 5  ;;  %v8505_v12 = vld [vmem:[#allocation2 + $0xa8] sm:$0xff]  ;;  %v9506_v0 = vshll.u32 %v8478_v36, 16  ;;  %v8552_v51 = vld [vmem:[#allocation2 + $0xa0] sm:$0xff] }
 0x175   : > { %v1708_v16 = vrot.slane %v1689_v4, 4  ;;  %v8512_v40 = vsel %vm3022_vm4, %v9491_v2, %v3680_v61  ;;  %v9504_v13 = vshrl.u32 %v8478_v36, 16  ;;  %v9508_v29 = vshll.u32 %v8476_v33, 16 }
 0x176   : > { %v8493_v9 = vsel %vm3501_vm11, %v3520_v37, %v8480_v6  ;;  %v8519_v53 = vsel %vm3022_vm4, %v3680_v61, %v3682_v7  ;;  %v9501_v27 = vshrl.u32 %v8482_v35, 16  ;;  %v9488_v18 = vrot.slane %v8505_v12, 1 }
 0x177   : > { %v1709_v48 = vsel %vm995_vm3, %v1706_v19, %v1708_v16  ;;  %v9505_v19 = vshrl.u32 %v8476_v33, 16  ;;  %v3825_v46 = vrot.slane %v8416_v24, 1  ;;  %v3827_v4 = vrot.slane %v8507_v28, 1 }
 0x178   : > { %1723 = vst.msk [vmem:[#allocation2 + $0xc8] sm:$0x3f] %vm1023_vm7, %v1709_v48  ;;  %v9503_v15 = vshll.u32 %v8482_v35, 16  ;;  %v9502_v16 = vshll.u32 %v8487_v56, 16  ;;  %v9500_v48 = vshrl.u32 %v8487_v56, 16  ;;  %v3976_v61 = vrot.slane %v9508_v29, 6 }
 0x179   : > { %6808 = vmatmul.mubr.msk.bf16.gmra.mrb[64].mxu0 %vm280_vm1, %v2228_v21  ;;  %v8516_v22 = vld [vmem:[#allocation2 + $0xc0] sm:$0xff]  ;;  %v8536_v21 = vld [vmem:[#allocation2 + $0x98] sm:$0xf0]  ;;  %v8543_v63 = vsel %vm3168_vm6, %v9488_v18, %v3825_v46  ;;  %v8546_v37 = vsel %vm3168_vm6, %v3825_v46, %v3827_v4  ;;  %v3973_v1 = vrot.slane %v9505_v19, 5  ;;  %v3982_v46 = vrot.slane %v9504_v13, 5 }
 0x17a   : > { %6815 = vmatprep.mubr.msk.bf16.mxu0 %vm280_vm1, %v8460_v54  ;;  %v9490_v49 = vrot.slane %v8516_v22, 1  ;;  %v3985_v47 = vrot.slane %v9506_v0, 6  ;;  %v3991_v18 = vrot.slane %v9501_v27, 5  ;;  %v4003_v2 = vrot.slane %v9502_v16, 6 }
 0x17b   : > { %v2506_v50 = vrot.slane %v8552_v51, 4  ;;  %v9507_v11 = vshrl.u32 %v8505_v12, 16  ;;  %v9509_v57 = vshll.u32 %v8505_v12, 16  ;;  %v9511_v45 = vshrl.u32 %v8507_v28, 16 }
 0x17c   : > { %v3986_v23 = vor.u32 %v3985_v47, %v3982_v46  ;;  %v9514_v42 = vshrl.u32 %v8516_v22, 16  ;;  %v9513_v27 = vshll.u32 %v8516_v22, 16  ;;  %v2357_v46 = vld [vmem:[#allocation2 + $0x90] sm:$0x1f] }
 0x17f   : > { %v4147_v13 = vld [vmem:[#allocation2 + $0xc8] sm:$0x7f] }
 0x181   : > { %6816 = vmatmul.mubr.msk.bf16.vlgmr.msra.gmra.mrb[56].mxu0 %vm280_vm1, %v8476_v33 }
 0x182   : > { %6828 = vmatpush3.bf16.msra.mxu0 %v7606_v17  ;;  %6819 = vmatprep.mubr.msk.bf16.mxu0 %vm280_vm1, %v8478_v36  ;;  %v9489_v17 = vrot.slane %v8487_v56, 5 }
 0x183   : > { %6829 = vmatprep.subr.bf16.mxu0 %v7607_v14 }
 0x184   : > { %v8527_v58 = vsel %vm3022_vm4, %v3682_v7, %v9489_v17  ;;  %v2505_v7 = vrot.slane %v8536_v21, 4  ;;  %v8570_v17 = vor.u32 %v3976_v61, %v3973_v1  ;;  %v9512_v1 = vshll.u32 %v8507_v28, 16  ;;  %v8583_v61 = vld [vmem:[#allocation2 + $0xa0] sm:$0xfe] }
 0x186   : > { %6830 = vmatpush3.bf16.msra.mxu0 %v7607_v14  ;;  %v8557_v14 = vsel %vm3168_vm6, %v3827_v4, %v9490_v49  ;;  %v3994_v4 = vrot.slane %v9503_v15, 6  ;;  %v4000_v49 = vrot.slane %v9500_v48, 5  ;;  %v8590_v48 = vsel %vm3309_vm9, %v8570_v17, %v3986_v23 }
 0x187   : > { %6843 = vmatprep.subr.bf16.mxu0 %v8503_v39  ;;  %v4169_v15 = vrot.slane %v9511_v45, 1  ;;  %v4178_v45 = vshrl.u32 %v4147_v13, 16 }
 0x188   : > { %v3995_v44 = vor.u32 %v3994_v4, %v3991_v18  ;;  %v8585_v43 = vor.u32 %v4003_v2, %v4000_v49  ;;  %v4154_v18 = vshrl.u32 %v8583_v61, 16  ;;  %v4157_v2 = vshll.u32 %v8583_v61, 16 }
 0x189   : > { %6820 = vmatmul.mubr.msk.bf16.gmra.mrb[60].mxu0 %vm280_vm1, %v8482_v35  ;;  %v4161_v49 = vrot.slane %v9507_v11, 1  ;;  %v2507_v4 = vsel %vm995_vm3, %v2505_v7, %v2506_v50  ;;  %v4173_v11 = vrot.slane %v9514_v42, 1  ;;  %v4174_v7 = vrot.slane %v9513_v27, 2 }
 0x18a   : > { %6823 = vmatprep.mubr.msk.bf16.mxu0 %vm280_vm1, %v8487_v56  ;;  %9515 = vst [vmem:[#allocation4_spill] sm:$0xff] %v8585_v43  ;;  %v8594_v16 = vsel %vm3309_vm9, %v3986_v23, %v3995_v44  ;;  %v8598_v47 = vsel %vm3309_vm9, %v3995_v44, %v8585_v43  ;;  %v4162_v23 = vrot.slane %v9509_v57, 2  ;;  %v4170_v44 = vrot.slane %v9512_v1, 2 }
 0x18b   : > { %9516 = vst [vmem:[#allocation5_spill] sm:$0xff] %v8598_v47  ;;  %v4156_v19 = vrot.slane %v4154_v18, 1  ;;  %v4159_v0 = vrot.slane %v4157_v2, 2  ;;  %v2508_v57 = vrot.slane %v8505_v12, 4  ;;  %v4181_v47 = vshll.u32 %v4147_v13, 16 }
 0x18c   : > { %v4171_v29 = vor.u32 %v4170_v44, %v4169_v15  ;;  %v2510_v1 = vrot.slane %v8416_v24, 4  ;;  %v4175_v2 = vor.u32 %v4174_v7, %v4173_v11  ;;  %v2492_v7 = vld [vmem:[#allocation2 + $0xc8] sm:$0x1]  ;;  %v9526_v42 = vshll.u32 %v8505_v12, 16 }
 0x18d   : > { %v4160_v43 = vor.u32 %v4159_v0, %v4156_v19  ;;  %v7609_v19 = vld [vmem:[%s9481_s3 + $0x68] sm:$0xff]   ;;  %v2509_v13 = vsel %vm995_vm3, %v2506_v50, %v2508_v57  ;;  %v2512_v50 = vrot.slane %v8507_v28, 4 }
 0x18e   : > { %v8625_v18 = vsel %vm3501_vm11, %v8447_v30, %v4171_v29  ;;  %v8634_v0 = vsel %vm3501_vm11, %v4171_v29, %v4175_v2  ;;  %v2511_v11 = vsel %vm995_vm3, %v2508_v57, %v2510_v1  ;;  %v2514_v29 = vrot.slane %v8516_v22, 4 }
 0x18f   : > { %v2513_v57 = vsel %vm995_vm3, %v2510_v1, %v2512_v50 }
 0x191   : > { %6824 = vmatmul.mubr.msk.bf16.gmra.mrb[64].mxu0 %vm280_vm1, %v2357_v46  ;;  %v4163_v46 = vor.u32 %v4162_v23, %v4161_v49  ;;  %v4180_v49 = vrot.slane %v4178_v45, 1  ;;  %v4183_v23 = vrot.slane %v4181_v47, 2 }
 0x192   : > { %6831 = vmatprep.mubr.msk.bf16.mxu0 %vm280_vm1, %v2507_v4 }
 0x193   : > { %v8621_v4 = vsel %vm3501_vm11, %v4163_v46, %v8447_v30  ;;  %v8628_v15 = vsel %vm3501_vm11, %v4160_v43, %v4163_v46  ;;  %v8637_v44 = vor.u32 %v4183_v23, %v4180_v49  ;;  %v7610_v43 = vld [vmem:[%s9481_s3 + $0x70] sm:$0xff]   ;;  %v2649_v30 = vshll.u32 %v8460_v54, 16 }
 0x194   : > { %v2515_v46 = vsel %vm995_vm3, %v2512_v50, %v2514_v29  ;;  %v9517_v23 = vshll.u32 %v8476_v33, 16  ;;  %v9519_v50 = vshrl.u32 %v8476_v33, 16 }
 0x195   : > { %v8645_v45 = vsel %vm3501_vm11, %v4175_v2, %v8637_v44  ;;  %v2651_v47 = vrot.slane %v2649_v30, 1  ;;  %v2516_v2 = vrot.slane %v2492_v7, 4  ;;  %v2641_v7 = vld [vmem:[#allocation2 + $0x90] sm:$0x3f] }
 0x199   : > { %6832 = vmatmul.mubr.msk.bf16.vlgmr.msra.gmra.mrb[56].mxu0 %vm280_vm1, %v2509_v13  ;;  %v2655_v13 = vrot.slane %v9517_v23, 1  ;;  %v2682_v23 = vshll.u32 %v2641_v7, 16 }
 0x19a   : > { %6844 = vmatpush3.bf16.msra.mxu0 %v8503_v39  ;;  %6835 = vmatprep.mubr.msk.bf16.mxu0 %vm280_vm1, %v2511_v11  ;;  %v2647_v39 = vshrl.u32 %v8460_v54, 16  ;;  %v9518_v54 = vshll.u32 %v8478_v36, 16 }
 0x19b   : > { %6845 = vmatprep.subr.bf16.mxu0 %v7609_v19  ;;  %v2659_v30 = vor.u32 %v9519_v50, %v2655_v13  ;;  %v2822_v50 = vshll.u32 %v8536_v21, 16 }
 0x19c   : > { %v2652_v49 = vor.u32 %v2651_v47, %v2647_v39  ;;  %v2662_v11 = vrot.slane %v9518_v54, 1  ;;  %v9521_v47 = vshll.u32 %v8482_v35, 16 }
 0x19e   : > { %6846 = vmatpush3.bf16.msra.mxu0 %v7609_v19  ;;  %v2517_v19 = vsel %vm995_vm3, %v2514_v29, %v2516_v2  ;;  %v2656_v1 = vsel %vm1994_vm8, %v2652_v49, %v2655_v13  ;;  %v7611_v29 = vld [vmem:[%s9481_s3 + $0x78] sm:$0xff]   ;;  %v2663_v2 = vsel %vm1994_vm8, %v2659_v30, %v2662_v11  ;;  %v9524_v30 = vshrl.u32 %v8487_v56, 16 }
 0x19f   : > { %6859 = vmatprep.subr.bf16.mxu0 %v7610_v43  ;;  %vm5766_vm3 = vcmask 518144  }
 0x1a1   : > { %6836 = vmatmul.mubr.msk.bf16.gmra.mrb[60].mxu0 %vm280_vm1, %v2513_v57  ;;  %v9520_v57 = vshrl.u32 %v8478_v36, 16  ;;  %v9522_v36 = vshll.u32 %v8487_v56, 16 }
 0x1a2   : > { %6839 = vmatprep.mubr.msk.bf16.mxu0 %vm280_vm1, %v2515_v46  ;;  %v2669_v46 = vrot.slane %v9521_v47, 1  ;;  %v2830_v47 = vshll.u32 %v8552_v51, 16 }
 0x1a3   : > { %v2666_v39 = vor.u32 %v9520_v57, %v2662_v11  ;;  %v2676_v13 = vrot.slane %v9522_v36, 1  ;;  %v2819_v11 = vshrl.u32 %v8536_v21, 16  ;;  %v2684_v57 = vrot.slane %v2682_v23, 1 }
 0x1a4   : > { %v2832_v21 = vrot.slane %v2830_v47, 5  ;;  %v7613_v47 = vld [vmem:[%s9481_s3 + $0x88] sm:$0xff]  }
 0x1a5   : > { %v2670_v49 = vsel %vm1994_vm8, %v2666_v39, %v2669_v46  ;;  %v2827_v39 = vshrl.u32 %v8552_v51, 16  ;;  %v9525_v51 = vshrl.u32 %v8505_v12, 16 }
 0x1a7   : > { %v2829_v36 = vrot.slane %v2827_v39, 4 }
 0x1a9   : > { %6840 = vmatmul.mubr.msk.bf16.gmra.mrb[64].mxu0 %vm280_vm1, %v2517_v19  ;;  %v7612_v19 = vld [vmem:[%s9481_s3 + $0x80] sm:$0xff]  }
 0x1aa   : > { %6847 = vmatprep.mubr.msk.bf16.mxu0 %vm280_vm1, %v2656_v1  ;;  %v9523_v1 = vshrl.u32 %v8482_v35, 16 }
 0x1ac   : > { %v2673_v54 = vor.u32 %v9523_v1, %v2669_v46  ;;  %v2824_v46 = vrot.slane %v2822_v50, 5  ;;  %v2686_v1 = vshrl.u32 %v2641_v7, 16 }
 0x1ae   : > { %v2688_v27 = vor.u32 %v2686_v1, %v2684_v57 }
 0x1b1   : > { %6848 = vmatmul.mubr.msk.bf16.vlgmr.msra.gmra.mrb[56].mxu0 %vm280_vm1, %v2663_v2  ;;  %v2677_v2 = vsel %vm1994_vm8, %v2673_v54, %v2676_v13 }
 0x1b2   : > { %6860 = vmatpush3.bf16.msra.mxu0 %v7610_v43  ;;  %6851 = vmatprep.mubr.msk.bf16.mxu0 %vm280_vm1, %v2670_v49  ;;  %v2680_v43 = vor.u32 %v9524_v30, %v2676_v13  ;;  %v2821_v49 = vrot.slane %v2819_v11, 4  ;;  %v2833_v30 = vor.u32 %v2832_v21, %v2829_v36  ;;  %v2841_v13 = vrot.slane %v9526_v42, 5 }
 0x1b3   : > { %6861 = vmatprep.subr.bf16.mxu0 %v7611_v29  ;;  %v9527_v11 = vshrl.u32 %v8416_v24, 16  ;;  %v9532_v21 = vshll.u32 %v8516_v22, 16 }
 0x1b4   : > { %v2685_v35 = vsel %vm1994_vm8, %v2680_v43, %v2684_v57  ;;  %v2825_v23 = vor.u32 %v2824_v46, %v2821_v49  ;;  %v9528_v43 = vshll.u32 %v8416_v24, 16  ;;  %v9530_v49 = vshll.u32 %v8507_v28, 16 }
 0x1b5   : > { %v2847_v50 = vrot.slane %v9527_v11, 4  ;;  %v9531_v46 = vshrl.u32 %v8516_v22, 16  ;;  %v2868_v1 = vrot.slane %v9532_v21, 5 }
 0x1b6   : > { %6862 = vmatpush3.bf16.msra.mxu0 %v7611_v29  ;;  %v2838_v29 = vrot.slane %v9525_v51, 4  ;;  %v2834_v54 = vsel %vm2166_vm10, %v2825_v23, %v2833_v30  ;;  %v2850_v39 = vrot.slane %v9528_v43, 5  ;;  %v2812_v23 = vld [vmem:[#allocation2 + $0xc8] sm:$0x3]  ;;  %v3003_v43 = vld [vmem:[#allocation2] sm:$0xe0] }
 0x1b7   : > { %6875 = vmatprep.subr.bf16.mxu0 %v7612_v19  ;;  %v2865_v36 = vrot.slane %v9531_v46, 4  ;;  %v2872_v51 = vshrl.u32 %v2812_v23, 16  ;;  %v3159_v46 = vld [vmem:[#allocation2 + $0x38] sm:$0xfe] }
 0x1b8   : > { %v2842_v7 = vor.u32 %v2841_v13, %v2838_v29  ;;  %v2851_v57 = vor.u32 %v2850_v39, %v2847_v50  ;;  %v2875_v29 = vshll.u32 %v2812_v23, 16 }
 0x1b9   : > { %6852 = vmatmul.mubr.msk.bf16.gmra.mrb[60].mxu0 %vm280_vm1, %v2677_v2  ;;  %v2869_v13 = vor.u32 %v2868_v1, %v2865_v36  ;;  %v2874_v11 = vrot.slane %v2872_v51, 4  ;;  %v3169_v36 = vrot.slane %v3159_v46, 1  ;;  %v9535_v1 = vrot.slane %v8133_v60, 1 }
 0x1ba   : > { %6855 = vmatprep.mubr.msk.bf16.mxu0 %vm280_vm1, %v2685_v35  ;;  %v2843_v42 = vsel %vm2166_vm10, %v2833_v30, %v2842_v7  ;;  %v2859_v35 = vrot.slane %v9530_v49, 5  ;;  %v2852_v24 = vsel %vm2166_vm10, %v2842_v7, %v2851_v57  ;;  %v2877_v50 = vrot.slane %v2875_v29, 5 }
 0x1bb   : > { %v3023_v7 = vrot.slane %v3003_v43, 5  ;;  %v3171_v23 = vsel %vm3168_vm6, %v3169_v36, %v9535_v1  ;;  %v3311_v51 = vshrl.u32 %v3003_v43, 16  ;;  %v3314_v29 = vshll.u32 %v3003_v43, 16 }
 0x1bc   : > { %v2878_v39 = vor.u32 %v2877_v50, %v2874_v11 }
 0x1c1   : > { %6856 = vmatmul.mubr.msk.bf16.gmra.mrb[64].mxu0 %vm280_vm1, %v2688_v27  ;;  %v9529_v27 = vshrl.u32 %v8507_v28, 16  ;;  %v7614_v28 = vld [vmem:[%s9481_s3 + $0x90] sm:$0xff]  }
 0x1c2   : > { %6863 = vmatprep.mubr.msk.bf16.mxu0 %vm280_vm1, %v2834_v54 }
 0x1c3   : > { %v2856_v2 = vrot.slane %v9529_v27, 4 }
 0x1c5   : > { %v2860_v30 = vor.u32 %v2859_v35, %v2856_v2  ;;  %v3008_v2 = vld [vmem:[#allocation2 + $0x28] sm:$0xff]  ;;  %v9534_v35 = vrot.slane %v8167_v31, 5 }
 0x1c6   : > { %v3032_v49 = vrot.slane %v3008_v2, 5  ;;  %v7617_v31 = vld [vmem:[%s9481_s3 + $0xa8] sm:$0xff]   ;;  %v3358_v43 = vshll.u32 %v3008_v2, 16 }
 0x1c7   : > { %v2861_v54 = vsel %vm2166_vm10, %v2851_v57, %v2860_v30  ;;  %v7615_v57 = vld [vmem:[%s9481_s3 + $0x98] sm:$0xff]  }
 0x1c9   : > { %6864 = vmatmul.mubr.msk.bf16.vlgmr.msra.gmra.mrb[56].mxu0 %vm280_vm1, %v2843_v42  ;;  %v2879_v42 = vsel %vm2166_vm10, %v2869_v13, %v2878_v39 }
 0x1ca   : > { %6876 = vmatpush3.bf16.msra.mxu0 %v7612_v19  ;;  %6867 = vmatprep.mubr.msk.bf16.mxu0 %vm280_vm1, %v2852_v24  ;;  %v2870_v19 = vsel %vm2166_vm10, %v2860_v30, %v2869_v13  ;;  %v3009_v24 = vld [vmem:[#allocation2 + $0x30] sm:$0x3] }
 0x1cb   : > { %6877 = vmatprep.subr.bf16.mxu0 %v7613_v47 }
 0x1ce   : > { %6878 = vmatpush3.bf16.msra.mxu0 %v7613_v47  ;;  %v9533_v47 = vrot.slane %v8116_v32, 5  ;;  %v7616_v32 = vld [vmem:[%s9481_s3 + $0xa0] sm:$0xff]  }
 0x1cf   : > { %6891 = vmatprep.subr.bf16.mxu0 %v7614_v28 }
 0x1d0   : > { %v3025_v27 = vsel %vm3022_vm4, %v3023_v7, %v9533_v47  ;;  %v3303_v47 = vld [vmem:[#allocation2 + $0x30] sm:$0x7] }
 0x1d1   : > { %6868 = vmatmul.mubr.msk.bf16.gmra.mrb[60].mxu0 %vm280_vm1, %v2861_v54  ;;  %v3313_v54 = vrot.slane %v3311_v51, 5 }
 0x1d2   : > { %6871 = vmatprep.mubr.msk.bf16.mxu0 %vm280_vm1, %v2870_v19  ;;  %v3355_v19 = vshrl.u32 %v3008_v2, 16  ;;  %v3364_v2 = vshrl.u32 %v3303_v47, 16 }
 0x1d4   : > { %v3357_v7 = vrot.slane %v3355_v19, 5 }
 0x1d9   : > { %6872 = vmatmul.mubr.msk.bf16.gmra.mrb[64].mxu0 %vm280_vm1, %v2879_v42  ;;  %v3360_v42 = vrot.slane %v3358_v43, 6  ;;  %v7622_v43 = vld [vmem:[%s9481_s3 + $0xd0] sm:$0xff]  }
 0x1da   : > { %6879 = vmatprep.mubr.msk.bf16.mxu0 %vm280_vm1, %v3025_v27 }
 0x1e1   : > { %6880 = vmatmul.mubr.msk.bf16.vlgmr.msra.gmra.mrb[56].mxu0 %vm280_vm1, %v8129_v55  ;;  %v3033_v55 = vsel %vm3022_vm4, %v9534_v35, %v3032_v49  ;;  %v3506_v35 = vshll.u32 %v3159_v46, 16 }
 0x1e2   : > { %6892 = vmatpush3.bf16.msra.mxu0 %v7614_v28  ;;  %6883 = vmatprep.mubr.msk.bf16.mxu0 %vm280_vm1, %v8161_v26  ;;  %v3034_v26 = vrot.slane %v3009_v24, 5  ;;  %v7618_v28 = vld [vmem:[%s9481_s3 + $0xb0] sm:$0xff]  }
 0x1e3   : > { %6893 = vmatprep.subr.bf16.mxu0 %v7615_v57 }
 0x1e4   : > { %v3035_v21 = vsel %vm3022_vm4, %v3032_v49, %v3034_v26  ;;  %v3361_v49 = vor.u32 %v3360_v42, %v3357_v7  ;;  %v9537_v26 = vshrl.u32 %v8133_v60, 16  ;;  %v3658_v7 = vld [vmem:[#allocation2 + $0x68] sm:$0xe0] }
 0x1e5   : > { %v3677_v42 = vrot.slane %v3658_v7, 5 }
 0x1e6   : > { %6894 = vmatpush3.bf16.msra.mxu0 %v7615_v57  ;;  %v7620_v57 = vld [vmem:[%s9481_s3 + $0xc0] sm:$0xff]   ;;  %v3510_v36 = vrot.slane %v9537_v26, 1 }
 0x1e7   : > { %6907 = vmatprep.subr.bf16.mxu0 %v7616_v32 }
 0x1e9   : > { %6884 = vmatmul.mubr.msk.bf16.gmra.mrb[60].mxu0 %vm280_vm1, %v8192_v3  ;;  %v3160_v3 = vld [vmem:[#allocation2 + $0x60] sm:$0x3f] }
 0x1ea   : > { %6887 = vmatprep.mubr.msk.bf16.mxu0 %vm280_vm1, %v3033_v55  ;;  %v3178_v30 = vrot.slane %v3160_v3, 1  ;;  %v3366_v55 = vrot.slane %v3364_v2, 5  ;;  %v9540_v2 = vrot.slane %v8487_v56, 5  ;;  %v7625_v56 = vld [vmem:[%s9481_s3 + $0xe8] sm:$0xff]  }
 0x1f1   : > { %6888 = vmatmul.mubr.msk.bf16.gmra.mrb[64].mxu0 %vm280_vm1, %v3035_v21  ;;  %v9538_v21 = vshll.u32 %v8133_v60, 16 }
 0x1f2   : > { %6895 = vmatprep.mubr.msk.bf16.mxu0 %vm280_vm1, %v3171_v23 }
 0x1f3   : > { %v3511_v1 = vrot.slane %v9538_v21, 2 }
 0x1f5   : > { %v3512_v3 = vor.u32 %v3511_v1, %v3510_v36 }
 0x1f9   : > { %6896 = vmatmul.mubr.msk.bf16.vlgmr.msra.gmra.mrb[56].mxu0 %vm280_vm1, %v8222_v41  ;;  %v9536_v41 = vrot.slane %v8234_v59, 1  ;;  %v7619_v59 = vld [vmem:[%s9481_s3 + $0xb8] sm:$0xff]  }
 0x1fa   : > { %6908 = vmatpush3.bf16.msra.mxu0 %v7616_v32  ;;  %6899 = vmatprep.mubr.msk.bf16.mxu0 %vm280_vm1, %v8253_v20  ;;  %v3316_v20 = vrot.slane %v3314_v29, 6  ;;  %v3367_v32 = vshll.u32 %v3303_v47, 16 }
 0x1fb   : > { %6909 = vmatprep.subr.bf16.mxu0 %v7617_v31  ;;  %v3179_v13 = vsel %vm3168_vm6, %v9536_v41, %v3178_v30  ;;  %v3495_v41 = vld [vmem:[#allocation2 + $0x60] sm:$0x7f] }
 0x1fc   : > { %v3317_v11 = vor.u32 %v3316_v20, %v3313_v54  ;;  %v3369_v24 = vrot.slane %v3367_v32, 6  ;;  %v3530_v54 = vshll.u32 %v3495_v41, 16  ;;  %v7621_v20 = vld [vmem:[%s9481_s3 + $0xc8] sm:$0xff]   ;;  %v3664_v32 = vld [vmem:[#allocation2 + $0x98] sm:$0x3] }
 0x1fe   : > { %6910 = vmatpush3.bf16.msra.mxu0 %v7617_v31  ;;  %v3326_v50 = vsel %vm3309_vm9, %v3317_v11, %v8340_v62  ;;  %v3508_v31 = vrot.slane %v3506_v35, 2  ;;  %v3517_v11 = vsel %vm3501_vm11, %v3512_v3, %v8199_v10  ;;  %v3532_v19 = vrot.slane %v3530_v54, 2  ;;  %v9544_v54 = vld [vmem:[#allocation4_spill] sm:$0xff] }
 0x1ff   : > { %6923 = vmatprep.subr.bf16.mxu0 %v7618_v28  ;;  %v9541_v35 = vrot.slane %v8505_v12, 1  ;;  %v7626_v12 = vld [vmem:[%s9481_s3 + $0xf0] sm:$0xff]  }
 0x201   : > { %6900 = vmatmul.mubr.msk.bf16.gmra.mrb[60].mxu0 %vm280_vm1, %v8288_v5 }
 0x202   : > { %6903 = vmatprep.mubr.msk.bf16.mxu0 %vm280_vm1, %v3179_v13  ;;  %v3527_v13 = vshrl.u32 %v3495_v41, 16 }
 0x209   : > { %6904 = vmatmul.mubr.msk.bf16.gmra.mrb[64].mxu0 %vm280_vm1, %v3178_v30 }
 0x20a   : > { %6911 = vmatprep.mubr.msk.bf16.mxu0 %vm280_vm1, %v3326_v50  ;;  %v3529_v50 = vrot.slane %v3527_v13, 1  ;;  %v9543_v13 = vld [vmem:[#allocation5_spill] sm:$0xff] }
 0x210   : > { %v8780_v5 = vpop.f32.mrb[56].mxu1 }
 0x211   : > { %v8782_v39 = vpop.f32.mrb[57].mxu1  ;;  %6912 = vmatmul.mubr.msk.bf16.vlgmr.msra.gmra.mrb[56].mxu0 %vm280_vm1, %v8348_v8  ;;  %v3503_v8 = vshrl.u32 %v3159_v46, 16  ;;  %v3370_v46 = vor.u32 %v3369_v24, %v3366_v55  ;;  %v3963_v24 = vshrl.u32 %v3658_v7, 16 }
 0x212   : > { %6924 = vmatpush3.bf16.msra.mxu0 %v7618_v28  ;;  %v8786_v62 = vpop.f32.mrb[58].mxu1  ;;  %6915 = vmatprep.mubr.msk.bf16.mxu0 %vm280_vm1, %v8383_v38  ;;  %v3362_v38 = vsel %vm3309_vm9, %v8442_v25, %v3361_v49 }
 0x213   : > { %v8790_v27 = vpop.f32.mrb[59].mxu1  ;;  %6925 = vmatprep.subr.bf16.mxu0 %v7619_v59  ;;  %v3505_v23 = vrot.slane %v3503_v8, 1  ;;  %v3965_v36 = vrot.slane %v3963_v24, 5 }
 0x215   : > { %v3509_v30 = vor.u32 %v3508_v31, %v3505_v23 }
 0x216   : > { %6926 = vmatpush3.bf16.msra.mxu0 %v7619_v59  ;;  %v3533_v59 = vor.u32 %v3532_v19, %v3529_v50 }
 0x217   : > { %6939 = vmatprep.subr.bf16.mxu0 %v7620_v57  ;;  %v3513_v60 = vsel %vm3501_vm11, %v3509_v30, %v3512_v3  ;;  %v3956_v3 = vld [vmem:[#allocation2 + $0x98] sm:$0x7] }
 0x218   : > { %v3534_v10 = vsel %vm3501_vm11, %v8480_v6, %v3533_v59  ;;  %v3663_v6 = vld [vmem:[#allocation2 + $0x90] sm:$0xff]  ;;  %v4019_v30 = vshll.u32 %v3956_v3, 16 }
 0x219   : > { %6916 = vmatmul.mubr.msk.bf16.gmra.mrb[60].mxu0 %vm280_vm1, %v8454_v34  ;;  %v3371_v34 = vsel %vm3309_vm9, %v3361_v49, %v3370_v46  ;;  %v3822_v49 = vrot.slane %v8583_v61, 1  ;;  %v4007_v23 = vshrl.u32 %v3663_v6, 16  ;;  %v4010_v31 = vshll.u32 %v3663_v6, 16 }
 0x21a   : > { %6919 = vmatprep.mubr.msk.bf16.mxu0 %vm280_vm1, %v3362_v38  ;;  %v3966_v38 = vshll.u32 %v3658_v7, 16  ;;  %v4021_v41 = vrot.slane %v4019_v30, 6 }
 0x21b   : > { %v3824_v55 = vsel %vm3168_vm6, %v3822_v49, %v9541_v35  ;;  %v4012_v46 = vrot.slane %v4010_v31, 6 }
 0x21e   : > { %v8804_v28 = vpop.f32.mrb[60].mxu1 }
 0x21f   : > { %v8806_v51 = vpop.f32.mrb[61].mxu1 }
 0x220   : > { %v8809_v25 = vpop.f32.mrb[62].mxu1 }
 0x221   : > { %6920 = vmatmul.mubr.msk.bf16.gmra.mrb[64].mxu0 %vm280_vm1, %v3371_v34  ;;  %v8813_v29 = vpop.f32.mrb[63].mxu1 }
 0x222   : > { %6927 = vmatprep.mubr.msk.bf16.mxu0 %vm280_vm1, %v3513_v60 }
 0x229   : > { %6928 = vmatmul.mubr.msk.bf16.vlgmr.msra.gmra.mrb[56].mxu0 %vm280_vm1, %v3517_v11 }
 0x22a   : > { %6940 = vmatpush3.bf16.msra.mxu0 %v7620_v57  ;;  %6931 = vmatprep.mubr.msk.bf16.mxu0 %vm280_vm1, %v8474_v52  ;;  %v9539_v52 = vrot.slane %v8476_v33, 5  ;;  %v7623_v57 = vld [vmem:[%s9481_s3 + $0xd8] sm:$0xff]   ;;  %v7624_v33 = vld [vmem:[%s9481_s3 + $0xe0] sm:$0xff]  }
 0x22b   : > { %6941 = vmatprep.subr.bf16.mxu0 %v7621_v20 }
 0x22c   : > { %v3679_v47 = vsel %vm3022_vm4, %v3677_v42, %v9539_v52 }
 0x22e   : > { %6942 = vmatpush3.bf16.msra.mxu0 %v7621_v20 }
 0x22f   : > { %6955 = vmatprep.subr.bf16.mxu0 %v7622_v43 }
 0x231   : > { %6932 = vmatmul.mubr.msk.bf16.gmra.mrb[60].mxu0 %vm280_vm1, %v8493_v9  ;;  %v3686_v9 = vrot.slane %v3663_v6, 5 }
 0x232   : > { %6935 = vmatprep.mubr.msk.bf16.mxu0 %vm280_vm1, %v3534_v10 }
 0x239   : > { %6936 = vmatmul.mubr.msk.bf16.gmra.mrb[64].mxu0 %vm280_vm1, %v3533_v59 }
 0x23a   : > { %6943 = vmatprep.mubr.msk.bf16.mxu0 %vm280_vm1, %v3679_v47 }
 0x241   : > { %6944 = vmatmul.mubr.msk.bf16.vlgmr.msra.gmra.mrb[56].mxu0 %vm280_vm1, %v8512_v40  ;;  %v3687_v40 = vsel %vm3022_vm4, %v9540_v2, %v3686_v9 }
 0x242   : > { %6956 = vmatpush3.bf16.msra.mxu0 %v7622_v43  ;;  %6947 = vmatprep.mubr.msk.bf16.mxu0 %vm280_vm1, %v8519_v53  ;;  %v3688_v53 = vrot.slane %v3664_v32, 5 }
 0x243   : > { %6957 = vmatprep.subr.bf16.mxu0 %v7623_v57 }
 0x244   : > { %v3689_v8 = vsel %vm3022_vm4, %v3686_v9, %v3688_v53 }
 0x246   : > { %6958 = vmatpush3.bf16.msra.mxu0 %v7623_v57 }
 0x247   : > { %6971 = vmatprep.subr.bf16.mxu0 %v7624_v33 }
 0x249   : > { %6948 = vmatmul.mubr.msk.bf16.gmra.mrb[60].mxu0 %vm280_vm1, %v8527_v58  ;;  %v3814_v58 = vld [vmem:[#allocation2 + $0xc8] sm:$0x3f] }
 0x24a   : > { %6951 = vmatprep.mubr.msk.bf16.mxu0 %vm280_vm1, %v3687_v40  ;;  %v3831_v61 = vrot.slane %v3814_v58, 1 }
 0x251   : > { %6952 = vmatmul.mubr.msk.bf16.gmra.mrb[64].mxu0 %vm280_vm1, %v3689_v8 }
 0x252   : > { %6959 = vmatprep.mubr.msk.bf16.mxu0 %vm280_vm1, %v3824_v55 }
 0x259   : > { %6960 = vmatmul.mubr.msk.bf16.vlgmr.msra.gmra.mrb[56].mxu0 %vm280_vm1, %v8543_v63  ;;  %v9542_v63 = vrot.slane %v8516_v22, 1  ;;  %v7627_v22 = vld [vmem:[%s9481_s3 + $0xf8] sm:$0xff]  }
 0x25a   : > { %6972 = vmatpush3.bf16.msra.mxu0 %v7624_v33  ;;  %6963 = vmatprep.mubr.msk.bf16.mxu0 %vm280_vm1, %v8546_v37  ;;  %v3968_v37 = vrot.slane %v3966_v38, 6 }
 0x25b   : > { %6973 = vmatprep.subr.bf16.mxu0 %v7625_v56  ;;  %v3832_v26 = vsel %vm3168_vm6, %v9542_v63, %v3831_v61 }
 0x25c   : > { %v3969_v21 = vor.u32 %v3968_v37, %v3965_v36 }
 0x25e   : > { %6974 = vmatpush3.bf16.msra.mxu0 %v7625_v56  ;;  %v3978_v1 = vsel %vm3309_vm9, %v3969_v21, %v8570_v17  ;;  %v4016_v17 = vshrl.u32 %v3956_v3, 16 }
 0x25f   : > { %6987 = vmatprep.subr.bf16.mxu0 %v7626_v12 }
 0x260   : > { %v4018_v60 = vrot.slane %v4016_v17, 5 }
 0x261   : > { %6964 = vmatmul.mubr.msk.bf16.gmra.mrb[60].mxu0 %vm280_vm1, %v8557_v14  ;;  %v4009_v14 = vrot.slane %v4007_v23, 5 }
 0x262   : > { %6967 = vmatprep.mubr.msk.bf16.mxu0 %vm280_vm1, %v3832_v26  ;;  %v4022_v20 = vor.u32 %v4021_v41, %v4018_v60 }
 0x263   : > { %v4013_v34 = vor.u32 %v4012_v46, %v4009_v14 }
 0x265   : > { %v4023_v11 = vsel %vm3309_vm9, %v4013_v34, %v4022_v20  ;;  %v7632_v20 = vld [vmem:[%s9483_s5] sm:$0xff]  }
 0x269   : > { %6968 = vmatmul.mubr.msk.bf16.gmra.mrb[64].mxu0 %vm280_vm1, %v3831_v61 }
 0x26a   : > { %6975 = vmatprep.mubr.msk.bf16.mxu0 %vm280_vm1, %v3978_v1 }
 0x271   : > { %6976 = vmatmul.mubr.msk.bf16.vlgmr.msra.gmra.mrb[56].mxu0 %vm280_vm1, %v8590_v48  ;;  %v4014_v48 = vsel %vm3309_vm9, %v9544_v54, %v4013_v34 }
 0x272   : > { %6988 = vmatpush3.bf16.msra.mxu0 %v7626_v12  ;;  %6979 = vmatprep.mubr.msk.bf16.mxu0 %vm280_vm1, %v8594_v16  ;;  %v9545_v16 = vmov 0  }
 0x273   : > { %6989 = vmatprep.subr.bf16.mxu0 %v7627_v22  ;;  %309 = vst.msk [vmem:[#allocation3 + $0x8] sm:$0xff] %vm307_vm12, %v9545_v16  ;;  %308 = vst.msk [vmem:[#allocation3] sm:$0xff] %vm307_vm12, %v9545_v16 }
 0x274   : > { %310 = vst.msk [vmem:[#allocation3 + $0x10] sm:$0xff] %vm307_vm12, %v9545_v16  ;;  %311 = vst.msk [vmem:[#allocation3 + $0x18] sm:$0xff] %vm307_vm12, %v9545_v16 }
 0x275   : > { %312 = vst.msk [vmem:[#allocation3 + $0x20] sm:$0xff] %vm307_vm12, %v9545_v16  ;;  %313 = vst.msk [vmem:[#allocation3 + $0x28] sm:$0xff] %vm307_vm12, %v9545_v16 }
 0x276   : > { %6990 = vmatpush3.bf16.msra.mxu0 %v7627_v22 }
 0x279   : > { %6980 = vmatmul.mubr.msk.bf16.gmra.mrb[60].mxu0 %vm280_vm1, %v9543_v13 }
 0x27a   : > { %6983 = vmatprep.mubr.msk.bf16.mxu0 %vm280_vm1, %v4014_v48 }
 0x281   : > { %6984 = vmatmul.mubr.msk.bf16.gmra.mrb[64].mxu0 %vm280_vm1, %v4023_v11 }
 0x282   : > { %6991 = vmatprep.mubr.msk.bf16.mxu0 %vm280_vm1, %v8628_v15  ;;  %v7629_v15 = vld [vmem:[%s9483_s5 + $0x28] sm:$0xff]  }
 0x289   : > { %6992 = vmatmul.mubr.msk.bf16.vlgmr.msra.gmra.mrb[56].mxu0 %vm280_vm1, %v8621_v4  ;;  %v7674_v4 = vmov 0.0  }
 0x28a   : > { %6995 = vmatprep.mubr.msk.bf16.mxu0 %vm280_vm1, %v8625_v18  ;;  %7003 = vmatprep.subr.bf16.mxu1 %v7674_v4  ;;  %v7628_v18 = vld [vmem:[%s9483_s5 + $0x20] sm:$0xff]  }
 0x28b   : > { %7004 = vmatpush3.bf16.msra.mxu1 %v7628_v18  ;;  %7011 = vmatprep.mubr.msk.bf16.mxu1 %vm7675_vm13, %v7674_v4 }
 0x28c   : > { %7005 = vmatprep.subr.bf16.mxu1 %v7674_v4 }
 0x28f   : > { %7006 = vmatpush3.bf16.msra.mxu1 %v7629_v15 }
 0x290   : > { %7007 = vmatprep.subr.bf16.mxu1 %v7674_v4 }
 0x291   : > { %6996 = vmatmul.mubr.msk.bf16.gmra.mrb[60].mxu0 %vm280_vm1, %v8634_v0  ;;  %v7630_v0 = vld [vmem:[%s9483_s5 + $0x30] sm:$0xff]  }
 0x292   : > { %6999 = vmatprep.mubr.msk.bf16.mxu0 %vm280_vm1, %v8645_v45  ;;  %v6139_v45 = vld [vmem:[%s9482_s4] ss:$0 sm:$0xff] }
 0x293   : > { %7008 = vmatpush3.bf16.msra.mxu1 %v7630_v0 }
 0x294   : > { %7009 = vmatprep.subr.bf16.mxu1 %v7674_v4 }
 0x299   : > { %7000 = vmatmul.mubr.msk.bf16.gmra.mrb[64].mxu0 %vm280_vm1, %v8637_v44  ;;  %v7631_v44 = vld [vmem:[%s9483_s5 + $0x38] sm:$0xff]   ;;  %vm5403_vm1 = vsmask.f32 5376 }
 0x29a   : > { %7010 = vmatpush3.bf16.msra.mxu1 %v7631_v44 }
 0x29b   : > { %7031 = vmatprep.subr.bf16.mxu1 %v7674_v4 }
 0x35c   : > { %v6993_v50 = vpop.f32.mrb[56].mxu0 }
 0x35d   : > { %v4318_v19 = vadd.f32 %v6993_v50, %v6139_v45  ;;  %v4250_v43 = vpop.f32.mrb[57].mxu0 }
 0x35e   : > { %v4316_v59 = vadd.f32 %v6139_v45, %v4250_v43  ;;  %v6994_v10 = vpop.f32.mrb[58].mxu0 }
 0x35f   : > { %v4319_v7 = vadd.f32 %v6994_v10, %v6139_v45  ;;  %v4253_v42 = vpop.f32.mrb[59].mxu0  ;;  %v4330_v47 = vmax.f32 %v4318_v19, 0.0 }
 0x360   : > { %v4317_v52 = vadd.f32 %v6139_v45, %v4253_v42  ;;  %v4328_v6 = vmax.f32 %v4316_v59, 0.0 }
 0x361   : > { %v4331_v57 = vmax.f32 %v4319_v7, 0.0 }
 0x362   : > { %v4329_v33 = vmax.f32 %v4317_v52, 0.0 }
 0x363   : > { %v4341_v9 = vpack.c.bf16 %v4331_v57, %v4330_v47 }
 0x364   : > { %v4340_v2 = vpack.c.bf16 %v4329_v33, %v4328_v6  ;;  %v6997_v40 = vpop.f32.mrb[60].mxu0 }
 0x365   : > { %4347 = vst.msk [vmem:[#allocation3 + $0x8] sm:$0xff] %vm307_vm12, %v4341_v9  ;;  %v7259_v32 = vadd.f32 %v6997_v40, %v8780_v5  ;;  %v4266_v53 = vpop.f32.mrb[61].mxu0 }
 0x366   : > { %4346 = vst.msk [vmem:[#allocation3] sm:$0xff] %vm307_vm12, %v4340_v2  ;;  %v7260_v49 = vadd.f32 %v4266_v53, %v8782_v39  ;;  %v6998_v8 = vpop.f32.mrb[62].mxu0 }
 0x367   : > { %v4322_v35 = vadd.f32 %v7259_v32, %v6139_v45  ;;  %v7261_v55 = vadd.f32 %v6998_v8, %v8786_v62  ;;  %v4269_v56 = vpop.f32.mrb[63].mxu0  ;;  %v7634_v8 = vld [vmem:[%s9483_s5 + $0x10] sm:$0xff]  }
 0x368   : > { %v4320_v58 = vadd.f32 %v7260_v49, %v6139_v45  ;;  %v7262_v12 = vadd.f32 %v4269_v56, %v8790_v27 }
 0x369   : > { %v4323_v61 = vadd.f32 %v7261_v55, %v6139_v45  ;;  %v4334_v38 = vmax.f32 %v4322_v35, 0.0 }
 0x36a   : > { %v4321_v24 = vadd.f32 %v7262_v12, %v6139_v45  ;;  %v4332_v26 = vmax.f32 %v4320_v58, 0.0 }
 0x36b   : > { %v4335_v63 = vmax.f32 %v4323_v61, 0.0 }
 0x36c   : > { %v4333_v36 = vmax.f32 %v4321_v24, 0.0  ;;  %v7001_v5 = vpop.f32.mrb[64].mxu0  ;;  %v8946_v37 = vld [vmem:[#allocation3 + $0x8] sm:$0xff] }
 0x36d   : > { %v4343_v21 = vpack.c.bf16 %v4335_v63, %v4334_v38  ;;  %v7263_v39 = vadd.f32 %v7001_v5, %v8804_v28  ;;  %v4282_v1 = vpop.f32.mrb[65].mxu0  ;;  %v8949_v23 = vld [vmem:[#allocation3] sm:$0xff]  ;;  %v4384_v14 = vshll.u32 %v8946_v37, 16  ;;  %v4388_v30 = vshrl.u32 %v8946_v37, 16 }
 0x36e   : > { %v4342_v62 = vpack.c.bf16 %v4333_v36, %v4332_v26  ;;  %v7264_v31 = vadd.f32 %v4282_v1, %v8806_v51  ;;  %v7002_v22 = vpop.f32.mrb[66].mxu0  ;;  %v4379_v27 = vshll.u32 %v8949_v23, 16  ;;  %v4377_v51 = vshrl.u32 %v8949_v23, 16 }
 0x36f   : > { %4349 = vst.msk [vmem:[#allocation3 + $0x18] sm:$0xff] %vm307_vm12, %v4343_v21  ;;  %v4326_v46 = vadd.f32 %v7263_v39, %v6139_v45  ;;  %v7265_v3 = vadd.f32 %v7002_v22, %v8809_v25  ;;  %v4285_v17 = vpop.f32.mrb[67].mxu0  ;;  %v4386_v48 = vrot.slane %v4384_v14, 1  ;;  %v4945_v0 = vrot.slane %v4388_v30, 5  ;;  %v7635_v21 = vld [vmem:[%s9483_s5 + $0x18] sm:$0xff]  }
 0x370   : > { %4348 = vst.msk [vmem:[#allocation3 + $0x10] sm:$0xff] %vm307_vm12, %v4342_v62  ;;  %v4324_v28 = vadd.f32 %v7264_v31, %v6139_v45  ;;  %v7266_v34 = vadd.f32 %v4285_v17, %v8813_v29  ;;  %v4381_v60 = vrot.slane %v4379_v27, 1  ;;  %v4948_v29 = vrot.slane %v4384_v14, 6 }
 0x371   : > { %v4327_v41 = vadd.f32 %v7265_v3, %v6139_v45  ;;  %v4338_v25 = vmax.f32 %v4326_v46, 0.0  ;;  %v4649_v43 = vrot.slane %v8946_v37, 1  ;;  %v4791_v59 = vrot.slane %v8946_v37, 5 }
 0x372   : > { %v4325_v13 = vadd.f32 %v7266_v34, %v6139_v45  ;;  %v4382_v54 = vor.u32 %v4381_v60, %v4377_v51  ;;  %v4336_v11 = vmax.f32 %v4324_v28, 0.0  ;;  %v7633_v45 = vld [vmem:[%s9483_s5 + $0x8] sm:$0xff]   ;;  %v8974_v10 = vor.u32 %v4948_v29, %v4945_v0 }
 0x373   : > { %v4339_v16 = vmax.f32 %v4327_v41, 0.0  ;;  %v4390_v40 = vor.u32 %v4388_v30, %v4386_v48  ;;  %v5121_v36 = vrot.slane %v8946_v37, 6 }
 0x374   : > { %v4337_v18 = vmax.f32 %v4325_v13, 0.0  ;;  %v4387_v15 = vsel %vm1994_vm8, %v4382_v54, %v4386_v48 }
 0x375   : > { %v4345_v44 = vpack.c.bf16 %v4339_v16, %v4338_v25  ;;  %7012 = vmatmul.mubr.msk.bf16.vlgmr.msra.gmra.mrb[64].mxu1 %vm307_vm12, %v4387_v15 }
 0x376   : > { %v4344_v50 = vpack.c.bf16 %v4337_v18, %v4336_v11  ;;  %7032 = vmatpush3.bf16.msra.mxu1 %v7632_v20  ;;  %7015 = vmatprep.mubr.msk.bf16.mxu1 %vm7675_vm13, %v7674_v4  ;;  %v8970_v19 = vld [vmem:[#allocation3 + $0x18] sm:$0xff] }
 0x377   : > { %4352 = vst.msk [vmem:[#allocation3 + $0x28] sm:$0x1f] %vm4351_vm14, %v4345_v44  ;;  %v8976_v7 = vld [vmem:[#allocation3 + $0x10] sm:$0xff]  ;;  %7033 = vmatprep.subr.bf16.mxu1 %v7674_v4  ;;  %v8980_v42 = vshll.u32 %v8970_v19, 16  ;;  %v8983_v52 = vshrl.u32 %v8970_v19, 16  ;;  %v4653_v47 = vrot.slane %v8970_v19, 1 }
 0x378   : > { %v4795_v57 = vrot.slane %v8970_v19, 5  ;;  %4350 = vst.msk [vmem:[#allocation3 + $0x20] sm:$0xff] %vm307_vm12, %v4344_v50  ;;  %v4392_v6 = vshll.u32 %v8976_v7, 16  ;;  %v4396_v33 = vshrl.u32 %v8976_v7, 16  ;;  %v4651_v9 = vrot.slane %v8976_v7, 1 }
 0x379   : > { %v4793_v2 = vrot.slane %v8976_v7, 5  ;;  %v4963_v32 = vrot.slane %v8983_v52, 5  ;;  %v4966_v53 = vrot.slane %v8980_v42, 6  ;;  %v5123_v5 = vrot.slane %v8976_v7, 6 }
 0x37a   : > { %v4394_v49 = vrot.slane %v4392_v6, 1  ;;  %7034 = vmatpush3.bf16.msra.mxu1 %v7633_v45  ;;  %v9000_v35 = vsel %vm3168_vm6, %v4649_v43, %v4651_v9  ;;  %v9003_v55 = vsel %vm3168_vm6, %v4651_v9, %v4653_v47  ;;  %v4954_v12 = vrot.slane %v4396_v33, 5 }
 0x37b   : > { %v9008_v56 = vsel %vm3022_vm4, %v4791_v59, %v4793_v2  ;;  %7035 = vmatprep.subr.bf16.mxu1 %v7674_v4  ;;  %v9014_v58 = vsel %vm3022_vm4, %v4793_v2, %v4795_v57  ;;  %v4957_v24 = vrot.slane %v4392_v6, 6  ;;  %v5412_v38 = vrot.slane %v4396_v33, 2 }
 0x37c   : > { %v4395_v61 = vsel %vm1994_vm8, %v4390_v40, %v4394_v49  ;;  %v5413_v63 = vrot.slane %v4392_v6, 3  ;;  %v9018_v26 = vor.u32 %v4966_v53, %v4963_v32  ;;  %v9033_v62 = vsel %vm5119_vm15, %v5121_v36, %v5123_v5 }
 0x37d   : > { %7016 = vmatmul.mubr.msk.bf16.gmra.mrb[68].mxu1 %vm307_vm12, %v4395_v61  ;;  %v4958_v39 = vor.u32 %v4957_v24, %v4954_v12  ;;  %v5125_v31 = vrot.slane %v8970_v19, 6  ;;  %v4398_v27 = vor.u32 %v4396_v33, %v4394_v49  ;;  %v4402_v30 = vrot.slane %v8980_v42, 1  ;;  %v7636_v12 = vld [vmem:[%s9483_s5 + $0x40] sm:$0xff]   ;;  %v7637_v61 = vld [vmem:[%s9483_s5 + $0x48] sm:$0xff]   ;;  %v7638_v24 = vld [vmem:[%s9483_s5 + $0x50] sm:$0xff]  }
 0x37e   : > { %7019 = vmatprep.mubr.msk.bf16.mxu1 %vm7675_vm13, %v7674_v4  ;;  %7036 = vmatpush3.bf16.msra.mxu1 %v7634_v8  ;;  %v9036_v22 = vor.u32 %v5413_v63, %v5412_v38  ;;  %v5265_v54 = vrot.slane %v8976_v7, 2  ;;  %v5267_v25 = vrot.slane %v8970_v19, 2  ;;  %v5416_v0 = vrot.slane %v8983_v52, 2  ;;  %v4633_v63 = vld [vmem:[#allocation3] sm:$0xfe] }
 0x37f   : > { %v9027_v1 = vld [vmem:[#allocation3 + $0x20] sm:$0xf]  ;;  %7037 = vmatprep.subr.bf16.mxu1 %v7674_v4  ;;  %v9043_v3 = vsel %vm3309_vm9, %v8974_v10, %v4958_v39  ;;  %v9047_v17 = vsel %vm3309_vm9, %v4958_v39, %v9018_v26  ;;  %v9057_v34 = vsel %vm5119_vm15, %v5123_v5, %v5125_v31  ;;  %v4403_v60 = vsel %vm1994_vm8, %v4398_v27, %v4402_v30 }
 0x380   : > { %v4655_v14 = vrot.slane %v9027_v1, 1  ;;  %v9039_v46 = vld [vmem:[#allocation3 + $0x20] sm:$0xff]  ;;  %v4408_v41 = vshll.u32 %v9027_v1, 16  ;;  %v9078_v16 = vsel %vm743_vm0, %v5265_v54, %v5267_v25  ;;  %v5417_v29 = vrot.slane %v8980_v42, 3 }
 0x381   : > { %v5127_v51 = vrot.slane %v9039_v46, 6  ;;  %v4970_v13 = vshrl.u32 %v9039_v46, 16  ;;  %v4973_v48 = vshll.u32 %v9039_v46, 16  ;;  %v5269_v11 = vrot.slane %v9039_v46, 2  ;;  %v4357_v38 = vld [vmem:[#allocation3 + $0x20] sm:$0x7] }
 0x382   : > { %7038 = vmatpush3.bf16.msra.mxu1 %v7635_v21  ;;  %v9053_v28 = vsel %vm3168_vm6, %v4653_v47, %v4655_v14  ;;  %v4410_v15 = vrot.slane %v4408_v41, 1  ;;  %v4406_v45 = vor.u32 %v8983_v52, %v4402_v30  ;;  %v5567_v47 = vrot.slane %v8976_v7, 3  ;;  %v7640_v21 = vld [vmem:[%s9483_s5 + $0x60] sm:$0xff]   ;;  %v7642_v27 = vld [vmem:[%s9483_s5 + $0x70] sm:$0xff]  }
 0x383   : > { %7059 = vmatprep.subr.bf16.mxu1 %v7674_v4  ;;  %v9069_v20 = vsel %vm5119_vm15, %v5125_v31, %v5127_v51  ;;  %v9083_v18 = vsel %vm743_vm0, %v5267_v25, %v5269_v11  ;;  %v5420_v44 = vrot.slane %v4970_v13, 2  ;;  %v5421_v50 = vrot.slane %v4973_v48, 3  ;;  %v7641_v31 = vld [vmem:[%s9483_s5 + $0x68] sm:$0xff]   ;;  %v4919_v41 = vld [vmem:[#allocation3] sm:$0xe0] }
 0x384   : > { %v5418_v6 = vor.u32 %v5417_v29, %v5416_v0  ;;  %v5569_v9 = vrot.slane %v8970_v19, 3  ;;  %v4411_v2 = vsel %vm1994_vm8, %v4406_v45, %v4410_v15  ;;  %v5571_v42 = vrot.slane %v9039_v46, 3 }
 0x385   : > { %7020 = vmatmul.mubr.msk.bf16.gmra.mrb[72].mxu1 %vm307_vm12, %v4403_v60  ;;  %v9093_v33 = vor.u32 %v5421_v50, %v5420_v44  ;;  %v4412_v49 = vshrl.u32 %v9027_v1, 16  ;;  %v4648_v5 = vrot.slane %v4633_v63, 1  ;;  %v7645_v1 = vld [vmem:[%s9483_s5 + $0x88] sm:$0xff]   ;;  %v4935_v25 = vshrl.u32 %v4919_v41, 16  ;;  %v7650_v50 = vld [vmem:[%s9483_s5 + $0xb0] sm:$0xff]  }
 0x386   : > { %7023 = vmatprep.mubr.msk.bf16.mxu1 %vm7675_vm13, %v7674_v4  ;;  %v9101_v40 = vsel %vm5403_vm1, %v9036_v22, %v5418_v6  ;;  %v9110_v32 = vsel %vm5565_vm2, %v5567_v47, %v5569_v9  ;;  %v9117_v53 = vsel %vm5565_vm2, %v5569_v9, %v5571_v42  ;;  %v7649_v44 = vld [vmem:[%s9483_s5 + $0xa8] sm:$0xff]   ;;  %v4972_v45 = vrot.slane %v4970_v13, 5  ;;  %v4924_v9 = vld [vmem:[#allocation3 + $0x28] sm:$0x1] }
 0x387   : > { %v9105_v52 = vsel %vm5403_vm1, %v5418_v6, %v9093_v33  ;;  %v4414_v8 = vor.u32 %v4412_v49, %v4410_v15  ;;  %v4650_v39 = vsel %vm3168_vm6, %v4648_v5, %v4649_v43  ;;  %v7643_v43 = vld [vmem:[%s9483_s5 + $0x78] sm:$0xff]   ;;  %v4938_v15 = vshll.u32 %v4919_v41, 16 }
 0x388   : > { %v4937_v0 = vrot.slane %v4935_v25, 5  ;;  %v4975_v6 = vrot.slane %v4973_v48, 6  ;;  %v4979_v13 = vshll.u32 %v4924_v9, 16 }
 0x389   : > { %v4940_v29 = vrot.slane %v4938_v15, 6 }
 0x38a   : > { %v4981_v49 = vrot.slane %v4979_v13, 6 }
 0x38d   : > { %7024 = vmatmul.mubr.msk.bf16.gmra.mrb[76].mxu1 %vm307_vm12, %v4411_v2 }
 0x38e   : > { %7027 = vmatprep.mubr.msk.bf16.mxu1 %vm7675_vm13, %v7674_v4 }
 0x395   : > { %7028 = vmatmul.mubr.msk.bf16.gmra.mrb[80].mxu1 %vm307_vm12, %v4414_v8 }
 0x396   : > { %7039 = vmatprep.mubr.msk.bf16.mxu1 %vm7675_vm13, %v7674_v4 }
 0x39d   : > { %7040 = vmatmul.mubr.msk.bf16.vlgmr.msra.gmra.mrb[84].mxu1 %vm307_vm12, %v8949_v23  ;;  %v7639_v23 = vld [vmem:[%s9483_s5 + $0x58] sm:$0xff]  }
 0x39e   : > { %7060 = vmatpush3.bf16.msra.mxu1 %v7636_v12  ;;  %7043 = vmatprep.mubr.msk.bf16.mxu1 %vm7675_vm13, %v7674_v4 }
 0x39f   : > { %7061 = vmatprep.subr.bf16.mxu1 %v7674_v4 }
 0x3a2   : > { %7062 = vmatpush3.bf16.msra.mxu1 %v7637_v61  ;;  %v7653_v61 = vld [vmem:[%s9483_s5 + $0xc8] sm:$0xff]  }
 0x3a3   : > { %7063 = vmatprep.subr.bf16.mxu1 %v7674_v4 }
 0x3a5   : > { %7044 = vmatmul.mubr.msk.bf16.gmra.mrb[88].mxu1 %vm307_vm12, %v8946_v37  ;;  %v7655_v37 = vld [vmem:[%s9483_s5 + $0xd8] sm:$0xff]  }
 0x3a6   : > { %7047 = vmatprep.mubr.msk.bf16.mxu1 %vm7675_vm13, %v7674_v4  ;;  %7064 = vmatpush3.bf16.msra.mxu1 %v7638_v24  ;;  %v7654_v24 = vld [vmem:[%s9483_s5 + $0xd0] sm:$0xff]  }
 0x3a7   : > { %7065 = vmatprep.subr.bf16.mxu1 %v7674_v4 }
 0x3aa   : > { %7066 = vmatpush3.bf16.msra.mxu1 %v7639_v23 }
 0x3ab   : > { %7087 = vmatprep.subr.bf16.mxu1 %v7674_v4 }
 0x3ad   : > { %7048 = vmatmul.mubr.msk.bf16.gmra.mrb[92].mxu1 %vm307_vm12, %v8976_v7 }
 0x3ae   : > { %7051 = vmatprep.mubr.msk.bf16.mxu1 %vm7675_vm13, %v7674_v4 }
 0x3b5   : > { %7052 = vmatmul.mubr.msk.bf16.gmra.mrb[96].mxu1 %vm307_vm12, %v8970_v19  ;;  %v7648_v19 = vld [vmem:[%s9483_s5 + $0xa0] sm:$0xff]  }
 0x3b6   : > { %7055 = vmatprep.mubr.msk.bf16.mxu1 %vm7675_vm13, %v7674_v4 }
 0x3bd   : > { %7056 = vmatmul.mubr.msk.bf16.gmra.mrb[100].mxu1 %vm307_vm12, %v4357_v38 }
 0x3be   : > { %7067 = vmatprep.mubr.msk.bf16.mxu1 %vm7675_vm13, %v7674_v4 }
 0x3c5   : > { %7068 = vmatmul.mubr.msk.bf16.vlgmr.msra.gmra.mrb[104].mxu1 %vm307_vm12, %v4650_v39 }
 0x3c6   : > { %7088 = vmatpush3.bf16.msra.mxu1 %v7640_v21  ;;  %7071 = vmatprep.mubr.msk.bf16.mxu1 %vm7675_vm13, %v7674_v4 }
 0x3c7   : > { %7089 = vmatprep.subr.bf16.mxu1 %v7674_v4 }
 0x3ca   : > { %7090 = vmatpush3.bf16.msra.mxu1 %v7641_v31 }
 0x3cb   : > { %7091 = vmatprep.subr.bf16.mxu1 %v7674_v4 }
 0x3cd   : > { %7072 = vmatmul.mubr.msk.bf16.gmra.mrb[108].mxu1 %vm307_vm12, %v9000_v35  ;;  %v4777_v35 = vld [vmem:[#allocation3] sm:$0xe0] }
 0x3ce   : > { %7075 = vmatprep.mubr.msk.bf16.mxu1 %vm7675_vm13, %v7674_v4  ;;  %7092 = vmatpush3.bf16.msra.mxu1 %v7642_v27  ;;  %v4790_v30 = vrot.slane %v4777_v35, 5  ;;  %v5129_v27 = vrot.slane %v4924_v9, 6 }
 0x3cf   : > { %7093 = vmatprep.subr.bf16.mxu1 %v7674_v4 }
 0x3d2   : > { %7094 = vmatpush3.bf16.msra.mxu1 %v7643_v43 }
 0x3d3   : > { %7115 = vmatprep.subr.bf16.mxu1 %v7674_v4 }
 0x3d5   : > { %7076 = vmatmul.mubr.msk.bf16.gmra.mrb[112].mxu1 %vm307_vm12, %v9003_v55  ;;  %v7644_v55 = vld [vmem:[%s9483_s5 + $0x80] sm:$0xff]  }
 0x3d6   : > { %7079 = vmatprep.mubr.msk.bf16.mxu1 %vm7675_vm13, %v7674_v4 }
 0x3dd   : > { %7080 = vmatmul.mubr.msk.bf16.gmra.mrb[116].mxu1 %vm307_vm12, %v9053_v28  ;;  %v4792_v28 = vsel %vm3022_vm4, %v4790_v30, %v4791_v59  ;;  %v7647_v59 = vld [vmem:[%s9483_s5 + $0x98] sm:$0xff]  }
 0x3de   : > { %7083 = vmatprep.mubr.msk.bf16.mxu1 %vm7675_vm13, %v7674_v4 }
 0x3e5   : > { %7084 = vmatmul.mubr.msk.bf16.gmra.mrb[120].mxu1 %vm307_vm12, %v4655_v14  ;;  %v7646_v14 = vld [vmem:[%s9483_s5 + $0x90] sm:$0xff]  }
 0x3e6   : > { %7095 = vmatprep.mubr.msk.bf16.mxu1 %vm7675_vm13, %v7674_v4 }
 0x3ed   : > { %7096 = vmatmul.mubr.msk.bf16.vlgmr.msra.gmra.mrb[124].mxu1 %vm307_vm12, %v4792_v28 }
 0x3ee   : > { %7116 = vmatpush3.bf16.msra.mxu1 %v7644_v55  ;;  %7099 = vmatprep.mubr.msk.bf16.mxu1 %vm7675_vm13, %v7674_v4  ;;  %v5251_v55 = vld [vmem:[#allocation3 + $0x8] sm:$0xfc] }
 0x3ef   : > { %7117 = vmatprep.subr.bf16.mxu1 %v7674_v4 }
 0x3f2   : > { %7118 = vmatpush3.bf16.msra.mxu1 %v7645_v1 }
 0x3f3   : > { %7119 = vmatprep.subr.bf16.mxu1 %v7674_v4 }
 0x3f5   : > { %7100 = vmatmul.mubr.msk.bf16.gmra.mrb[128].mxu1 %vm307_vm12, %v9008_v56  ;;  %v4797_v56 = vrot.slane %v9039_v46, 5 }
 0x3f6   : > { %7103 = vmatprep.mubr.msk.bf16.mxu1 %vm7675_vm13, %v7674_v4  ;;  %7120 = vmatpush3.bf16.msra.mxu1 %v7646_v14  ;;  %v5264_v14 = vrot.slane %v5251_v55, 2 }
 0x3f7   : > { %7121 = vmatprep.subr.bf16.mxu1 %v7674_v4  ;;  %v4798_v60 = vsel %vm3022_vm4, %v4795_v57, %v4797_v56 }
 0x3fa   : > { %7122 = vmatpush3.bf16.msra.mxu1 %v7647_v59  ;;  %v7656_v59 = vld [vmem:[%s9483_s5 + $0xe0] sm:$0xff]  }
 0x3fb   : > { %7143 = vmatprep.subr.bf16.mxu1 %v7674_v4 }
 0x3fd   : > { %7104 = vmatmul.mubr.msk.bf16.gmra.mrb[132].mxu1 %vm307_vm12, %v9014_v58  ;;  %v4941_v58 = vor.u32 %v4940_v29, %v4937_v0  ;;  %v7659_v29 = vld [vmem:[%s9483_s5 + $0xf8] sm:$0xff]  }
 0x3fe   : > { %7107 = vmatprep.mubr.msk.bf16.mxu1 %vm7675_vm13, %v7674_v4 }
 0x3ff   : > { %v4950_v57 = vsel %vm3309_vm9, %v4941_v58, %v8974_v10  ;;  %v7651_v10 = vld [vmem:[%s9483_s5 + $0xb8] sm:$0xff]  }
 0x405   : > { %7108 = vmatmul.mubr.msk.bf16.gmra.mrb[136].mxu1 %vm307_vm12, %v4798_v60  ;;  %v5266_v60 = vsel %vm743_vm0, %v5264_v14, %v5265_v54  ;;  %v7658_v54 = vld [vmem:[%s9483_s5 + $0xf0] sm:$0xff]  }
 0x406   : > { %7111 = vmatprep.mubr.msk.bf16.mxu1 %vm7675_vm13, %v7674_v4 }
 0x40d   : > { %7112 = vmatmul.mubr.msk.bf16.gmra.mrb[140].mxu1 %vm307_vm12, %v4797_v56 }
 0x40e   : > { %7123 = vmatprep.mubr.msk.bf16.mxu1 %vm7675_vm13, %v7674_v4 }
 0x415   : > { %7124 = vmatmul.mubr.msk.bf16.vlgmr.msra.gmra.mrb[144].mxu1 %vm307_vm12, %v4950_v57 }
 0x416   : > { %7144 = vmatpush3.bf16.msra.mxu1 %v7648_v19  ;;  %7127 = vmatprep.mubr.msk.bf16.mxu1 %vm7675_vm13, %v7674_v4 }
 0x417   : > { %7145 = vmatprep.subr.bf16.mxu1 %v7674_v4 }
 0x41a   : > { %7146 = vmatpush3.bf16.msra.mxu1 %v7649_v44 }
 0x41b   : > { %7147 = vmatprep.subr.bf16.mxu1 %v7674_v4 }
 0x41d   : > { %7128 = vmatmul.mubr.msk.bf16.gmra.mrb[148].mxu1 %vm307_vm12, %v9043_v3  ;;  %v4976_v3 = vor.u32 %v4975_v6, %v4972_v45 }
 0x41e   : > { %7131 = vmatprep.mubr.msk.bf16.mxu1 %vm7675_vm13, %v7674_v4  ;;  %7148 = vmatpush3.bf16.msra.mxu1 %v7650_v50 }
 0x41f   : > { %7149 = vmatprep.subr.bf16.mxu1 %v7674_v4  ;;  %v4977_v2 = vsel %vm3309_vm9, %v9018_v26, %v4976_v3  ;;  %v4982_v48 = vsel %vm3309_vm9, %v4976_v3, %v4981_v49  ;;  %v7652_v26 = vld [vmem:[%s9483_s5 + $0xc0] sm:$0xff]  }
 0x422   : > { %7150 = vmatpush3.bf16.msra.mxu1 %v7651_v10 }
 0x423   : > { %7171 = vmatprep.subr.bf16.mxu1 %v7674_v4 }
 0x425   : > { %7132 = vmatmul.mubr.msk.bf16.gmra.mrb[152].mxu1 %vm307_vm12, %v9047_v17  ;;  %v5103_v17 = vld [vmem:[#allocation3] sm:$0xc0] }
 0x426   : > { %7135 = vmatprep.mubr.msk.bf16.mxu1 %vm7675_vm13, %v7674_v4  ;;  %v5120_v8 = vrot.slane %v5103_v17, 6 }
 0x428   : > { %v5122_v12 = vsel %vm5119_vm15, %v5120_v8, %v5121_v36 }
 0x42d   : > { %7136 = vmatmul.mubr.msk.bf16.gmra.mrb[156].mxu1 %vm307_vm12, %v4977_v2 }
 0x42e   : > { %7139 = vmatprep.mubr.msk.bf16.mxu1 %vm7675_vm13, %v7674_v4 }
 0x435   : > { %7140 = vmatmul.mubr.msk.bf16.gmra.mrb[160].mxu1 %vm307_vm12, %v4982_v48 }
 0x436   : > { %7151 = vmatprep.mubr.msk.bf16.mxu1 %vm7675_vm13, %v7674_v4 }
 0x43d   : > { %7152 = vmatmul.mubr.msk.bf16.vlgmr.msra.gmra.mrb[164].mxu1 %vm307_vm12, %v5122_v12  ;;  %v5405_v12 = vshrl.u32 %v5251_v55, 16 }
 0x43e   : > { %7172 = vmatpush3.bf16.msra.mxu1 %v7652_v26  ;;  %7155 = vmatprep.mubr.msk.bf16.mxu1 %vm7675_vm13, %v7674_v4 }
 0x43f   : > { %7173 = vmatprep.subr.bf16.mxu1 %v7674_v4 }
 0x442   : > { %7174 = vmatpush3.bf16.msra.mxu1 %v7653_v61  ;;  %v5408_v61 = vshll.u32 %v5251_v55, 16 }
 0x443   : > { %7175 = vmatprep.subr.bf16.mxu1 %v7674_v4 }
 0x445   : > { %7156 = vmatmul.mubr.msk.bf16.gmra.mrb[168].mxu1 %vm307_vm12, %v9033_v62 }
 0x446   : > { %7159 = vmatprep.mubr.msk.bf16.mxu1 %vm7675_vm13, %v7674_v4  ;;  %7176 = vmatpush3.bf16.msra.mxu1 %v7654_v24 }
 0x447   : > { %7177 = vmatprep.subr.bf16.mxu1 %v7674_v4 }
 0x448   : > { %v4488_v36 = vpop.f32.mrb[64].mxu1 }
 0x449   : > { %v7013_v23 = vpop.f32.mrb[65].mxu1 }
 0x44a   : > { %v4491_v38 = vpop.f32.mrb[66].mxu1  ;;  %7178 = vmatpush3.bf16.msra.mxu1 %v7655_v37 }
 0x44b   : > { %v7014_v63 = vpop.f32.mrb[67].mxu1  ;;  %7199 = vmatprep.subr.bf16.mxu1 %v7674_v4 }
 0x44d   : > { %7160 = vmatmul.mubr.msk.bf16.gmra.mrb[172].mxu1 %vm307_vm12, %v9057_v34  ;;  %v5130_v34 = vsel %vm5119_vm15, %v5127_v51, %v5129_v27  ;;  %v7657_v51 = vld [vmem:[%s9483_s5 + $0xe8] sm:$0xff]  }
 0x44e   : > { %7163 = vmatprep.mubr.msk.bf16.mxu1 %vm7675_vm13, %v7674_v4 }
 0x450   : > { %v4496_v62 = vpop.f32.mrb[68].mxu1 }
 0x451   : > { %v7017_v5 = vpop.f32.mrb[69].mxu1 }
 0x452   : > { %v4499_v21 = vpop.f32.mrb[70].mxu1 }
 0x453   : > { %v7018_v39 = vpop.f32.mrb[71].mxu1 }
 0x455   : > { %7164 = vmatmul.mubr.msk.bf16.gmra.mrb[176].mxu1 %vm307_vm12, %v9069_v20 }
 0x456   : > { %7167 = vmatprep.mubr.msk.bf16.mxu1 %vm7675_vm13, %v7674_v4 }
 0x458   : > { %v4504_v31 = vpop.f32.mrb[72].mxu1 }
 0x459   : > { %v7021_v43 = vpop.f32.mrb[73].mxu1 }
 0x45a   : > { %v4507_v35 = vpop.f32.mrb[74].mxu1  ;;  %v7661_v43 = vld [vmem:[%s9483_s5 + $0x108] sm:$0xff]  }
 0x45b   : > { %v7022_v30 = vpop.f32.mrb[75].mxu1 }
 0x45d   : > { %7168 = vmatmul.mubr.msk.bf16.gmra.mrb[180].mxu1 %vm307_vm12, %v5130_v34 }
 0x45e   : > { %7179 = vmatprep.mubr.msk.bf16.mxu1 %vm7675_vm13, %v7674_v4 }
 0x460   : > { %v4512_v28 = vpop.f32.mrb[76].mxu1 }
 0x461   : > { %v7025_v20 = vpop.f32.mrb[77].mxu1 }
 0x462   : > { %v4515_v1 = vpop.f32.mrb[78].mxu1  ;;  %v9386_v20 = vld [vmem:[#allocation3 + $0x28] sm:$0x3f] }
 0x463   : > { %v7026_v56 = vpop.f32.mrb[79].mxu1 }
 0x464   : > { %v5428_v56 = vshll.u32 %v9386_v20, 16 }
 0x465   : > { %7180 = vmatmul.mubr.msk.bf16.vlgmr.msra.gmra.mrb[184].mxu1 %vm307_vm12, %v5266_v60 }
 0x466   : > { %7200 = vmatpush3.bf16.msra.mxu1 %v7656_v59  ;;  %7183 = vmatprep.mubr.msk.bf16.mxu1 %vm7675_vm13, %v7674_v4  ;;  %v5425_v59 = vshrl.u32 %v9386_v20, 16 }
 0x467   : > { %7201 = vmatprep.subr.bf16.mxu1 %v7674_v4 }
 0x468   : > { %v4520_v41 = vpop.f32.mrb[80].mxu1 }
 0x469   : > { %v7029_v25 = vpop.f32.mrb[81].mxu1 }
 0x46a   : > { %v4523_v15 = vpop.f32.mrb[82].mxu1  ;;  %7202 = vmatpush3.bf16.msra.mxu1 %v7657_v51 }
 0x46b   : > { %v7030_v0 = vpop.f32.mrb[83].mxu1  ;;  %7203 = vmatprep.subr.bf16.mxu1 %v7674_v4  ;;  %v5427_v15 = vrot.slane %v5425_v59, 2 }
 0x46d   : > { %7184 = vmatmul.mubr.msk.bf16.gmra.mrb[188].mxu1 %vm307_vm12, %v9078_v16  ;;  %v5252_v16 = vld [vmem:[#allocation3 + $0x28] sm:$0x1f] }
 0x46e   : > { %7187 = vmatprep.mubr.msk.bf16.mxu1 %vm7675_vm13, %v7674_v4  ;;  %7204 = vmatpush3.bf16.msra.mxu1 %v7658_v54  ;;  %v5271_v6 = vrot.slane %v5252_v16, 2  ;;  %v5430_v54 = vrot.slane %v5428_v56, 3 }
 0x46f   : > { %7205 = vmatprep.subr.bf16.mxu1 %v7674_v4 }
 0x470   : > { %v4595_v58 = vpop.f32.mrb[84].mxu1  ;;  %v5272_v48 = vsel %vm743_vm0, %v5269_v11, %v5271_v6  ;;  %v5407_v11 = vrot.slane %v5405_v12, 2  ;;  %vm5757_vm0 = vcmask 519168  }
 0x471   : > { %v9344_v19 = vadd.f32 %v4595_v58, %v4488_v36  ;;  %v7041_v57 = vpop.f32.mrb[85].mxu1  ;;  %v5410_v36 = vrot.slane %v5408_v61, 3 }
 0x472   : > { %v4598_v44 = vpop.f32.mrb[86].mxu1  ;;  %7206 = vmatpush3.bf16.msra.mxu1 %v7659_v29  ;;  %v5431_v29 = vor.u32 %v5430_v54, %v5427_v15 }
 0x473   : > { %v9346_v50 = vadd.f32 %v4598_v44, %v4491_v38  ;;  %v7042_v10 = vpop.f32.mrb[87].mxu1  ;;  %7227 = vmatprep.subr.bf16.mxu1 %v7674_v4  ;;  %v5411_v5 = vor.u32 %v5410_v36, %v5407_v11 }
 0x475   : > { %7188 = vmatmul.mubr.msk.bf16.gmra.mrb[192].mxu1 %vm307_vm12, %v9083_v18  ;;  %v5415_v27 = vsel %vm5403_vm1, %v5411_v5, %v9036_v22  ;;  %v7662_v22 = vld [vmem:[%s9483_s5 + $0x110] sm:$0xff]   ;;  %v5573_v5 = vrot.slane %v9386_v20, 3 }
 0x476   : > { %7191 = vmatprep.mubr.msk.bf16.mxu1 %vm7675_vm13, %v7674_v4 }
 0x478   : > { %v4603_v45 = vpop.f32.mrb[88].mxu1 }
 0x479   : > { %v9353_v3 = vadd.f32 %v4603_v45, %v4496_v62  ;;  %v7045_v9 = vpop.f32.mrb[89].mxu1 }
 0x47a   : > { %v4606_v2 = vpop.f32.mrb[90].mxu1 }
 0x47b   : > { %v9355_v13 = vadd.f32 %v4606_v2, %v4499_v21  ;;  %v7046_v49 = vpop.f32.mrb[91].mxu1  ;;  %v7660_v21 = vld [vmem:[%s9483_s5 + $0x100] sm:$0xff]   ;;  %v5553_v2 = vld [vmem:[#allocation3 + $0x8] sm:$0xf8] }
 0x47d   : > { %7192 = vmatmul.mubr.msk.bf16.gmra.mrb[196].mxu1 %vm307_vm12, %v5272_v48 }
 0x47e   : > { %7195 = vmatprep.mubr.msk.bf16.mxu1 %vm7675_vm13, %v7674_v4 }
 0x480   : > { %v4611_v18 = vpop.f32.mrb[92].mxu1 }
 0x481   : > { %v9363_v17 = vadd.f32 %v4611_v18, %v4504_v31  ;;  %v7049_v8 = vpop.f32.mrb[93].mxu1  ;;  %v5566_v18 = vrot.slane %v5553_v2, 3 }
 0x482   : > { %v4614_v26 = vpop.f32.mrb[94].mxu1 }
 0x483   : > { %v4615_v24 = vadd.f32 %v4614_v26, %v4507_v35  ;;  %v7050_v37 = vpop.f32.mrb[95].mxu1 }
 0x485   : > { %7196 = vmatmul.mubr.msk.bf16.gmra.mrb[200].mxu1 %vm307_vm12, %v5271_v6 }
 0x486   : > { %7207 = vmatprep.mubr.msk.bf16.mxu1 %vm7675_vm13, %v7674_v4 }
 0x488   : > { %v4619_v23 = vpop.f32.mrb[96].mxu1 }
 0x489   : > { %v4620_v38 = vadd.f32 %v4619_v23, %v4512_v28  ;;  %v7053_v63 = vpop.f32.mrb[97].mxu1 }
 0x48a   : > { %v4622_v62 = vpop.f32.mrb[98].mxu1 }
 0x48b   : > { %v4623_v39 = vadd.f32 %v4622_v62, %v4515_v1  ;;  %v7054_v31 = vpop.f32.mrb[99].mxu1  ;;  %v7663_v1 = vld [vmem:[%s9483_s5 + $0x118] sm:$0xff]  }
 0x48d   : > { %7208 = vmatmul.mubr.msk.bf16.vlgmr.msra.gmra.mrb[204].mxu1 %vm307_vm12, %v5415_v27 }
 0x48e   : > { %7228 = vmatpush3.bf16.msra.mxu1 %v7660_v21  ;;  %7211 = vmatprep.mubr.msk.bf16.mxu1 %vm7675_vm13, %v7674_v4 }
 0x48f   : > { %7229 = vmatprep.subr.bf16.mxu1 %v7674_v4 }
 0x490   : > { %v4627_v35 = vpop.f32.mrb[100].mxu1 }
 0x491   : > { %v4628_v30 = vadd.f32 %v4627_v35, %v4520_v41  ;;  %v7057_v34 = vpop.f32.mrb[101].mxu1 }
 0x492   : > { %v4630_v55 = vpop.f32.mrb[102].mxu1  ;;  %7230 = vmatpush3.bf16.msra.mxu1 %v7661_v43  ;;  %v5574_v43 = vsel %vm5565_vm2, %v5571_v42, %v5573_v5 }
 0x493   : > { %v7058_v28 = vpop.f32.mrb[103].mxu1  ;;  %7231 = vmatprep.subr.bf16.mxu1 %v7674_v4 }
 0x495   : > { %7212 = vmatmul.mubr.msk.bf16.gmra.mrb[208].mxu1 %vm307_vm12, %v9101_v40 }
 0x496   : > { %7215 = vmatprep.mubr.msk.bf16.mxu1 %vm7675_vm13, %v7674_v4  ;;  %7232 = vmatpush3.bf16.msra.mxu1 %v7662_v22 }
 0x497   : > { %7233 = vmatprep.subr.bf16.mxu1 %v7674_v4 }
 0x498   : > { %v4730_v14 = vpop.f32.mrb[104].mxu1 }
 0x499   : > { %v4768_v60 = vadd.f32 %v4730_v14, %v9344_v19  ;;  %v7069_v40 = vpop.f32.mrb[105].mxu1 }
 0x49a   : > { %v4733_v51 = vpop.f32.mrb[106].mxu1  ;;  %7234 = vmatpush3.bf16.msra.mxu1 %v7663_v1 }
 0x49b   : > { %v4769_v41 = vadd.f32 %v4733_v51, %v9346_v50  ;;  %v7070_v25 = vpop.f32.mrb[107].mxu1  ;;  %v5432_v50 = vsel %vm5403_vm1, %v9093_v33, %v5431_v29 }
 0x49d   : > { %7216 = vmatmul.mubr.msk.bf16.gmra.mrb[212].mxu1 %vm307_vm12, %v9105_v52 }
 0x49e   : > { %7219 = vmatprep.mubr.msk.bf16.mxu1 %vm7675_vm13, %v7674_v4 }
 0x4a0   : > { %v4738_v0 = vpop.f32.mrb[108].mxu1 }
 0x4a1   : > { %v4770_v58 = vadd.f32 %v4738_v0, %v9353_v3  ;;  %v7073_v57 = vpop.f32.mrb[109].mxu1 }
 0x4a2   : > { %v4741_v19 = vpop.f32.mrb[110].mxu1 }
 0x4a3   : > { %v4771_v44 = vadd.f32 %v4741_v19, %v9355_v13  ;;  %v7074_v10 = vpop.f32.mrb[111].mxu1 }
 0x4a5   : > { %7220 = vmatmul.mubr.msk.bf16.gmra.mrb[216].mxu1 %vm307_vm12, %v5432_v50 }
 0x4a6   : > { %7223 = vmatprep.mubr.msk.bf16.mxu1 %vm7675_vm13, %v7674_v4 }
 0x4a8   : > { %v4746_v52 = vpop.f32.mrb[112].mxu1 }
 0x4a9   : > { %v4772_v16 = vadd.f32 %v4746_v52, %v9363_v17  ;;  %v7077_v45 = vpop.f32.mrb[113].mxu1  ;;  %v5568_v17 = vsel %vm5565_vm2, %v5566_v18, %v5567_v47 }
 0x4aa   : > { %v4749_v6 = vpop.f32.mrb[114].mxu1 }
 0x4ab   : > { %v4773_v9 = vadd.f32 %v4749_v6, %v4615_v24  ;;  %v7078_v3 = vpop.f32.mrb[115].mxu1 }
 0x4ad   : > { %7224 = vmatmul.mubr.msk.bf16.gmra.mrb[220].mxu1 %vm307_vm12, %v5431_v29 }
 0x4ae   : > { %7235 = vmatprep.mubr.msk.bf16.mxu1 %vm7675_vm13, %v7674_v4 }
 0x4b0   : > { %v4754_v13 = vpop.f32.mrb[116].mxu1 }
 0x4b1   : > { %v4774_v33 = vadd.f32 %v4754_v13, %v4620_v38  ;;  %v7081_v49 = vpop.f32.mrb[117].mxu1 }
 0x4b2   : > { %v4757_v48 = vpop.f32.mrb[118].mxu1 }
 0x4b3   : > { %v4775_v8 = vadd.f32 %v4757_v48, %v4623_v39  ;;  %v7082_v26 = vpop.f32.mrb[119].mxu1 }
 0x4b5   : > { %7236 = vmatmul.mubr.msk.bf16.vlgmr.msra.gmra.mrb[224].mxu1 %vm307_vm12, %v5568_v17 }
 0x4b6   : > { %7239 = vmatprep.mubr.msk.bf16.mxu1 %vm7675_vm13, %v7674_v4 }
 0x4b8   : > { %v4762_v12 = vpop.f32.mrb[120].mxu1 }
 0x4b9   : > { %v4776_v61 = vadd.f32 %v4762_v12, %v4628_v30  ;;  %v7085_v24 = vpop.f32.mrb[121].mxu1 }
 0x4ba   : > { %v4765_v37 = vpop.f32.mrb[122].mxu1 }
 0x4bb   : > { %v7086_v11 = vpop.f32.mrb[123].mxu1 }
 0x4bd   : > { %7240 = vmatmul.mubr.msk.bf16.gmra.mrb[228].mxu1 %vm307_vm12, %v9110_v32 }
 0x4be   : > { %7243 = vmatprep.mubr.msk.bf16.mxu1 %vm7675_vm13, %v7674_v4 }
 0x4c0   : > { %v4872_v36 = vpop.f32.mrb[124].mxu1 }
 0x4c1   : > { %v4910_v7 = vadd.f32 %v4872_v36, %v4768_v60  ;;  %v7097_v23 = vpop.f32.mrb[125].mxu1 }
 0x4c2   : > { %v4875_v47 = vpop.f32.mrb[126].mxu1 }
 0x4c3   : > { %v4911_v38 = vadd.f32 %v4875_v47, %v4769_v41  ;;  %v7098_v63 = vpop.f32.mrb[127].mxu1 }
 0x4c5   : > { %7244 = vmatmul.mubr.msk.bf16.gmra.mrb[232].mxu1 %vm307_vm12, %v9117_v53 }
 0x4c6   : > { %7247 = vmatprep.mubr.msk.bf16.mxu1 %vm7675_vm13, %v7674_v4 }
 0x4c8   : > { %v4880_v62 = vpop.f32.mrb[128].mxu1 }
 0x4c9   : > { %v4912_v21 = vadd.f32 %v4880_v62, %v4770_v58  ;;  %v7101_v32 = vpop.f32.mrb[129].mxu1 }
 0x4ca   : > { %v4883_v39 = vpop.f32.mrb[130].mxu1 }
 0x4cb   : > { %v4913_v31 = vadd.f32 %v4883_v39, %v4771_v44  ;;  %v7102_v27 = vpop.f32.mrb[131].mxu1 }
 0x4cd   : > { %7248 = vmatmul.mubr.msk.bf16.gmra.mrb[236].mxu1 %vm307_vm12, %v5574_v43 }
 0x4ce   : > { %7251 = vmatprep.mubr.msk.bf16.mxu1 %vm7675_vm13, %v7674_v4 }
 0x4d0   : > { %v4888_v53 = vpop.f32.mrb[132].mxu1 }
 0x4d1   : > { %v4914_v35 = vadd.f32 %v4888_v53, %v4772_v16  ;;  %v7105_v30 = vpop.f32.mrb[133].mxu1 }
 0x4d2   : > { %v4891_v34 = vpop.f32.mrb[134].mxu1 }
 0x4d3   : > { %v4915_v55 = vadd.f32 %v4891_v34, %v4773_v9  ;;  %v7106_v22 = vpop.f32.mrb[135].mxu1 }
 0x4d5   : > { %7252 = vmatmul.mubr.msk.bf16.gmra.mrb[240].mxu1 %vm307_vm12, %v5573_v5 }
 0x4d8   : > { %v4896_v28 = vpop.f32.mrb[136].mxu1 }
 0x4d9   : > { %v4916_v20 = vadd.f32 %v4896_v28, %v4774_v33  ;;  %v7109_v1 = vpop.f32.mrb[137].mxu1 }
 0x4da   : > { %v4899_v14 = vpop.f32.mrb[138].mxu1 }
 0x4db   : > { %v4917_v46 = vadd.f32 %v4899_v14, %v4775_v8  ;;  %v7110_v59 = vpop.f32.mrb[139].mxu1 }
 0x4e0   : > { %v4904_v42 = vpop.f32.mrb[140].mxu1 }
 0x4e1   : > { %v4918_v56 = vadd.f32 %v4904_v42, %v4776_v61  ;;  %v7113_v60 = vpop.f32.mrb[141].mxu1 }
 0x4e2   : > { %v4907_v40 = vpop.f32.mrb[142].mxu1 }
 0x4e3   : > { %v7114_v51 = vpop.f32.mrb[143].mxu1 }
 0x4e8   : > { %v5056_v4 = vpop.f32.mrb[144].mxu1 }
 0x4e9   : > { %v5094_v41 = vadd.f32 %v5056_v4, %v4910_v7  ;;  %v7125_v25 = vpop.f32.mrb[145].mxu1 }
 0x4ea   : > { %v5059_v15 = vpop.f32.mrb[146].mxu1 }
 0x4eb   : > { %v5095_v54 = vadd.f32 %v5059_v15, %v4911_v38  ;;  %v7126_v0 = vpop.f32.mrb[147].mxu1 }
 0x4f0   : > { %v5064_v29 = vpop.f32.mrb[148].mxu1 }
 0x4f1   : > { %v5096_v58 = vadd.f32 %v5064_v29, %v4912_v21  ;;  %v7129_v57 = vpop.f32.mrb[149].mxu1 }
 0x4f2   : > { %v5067_v19 = vpop.f32.mrb[150].mxu1 }
 0x4f3   : > { %v5097_v44 = vadd.f32 %v5067_v19, %v4913_v31  ;;  %v7130_v10 = vpop.f32.mrb[151].mxu1 }
 0x4f8   : > { %v5072_v50 = vpop.f32.mrb[152].mxu1 }
 0x4f9   : > { %v5098_v52 = vadd.f32 %v5072_v50, %v4914_v35  ;;  %v7133_v16 = vpop.f32.mrb[153].mxu1 }
 0x4fa   : > { %v5075_v45 = vpop.f32.mrb[154].mxu1 }
 0x4fb   : > { %v5099_v6 = vadd.f32 %v5075_v45, %v4915_v55  ;;  %v7134_v9 = vpop.f32.mrb[155].mxu1 }
 0x500   : > { %v5080_v3 = vpop.f32.mrb[156].mxu1 }
 0x501   : > { %v5100_v2 = vadd.f32 %v5080_v3, %v4916_v20  ;;  %v7137_v13 = vpop.f32.mrb[157].mxu1 }
 0x502   : > { %v5083_v33 = vpop.f32.mrb[158].mxu1 }
 0x503   : > { %v5101_v49 = vadd.f32 %v5083_v33, %v4917_v46  ;;  %v7138_v48 = vpop.f32.mrb[159].mxu1 }
 0x508   : > { %v5088_v18 = vpop.f32.mrb[160].mxu1 }
 0x509   : > { %v5102_v8 = vadd.f32 %v5088_v18, %v4918_v56  ;;  %v7141_v26 = vpop.f32.mrb[161].mxu1 }
 0x50a   : > { %v5091_v17 = vpop.f32.mrb[162].mxu1 }
 0x50b   : > { %v7142_v12 = vpop.f32.mrb[163].mxu1 }
 0x510   : > { %v5204_v61 = vpop.f32.mrb[164].mxu1 }
 0x511   : > { %v5242_v24 = vadd.f32 %v5204_v61, %v5094_v41  ;;  %v7153_v37 = vpop.f32.mrb[165].mxu1 }
 0x512   : > { %v5207_v11 = vpop.f32.mrb[166].mxu1 }
 0x513   : > { %v5243_v36 = vadd.f32 %v5207_v11, %v5095_v54  ;;  %v7154_v7 = vpop.f32.mrb[167].mxu1 }
 0x518   : > { %v5212_v23 = vpop.f32.mrb[168].mxu1 }
 0x519   : > { %v5244_v47 = vadd.f32 %v5212_v23, %v5096_v58  ;;  %v7157_v38 = vpop.f32.mrb[169].mxu1 }
 0x51a   : > { %v5215_v63 = vpop.f32.mrb[170].mxu1 }
 0x51b   : > { %v5245_v62 = vadd.f32 %v5215_v63, %v5097_v44  ;;  %v7158_v5 = vpop.f32.mrb[171].mxu1 }
 0x520   : > { %v5220_v21 = vpop.f32.mrb[172].mxu1 }
 0x521   : > { %v5246_v32 = vadd.f32 %v5220_v21, %v5098_v52  ;;  %v7161_v39 = vpop.f32.mrb[173].mxu1 }
 0x522   : > { %v5223_v31 = vpop.f32.mrb[174].mxu1 }
 0x523   : > { %v5247_v27 = vadd.f32 %v5223_v31, %v5099_v6  ;;  %v7162_v43 = vpop.f32.mrb[175].mxu1 }
 0x528   : > { %v5228_v53 = vpop.f32.mrb[176].mxu1 }
 0x529   : > { %v5248_v35 = vadd.f32 %v5228_v53, %v5100_v2  ;;  %v7165_v30 = vpop.f32.mrb[177].mxu1 }
 0x52a   : > { %v5231_v34 = vpop.f32.mrb[178].mxu1 }
 0x52b   : > { %v5249_v55 = vadd.f32 %v5231_v34, %v5101_v49  ;;  %v7166_v22 = vpop.f32.mrb[179].mxu1 }
 0x530   : > { %v5236_v28 = vpop.f32.mrb[180].mxu1 }
 0x531   : > { %v5250_v20 = vadd.f32 %v5236_v28, %v5102_v8  ;;  %v7169_v1 = vpop.f32.mrb[181].mxu1  ;;  %v9440_v28 = vld [vmem:[%s9484_s6] ss:$0 sm:$0xff] }
 0x532   : > { %v5239_v14 = vpop.f32.mrb[182].mxu1 }
 0x533   : > { %v7170_v46 = vpop.f32.mrb[183].mxu1 }
 0x538   : > { %v5346_v59 = vpop.f32.mrb[184].mxu1 }
 0x539   : > { %v5384_v42 = vadd.f32 %v5346_v59, %v5242_v24  ;;  %v7181_v56 = vpop.f32.mrb[185].mxu1 }
 0x53a   : > { %v5349_v60 = vpop.f32.mrb[186].mxu1 }
 0x53b   : > { %v5385_v40 = vadd.f32 %v5349_v60, %v5243_v36  ;;  %v7182_v51 = vpop.f32.mrb[187].mxu1 }
 0x540   : > { %v5354_v4 = vpop.f32.mrb[188].mxu1 }
 0x541   : > { %v5386_v41 = vadd.f32 %v5354_v4, %v5244_v47  ;;  %v7185_v25 = vpop.f32.mrb[189].mxu1 }
 0x542   : > { %v5357_v15 = vpop.f32.mrb[190].mxu1 }
 0x543   : > { %v5387_v54 = vadd.f32 %v5357_v15, %v5245_v62  ;;  %v7186_v0 = vpop.f32.mrb[191].mxu1 }
 0x548   : > { %v5362_v29 = vpop.f32.mrb[192].mxu1 }
 0x549   : > { %v5388_v58 = vadd.f32 %v5362_v29, %v5246_v32  ;;  %v7189_v57 = vpop.f32.mrb[193].mxu1 }
 0x54a   : > { %v5365_v19 = vpop.f32.mrb[194].mxu1 }
 0x54b   : > { %v5389_v44 = vadd.f32 %v5365_v19, %v5247_v27  ;;  %v7190_v10 = vpop.f32.mrb[195].mxu1 }
 0x550   : > { %v5370_v50 = vpop.f32.mrb[196].mxu1 }
 0x551   : > { %v5390_v52 = vadd.f32 %v5370_v50, %v5248_v35  ;;  %v7193_v16 = vpop.f32.mrb[197].mxu1 }
 0x552   : > { %v5373_v45 = vpop.f32.mrb[198].mxu1 }
 0x553   : > { %v5391_v6 = vadd.f32 %v5373_v45, %v5249_v55  ;;  %v7194_v9 = vpop.f32.mrb[199].mxu1 }
 0x558   : > { %v5378_v3 = vpop.f32.mrb[200].mxu1 }
 0x559   : > { %v5392_v2 = vadd.f32 %v5378_v3, %v5250_v20  ;;  %v7197_v13 = vpop.f32.mrb[201].mxu1 }
 0x55a   : > { %v5381_v33 = vpop.f32.mrb[202].mxu1 }
 0x55b   : > { %v7198_v49 = vpop.f32.mrb[203].mxu1 }
 0x560   : > { %v5506_v48 = vpop.f32.mrb[204].mxu1 }
 0x561   : > { %v5544_v18 = vadd.f32 %v5506_v48, %v5384_v42  ;;  %v7209_v8 = vpop.f32.mrb[205].mxu1 }
 0x562   : > { %v5509_v26 = vpop.f32.mrb[206].mxu1 }
 0x563   : > { %v5545_v17 = vadd.f32 %v5509_v26, %v5385_v40  ;;  %v7210_v12 = vpop.f32.mrb[207].mxu1 }
 0x568   : > { %v5514_v61 = vpop.f32.mrb[208].mxu1 }
 0x569   : > { %v5546_v24 = vadd.f32 %v5514_v61, %v5386_v41  ;;  %v7213_v37 = vpop.f32.mrb[209].mxu1 }
 0x56a   : > { %v5517_v11 = vpop.f32.mrb[210].mxu1 }
 0x56b   : > { %v5547_v36 = vadd.f32 %v5517_v11, %v5387_v54  ;;  %v7214_v7 = vpop.f32.mrb[211].mxu1 }
 0x570   : > { %v5522_v23 = vpop.f32.mrb[212].mxu1 }
 0x571   : > { %v5548_v47 = vadd.f32 %v5522_v23, %v5388_v58  ;;  %v7217_v38 = vpop.f32.mrb[213].mxu1 }
 0x572   : > { %v5525_v63 = vpop.f32.mrb[214].mxu1 }
 0x573   : > { %v5549_v62 = vadd.f32 %v5525_v63, %v5389_v44  ;;  %v7218_v5 = vpop.f32.mrb[215].mxu1 }
 0x578   : > { %v5530_v21 = vpop.f32.mrb[216].mxu1 }
 0x579   : > { %v5550_v32 = vadd.f32 %v5530_v21, %v5390_v52  ;;  %v7221_v39 = vpop.f32.mrb[217].mxu1 }
 0x57a   : > { %v5533_v31 = vpop.f32.mrb[218].mxu1 }
 0x57b   : > { %v5551_v27 = vadd.f32 %v5533_v31, %v5391_v6  ;;  %v7222_v43 = vpop.f32.mrb[219].mxu1 }
 0x580   : > { %v5538_v53 = vpop.f32.mrb[220].mxu1 }
 0x581   : > { %v9435_v35 = vadd.f32 %v5538_v53, %v5392_v2  ;;  %v7225_v30 = vpop.f32.mrb[221].mxu1 }
 0x582   : > { %v5541_v34 = vpop.f32.mrb[222].mxu1 }
 0x583   : > { %v7226_v55 = vpop.f32.mrb[223].mxu1 }
 0x588   : > { %v5648_v22 = vpop.f32.mrb[224].mxu1 }
 0x589   : > { %v5686_v20 = vadd.f32 %v5648_v22, %v5544_v18  ;;  %v7237_v1 = vpop.f32.mrb[225].mxu1 }
 0x58a   : > { %v5651_v14 = vpop.f32.mrb[226].mxu1 }
 0x58b   : > { %v5702_v46 = vadd.f32 %v9440_v28, %v5686_v20  ;;  %v5687_v59 = vadd.f32 %v5651_v14, %v5545_v17  ;;  %v7238_v42 = vpop.f32.mrb[227].mxu1 }
 0x58d   : > { %v5711_v56 = vmax.f32 %v5702_v46, 0.0  ;;  %v5703_v60 = vadd.f32 %v9440_v28, %v5687_v59 }
 0x58f   : > { %v6297_v40 = vpack.c.bf16 %v5711_v56, %v5711_v56  ;;  %v5712_v51 = vmax.f32 %v5703_v60, 0.0 }
 0x590   : > { %v5656_v4 = vpop.f32.mrb[228].mxu1 }
 0x591   : > { %5758 = vst.msk [vmem:[%s9448_s12] sm:$0xf] %vm5757_vm0, %v6297_v40  ;;  %v6298_v41 = vpack.c.bf16 %v5712_v51, %v5712_v51  ;;  %v5688_v25 = vadd.f32 %v5656_v4, %v5546_v24  ;;  %v7241_v15 = vpop.f32.mrb[229].mxu1 }
 0x592   : > { %v5659_v54 = vpop.f32.mrb[230].mxu1 }
 0x593   : > { %5759 = vst.msk [vmem:[%s9448_s12 + $0x4] sm:$0xf] %vm5757_vm0, %v6298_v41  ;;  %v5704_v0 = vadd.f32 %v9440_v28, %v5688_v25  ;;  %v5689_v29 = vadd.f32 %v5659_v54, %v5547_v36  ;;  %v7242_v58 = vpop.f32.mrb[231].mxu1 }
 0x595   : > { %v5713_v57 = vmax.f32 %v5704_v0, 0.0  ;;  %v5705_v19 = vadd.f32 %v9440_v28, %v5689_v29 }
 0x597   : > { %v6299_v44 = vpack.c.bf16 %v5713_v57, %v5713_v57  ;;  %v5714_v10 = vmax.f32 %v5705_v19, 0.0 }
 0x598   : > { %v5664_v50 = vpop.f32.mrb[232].mxu1 }
 0x599   : > { %5760 = vst.msk [vmem:[%s9448_s12 + $0x8] sm:$0xf] %vm5757_vm0, %v6299_v44  ;;  %v6300_v52 = vpack.c.bf16 %v5714_v10, %v5714_v10  ;;  %v5690_v16 = vadd.f32 %v5664_v50, %v5548_v47  ;;  %v7245_v45 = vpop.f32.mrb[233].mxu1 }
 0x59a   : > { %v5667_v6 = vpop.f32.mrb[234].mxu1 }
 0x59b   : > { %5761 = vst.msk [vmem:[%s9448_s12 + $0xc] sm:$0xf] %vm5757_vm0, %v6300_v52  ;;  %v5706_v9 = vadd.f32 %v9440_v28, %v5690_v16  ;;  %v5691_v3 = vadd.f32 %v5667_v6, %v5549_v62  ;;  %v7246_v2 = vpop.f32.mrb[235].mxu1 }
 0x59d   : > { %v5715_v13 = vmax.f32 %v5706_v9, 0.0  ;;  %v5707_v33 = vadd.f32 %v9440_v28, %v5691_v3 }
 0x59f   : > { %v6301_v49 = vpack.c.bf16 %v5715_v13, %v5715_v13  ;;  %v5716_v48 = vmax.f32 %v5707_v33, 0.0 }
 0x5a0   : > { %v5672_v18 = vpop.f32.mrb[236].mxu1 }
 0x5a1   : > { %5762 = vst.msk [vmem:[%s9448_s12 + $0x10] sm:$0xf] %vm5757_vm0, %v6301_v49  ;;  %v6302_v8 = vpack.c.bf16 %v5716_v48, %v5716_v48  ;;  %v5692_v26 = vadd.f32 %v5672_v18, %v5550_v32  ;;  %v7249_v17 = vpop.f32.mrb[237].mxu1 }
 0x5a2   : > { %v5675_v12 = vpop.f32.mrb[238].mxu1 }
 0x5a3   : > { %5763 = vst.msk [vmem:[%s9448_s12 + $0x14] sm:$0xf] %vm5757_vm0, %v6302_v8  ;;  %v5708_v61 = vadd.f32 %v9440_v28, %v5692_v26  ;;  %v5693_v24 = vadd.f32 %v5675_v12, %v5551_v27  ;;  %v7250_v37 = vpop.f32.mrb[239].mxu1 }
 0x5a5   : > { %v5717_v11 = vmax.f32 %v5708_v61, 0.0  ;;  %v5709_v36 = vadd.f32 %v9440_v28, %v5693_v24 }
 0x5a7   : > { %v6303_v7 = vpack.c.bf16 %v5717_v11, %v5717_v11  ;;  %v5718_v23 = vmax.f32 %v5709_v36, 0.0 }
 0x5a8   : > { %v5680_v47 = vpop.f32.mrb[240].mxu1 }
 0x5a9   : > { %5764 = vst.msk [vmem:[%s9448_s12 + $0x18] sm:$0xf] %vm5757_vm0, %v6303_v7  ;;  %v6304_v38 = vpack.c.bf16 %v5718_v23, %v5718_v23  ;;  %v5694_v63 = vadd.f32 %v5680_v47, %v9435_v35  ;;  %v7253_v62 = vpop.f32.mrb[241].mxu1 }
 0x5aa   : > { %v5683_v5 = vpop.f32.mrb[242].mxu1 }
 0x5ab   : > { %5765 = vst.msk [vmem:[%s9448_s12 + $0x1c] sm:$0xf] %vm5757_vm0, %v6304_v38  ;;  %v5710_v21 = vadd.f32 %v9440_v28, %v5694_v63  ;;  %v7254_v32 = vpop.f32.mrb[243].mxu1 }
 0x5ad   : > { %v5719_v39 = vmax.f32 %v5710_v21, 0.0 }
 0x5af   : > { %v6305_v31 = vpack.c.bf16 %v5719_v39, %v5719_v39 }
 0x5b1   : > { %5767 = vst.msk [vmem:[%s9448_s12 + $0x20] sm:$0x7] %vm5766_vm3, %v6305_v31 }
 0x5b2 PF: > { %s17_s24 = sadd.s32 1, %s7671_s24  }
 0x5b3   : > { %p14_p4 = scmp.ge.s32.totalorder %s17_s24, 4  }
 0x5b5   :  { %16 = sbr.rel (!%p14_p4) target bundleno = 1 (0x1), region = 101 }

// kernel: cnn_policy_forward.3
= control target key start
LH: loop header
LB: loop body
LE: loop exit
PB: predicated region body
PF: predicated region fallthrough
CT: control target
= control target key end

     0   :  { %s15502_s1 = inlined_call_operand.vmem [shape: bf16[4480,512], index: 1, kind: input, shape index: {}]   ;;  %s15503_s0 = inlined_call_operand.vmem [shape: bf16[8,4480], index: 0, kind: input, shape index: {}]   ;;  %s15504_s3 = inlined_call_operand.vmem [shape: bf16[512,128], index: 3, kind: input, shape index: {}]   ;;  %s15505_s2 = inlined_call_operand.vmem [shape: f32[1,512], index: 2, kind: input, shape index: {}]   ;;  %s15506_s4 = inlined_call_operand.vmem [shape: f32[1,128], index: 4, kind: input, shape index: {}]   ;;  %s15507_s5 = inlined_call_operand.vmem [shape: f32[8,128], index: 5, kind: output, shape index: {}]  }
   0x1   :  { %v10109_v0 = vld [vmem:[%s15502_s1 + $0x4] ss:$16 sps:$4 sm:$0xff]   ;;  %v10111_v1 = vld [vmem:[%s15502_s1 + $0xc] ss:$16 sps:$4 sm:$0xff]   ;;  %v10113_v2 = vld [vmem:[%s15502_s1] ss:$16 sps:$4 sm:$0xff]  }
   0x2   :  { %6904 = vmatprep.subr.bf16.mxu0 %v10109_v0  ;;  %v10114_v3 = vld [vmem:[%s15502_s1 + $0x8] ss:$16 sps:$4 sm:$0xff]   ;;  %7642 = vmatprep.subr.bf16.mxu1 %v10111_v1  ;;  %v10115_v4 = vld [vmem:[%s15502_s1 + $0x24] ss:$16 sps:$4 sm:$0xff]   ;;  %v10117_v5 = vld [vmem:[%s15502_s1 + $0x2c] ss:$16 sps:$4 sm:$0xff]  }
   0x3   :  { %6905 = vmatpush1.bf16.msra.mxu0 %v10113_v2  ;;  %7643 = vmatpush1.bf16.msra.mxu1 %v10114_v3  ;;  %v10119_v6 = vld [vmem:[%s15502_s1 + $0x20] ss:$16 sps:$4 sm:$0xff]   ;;  %v10120_v7 = vld [vmem:[%s15502_s1 + $0x28] ss:$16 sps:$4 sm:$0xff]   ;;  %v10121_v8 = vld [vmem:[%s15502_s1 + $0x44] ss:$16 sps:$4 sm:$0xff]  }
   0x4   :  { %6906 = vmatprep.subr.bf16.mxu0 %v10115_v4  ;;  %7644 = vmatprep.subr.bf16.mxu1 %v10117_v5  ;;  %v10123_v9 = vld [vmem:[%s15502_s1 + $0x4c] ss:$16 sps:$4 sm:$0xff]   ;;  %v10125_v10 = vld [vmem:[%s15502_s1 + $0x40] ss:$16 sps:$4 sm:$0xff]   ;;  %v10126_v11 = vld [vmem:[%s15502_s1 + $0x48] ss:$16 sps:$4 sm:$0xff]  }
   0x5   :  { %v10127_v12 = vld [vmem:[%s15502_s1 + $0x64] ss:$16 sps:$4 sm:$0xff]   ;;  %v10129_v13 = vld [vmem:[%s15502_s1 + $0x6c] ss:$16 sps:$4 sm:$0xff]   ;;  %v10131_v14 = vld [vmem:[%s15502_s1 + $0x60] ss:$16 sps:$4 sm:$0xff]  }
   0x6   :  { %v10132_v15 = vld [vmem:[%s15502_s1 + $0x68] ss:$16 sps:$4 sm:$0xff]   ;;  %v10133_v16 = vld [vmem:[%s15502_s1 + $0x84] ss:$16 sps:$4 sm:$0xff]   ;;  %v10135_v17 = vld [vmem:[%s15502_s1 + $0x8c] ss:$16 sps:$4 sm:$0xff]  }
   0x7   :  { %6907 = vmatpush1.bf16.msra.mxu0 %v10119_v6  ;;  %7645 = vmatpush1.bf16.msra.mxu1 %v10120_v7  ;;  %v10137_v18 = vld [vmem:[%s15502_s1 + $0x80] ss:$16 sps:$4 sm:$0xff]   ;;  %v10138_v19 = vld [vmem:[%s15502_s1 + $0x88] ss:$16 sps:$4 sm:$0xff]   ;;  %v10139_v20 = vld [vmem:[%s15502_s1 + $0xa4] ss:$16 sps:$4 sm:$0xff]  }
   0x8   :  { %6908 = vmatprep.subr.bf16.mxu0 %v10121_v8  ;;  %7646 = vmatprep.subr.bf16.mxu1 %v10123_v9  ;;  %v10141_v21 = vld [vmem:[%s15502_s1 + $0xac] ss:$16 sps:$4 sm:$0xff]   ;;  %v10143_v22 = vld [vmem:[%s15502_s1 + $0xa0] ss:$16 sps:$4 sm:$0xff]   ;;  %v10144_v23 = vld [vmem:[%s15502_s1 + $0xa8] ss:$16 sps:$4 sm:$0xff]  }
   0x9   :  { %v10145_v24 = vld [vmem:[%s15502_s1 + $0xc4] ss:$16 sps:$4 sm:$0xff]   ;;  %v10147_v25 = vld [vmem:[%s15502_s1 + $0xcc] ss:$16 sps:$4 sm:$0xff]   ;;  %v10149_v26 = vld [vmem:[%s15502_s1 + $0xc0] ss:$16 sps:$4 sm:$0xff]  }
   0xa   :  { %v10150_v27 = vld [vmem:[%s15502_s1 + $0xc8] ss:$16 sps:$4 sm:$0xff]   ;;  %v10151_v28 = vld [vmem:[%s15502_s1 + $0xe4] ss:$16 sps:$4 sm:$0xff]   ;;  %v10153_v29 = vld [vmem:[%s15502_s1 + $0xec] ss:$16 sps:$4 sm:$0xff]  }
   0xb   :  { %6909 = vmatpush1.bf16.msra.mxu0 %v10125_v10  ;;  %7647 = vmatpush1.bf16.msra.mxu1 %v10126_v11  ;;  %v10155_v30 = vld [vmem:[%s15502_s1 + $0xe0] ss:$16 sps:$4 sm:$0xff]   ;;  %v10156_v31 = vld [vmem:[%s15502_s1 + $0xe8] ss:$16 sps:$4 sm:$0xff]   ;;  %v10157_v32 = vld [vmem:[%s15502_s1 + $0x104] ss:$16 sps:$4 sm:$0xff]  }
   0xc   :  { %6910 = vmatprep.subr.bf16.mxu0 %v10127_v12  ;;  %7648 = vmatprep.subr.bf16.mxu1 %v10129_v13  ;;  %v10159_v33 = vld [vmem:[%s15502_s1 + $0x10c] ss:$16 sps:$4 sm:$0xff]   ;;  %v10161_v34 = vld [vmem:[%s15502_s1 + $0x100] ss:$16 sps:$4 sm:$0xff]   ;;  %v10162_v35 = vld [vmem:[%s15502_s1 + $0x108] ss:$16 sps:$4 sm:$0xff]  }
   0xd   :  { %v10163_v36 = vld [vmem:[%s15502_s1 + $0x124] ss:$16 sps:$4 sm:$0xff]   ;;  %v10165_v37 = vld [vmem:[%s15502_s1 + $0x12c] ss:$16 sps:$4 sm:$0xff]   ;;  %v10167_v38 = vld [vmem:[%s15502_s1 + $0x120] ss:$16 sps:$4 sm:$0xff]  }
   0xe   :  { %v10168_v39 = vld [vmem:[%s15502_s1 + $0x128] ss:$16 sps:$4 sm:$0xff]   ;;  %v10169_v40 = vld [vmem:[%s15502_s1 + $0x144] ss:$16 sps:$4 sm:$0xff]   ;;  %v10171_v41 = vld [vmem:[%s15502_s1 + $0x14c] ss:$16 sps:$4 sm:$0xff]  }
   0xf   :  { %6911 = vmatpush1.bf16.msra.mxu0 %v10131_v14  ;;  %7649 = vmatpush1.bf16.msra.mxu1 %v10132_v15  ;;  %v10173_v42 = vld [vmem:[%s15502_s1 + $0x140] ss:$16 sps:$4 sm:$0xff]   ;;  %v10174_v43 = vld [vmem:[%s15502_s1 + $0x148] ss:$16 sps:$4 sm:$0xff]   ;;  %v10175_v44 = vld [vmem:[%s15502_s1 + $0x164] ss:$16 sps:$4 sm:$0xff]  }
  0x10   :  { %6912 = vmatprep.subr.bf16.mxu0 %v10133_v16  ;;  %7650 = vmatprep.subr.bf16.mxu1 %v10135_v17  ;;  %v10177_v45 = vld [vmem:[%s15502_s1 + $0x16c] ss:$16 sps:$4 sm:$0xff]   ;;  %v21_v46 = vld [vmem:[%s15503_s0] sm:$0xff]  ;;  %v10180_v49 = vld [vmem:[%s15502_s1 + $0x168] ss:$16 sps:$4 sm:$0xff]  }
  0x11   :  { %v10179_v47 = vld [vmem:[%s15502_s1 + $0x160] ss:$16 sps:$4 sm:$0xff]   ;;  %v8737_v48 = vcombine.high %v21_v46, %v21_v46  ;;  %v10181_v50 = vld [vmem:[%s15502_s1 + $0x184] ss:$16 sps:$4 sm:$0xff]   ;;  %v10183_v51 = vld [vmem:[%s15502_s1 + $0x18c] ss:$16 sps:$4 sm:$0xff]   ;;  %v8736_v4 = vcombine.low %v21_v46, %v21_v46 }
  0x12   :  { %v10185_v52 = vld [vmem:[%s15502_s1 + $0x180] ss:$16 sps:$4 sm:$0xff]   ;;  %v10186_v53 = vld [vmem:[%s15502_s1 + $0x188] ss:$16 sps:$4 sm:$0xff]   ;;  %v10187_v54 = vld [vmem:[%s15502_s1 + $0x1a4] ss:$16 sps:$4 sm:$0xff]  }
  0x13   :  { %6913 = vmatpush1.bf16.msra.mxu0 %v10137_v18  ;;  %7651 = vmatpush1.bf16.msra.mxu1 %v10138_v19  ;;  %v10189_v55 = vld [vmem:[%s15502_s1 + $0x1ac] ss:$16 sps:$4 sm:$0xff]   ;;  %v10191_v56 = vld [vmem:[%s15502_s1 + $0x1a0] ss:$16 sps:$4 sm:$0xff]   ;;  %v10192_v57 = vld [vmem:[%s15502_s1 + $0x1a8] ss:$16 sps:$4 sm:$0xff]  }
  0x14   :  { %6914 = vmatprep.subr.bf16.mxu0 %v10139_v20  ;;  %7652 = vmatprep.subr.bf16.mxu1 %v10141_v21  ;;  %v10193_v58 = vld [vmem:[%s15502_s1 + $0x1c4] ss:$16 sps:$4 sm:$0xff]   ;;  %v10195_v59 = vld [vmem:[%s15502_s1 + $0x1cc] ss:$16 sps:$4 sm:$0xff]   ;;  %v10197_v60 = vld [vmem:[%s15502_s1 + $0x1c0] ss:$16 sps:$4 sm:$0xff]  }
  0x15   :  { %6936 = vmatprep.mubr.bf16.mxu0 %v8737_v48  ;;  %7674 = vmatprep.mubr.bf16.mxu1 %v8737_v48  ;;  %v10198_v61 = vld [vmem:[%s15502_s1 + $0x1c8] ss:$16 sps:$4 sm:$0xff]   ;;  %v10199_v62 = vld [vmem:[%s15502_s1 + $0x1e4] ss:$16 sps:$4 sm:$0xff]   ;;  %v10201_v63 = vld [vmem:[%s15502_s1 + $0x1ec] ss:$16 sps:$4 sm:$0xff]  }
  0x16   :  { %v10203_v0 = vld [vmem:[%s15502_s1 + $0x1e0] ss:$16 sps:$4 sm:$0xff]   ;;  %v10204_v1 = vld [vmem:[%s15502_s1 + $0x1e8] ss:$16 sps:$4 sm:$0xff]   ;;  %v10209_v2 = vld [vmem:[%s15502_s1 + $0x204] ss:$16 sps:$4 sm:$0xff]  }
  0x17   :  { %6915 = vmatpush1.bf16.msra.mxu0 %v10143_v22  ;;  %7653 = vmatpush1.bf16.msra.mxu1 %v10144_v23  ;;  %v10212_v3 = vld [vmem:[%s15502_s1 + $0x20c] ss:$16 sps:$4 sm:$0xff]   ;;  %v10207_v5 = vld [vmem:[%s15502_s1 + $0x200] ss:$16 sps:$4 sm:$0xff]   ;;  %v10210_v6 = vld [vmem:[%s15502_s1 + $0x208] ss:$16 sps:$4 sm:$0xff]  }
  0x18   :  { %6916 = vmatprep.subr.bf16.mxu0 %v10145_v24  ;;  %7654 = vmatprep.subr.bf16.mxu1 %v10147_v25  ;;  %v10215_v7 = vld [vmem:[%s15502_s1 + $0x224] ss:$16 sps:$4 sm:$0xff]   ;;  %v10218_v8 = vld [vmem:[%s15502_s1 + $0x22c] ss:$16 sps:$4 sm:$0xff]   ;;  %v10213_v9 = vld [vmem:[%s15502_s1 + $0x220] ss:$16 sps:$4 sm:$0xff]  }
  0x19   :  { %v10216_v10 = vld [vmem:[%s15502_s1 + $0x228] ss:$16 sps:$4 sm:$0xff]   ;;  %v10221_v11 = vld [vmem:[%s15502_s1 + $0x244] ss:$16 sps:$4 sm:$0xff]   ;;  %v10224_v12 = vld [vmem:[%s15502_s1 + $0x24c] ss:$16 sps:$4 sm:$0xff]  }
  0x1a   :  { %v10219_v13 = vld [vmem:[%s15502_s1 + $0x240] ss:$16 sps:$4 sm:$0xff]   ;;  %v10222_v14 = vld [vmem:[%s15502_s1 + $0x248] ss:$16 sps:$4 sm:$0xff]   ;;  %v10227_v15 = vld [vmem:[%s15502_s1 + $0x264] ss:$16 sps:$4 sm:$0xff]  }
  0x1b   :  { %6917 = vmatpush1.bf16.msra.mxu0 %v10149_v26  ;;  %7655 = vmatpush1.bf16.msra.mxu1 %v10150_v27  ;;  %v10230_v16 = vld [vmem:[%s15502_s1 + $0x26c] ss:$16 sps:$4 sm:$0xff]   ;;  %v10225_v17 = vld [vmem:[%s15502_s1 + $0x260] ss:$16 sps:$4 sm:$0xff]   ;;  %v10228_v18 = vld [vmem:[%s15502_s1 + $0x268] ss:$16 sps:$4 sm:$0xff]  }
  0x1c   :  { %6918 = vmatprep.subr.bf16.mxu0 %v10151_v28  ;;  %7656 = vmatprep.subr.bf16.mxu1 %v10153_v29  ;;  %v10233_v19 = vld [vmem:[%s15502_s1 + $0x284] ss:$16 sps:$4 sm:$0xff]   ;;  %v10236_v20 = vld [vmem:[%s15502_s1 + $0x28c] ss:$16 sps:$4 sm:$0xff]   ;;  %v10231_v21 = vld [vmem:[%s15502_s1 + $0x280] ss:$16 sps:$4 sm:$0xff]  }
  0x1d   :  { %v10234_v22 = vld [vmem:[%s15502_s1 + $0x288] ss:$16 sps:$4 sm:$0xff]   ;;  %v10239_v23 = vld [vmem:[%s15502_s1 + $0x2a4] ss:$16 sps:$4 sm:$0xff]   ;;  %v10242_v24 = vld [vmem:[%s15502_s1 + $0x2ac] ss:$16 sps:$4 sm:$0xff]  }
  0x1e   :  { %v10237_v25 = vld [vmem:[%s15502_s1 + $0x2a0] ss:$16 sps:$4 sm:$0xff]   ;;  %v10240_v26 = vld [vmem:[%s15502_s1 + $0x2a8] ss:$16 sps:$4 sm:$0xff]   ;;  %v10245_v27 = vld [vmem:[%s15502_s1 + $0x2c4] ss:$16 sps:$4 sm:$0xff]  }
  0x1f   :  { %6919 = vmatpush1.bf16.msra.mxu0 %v10155_v30  ;;  %7657 = vmatpush1.bf16.msra.mxu1 %v10156_v31  ;;  %v10248_v28 = vld [vmem:[%s15502_s1 + $0x2cc] ss:$16 sps:$4 sm:$0xff]   ;;  %v10243_v31 = vld [vmem:[%s15502_s1 + $0x2c0] ss:$16 sps:$4 sm:$0xff]   ;;  %v10270_v48 = vld [vmem:[%s15502_s1 + $0x348] ss:$16 sps:$4 sm:$0xff]  }
  0x20   :  { %6920 = vmatprep.subr.bf16.mxu0 %v10157_v32  ;;  %7658 = vmatprep.subr.bf16.mxu1 %v10159_v33  ;;  %v12163_v29 = vld [vmem:[%s15503_s0 + $0x8] sm:$0xff]  ;;  %v10251_v33 = vld [vmem:[%s15502_s1 + $0x2e4] ss:$16 sps:$4 sm:$0xff]  }
  0x21   :  { %v8739_v30 = vcombine.high %v12163_v29, %v12163_v29  ;;  %v10246_v32 = vld [vmem:[%s15502_s1 + $0x2c8] ss:$16 sps:$4 sm:$0xff]   ;;  %v10272_v46 = vld [vmem:[%s15502_s1 + $0x34c] ss:$16 sps:$4 sm:$0xff]  }
  0x23   :  { %6921 = vmatpush1.bf16.msra.mxu0 %v10161_v34  ;;  %7659 = vmatpush1.bf16.msra.mxu1 %v10162_v35  ;;  %v10254_v34 = vld [vmem:[%s15502_s1 + $0x2ec] ss:$16 sps:$4 sm:$0xff]   ;;  %v10249_v35 = vld [vmem:[%s15502_s1 + $0x2e0] ss:$16 sps:$4 sm:$0xff]  }
  0x24   :  { %6922 = vmatprep.subr.bf16.mxu0 %v10163_v36  ;;  %7660 = vmatprep.subr.bf16.mxu1 %v10165_v37  ;;  %v10252_v36 = vld [vmem:[%s15502_s1 + $0x2e8] ss:$16 sps:$4 sm:$0xff]   ;;  %v10257_v37 = vld [vmem:[%s15502_s1 + $0x304] ss:$16 sps:$4 sm:$0xff]  }
  0x27   :  { %6923 = vmatpush1.bf16.msra.mxu0 %v10167_v38  ;;  %7661 = vmatpush1.bf16.msra.mxu1 %v10168_v39  ;;  %v10260_v38 = vld [vmem:[%s15502_s1 + $0x30c] ss:$16 sps:$4 sm:$0xff]   ;;  %v10255_v39 = vld [vmem:[%s15502_s1 + $0x300] ss:$16 sps:$4 sm:$0xff]  }
  0x28   :  { %6924 = vmatprep.subr.bf16.mxu0 %v10169_v40  ;;  %7662 = vmatprep.subr.bf16.mxu1 %v10171_v41  ;;  %v10258_v40 = vld [vmem:[%s15502_s1 + $0x308] ss:$16 sps:$4 sm:$0xff]   ;;  %v10263_v41 = vld [vmem:[%s15502_s1 + $0x324] ss:$16 sps:$4 sm:$0xff]  }
  0x2b   :  { %6925 = vmatpush1.bf16.msra.mxu0 %v10173_v42  ;;  %7663 = vmatpush1.bf16.msra.mxu1 %v10174_v43  ;;  %v10266_v42 = vld [vmem:[%s15502_s1 + $0x32c] ss:$16 sps:$4 sm:$0xff]   ;;  %v10261_v43 = vld [vmem:[%s15502_s1 + $0x320] ss:$16 sps:$4 sm:$0xff]  }
  0x2c   :  { %6926 = vmatprep.subr.bf16.mxu0 %v10175_v44  ;;  %7664 = vmatprep.subr.bf16.mxu1 %v10177_v45  ;;  %v10264_v44 = vld [vmem:[%s15502_s1 + $0x328] ss:$16 sps:$4 sm:$0xff]   ;;  %v10269_v45 = vld [vmem:[%s15502_s1 + $0x344] ss:$16 sps:$4 sm:$0xff]  }
  0x2f   :  { %6927 = vmatpush1.bf16.msra.mxu0 %v10179_v47  ;;  %7665 = vmatpush1.bf16.msra.mxu1 %v10180_v49  ;;  %v10267_v47 = vld [vmem:[%s15502_s1 + $0x340] ss:$16 sps:$4 sm:$0xff]   ;;  %v10275_v49 = vld [vmem:[%s15502_s1 + $0x364] ss:$16 sps:$4 sm:$0xff]  }
  0x30   :  { %6928 = vmatprep.subr.bf16.mxu0 %v10181_v50  ;;  %7666 = vmatprep.subr.bf16.mxu1 %v10183_v51  ;;  %v10278_v50 = vld [vmem:[%s15502_s1 + $0x36c] ss:$16 sps:$4 sm:$0xff]   ;;  %v10273_v51 = vld [vmem:[%s15502_s1 + $0x360] ss:$16 sps:$4 sm:$0xff]  }
  0x33   :  { %6929 = vmatpush1.bf16.msra.mxu0 %v10185_v52  ;;  %7667 = vmatpush1.bf16.msra.mxu1 %v10186_v53  ;;  %v10276_v52 = vld [vmem:[%s15502_s1 + $0x368] ss:$16 sps:$4 sm:$0xff]   ;;  %v10281_v53 = vld [vmem:[%s15502_s1 + $0x384] ss:$16 sps:$4 sm:$0xff]  }
  0x34   :  { %6930 = vmatprep.subr.bf16.mxu0 %v10187_v54  ;;  %7668 = vmatprep.subr.bf16.mxu1 %v10189_v55  ;;  %v10284_v54 = vld [vmem:[%s15502_s1 + $0x38c] ss:$16 sps:$4 sm:$0xff]   ;;  %v10279_v55 = vld [vmem:[%s15502_s1 + $0x380] ss:$16 sps:$4 sm:$0xff]  }
  0x37   :  { %6931 = vmatpush1.bf16.msra.mxu0 %v10191_v56  ;;  %7669 = vmatpush1.bf16.msra.mxu1 %v10192_v57  ;;  %v10282_v56 = vld [vmem:[%s15502_s1 + $0x388] ss:$16 sps:$4 sm:$0xff]   ;;  %v10287_v57 = vld [vmem:[%s15502_s1 + $0x3a4] ss:$16 sps:$4 sm:$0xff]  }
  0x38   :  { %6932 = vmatprep.subr.bf16.mxu0 %v10193_v58  ;;  %7670 = vmatprep.subr.bf16.mxu1 %v10195_v59  ;;  %v10290_v58 = vld [vmem:[%s15502_s1 + $0x3ac] ss:$16 sps:$4 sm:$0xff]   ;;  %v10285_v59 = vld [vmem:[%s15502_s1 + $0x3a0] ss:$16 sps:$4 sm:$0xff]  }
  0x3b   :  { %6933 = vmatpush1.bf16.msra.mxu0 %v10197_v60  ;;  %7671 = vmatpush1.bf16.msra.mxu1 %v10198_v61  ;;  %v10288_v60 = vld [vmem:[%s15502_s1 + $0x3a8] ss:$16 sps:$4 sm:$0xff]   ;;  %v10293_v61 = vld [vmem:[%s15502_s1 + $0x3c4] ss:$16 sps:$4 sm:$0xff]  }
  0x3c   :  { %6934 = vmatprep.subr.bf16.mxu0 %v10199_v62  ;;  %7672 = vmatprep.subr.bf16.mxu1 %v10201_v63  ;;  %v10296_v62 = vld [vmem:[%s15502_s1 + $0x3cc] ss:$16 sps:$4 sm:$0xff]   ;;  %v10291_v63 = vld [vmem:[%s15502_s1 + $0x3c0] ss:$16 sps:$4 sm:$0xff]  }
  0x3f   :  { %6935 = vmatpush1.bf16.msra.mxu0 %v10203_v0  ;;  %7673 = vmatpush1.bf16.msra.mxu1 %v10204_v1  ;;  %v10294_v0 = vld [vmem:[%s15502_s1 + $0x3c8] ss:$16 sps:$4 sm:$0xff]   ;;  %v10299_v1 = vld [vmem:[%s15502_s1 + $0x3e4] ss:$16 sps:$4 sm:$0xff]  }
  0x40   :  { %6945 = vmatprep.subr.bf16.mxu0 %v10209_v2  ;;  %7683 = vmatprep.subr.bf16.mxu1 %v10212_v3  ;;  %v10302_v2 = vld [vmem:[%s15502_s1 + $0x3ec] ss:$16 sps:$4 sm:$0xff]   ;;  %v10297_v3 = vld [vmem:[%s15502_s1 + $0x3e0] ss:$16 sps:$4 sm:$0xff]  }
  0x42   :  { %6937 = vmatmul.mubr.bf16.vlgmr.msra.gmra.mrb[0].mxu0 %v8736_v4  ;;  %7675 = vmatmul.mubr.bf16.vlgmr.msra.gmra.mrb[0].mxu1 %v8736_v4  ;;  %v10300_v4 = vld [vmem:[%s15502_s1 + $0x3e8] ss:$16 sps:$4 sm:$0xff]  }
  0x43   :  { %6946 = vmatpush1.bf16.msra.mxu0 %v10207_v5  ;;  %7684 = vmatpush1.bf16.msra.mxu1 %v10210_v6  ;;  %v10307_v5 = vld [vmem:[%s15502_s1 + $0x404] ss:$16 sps:$4 sm:$0xff]   ;;  %v10310_v6 = vld [vmem:[%s15502_s1 + $0x40c] ss:$16 sps:$4 sm:$0xff]  }
  0x44   :  { %6947 = vmatprep.subr.bf16.mxu0 %v10215_v7  ;;  %7685 = vmatprep.subr.bf16.mxu1 %v10218_v8  ;;  %v8738_v7 = vcombine.low %v12163_v29, %v12163_v29  ;;  %v10305_v8 = vld [vmem:[%s15502_s1 + $0x400] ss:$16 sps:$4 sm:$0xff]   ;;  %v10340_v29 = vld [vmem:[%s15502_s1 + $0x4ac] ss:$16 sps:$4 sm:$0xff]  }
  0x45   :  { %6977 = vmatprep.mubr.bf16.mxu0 %v8739_v30  ;;  %7715 = vmatprep.mubr.bf16.mxu1 %v8739_v30  ;;  %v10335_v30 = vld [vmem:[%s15502_s1 + $0x4a0] ss:$16 sps:$4 sm:$0xff]  }
  0x47   :  { %6948 = vmatpush1.bf16.msra.mxu0 %v10213_v9  ;;  %7686 = vmatpush1.bf16.msra.mxu1 %v10216_v10  ;;  %v10308_v9 = vld [vmem:[%s15502_s1 + $0x408] ss:$16 sps:$4 sm:$0xff]   ;;  %v10313_v10 = vld [vmem:[%s15502_s1 + $0x424] ss:$16 sps:$4 sm:$0xff]  }
  0x48   :  { %6949 = vmatprep.subr.bf16.mxu0 %v10221_v11  ;;  %7687 = vmatprep.subr.bf16.mxu1 %v10224_v12  ;;  %v12301_v11 = vld [vmem:[%s15503_s0 + $0x10] sm:$0xff]  ;;  %v10316_v12 = vld [vmem:[%s15502_s1 + $0x42c] ss:$16 sps:$4 sm:$0xff]  }
  0x4b   :  { %6950 = vmatpush1.bf16.msra.mxu0 %v10219_v13  ;;  %7688 = vmatpush1.bf16.msra.mxu1 %v10222_v14  ;;  %v8741_v13 = vcombine.high %v12301_v11, %v12301_v11  ;;  %v10311_v14 = vld [vmem:[%s15502_s1 + $0x420] ss:$16 sps:$4 sm:$0xff]  }
  0x4c   :  { %6951 = vmatprep.subr.bf16.mxu0 %v10227_v15  ;;  %7689 = vmatprep.subr.bf16.mxu1 %v10230_v16  ;;  %v10314_v15 = vld [vmem:[%s15502_s1 + $0x428] ss:$16 sps:$4 sm:$0xff]   ;;  %v10319_v16 = vld [vmem:[%s15502_s1 + $0x444] ss:$16 sps:$4 sm:$0xff]  }
  0x4f   :  { %6952 = vmatpush1.bf16.msra.mxu0 %v10225_v17  ;;  %7690 = vmatpush1.bf16.msra.mxu1 %v10228_v18  ;;  %v10322_v17 = vld [vmem:[%s15502_s1 + $0x44c] ss:$16 sps:$4 sm:$0xff]   ;;  %v10317_v18 = vld [vmem:[%s15502_s1 + $0x440] ss:$16 sps:$4 sm:$0xff]  }
  0x50   :  { %6953 = vmatprep.subr.bf16.mxu0 %v10233_v19  ;;  %7691 = vmatprep.subr.bf16.mxu1 %v10236_v20  ;;  %v10320_v19 = vld [vmem:[%s15502_s1 + $0x448] ss:$16 sps:$4 sm:$0xff]   ;;  %v10325_v20 = vld [vmem:[%s15502_s1 + $0x464] ss:$16 sps:$4 sm:$0xff]  }
  0x53   :  { %6954 = vmatpush1.bf16.msra.mxu0 %v10231_v21  ;;  %7692 = vmatpush1.bf16.msra.mxu1 %v10234_v22  ;;  %v10328_v21 = vld [vmem:[%s15502_s1 + $0x46c] ss:$16 sps:$4 sm:$0xff]   ;;  %v10323_v22 = vld [vmem:[%s15502_s1 + $0x460] ss:$16 sps:$4 sm:$0xff]  }
  0x54   :  { %6955 = vmatprep.subr.bf16.mxu0 %v10239_v23  ;;  %7693 = vmatprep.subr.bf16.mxu1 %v10242_v24  ;;  %v10326_v23 = vld [vmem:[%s15502_s1 + $0x468] ss:$16 sps:$4 sm:$0xff]   ;;  %v10331_v24 = vld [vmem:[%s15502_s1 + $0x484] ss:$16 sps:$4 sm:$0xff]  }
  0x57   :  { %6956 = vmatpush1.bf16.msra.mxu0 %v10237_v25  ;;  %7694 = vmatpush1.bf16.msra.mxu1 %v10240_v26  ;;  %v10334_v25 = vld [vmem:[%s15502_s1 + $0x48c] ss:$16 sps:$4 sm:$0xff]   ;;  %v10329_v26 = vld [vmem:[%s15502_s1 + $0x480] ss:$16 sps:$4 sm:$0xff]  }
  0x58   :  { %6957 = vmatprep.subr.bf16.mxu0 %v10245_v27  ;;  %7695 = vmatprep.subr.bf16.mxu1 %v10248_v28  ;;  %v10332_v27 = vld [vmem:[%s15502_s1 + $0x488] ss:$16 sps:$4 sm:$0xff]   ;;  %v10337_v28 = vld [vmem:[%s15502_s1 + $0x4a4] ss:$16 sps:$4 sm:$0xff]  }
  0x5b   :  { %6958 = vmatpush1.bf16.msra.mxu0 %v10243_v31  ;;  %7696 = vmatpush1.bf16.msra.mxu1 %v10246_v32  ;;  %v10338_v31 = vld [vmem:[%s15502_s1 + $0x4a8] ss:$16 sps:$4 sm:$0xff]   ;;  %v10343_v32 = vld [vmem:[%s15502_s1 + $0x4c4] ss:$16 sps:$4 sm:$0xff]  }
  0x5c   :  { %6959 = vmatprep.subr.bf16.mxu0 %v10251_v33  ;;  %7697 = vmatprep.subr.bf16.mxu1 %v10254_v34  ;;  %v10346_v33 = vld [vmem:[%s15502_s1 + $0x4cc] ss:$16 sps:$4 sm:$0xff]   ;;  %v10341_v34 = vld [vmem:[%s15502_s1 + $0x4c0] ss:$16 sps:$4 sm:$0xff]  }
  0x5f   :  { %6960 = vmatpush1.bf16.msra.mxu0 %v10249_v35  ;;  %7698 = vmatpush1.bf16.msra.mxu1 %v10252_v36  ;;  %v10344_v35 = vld [vmem:[%s15502_s1 + $0x4c8] ss:$16 sps:$4 sm:$0xff]   ;;  %v10349_v36 = vld [vmem:[%s15502_s1 + $0x4e4] ss:$16 sps:$4 sm:$0xff]  }
  0x60   :  { %6961 = vmatprep.subr.bf16.mxu0 %v10257_v37  ;;  %7699 = vmatprep.subr.bf16.mxu1 %v10260_v38  ;;  %v10352_v37 = vld [vmem:[%s15502_s1 + $0x4ec] ss:$16 sps:$4 sm:$0xff]   ;;  %v10347_v38 = vld [vmem:[%s15502_s1 + $0x4e0] ss:$16 sps:$4 sm:$0xff]  }
  0x63   :  { %6962 = vmatpush1.bf16.msra.mxu0 %v10255_v39  ;;  %7700 = vmatpush1.bf16.msra.mxu1 %v10258_v40  ;;  %v10350_v39 = vld [vmem:[%s15502_s1 + $0x4e8] ss:$16 sps:$4 sm:$0xff]   ;;  %v10355_v40 = vld [vmem:[%s15502_s1 + $0x504] ss:$16 sps:$4 sm:$0xff]  }
  0x64   :  { %6963 = vmatprep.subr.bf16.mxu0 %v10263_v41  ;;  %7701 = vmatprep.subr.bf16.mxu1 %v10266_v42  ;;  %v10358_v41 = vld [vmem:[%s15502_s1 + $0x50c] ss:$16 sps:$4 sm:$0xff]   ;;  %v10353_v42 = vld [vmem:[%s15502_s1 + $0x500] ss:$16 sps:$4 sm:$0xff]  }
  0x67   :  { %6964 = vmatpush1.bf16.msra.mxu0 %v10261_v43  ;;  %7702 = vmatpush1.bf16.msra.mxu1 %v10264_v44  ;;  %v10356_v43 = vld [vmem:[%s15502_s1 + $0x508] ss:$16 sps:$4 sm:$0xff]   ;;  %v10361_v44 = vld [vmem:[%s15502_s1 + $0x524] ss:$16 sps:$4 sm:$0xff]  }
  0x68   :  { %6965 = vmatprep.subr.bf16.mxu0 %v10269_v45  ;;  %7703 = vmatprep.subr.bf16.mxu1 %v10272_v46  ;;  %v10364_v45 = vld [vmem:[%s15502_s1 + $0x52c] ss:$16 sps:$4 sm:$0xff]   ;;  %v10359_v46 = vld [vmem:[%s15502_s1 + $0x520] ss:$16 sps:$4 sm:$0xff]  }
  0x6b   :  { %6966 = vmatpush1.bf16.msra.mxu0 %v10267_v47  ;;  %7704 = vmatpush1.bf16.msra.mxu1 %v10270_v48  ;;  %v10362_v47 = vld [vmem:[%s15502_s1 + $0x528] ss:$16 sps:$4 sm:$0xff]   ;;  %v10367_v48 = vld [vmem:[%s15502_s1 + $0x544] ss:$16 sps:$4 sm:$0xff]  }
  0x6c   :  { %6967 = vmatprep.subr.bf16.mxu0 %v10275_v49  ;;  %7705 = vmatprep.subr.bf16.mxu1 %v10278_v50  ;;  %v10370_v49 = vld [vmem:[%s15502_s1 + $0x54c] ss:$16 sps:$4 sm:$0xff]   ;;  %v10365_v50 = vld [vmem:[%s15502_s1 + $0x540] ss:$16 sps:$4 sm:$0xff]  }
  0x6f   :  { %6968 = vmatpush1.bf16.msra.mxu0 %v10273_v51  ;;  %7706 = vmatpush1.bf16.msra.mxu1 %v10276_v52  ;;  %v10368_v51 = vld [vmem:[%s15502_s1 + $0x548] ss:$16 sps:$4 sm:$0xff]   ;;  %v10373_v52 = vld [vmem:[%s15502_s1 + $0x564] ss:$16 sps:$4 sm:$0xff]  }
  0x70   :  { %6969 = vmatprep.subr.bf16.mxu0 %v10281_v53  ;;  %7707 = vmatprep.subr.bf16.mxu1 %v10284_v54  ;;  %v10376_v53 = vld [vmem:[%s15502_s1 + $0x56c] ss:$16 sps:$4 sm:$0xff]   ;;  %v10371_v54 = vld [vmem:[%s15502_s1 + $0x560] ss:$16 sps:$4 sm:$0xff]  }
  0x73   :  { %6970 = vmatpush1.bf16.msra.mxu0 %v10279_v55  ;;  %7708 = vmatpush1.bf16.msra.mxu1 %v10282_v56  ;;  %v10374_v55 = vld [vmem:[%s15502_s1 + $0x568] ss:$16 sps:$4 sm:$0xff]   ;;  %v10379_v56 = vld [vmem:[%s15502_s1 + $0x584] ss:$16 sps:$4 sm:$0xff]  }
  0x74   :  { %6971 = vmatprep.subr.bf16.mxu0 %v10287_v57  ;;  %7709 = vmatprep.subr.bf16.mxu1 %v10290_v58  ;;  %v10382_v57 = vld [vmem:[%s15502_s1 + $0x58c] ss:$16 sps:$4 sm:$0xff]   ;;  %v10377_v58 = vld [vmem:[%s15502_s1 + $0x580] ss:$16 sps:$4 sm:$0xff]  }
  0x77   :  { %6972 = vmatpush1.bf16.msra.mxu0 %v10285_v59  ;;  %7710 = vmatpush1.bf16.msra.mxu1 %v10288_v60  ;;  %v10380_v59 = vld [vmem:[%s15502_s1 + $0x588] ss:$16 sps:$4 sm:$0xff]   ;;  %v10385_v60 = vld [vmem:[%s15502_s1 + $0x5a4] ss:$16 sps:$4 sm:$0xff]  }
  0x78   :  { %6973 = vmatprep.subr.bf16.mxu0 %v10293_v61  ;;  %7711 = vmatprep.subr.bf16.mxu1 %v10296_v62  ;;  %v10388_v61 = vld [vmem:[%s15502_s1 + $0x5ac] ss:$16 sps:$4 sm:$0xff]   ;;  %v10383_v62 = vld [vmem:[%s15502_s1 + $0x5a0] ss:$16 sps:$4 sm:$0xff]  }
  0x7b   :  { %6974 = vmatpush1.bf16.msra.mxu0 %v10291_v63  ;;  %7712 = vmatpush1.bf16.msra.mxu1 %v10294_v0  ;;  %v10386_v63 = vld [vmem:[%s15502_s1 + $0x5a8] ss:$16 sps:$4 sm:$0xff]   ;;  %v10391_v0 = vld [vmem:[%s15502_s1 + $0x5c4] ss:$16 sps:$4 sm:$0xff]  }
  0x7c   :  { %6975 = vmatprep.subr.bf16.mxu0 %v10299_v1  ;;  %7713 = vmatprep.subr.bf16.mxu1 %v10302_v2  ;;  %v10394_v1 = vld [vmem:[%s15502_s1 + $0x5cc] ss:$16 sps:$4 sm:$0xff]   ;;  %v10389_v2 = vld [vmem:[%s15502_s1 + $0x5c0] ss:$16 sps:$4 sm:$0xff]  }
  0x7f   :  { %6976 = vmatpush1.bf16.msra.mxu0 %v10297_v3  ;;  %7714 = vmatpush1.bf16.msra.mxu1 %v10300_v4  ;;  %v10392_v3 = vld [vmem:[%s15502_s1 + $0x5c8] ss:$16 sps:$4 sm:$0xff]   ;;  %v10397_v4 = vld [vmem:[%s15502_s1 + $0x5e4] ss:$16 sps:$4 sm:$0xff]  }
  0x80   :  { %6986 = vmatprep.subr.bf16.mxu0 %v10307_v5  ;;  %7724 = vmatprep.subr.bf16.mxu1 %v10310_v6  ;;  %v10400_v5 = vld [vmem:[%s15502_s1 + $0x5ec] ss:$16 sps:$4 sm:$0xff]   ;;  %v10395_v6 = vld [vmem:[%s15502_s1 + $0x5e0] ss:$16 sps:$4 sm:$0xff]  }
  0x82   :  { %6978 = vmatmul.mubr.bf16.vlgmr.msra.gmra.mrb[0].mxu0 %v8738_v7  ;;  %7716 = vmatmul.mubr.bf16.vlgmr.msra.gmra.mrb[0].mxu1 %v8738_v7  ;;  %v10398_v7 = vld [vmem:[%s15502_s1 + $0x5e8] ss:$16 sps:$4 sm:$0xff]  }
  0x83   :  { %6987 = vmatpush1.bf16.msra.mxu0 %v10305_v8  ;;  %7725 = vmatpush1.bf16.msra.mxu1 %v10308_v9  ;;  %v10405_v8 = vld [vmem:[%s15502_s1 + $0x604] ss:$16 sps:$4 sm:$0xff]   ;;  %v10408_v9 = vld [vmem:[%s15502_s1 + $0x60c] ss:$16 sps:$4 sm:$0xff]  }
  0x84   :  { %6988 = vmatprep.subr.bf16.mxu0 %v10313_v10  ;;  %7726 = vmatprep.subr.bf16.mxu1 %v10316_v12  ;;  %v10403_v10 = vld [vmem:[%s15502_s1 + $0x600] ss:$16 sps:$4 sm:$0xff]   ;;  %v8740_v12 = vcombine.low %v12301_v11, %v12301_v11  ;;  %v10414_v11 = vld [vmem:[%s15502_s1 + $0x62c] ss:$16 sps:$4 sm:$0xff]  }
  0x85   :  { %7018 = vmatprep.mubr.bf16.mxu0 %v8741_v13  ;;  %7756 = vmatprep.mubr.bf16.mxu1 %v8741_v13  ;;  %v10406_v13 = vld [vmem:[%s15502_s1 + $0x608] ss:$16 sps:$4 sm:$0xff]  }
  0x87   :  { %6989 = vmatpush1.bf16.msra.mxu0 %v10311_v14  ;;  %7727 = vmatpush1.bf16.msra.mxu1 %v10314_v15  ;;  %v12499_v14 = vld [vmem:[%s15503_s0 + $0x18] sm:$0xff]  ;;  %v10411_v15 = vld [vmem:[%s15502_s1 + $0x624] ss:$16 sps:$4 sm:$0xff]  }
  0x88   :  { %6990 = vmatprep.subr.bf16.mxu0 %v10319_v16  ;;  %7728 = vmatprep.subr.bf16.mxu1 %v10322_v17  ;;  %v8743_v16 = vcombine.high %v12499_v14, %v12499_v14  ;;  %v10409_v17 = vld [vmem:[%s15502_s1 + $0x620] ss:$16 sps:$4 sm:$0xff]  }
  0x8b   :  { %6991 = vmatpush1.bf16.msra.mxu0 %v10317_v18  ;;  %7729 = vmatpush1.bf16.msra.mxu1 %v10320_v19  ;;  %v10412_v18 = vld [vmem:[%s15502_s1 + $0x628] ss:$16 sps:$4 sm:$0xff]   ;;  %v10417_v19 = vld [vmem:[%s15502_s1 + $0x644] ss:$16 sps:$4 sm:$0xff]  }
  0x8c   :  { %6992 = vmatprep.subr.bf16.mxu0 %v10325_v20  ;;  %7730 = vmatprep.subr.bf16.mxu1 %v10328_v21  ;;  %v10420_v20 = vld [vmem:[%s15502_s1 + $0x64c] ss:$16 sps:$4 sm:$0xff]   ;;  %v10415_v21 = vld [vmem:[%s15502_s1 + $0x640] ss:$16 sps:$4 sm:$0xff]  }
  0x8f   :  { %6993 = vmatpush1.bf16.msra.mxu0 %v10323_v22  ;;  %7731 = vmatpush1.bf16.msra.mxu1 %v10326_v23  ;;  %v10418_v22 = vld [vmem:[%s15502_s1 + $0x648] ss:$16 sps:$4 sm:$0xff]   ;;  %v10423_v23 = vld [vmem:[%s15502_s1 + $0x664] ss:$16 sps:$4 sm:$0xff]  }
  0x90   :  { %6994 = vmatprep.subr.bf16.mxu0 %v10331_v24  ;;  %7732 = vmatprep.subr.bf16.mxu1 %v10334_v25  ;;  %v10426_v24 = vld [vmem:[%s15502_s1 + $0x66c] ss:$16 sps:$4 sm:$0xff]   ;;  %v10421_v25 = vld [vmem:[%s15502_s1 + $0x660] ss:$16 sps:$4 sm:$0xff]  }
  0x93   :  { %6995 = vmatpush1.bf16.msra.mxu0 %v10329_v26  ;;  %7733 = vmatpush1.bf16.msra.mxu1 %v10332_v27  ;;  %v10424_v26 = vld [vmem:[%s15502_s1 + $0x668] ss:$16 sps:$4 sm:$0xff]   ;;  %v10429_v27 = vld [vmem:[%s15502_s1 + $0x684] ss:$16 sps:$4 sm:$0xff]  }
  0x94   :  { %6996 = vmatprep.subr.bf16.mxu0 %v10337_v28  ;;  %7734 = vmatprep.subr.bf16.mxu1 %v10340_v29  ;;  %v10432_v28 = vld [vmem:[%s15502_s1 + $0x68c] ss:$16 sps:$4 sm:$0xff]   ;;  %v10427_v29 = vld [vmem:[%s15502_s1 + $0x680] ss:$16 sps:$4 sm:$0xff]  }
  0x97   :  { %6997 = vmatpush1.bf16.msra.mxu0 %v10335_v30  ;;  %7735 = vmatpush1.bf16.msra.mxu1 %v10338_v31  ;;  %v10430_v30 = vld [vmem:[%s15502_s1 + $0x688] ss:$16 sps:$4 sm:$0xff]   ;;  %v10435_v31 = vld [vmem:[%s15502_s1 + $0x6a4] ss:$16 sps:$4 sm:$0xff]  }
  0x98   :  { %6998 = vmatprep.subr.bf16.mxu0 %v10343_v32  ;;  %7736 = vmatprep.subr.bf16.mxu1 %v10346_v33  ;;  %v10438_v32 = vld [vmem:[%s15502_s1 + $0x6ac] ss:$16 sps:$4 sm:$0xff]   ;;  %v10433_v33 = vld [vmem:[%s15502_s1 + $0x6a0] ss:$16 sps:$4 sm:$0xff]  }
  0x9b   :  { %6999 = vmatpush1.bf16.msra.mxu0 %v10341_v34  ;;  %7737 = vmatpush1.bf16.msra.mxu1 %v10344_v35  ;;  %v10436_v34 = vld [vmem:[%s15502_s1 + $0x6a8] ss:$16 sps:$4 sm:$0xff]   ;;  %v10441_v35 = vld [vmem:[%s15502_s1 + $0x6c4] ss:$16 sps:$4 sm:$0xff]  }
  0x9c   :  { %7000 = vmatprep.subr.bf16.mxu0 %v10349_v36  ;;  %7738 = vmatprep.subr.bf16.mxu1 %v10352_v37  ;;  %v10444_v36 = vld [vmem:[%s15502_s1 + $0x6cc] ss:$16 sps:$4 sm:$0xff]   ;;  %v10439_v37 = vld [vmem:[%s15502_s1 + $0x6c0] ss:$16 sps:$4 sm:$0xff]  }
  0x9f   :  { %7001 = vmatpush1.bf16.msra.mxu0 %v10347_v38  ;;  %7739 = vmatpush1.bf16.msra.mxu1 %v10350_v39  ;;  %v10442_v38 = vld [vmem:[%s15502_s1 + $0x6c8] ss:$16 sps:$4 sm:$0xff]   ;;  %v10447_v39 = vld [vmem:[%s15502_s1 + $0x6e4] ss:$16 sps:$4 sm:$0xff]  }
  0xa0   :  { %7002 = vmatprep.subr.bf16.mxu0 %v10355_v40  ;;  %7740 = vmatprep.subr.bf16.mxu1 %v10358_v41  ;;  %v10450_v40 = vld [vmem:[%s15502_s1 + $0x6ec] ss:$16 sps:$4 sm:$0xff]   ;;  %v10445_v41 = vld [vmem:[%s15502_s1 + $0x6e0] ss:$16 sps:$4 sm:$0xff]  }
  0xa3   :  { %7003 = vmatpush1.bf16.msra.mxu0 %v10353_v42  ;;  %7741 = vmatpush1.bf16.msra.mxu1 %v10356_v43  ;;  %v10448_v42 = vld [vmem:[%s15502_s1 + $0x6e8] ss:$16 sps:$4 sm:$0xff]   ;;  %v10453_v43 = vld [vmem:[%s15502_s1 + $0x704] ss:$16 sps:$4 sm:$0xff]  }
  0xa4   :  { %7004 = vmatprep.subr.bf16.mxu0 %v10361_v44  ;;  %7742 = vmatprep.subr.bf16.mxu1 %v10364_v45  ;;  %v10456_v44 = vld [vmem:[%s15502_s1 + $0x70c] ss:$16 sps:$4 sm:$0xff]   ;;  %v10451_v45 = vld [vmem:[%s15502_s1 + $0x700] ss:$16 sps:$4 sm:$0xff]  }
  0xa7   :  { %7005 = vmatpush1.bf16.msra.mxu0 %v10359_v46  ;;  %7743 = vmatpush1.bf16.msra.mxu1 %v10362_v47  ;;  %v10454_v46 = vld [vmem:[%s15502_s1 + $0x708] ss:$16 sps:$4 sm:$0xff]   ;;  %v10459_v47 = vld [vmem:[%s15502_s1 + $0x724] ss:$16 sps:$4 sm:$0xff]  }
  0xa8   :  { %7006 = vmatprep.subr.bf16.mxu0 %v10367_v48  ;;  %7744 = vmatprep.subr.bf16.mxu1 %v10370_v49  ;;  %v10462_v48 = vld [vmem:[%s15502_s1 + $0x72c] ss:$16 sps:$4 sm:$0xff]   ;;  %v10457_v49 = vld [vmem:[%s15502_s1 + $0x720] ss:$16 sps:$4 sm:$0xff]  }
  0xab   :  { %7007 = vmatpush1.bf16.msra.mxu0 %v10365_v50  ;;  %7745 = vmatpush1.bf16.msra.mxu1 %v10368_v51  ;;  %v10460_v50 = vld [vmem:[%s15502_s1 + $0x728] ss:$16 sps:$4 sm:$0xff]   ;;  %v10465_v51 = vld [vmem:[%s15502_s1 + $0x744] ss:$16 sps:$4 sm:$0xff]  }
  0xac   :  { %7008 = vmatprep.subr.bf16.mxu0 %v10373_v52  ;;  %7746 = vmatprep.subr.bf16.mxu1 %v10376_v53  ;;  %v10468_v52 = vld [vmem:[%s15502_s1 + $0x74c] ss:$16 sps:$4 sm:$0xff]   ;;  %v10463_v53 = vld [vmem:[%s15502_s1 + $0x740] ss:$16 sps:$4 sm:$0xff]  }
  0xaf   :  { %7009 = vmatpush1.bf16.msra.mxu0 %v10371_v54  ;;  %7747 = vmatpush1.bf16.msra.mxu1 %v10374_v55  ;;  %v10466_v54 = vld [vmem:[%s15502_s1 + $0x748] ss:$16 sps:$4 sm:$0xff]   ;;  %v10471_v55 = vld [vmem:[%s15502_s1 + $0x764] ss:$16 sps:$4 sm:$0xff]  }
  0xb0   :  { %7010 = vmatprep.subr.bf16.mxu0 %v10379_v56  ;;  %7748 = vmatprep.subr.bf16.mxu1 %v10382_v57  ;;  %v10474_v56 = vld [vmem:[%s15502_s1 + $0x76c] ss:$16 sps:$4 sm:$0xff]   ;;  %v10469_v57 = vld [vmem:[%s15502_s1 + $0x760] ss:$16 sps:$4 sm:$0xff]  }
  0xb3   :  { %7011 = vmatpush1.bf16.msra.mxu0 %v10377_v58  ;;  %7749 = vmatpush1.bf16.msra.mxu1 %v10380_v59  ;;  %v10472_v58 = vld [vmem:[%s15502_s1 + $0x768] ss:$16 sps:$4 sm:$0xff]   ;;  %v10477_v59 = vld [vmem:[%s15502_s1 + $0x784] ss:$16 sps:$4 sm:$0xff]  }
  0xb4   :  { %7012 = vmatprep.subr.bf16.mxu0 %v10385_v60  ;;  %7750 = vmatprep.subr.bf16.mxu1 %v10388_v61  ;;  %v10480_v60 = vld [vmem:[%s15502_s1 + $0x78c] ss:$16 sps:$4 sm:$0xff]   ;;  %v10475_v61 = vld [vmem:[%s15502_s1 + $0x780] ss:$16 sps:$4 sm:$0xff]  }
  0xb7   :  { %7013 = vmatpush1.bf16.msra.mxu0 %v10383_v62  ;;  %7751 = vmatpush1.bf16.msra.mxu1 %v10386_v63  ;;  %v10478_v62 = vld [vmem:[%s15502_s1 + $0x788] ss:$16 sps:$4 sm:$0xff]   ;;  %v10483_v63 = vld [vmem:[%s15502_s1 + $0x7a4] ss:$16 sps:$4 sm:$0xff]  }
  0xb8   :  { %7014 = vmatprep.subr.bf16.mxu0 %v10391_v0  ;;  %7752 = vmatprep.subr.bf16.mxu1 %v10394_v1  ;;  %v10486_v0 = vld [vmem:[%s15502_s1 + $0x7ac] ss:$16 sps:$4 sm:$0xff]   ;;  %v10481_v1 = vld [vmem:[%s15502_s1 + $0x7a0] ss:$16 sps:$4 sm:$0xff]  }
  0xbb   :  { %7015 = vmatpush1.bf16.msra.mxu0 %v10389_v2  ;;  %7753 = vmatpush1.bf16.msra.mxu1 %v10392_v3  ;;  %v10484_v2 = vld [vmem:[%s15502_s1 + $0x7a8] ss:$16 sps:$4 sm:$0xff]   ;;  %v10489_v3 = vld [vmem:[%s15502_s1 + $0x7c4] ss:$16 sps:$4 sm:$0xff]  }
  0xbc   :  { %7016 = vmatprep.subr.bf16.mxu0 %v10397_v4  ;;  %7754 = vmatprep.subr.bf16.mxu1 %v10400_v5  ;;  %v10492_v4 = vld [vmem:[%s15502_s1 + $0x7cc] ss:$16 sps:$4 sm:$0xff]   ;;  %v10487_v5 = vld [vmem:[%s15502_s1 + $0x7c0] ss:$16 sps:$4 sm:$0xff]  }
  0xbf   :  { %7017 = vmatpush1.bf16.msra.mxu0 %v10395_v6  ;;  %7755 = vmatpush1.bf16.msra.mxu1 %v10398_v7  ;;  %v10490_v6 = vld [vmem:[%s15502_s1 + $0x7c8] ss:$16 sps:$4 sm:$0xff]   ;;  %v10495_v7 = vld [vmem:[%s15502_s1 + $0x7e4] ss:$16 sps:$4 sm:$0xff]  }
  0xc0   :  { %7027 = vmatprep.subr.bf16.mxu0 %v10405_v8  ;;  %7765 = vmatprep.subr.bf16.mxu1 %v10408_v9  ;;  %v10498_v8 = vld [vmem:[%s15502_s1 + $0x7ec] ss:$16 sps:$4 sm:$0xff]   ;;  %v10493_v9 = vld [vmem:[%s15502_s1 + $0x7e0] ss:$16 sps:$4 sm:$0xff]  }
  0xc2   :  { %7019 = vmatmul.mubr.bf16.vlgmr.msra.gmra.mrb[0].mxu0 %v8740_v12  ;;  %7757 = vmatmul.mubr.bf16.vlgmr.msra.gmra.mrb[0].mxu1 %v8740_v12  ;;  %v10503_v12 = vld [vmem:[%s15502_s1 + $0x804] ss:$16 sps:$4 sm:$0xff]  }
  0xc3   :  { %7028 = vmatpush1.bf16.msra.mxu0 %v10403_v10  ;;  %7766 = vmatpush1.bf16.msra.mxu1 %v10406_v13  ;;  %v10496_v10 = vld [vmem:[%s15502_s1 + $0x7e8] ss:$16 sps:$4 sm:$0xff]   ;;  %v10506_v13 = vld [vmem:[%s15502_s1 + $0x80c] ss:$16 sps:$4 sm:$0xff]  }
  0xc4   :  { %7029 = vmatprep.subr.bf16.mxu0 %v10411_v15  ;;  %7767 = vmatprep.subr.bf16.mxu1 %v10414_v11  ;;  %v10501_v15 = vld [vmem:[%s15502_s1 + $0x800] ss:$16 sps:$4 sm:$0xff]   ;;  %v8742_v11 = vcombine.low %v12499_v14, %v12499_v14  ;;  %v10512_v14 = vld [vmem:[%s15502_s1 + $0x82c] ss:$16 sps:$4 sm:$0xff]  }
  0xc5   :  { %7059 = vmatprep.mubr.bf16.mxu0 %v8743_v16  ;;  %7797 = vmatprep.mubr.bf16.mxu1 %v8743_v16  ;;  %v12697_v16 = vld [vmem:[%s15503_s0 + $0x20] sm:$0xff] }
  0xc7   :  { %7030 = vmatpush1.bf16.msra.mxu0 %v10409_v17  ;;  %7768 = vmatpush1.bf16.msra.mxu1 %v10412_v18  ;;  %v10504_v17 = vld [vmem:[%s15502_s1 + $0x808] ss:$16 sps:$4 sm:$0xff]   ;;  %v10509_v18 = vld [vmem:[%s15502_s1 + $0x824] ss:$16 sps:$4 sm:$0xff]  }
  0xc8   :  { %7031 = vmatprep.subr.bf16.mxu0 %v10417_v19  ;;  %7769 = vmatprep.subr.bf16.mxu1 %v10420_v20  ;;  %v8745_v19 = vcombine.high %v12697_v16, %v12697_v16  ;;  %v10507_v20 = vld [vmem:[%s15502_s1 + $0x820] ss:$16 sps:$4 sm:$0xff]  }
  0xcb   :  { %7032 = vmatpush1.bf16.msra.mxu0 %v10415_v21  ;;  %7770 = vmatpush1.bf16.msra.mxu1 %v10418_v22  ;;  %v10510_v21 = vld [vmem:[%s15502_s1 + $0x828] ss:$16 sps:$4 sm:$0xff]   ;;  %v10515_v22 = vld [vmem:[%s15502_s1 + $0x844] ss:$16 sps:$4 sm:$0xff]  }
  0xcc   :  { %7033 = vmatprep.subr.bf16.mxu0 %v10423_v23  ;;  %7771 = vmatprep.subr.bf16.mxu1 %v10426_v24  ;;  %v10518_v23 = vld [vmem:[%s15502_s1 + $0x84c] ss:$16 sps:$4 sm:$0xff]   ;;  %v10513_v24 = vld [vmem:[%s15502_s1 + $0x840] ss:$16 sps:$4 sm:$0xff]  }
  0xcf   :  { %7034 = vmatpush1.bf16.msra.mxu0 %v10421_v25  ;;  %7772 = vmatpush1.bf16.msra.mxu1 %v10424_v26  ;;  %v10516_v25 = vld [vmem:[%s15502_s1 + $0x848] ss:$16 sps:$4 sm:$0xff]   ;;  %v10521_v26 = vld [vmem:[%s15502_s1 + $0x864] ss:$16 sps:$4 sm:$0xff]  }
  0xd0   :  { %7035 = vmatprep.subr.bf16.mxu0 %v10429_v27  ;;  %7773 = vmatprep.subr.bf16.mxu1 %v10432_v28  ;;  %v10524_v27 = vld [vmem:[%s15502_s1 + $0x86c] ss:$16 sps:$4 sm:$0xff]   ;;  %v10519_v28 = vld [vmem:[%s15502_s1 + $0x860] ss:$16 sps:$4 sm:$0xff]  }
  0xd3   :  { %7036 = vmatpush1.bf16.msra.mxu0 %v10427_v29  ;;  %7774 = vmatpush1.bf16.msra.mxu1 %v10430_v30  ;;  %v10522_v29 = vld [vmem:[%s15502_s1 + $0x868] ss:$16 sps:$4 sm:$0xff]   ;;  %v10527_v30 = vld [vmem:[%s15502_s1 + $0x884] ss:$16 sps:$4 sm:$0xff]  }
  0xd4   :  { %7037 = vmatprep.subr.bf16.mxu0 %v10435_v31  ;;  %7775 = vmatprep.subr.bf16.mxu1 %v10438_v32  ;;  %v10530_v31 = vld [vmem:[%s15502_s1 + $0x88c] ss:$16 sps:$4 sm:$0xff]   ;;  %v10525_v32 = vld [vmem:[%s15502_s1 + $0x880] ss:$16 sps:$4 sm:$0xff]  }
  0xd7   :  { %7038 = vmatpush1.bf16.msra.mxu0 %v10433_v33  ;;  %7776 = vmatpush1.bf16.msra.mxu1 %v10436_v34  ;;  %v10528_v33 = vld [vmem:[%s15502_s1 + $0x888] ss:$16 sps:$4 sm:$0xff]   ;;  %v10533_v34 = vld [vmem:[%s15502_s1 + $0x8a4] ss:$16 sps:$4 sm:$0xff]  }
  0xd8   :  { %7039 = vmatprep.subr.bf16.mxu0 %v10441_v35  ;;  %7777 = vmatprep.subr.bf16.mxu1 %v10444_v36  ;;  %v10536_v35 = vld [vmem:[%s15502_s1 + $0x8ac] ss:$16 sps:$4 sm:$0xff]   ;;  %v10531_v36 = vld [vmem:[%s15502_s1 + $0x8a0] ss:$16 sps:$4 sm:$0xff]  }
  0xdb   :  { %7040 = vmatpush1.bf16.msra.mxu0 %v10439_v37  ;;  %7778 = vmatpush1.bf16.msra.mxu1 %v10442_v38  ;;  %v10534_v37 = vld [vmem:[%s15502_s1 + $0x8a8] ss:$16 sps:$4 sm:$0xff]   ;;  %v10539_v38 = vld [vmem:[%s15502_s1 + $0x8c4] ss:$16 sps:$4 sm:$0xff]  }
  0xdc   :  { %7041 = vmatprep.subr.bf16.mxu0 %v10447_v39  ;;  %7779 = vmatprep.subr.bf16.mxu1 %v10450_v40  ;;  %v10542_v39 = vld [vmem:[%s15502_s1 + $0x8cc] ss:$16 sps:$4 sm:$0xff]   ;;  %v10537_v40 = vld [vmem:[%s15502_s1 + $0x8c0] ss:$16 sps:$4 sm:$0xff]  }
  0xdf   :  { %7042 = vmatpush1.bf16.msra.mxu0 %v10445_v41  ;;  %7780 = vmatpush1.bf16.msra.mxu1 %v10448_v42  ;;  %v10540_v41 = vld [vmem:[%s15502_s1 + $0x8c8] ss:$16 sps:$4 sm:$0xff]   ;;  %v10545_v42 = vld [vmem:[%s15502_s1 + $0x8e4] ss:$16 sps:$4 sm:$0xff]  }
  0xe0   :  { %7043 = vmatprep.subr.bf16.mxu0 %v10453_v43  ;;  %7781 = vmatprep.subr.bf16.mxu1 %v10456_v44  ;;  %v10548_v43 = vld [vmem:[%s15502_s1 + $0x8ec] ss:$16 sps:$4 sm:$0xff]   ;;  %v10543_v44 = vld [vmem:[%s15502_s1 + $0x8e0] ss:$16 sps:$4 sm:$0xff]  }
  0xe3   :  { %7044 = vmatpush1.bf16.msra.mxu0 %v10451_v45  ;;  %7782 = vmatpush1.bf16.msra.mxu1 %v10454_v46  ;;  %v10546_v45 = vld [vmem:[%s15502_s1 + $0x8e8] ss:$16 sps:$4 sm:$0xff]   ;;  %v10551_v46 = vld [vmem:[%s15502_s1 + $0x904] ss:$16 sps:$4 sm:$0xff]  }
  0xe4   :  { %7045 = vmatprep.subr.bf16.mxu0 %v10459_v47  ;;  %7783 = vmatprep.subr.bf16.mxu1 %v10462_v48  ;;  %v10554_v47 = vld [vmem:[%s15502_s1 + $0x90c] ss:$16 sps:$4 sm:$0xff]   ;;  %v10549_v48 = vld [vmem:[%s15502_s1 + $0x900] ss:$16 sps:$4 sm:$0xff]  }
  0xe7   :  { %7046 = vmatpush1.bf16.msra.mxu0 %v10457_v49  ;;  %7784 = vmatpush1.bf16.msra.mxu1 %v10460_v50  ;;  %v10552_v49 = vld [vmem:[%s15502_s1 + $0x908] ss:$16 sps:$4 sm:$0xff]   ;;  %v10557_v50 = vld [vmem:[%s15502_s1 + $0x924] ss:$16 sps:$4 sm:$0xff]  }
  0xe8   :  { %7047 = vmatprep.subr.bf16.mxu0 %v10465_v51  ;;  %7785 = vmatprep.subr.bf16.mxu1 %v10468_v52  ;;  %v10560_v51 = vld [vmem:[%s15502_s1 + $0x92c] ss:$16 sps:$4 sm:$0xff]   ;;  %v10555_v52 = vld [vmem:[%s15502_s1 + $0x920] ss:$16 sps:$4 sm:$0xff]  }
  0xeb   :  { %7048 = vmatpush1.bf16.msra.mxu0 %v10463_v53  ;;  %7786 = vmatpush1.bf16.msra.mxu1 %v10466_v54  ;;  %v10558_v53 = vld [vmem:[%s15502_s1 + $0x928] ss:$16 sps:$4 sm:$0xff]   ;;  %v10563_v54 = vld [vmem:[%s15502_s1 + $0x944] ss:$16 sps:$4 sm:$0xff]  }
  0xec   :  { %7049 = vmatprep.subr.bf16.mxu0 %v10471_v55  ;;  %7787 = vmatprep.subr.bf16.mxu1 %v10474_v56  ;;  %v10566_v55 = vld [vmem:[%s15502_s1 + $0x94c] ss:$16 sps:$4 sm:$0xff]   ;;  %v10561_v56 = vld [vmem:[%s15502_s1 + $0x940] ss:$16 sps:$4 sm:$0xff]  }
  0xef   :  { %7050 = vmatpush1.bf16.msra.mxu0 %v10469_v57  ;;  %7788 = vmatpush1.bf16.msra.mxu1 %v10472_v58  ;;  %v10564_v57 = vld [vmem:[%s15502_s1 + $0x948] ss:$16 sps:$4 sm:$0xff]   ;;  %v10569_v58 = vld [vmem:[%s15502_s1 + $0x964] ss:$16 sps:$4 sm:$0xff]  }
  0xf0   :  { %7051 = vmatprep.subr.bf16.mxu0 %v10477_v59  ;;  %7789 = vmatprep.subr.bf16.mxu1 %v10480_v60  ;;  %v10572_v59 = vld [vmem:[%s15502_s1 + $0x96c] ss:$16 sps:$4 sm:$0xff]   ;;  %v10567_v60 = vld [vmem:[%s15502_s1 + $0x960] ss:$16 sps:$4 sm:$0xff]  }
  0xf3   :  { %7052 = vmatpush1.bf16.msra.mxu0 %v10475_v61  ;;  %7790 = vmatpush1.bf16.msra.mxu1 %v10478_v62  ;;  %v10570_v61 = vld [vmem:[%s15502_s1 + $0x968] ss:$16 sps:$4 sm:$0xff]   ;;  %v10575_v62 = vld [vmem:[%s15502_s1 + $0x984] ss:$16 sps:$4 sm:$0xff]  }
  0xf4   :  { %7053 = vmatprep.subr.bf16.mxu0 %v10483_v63  ;;  %7791 = vmatprep.subr.bf16.mxu1 %v10486_v0  ;;  %v10578_v63 = vld [vmem:[%s15502_s1 + $0x98c] ss:$16 sps:$4 sm:$0xff]   ;;  %v10573_v0 = vld [vmem:[%s15502_s1 + $0x980] ss:$16 sps:$4 sm:$0xff]  }
  0xf7   :  { %7054 = vmatpush1.bf16.msra.mxu0 %v10481_v1  ;;  %7792 = vmatpush1.bf16.msra.mxu1 %v10484_v2  ;;  %v10576_v1 = vld [vmem:[%s15502_s1 + $0x988] ss:$16 sps:$4 sm:$0xff]   ;;  %v10581_v2 = vld [vmem:[%s15502_s1 + $0x9a4] ss:$16 sps:$4 sm:$0xff]  }
  0xf8   :  { %7055 = vmatprep.subr.bf16.mxu0 %v10489_v3  ;;  %7793 = vmatprep.subr.bf16.mxu1 %v10492_v4  ;;  %v10584_v3 = vld [vmem:[%s15502_s1 + $0x9ac] ss:$16 sps:$4 sm:$0xff]   ;;  %v10579_v4 = vld [vmem:[%s15502_s1 + $0x9a0] ss:$16 sps:$4 sm:$0xff]  }
  0xfb   :  { %7056 = vmatpush1.bf16.msra.mxu0 %v10487_v5  ;;  %7794 = vmatpush1.bf16.msra.mxu1 %v10490_v6  ;;  %v10582_v5 = vld [vmem:[%s15502_s1 + $0x9a8] ss:$16 sps:$4 sm:$0xff]   ;;  %v10587_v6 = vld [vmem:[%s15502_s1 + $0x9c4] ss:$16 sps:$4 sm:$0xff]  }
  0xfc   :  { %7057 = vmatprep.subr.bf16.mxu0 %v10495_v7  ;;  %7795 = vmatprep.subr.bf16.mxu1 %v10498_v8  ;;  %v10590_v7 = vld [vmem:[%s15502_s1 + $0x9cc] ss:$16 sps:$4 sm:$0xff]   ;;  %v10585_v8 = vld [vmem:[%s15502_s1 + $0x9c0] ss:$16 sps:$4 sm:$0xff]  }
  0xff   :  { %7058 = vmatpush1.bf16.msra.mxu0 %v10493_v9  ;;  %7796 = vmatpush1.bf16.msra.mxu1 %v10496_v10  ;;  %v10588_v9 = vld [vmem:[%s15502_s1 + $0x9c8] ss:$16 sps:$4 sm:$0xff]   ;;  %v10593_v10 = vld [vmem:[%s15502_s1 + $0x9e4] ss:$16 sps:$4 sm:$0xff]  }
 0x100   :  { %7068 = vmatprep.subr.bf16.mxu0 %v10503_v12  ;;  %7806 = vmatprep.subr.bf16.mxu1 %v10506_v13  ;;  %v10596_v12 = vld [vmem:[%s15502_s1 + $0x9ec] ss:$16 sps:$4 sm:$0xff]   ;;  %v10591_v13 = vld [vmem:[%s15502_s1 + $0x9e0] ss:$16 sps:$4 sm:$0xff]  }
 0x102   :  { %7060 = vmatmul.mubr.bf16.vlgmr.msra.gmra.mrb[0].mxu0 %v8742_v11  ;;  %7798 = vmatmul.mubr.bf16.vlgmr.msra.gmra.mrb[0].mxu1 %v8742_v11  ;;  %v10601_v11 = vld [vmem:[%s15502_s1 + $0xa04] ss:$16 sps:$4 sm:$0xff]  }
 0x103   :  { %7069 = vmatpush1.bf16.msra.mxu0 %v10501_v15  ;;  %7807 = vmatpush1.bf16.msra.mxu1 %v10504_v17  ;;  %v10594_v15 = vld [vmem:[%s15502_s1 + $0x9e8] ss:$16 sps:$4 sm:$0xff]   ;;  %v10604_v17 = vld [vmem:[%s15502_s1 + $0xa0c] ss:$16 sps:$4 sm:$0xff]  }
 0x104   :  { %7070 = vmatprep.subr.bf16.mxu0 %v10509_v18  ;;  %7808 = vmatprep.subr.bf16.mxu1 %v10512_v14  ;;  %v12893_v18 = vld [vmem:[%s15503_s0 + $0x28] sm:$0xff]  ;;  %v8744_v14 = vcombine.low %v12697_v16, %v12697_v16 }
 0x105   :  { %7100 = vmatprep.mubr.bf16.mxu0 %v8745_v19  ;;  %7838 = vmatprep.mubr.bf16.mxu1 %v8745_v19  ;;  %v10599_v19 = vld [vmem:[%s15502_s1 + $0xa00] ss:$16 sps:$4 sm:$0xff]   ;;  %v10610_v16 = vld [vmem:[%s15502_s1 + $0xa2c] ss:$16 sps:$4 sm:$0xff]  }
 0x107   :  { %7071 = vmatpush1.bf16.msra.mxu0 %v10507_v20  ;;  %7809 = vmatpush1.bf16.msra.mxu1 %v10510_v21  ;;  %v10602_v20 = vld [vmem:[%s15502_s1 + $0xa08] ss:$16 sps:$4 sm:$0xff]   ;;  %v10607_v21 = vld [vmem:[%s15502_s1 + $0xa24] ss:$16 sps:$4 sm:$0xff]  }
 0x108   :  { %7072 = vmatprep.subr.bf16.mxu0 %v10515_v22  ;;  %7810 = vmatprep.subr.bf16.mxu1 %v10518_v23  ;;  %v8747_v22 = vcombine.high %v12893_v18, %v12893_v18  ;;  %v10605_v23 = vld [vmem:[%s15502_s1 + $0xa20] ss:$16 sps:$4 sm:$0xff]  }
 0x10b   :  { %7073 = vmatpush1.bf16.msra.mxu0 %v10513_v24  ;;  %7811 = vmatpush1.bf16.msra.mxu1 %v10516_v25  ;;  %v10608_v24 = vld [vmem:[%s15502_s1 + $0xa28] ss:$16 sps:$4 sm:$0xff]   ;;  %v10613_v25 = vld [vmem:[%s15502_s1 + $0xa44] ss:$16 sps:$4 sm:$0xff]  }
 0x10c   :  { %7074 = vmatprep.subr.bf16.mxu0 %v10521_v26  ;;  %7812 = vmatprep.subr.bf16.mxu1 %v10524_v27  ;;  %v10616_v26 = vld [vmem:[%s15502_s1 + $0xa4c] ss:$16 sps:$4 sm:$0xff]   ;;  %v10611_v27 = vld [vmem:[%s15502_s1 + $0xa40] ss:$16 sps:$4 sm:$0xff]  }
 0x10f   :  { %7075 = vmatpush1.bf16.msra.mxu0 %v10519_v28  ;;  %7813 = vmatpush1.bf16.msra.mxu1 %v10522_v29  ;;  %v10614_v28 = vld [vmem:[%s15502_s1 + $0xa48] ss:$16 sps:$4 sm:$0xff]   ;;  %v10619_v29 = vld [vmem:[%s15502_s1 + $0xa64] ss:$16 sps:$4 sm:$0xff]  }
 0x110   :  { %7076 = vmatprep.subr.bf16.mxu0 %v10527_v30  ;;  %7814 = vmatprep.subr.bf16.mxu1 %v10530_v31  ;;  %v10622_v30 = vld [vmem:[%s15502_s1 + $0xa6c] ss:$16 sps:$4 sm:$0xff]   ;;  %v10617_v31 = vld [vmem:[%s15502_s1 + $0xa60] ss:$16 sps:$4 sm:$0xff]  }
 0x113   :  { %7077 = vmatpush1.bf16.msra.mxu0 %v10525_v32  ;;  %7815 = vmatpush1.bf16.msra.mxu1 %v10528_v33  ;;  %v10620_v32 = vld [vmem:[%s15502_s1 + $0xa68] ss:$16 sps:$4 sm:$0xff]   ;;  %v10625_v33 = vld [vmem:[%s15502_s1 + $0xa84] ss:$16 sps:$4 sm:$0xff]  }
 0x114   :  { %7078 = vmatprep.subr.bf16.mxu0 %v10533_v34  ;;  %7816 = vmatprep.subr.bf16.mxu1 %v10536_v35  ;;  %v10628_v34 = vld [vmem:[%s15502_s1 + $0xa8c] ss:$16 sps:$4 sm:$0xff]   ;;  %v10623_v35 = vld [vmem:[%s15502_s1 + $0xa80] ss:$16 sps:$4 sm:$0xff]  }
 0x117   :  { %7079 = vmatpush1.bf16.msra.mxu0 %v10531_v36  ;;  %7817 = vmatpush1.bf16.msra.mxu1 %v10534_v37  ;;  %v10626_v36 = vld [vmem:[%s15502_s1 + $0xa88] ss:$16 sps:$4 sm:$0xff]   ;;  %v10631_v37 = vld [vmem:[%s15502_s1 + $0xaa4] ss:$16 sps:$4 sm:$0xff]  }
 0x118   :  { %7080 = vmatprep.subr.bf16.mxu0 %v10539_v38  ;;  %7818 = vmatprep.subr.bf16.mxu1 %v10542_v39  ;;  %v10634_v38 = vld [vmem:[%s15502_s1 + $0xaac] ss:$16 sps:$4 sm:$0xff]   ;;  %v10629_v39 = vld [vmem:[%s15502_s1 + $0xaa0] ss:$16 sps:$4 sm:$0xff]  }
 0x11b   :  { %7081 = vmatpush1.bf16.msra.mxu0 %v10537_v40  ;;  %7819 = vmatpush1.bf16.msra.mxu1 %v10540_v41  ;;  %v10632_v40 = vld [vmem:[%s15502_s1 + $0xaa8] ss:$16 sps:$4 sm:$0xff]   ;;  %v10637_v41 = vld [vmem:[%s15502_s1 + $0xac4] ss:$16 sps:$4 sm:$0xff]  }
 0x11c   :  { %7082 = vmatprep.subr.bf16.mxu0 %v10545_v42  ;;  %7820 = vmatprep.subr.bf16.mxu1 %v10548_v43  ;;  %v10640_v42 = vld [vmem:[%s15502_s1 + $0xacc] ss:$16 sps:$4 sm:$0xff]   ;;  %v10635_v43 = vld [vmem:[%s15502_s1 + $0xac0] ss:$16 sps:$4 sm:$0xff]  }
 0x11f   :  { %7083 = vmatpush1.bf16.msra.mxu0 %v10543_v44  ;;  %7821 = vmatpush1.bf16.msra.mxu1 %v10546_v45  ;;  %v10638_v44 = vld [vmem:[%s15502_s1 + $0xac8] ss:$16 sps:$4 sm:$0xff]   ;;  %v10643_v45 = vld [vmem:[%s15502_s1 + $0xae4] ss:$16 sps:$4 sm:$0xff]  }
 0x120   :  { %7084 = vmatprep.subr.bf16.mxu0 %v10551_v46  ;;  %7822 = vmatprep.subr.bf16.mxu1 %v10554_v47  ;;  %v10646_v46 = vld [vmem:[%s15502_s1 + $0xaec] ss:$16 sps:$4 sm:$0xff]   ;;  %v10641_v47 = vld [vmem:[%s15502_s1 + $0xae0] ss:$16 sps:$4 sm:$0xff]  }
 0x123   :  { %7085 = vmatpush1.bf16.msra.mxu0 %v10549_v48  ;;  %7823 = vmatpush1.bf16.msra.mxu1 %v10552_v49  ;;  %v10644_v48 = vld [vmem:[%s15502_s1 + $0xae8] ss:$16 sps:$4 sm:$0xff]   ;;  %v10649_v49 = vld [vmem:[%s15502_s1 + $0xb04] ss:$16 sps:$4 sm:$0xff]  }
 0x124   :  { %7086 = vmatprep.subr.bf16.mxu0 %v10557_v50  ;;  %7824 = vmatprep.subr.bf16.mxu1 %v10560_v51  ;;  %v10652_v50 = vld [vmem:[%s15502_s1 + $0xb0c] ss:$16 sps:$4 sm:$0xff]   ;;  %v10647_v51 = vld [vmem:[%s15502_s1 + $0xb00] ss:$16 sps:$4 sm:$0xff]  }
 0x127   :  { %7087 = vmatpush1.bf16.msra.mxu0 %v10555_v52  ;;  %7825 = vmatpush1.bf16.msra.mxu1 %v10558_v53  ;;  %v10650_v52 = vld [vmem:[%s15502_s1 + $0xb08] ss:$16 sps:$4 sm:$0xff]   ;;  %v10655_v53 = vld [vmem:[%s15502_s1 + $0xb24] ss:$16 sps:$4 sm:$0xff]  }
 0x128   :  { %7088 = vmatprep.subr.bf16.mxu0 %v10563_v54  ;;  %7826 = vmatprep.subr.bf16.mxu1 %v10566_v55  ;;  %v10658_v54 = vld [vmem:[%s15502_s1 + $0xb2c] ss:$16 sps:$4 sm:$0xff]   ;;  %v10653_v55 = vld [vmem:[%s15502_s1 + $0xb20] ss:$16 sps:$4 sm:$0xff]  }
 0x12b   :  { %7089 = vmatpush1.bf16.msra.mxu0 %v10561_v56  ;;  %7827 = vmatpush1.bf16.msra.mxu1 %v10564_v57  ;;  %v10656_v56 = vld [vmem:[%s15502_s1 + $0xb28] ss:$16 sps:$4 sm:$0xff]   ;;  %v10661_v57 = vld [vmem:[%s15502_s1 + $0xb44] ss:$16 sps:$4 sm:$0xff]  }
 0x12c   :  { %7090 = vmatprep.subr.bf16.mxu0 %v10569_v58  ;;  %7828 = vmatprep.subr.bf16.mxu1 %v10572_v59  ;;  %v10664_v58 = vld [vmem:[%s15502_s1 + $0xb4c] ss:$16 sps:$4 sm:$0xff]   ;;  %v10659_v59 = vld [vmem:[%s15502_s1 + $0xb40] ss:$16 sps:$4 sm:$0xff]  }
 0x12f   :  { %7091 = vmatpush1.bf16.msra.mxu0 %v10567_v60  ;;  %7829 = vmatpush1.bf16.msra.mxu1 %v10570_v61  ;;  %v10662_v60 = vld [vmem:[%s15502_s1 + $0xb48] ss:$16 sps:$4 sm:$0xff]   ;;  %v10667_v61 = vld [vmem:[%s15502_s1 + $0xb64] ss:$16 sps:$4 sm:$0xff]  }
 0x130   :  { %7092 = vmatprep.subr.bf16.mxu0 %v10575_v62  ;;  %7830 = vmatprep.subr.bf16.mxu1 %v10578_v63  ;;  %v10670_v62 = vld [vmem:[%s15502_s1 + $0xb6c] ss:$16 sps:$4 sm:$0xff]   ;;  %v10665_v63 = vld [vmem:[%s15502_s1 + $0xb60] ss:$16 sps:$4 sm:$0xff]  }
 0x133   :  { %7093 = vmatpush1.bf16.msra.mxu0 %v10573_v0  ;;  %7831 = vmatpush1.bf16.msra.mxu1 %v10576_v1  ;;  %v10668_v0 = vld [vmem:[%s15502_s1 + $0xb68] ss:$16 sps:$4 sm:$0xff]   ;;  %v10673_v1 = vld [vmem:[%s15502_s1 + $0xb84] ss:$16 sps:$4 sm:$0xff]  }
 0x134   :  { %7094 = vmatprep.subr.bf16.mxu0 %v10581_v2  ;;  %7832 = vmatprep.subr.bf16.mxu1 %v10584_v3  ;;  %v10676_v2 = vld [vmem:[%s15502_s1 + $0xb8c] ss:$16 sps:$4 sm:$0xff]   ;;  %v10671_v3 = vld [vmem:[%s15502_s1 + $0xb80] ss:$16 sps:$4 sm:$0xff]  }
 0x137   :  { %7095 = vmatpush1.bf16.msra.mxu0 %v10579_v4  ;;  %7833 = vmatpush1.bf16.msra.mxu1 %v10582_v5  ;;  %v10674_v4 = vld [vmem:[%s15502_s1 + $0xb88] ss:$16 sps:$4 sm:$0xff]   ;;  %v10679_v5 = vld [vmem:[%s15502_s1 + $0xba4] ss:$16 sps:$4 sm:$0xff]  }
 0x138   :  { %7096 = vmatprep.subr.bf16.mxu0 %v10587_v6  ;;  %7834 = vmatprep.subr.bf16.mxu1 %v10590_v7  ;;  %v10682_v6 = vld [vmem:[%s15502_s1 + $0xbac] ss:$16 sps:$4 sm:$0xff]   ;;  %v10677_v7 = vld [vmem:[%s15502_s1 + $0xba0] ss:$16 sps:$4 sm:$0xff]  }
 0x13b   :  { %7097 = vmatpush1.bf16.msra.mxu0 %v10585_v8  ;;  %7835 = vmatpush1.bf16.msra.mxu1 %v10588_v9  ;;  %v10680_v8 = vld [vmem:[%s15502_s1 + $0xba8] ss:$16 sps:$4 sm:$0xff]   ;;  %v10685_v9 = vld [vmem:[%s15502_s1 + $0xbc4] ss:$16 sps:$4 sm:$0xff]  }
 0x13c   :  { %7098 = vmatprep.subr.bf16.mxu0 %v10593_v10  ;;  %7836 = vmatprep.subr.bf16.mxu1 %v10596_v12  ;;  %v10688_v10 = vld [vmem:[%s15502_s1 + $0xbcc] ss:$16 sps:$4 sm:$0xff]   ;;  %v10683_v12 = vld [vmem:[%s15502_s1 + $0xbc0] ss:$16 sps:$4 sm:$0xff]  }
 0x13f   :  { %7099 = vmatpush1.bf16.msra.mxu0 %v10591_v13  ;;  %7837 = vmatpush1.bf16.msra.mxu1 %v10594_v15  ;;  %v10686_v13 = vld [vmem:[%s15502_s1 + $0xbc8] ss:$16 sps:$4 sm:$0xff]   ;;  %v10691_v15 = vld [vmem:[%s15502_s1 + $0xbe4] ss:$16 sps:$4 sm:$0xff]  }
 0x140   :  { %7109 = vmatprep.subr.bf16.mxu0 %v10601_v11  ;;  %7847 = vmatprep.subr.bf16.mxu1 %v10604_v17  ;;  %v10694_v11 = vld [vmem:[%s15502_s1 + $0xbec] ss:$16 sps:$4 sm:$0xff]   ;;  %v10689_v17 = vld [vmem:[%s15502_s1 + $0xbe0] ss:$16 sps:$4 sm:$0xff]  }
 0x142   :  { %7101 = vmatmul.mubr.bf16.vlgmr.msra.gmra.mrb[0].mxu0 %v8744_v14  ;;  %7839 = vmatmul.mubr.bf16.vlgmr.msra.gmra.mrb[0].mxu1 %v8744_v14  ;;  %v10692_v14 = vld [vmem:[%s15502_s1 + $0xbe8] ss:$16 sps:$4 sm:$0xff]  }
 0x143   :  { %7110 = vmatpush1.bf16.msra.mxu0 %v10599_v19  ;;  %7848 = vmatpush1.bf16.msra.mxu1 %v10602_v20  ;;  %v10699_v19 = vld [vmem:[%s15502_s1 + $0xc04] ss:$16 sps:$4 sm:$0xff]   ;;  %v10702_v20 = vld [vmem:[%s15502_s1 + $0xc0c] ss:$16 sps:$4 sm:$0xff]  }
 0x144   :  { %7111 = vmatprep.subr.bf16.mxu0 %v10607_v21  ;;  %7849 = vmatprep.subr.bf16.mxu1 %v10610_v16  ;;  %v13094_v21 = vld [vmem:[%s15503_s0 + $0x30] sm:$0xff]  ;;  %v8746_v16 = vcombine.low %v12893_v18, %v12893_v18  ;;  %v10708_v18 = vld [vmem:[%s15502_s1 + $0xc2c] ss:$16 sps:$4 sm:$0xff]  }
 0x145   :  { %7141 = vmatprep.mubr.bf16.mxu0 %v8747_v22  ;;  %7879 = vmatprep.mubr.bf16.mxu1 %v8747_v22  ;;  %v10697_v22 = vld [vmem:[%s15502_s1 + $0xc00] ss:$16 sps:$4 sm:$0xff]  }
 0x147   :  { %7112 = vmatpush1.bf16.msra.mxu0 %v10605_v23  ;;  %7850 = vmatpush1.bf16.msra.mxu1 %v10608_v24  ;;  %v10700_v23 = vld [vmem:[%s15502_s1 + $0xc08] ss:$16 sps:$4 sm:$0xff]   ;;  %v10705_v24 = vld [vmem:[%s15502_s1 + $0xc24] ss:$16 sps:$4 sm:$0xff]  }
 0x148   :  { %7113 = vmatprep.subr.bf16.mxu0 %v10613_v25  ;;  %7851 = vmatprep.subr.bf16.mxu1 %v10616_v26  ;;  %v8749_v25 = vcombine.high %v13094_v21, %v13094_v21  ;;  %v10703_v26 = vld [vmem:[%s15502_s1 + $0xc20] ss:$16 sps:$4 sm:$0xff]  }
 0x14b   :  { %7114 = vmatpush1.bf16.msra.mxu0 %v10611_v27  ;;  %7852 = vmatpush1.bf16.msra.mxu1 %v10614_v28  ;;  %v10706_v27 = vld [vmem:[%s15502_s1 + $0xc28] ss:$16 sps:$4 sm:$0xff]   ;;  %v10711_v28 = vld [vmem:[%s15502_s1 + $0xc44] ss:$16 sps:$4 sm:$0xff]  }
 0x14c   :  { %7115 = vmatprep.subr.bf16.mxu0 %v10619_v29  ;;  %7853 = vmatprep.subr.bf16.mxu1 %v10622_v30  ;;  %v10714_v29 = vld [vmem:[%s15502_s1 + $0xc4c] ss:$16 sps:$4 sm:$0xff]   ;;  %v10709_v30 = vld [vmem:[%s15502_s1 + $0xc40] ss:$16 sps:$4 sm:$0xff]  }
 0x14f   :  { %7116 = vmatpush1.bf16.msra.mxu0 %v10617_v31  ;;  %7854 = vmatpush1.bf16.msra.mxu1 %v10620_v32  ;;  %v10712_v31 = vld [vmem:[%s15502_s1 + $0xc48] ss:$16 sps:$4 sm:$0xff]   ;;  %v10717_v32 = vld [vmem:[%s15502_s1 + $0xc64] ss:$16 sps:$4 sm:$0xff]  }
 0x150   :  { %7117 = vmatprep.subr.bf16.mxu0 %v10625_v33  ;;  %7855 = vmatprep.subr.bf16.mxu1 %v10628_v34  ;;  %v10720_v33 = vld [vmem:[%s15502_s1 + $0xc6c] ss:$16 sps:$4 sm:$0xff]   ;;  %v10715_v34 = vld [vmem:[%s15502_s1 + $0xc60] ss:$16 sps:$4 sm:$0xff]  }
 0x153   :  { %7118 = vmatpush1.bf16.msra.mxu0 %v10623_v35  ;;  %7856 = vmatpush1.bf16.msra.mxu1 %v10626_v36  ;;  %v10718_v35 = vld [vmem:[%s15502_s1 + $0xc68] ss:$16 sps:$4 sm:$0xff]   ;;  %v10723_v36 = vld [vmem:[%s15502_s1 + $0xc84] ss:$16 sps:$4 sm:$0xff]  }
 0x154   :  { %7119 = vmatprep.subr.bf16.mxu0 %v10631_v37  ;;  %7857 = vmatprep.subr.bf16.mxu1 %v10634_v38  ;;  %v10726_v37 = vld [vmem:[%s15502_s1 + $0xc8c] ss:$16 sps:$4 sm:$0xff]   ;;  %v10721_v38 = vld [vmem:[%s15502_s1 + $0xc80] ss:$16 sps:$4 sm:$0xff]  }
 0x157   :  { %7120 = vmatpush1.bf16.msra.mxu0 %v10629_v39  ;;  %7858 = vmatpush1.bf16.msra.mxu1 %v10632_v40  ;;  %v10724_v39 = vld [vmem:[%s15502_s1 + $0xc88] ss:$16 sps:$4 sm:$0xff]   ;;  %v10729_v40 = vld [vmem:[%s15502_s1 + $0xca4] ss:$16 sps:$4 sm:$0xff]  }
 0x158   :  { %7121 = vmatprep.subr.bf16.mxu0 %v10637_v41  ;;  %7859 = vmatprep.subr.bf16.mxu1 %v10640_v42  ;;  %v10732_v41 = vld [vmem:[%s15502_s1 + $0xcac] ss:$16 sps:$4 sm:$0xff]   ;;  %v10727_v42 = vld [vmem:[%s15502_s1 + $0xca0] ss:$16 sps:$4 sm:$0xff]  }
 0x15b   :  { %7122 = vmatpush1.bf16.msra.mxu0 %v10635_v43  ;;  %7860 = vmatpush1.bf16.msra.mxu1 %v10638_v44  ;;  %v10730_v43 = vld [vmem:[%s15502_s1 + $0xca8] ss:$16 sps:$4 sm:$0xff]   ;;  %v10735_v44 = vld [vmem:[%s15502_s1 + $0xcc4] ss:$16 sps:$4 sm:$0xff]  }
 0x15c   :  { %7123 = vmatprep.subr.bf16.mxu0 %v10643_v45  ;;  %7861 = vmatprep.subr.bf16.mxu1 %v10646_v46  ;;  %v10738_v45 = vld [vmem:[%s15502_s1 + $0xccc] ss:$16 sps:$4 sm:$0xff]   ;;  %v10733_v46 = vld [vmem:[%s15502_s1 + $0xcc0] ss:$16 sps:$4 sm:$0xff]  }
 0x15f   :  { %7124 = vmatpush1.bf16.msra.mxu0 %v10641_v47  ;;  %7862 = vmatpush1.bf16.msra.mxu1 %v10644_v48  ;;  %v10736_v47 = vld [vmem:[%s15502_s1 + $0xcc8] ss:$16 sps:$4 sm:$0xff]   ;;  %v10741_v48 = vld [vmem:[%s15502_s1 + $0xce4] ss:$16 sps:$4 sm:$0xff]  }
 0x160   :  { %7125 = vmatprep.subr.bf16.mxu0 %v10649_v49  ;;  %7863 = vmatprep.subr.bf16.mxu1 %v10652_v50  ;;  %v10744_v49 = vld [vmem:[%s15502_s1 + $0xcec] ss:$16 sps:$4 sm:$0xff]   ;;  %v10739_v50 = vld [vmem:[%s15502_s1 + $0xce0] ss:$16 sps:$4 sm:$0xff]  }
 0x163   :  { %7126 = vmatpush1.bf16.msra.mxu0 %v10647_v51  ;;  %7864 = vmatpush1.bf16.msra.mxu1 %v10650_v52  ;;  %v10742_v51 = vld [vmem:[%s15502_s1 + $0xce8] ss:$16 sps:$4 sm:$0xff]   ;;  %v10747_v52 = vld [vmem:[%s15502_s1 + $0xd04] ss:$16 sps:$4 sm:$0xff]  }
 0x164   :  { %7127 = vmatprep.subr.bf16.mxu0 %v10655_v53  ;;  %7865 = vmatprep.subr.bf16.mxu1 %v10658_v54  ;;  %v10750_v53 = vld [vmem:[%s15502_s1 + $0xd0c] ss:$16 sps:$4 sm:$0xff]   ;;  %v10745_v54 = vld [vmem:[%s15502_s1 + $0xd00] ss:$16 sps:$4 sm:$0xff]  }
 0x167   :  { %7128 = vmatpush1.bf16.msra.mxu0 %v10653_v55  ;;  %7866 = vmatpush1.bf16.msra.mxu1 %v10656_v56  ;;  %v10748_v55 = vld [vmem:[%s15502_s1 + $0xd08] ss:$16 sps:$4 sm:$0xff]   ;;  %v10753_v56 = vld [vmem:[%s15502_s1 + $0xd24] ss:$16 sps:$4 sm:$0xff]  }
 0x168   :  { %7129 = vmatprep.subr.bf16.mxu0 %v10661_v57  ;;  %7867 = vmatprep.subr.bf16.mxu1 %v10664_v58  ;;  %v10756_v57 = vld [vmem:[%s15502_s1 + $0xd2c] ss:$16 sps:$4 sm:$0xff]   ;;  %v10751_v58 = vld [vmem:[%s15502_s1 + $0xd20] ss:$16 sps:$4 sm:$0xff]  }
 0x16b   :  { %7130 = vmatpush1.bf16.msra.mxu0 %v10659_v59  ;;  %7868 = vmatpush1.bf16.msra.mxu1 %v10662_v60  ;;  %v10754_v59 = vld [vmem:[%s15502_s1 + $0xd28] ss:$16 sps:$4 sm:$0xff]   ;;  %v10759_v60 = vld [vmem:[%s15502_s1 + $0xd44] ss:$16 sps:$4 sm:$0xff]  }
 0x16c   :  { %7131 = vmatprep.subr.bf16.mxu0 %v10667_v61  ;;  %7869 = vmatprep.subr.bf16.mxu1 %v10670_v62  ;;  %v10762_v61 = vld [vmem:[%s15502_s1 + $0xd4c] ss:$16 sps:$4 sm:$0xff]   ;;  %v10757_v62 = vld [vmem:[%s15502_s1 + $0xd40] ss:$16 sps:$4 sm:$0xff]  }
 0x16f   :  { %7132 = vmatpush1.bf16.msra.mxu0 %v10665_v63  ;;  %7870 = vmatpush1.bf16.msra.mxu1 %v10668_v0  ;;  %v10760_v63 = vld [vmem:[%s15502_s1 + $0xd48] ss:$16 sps:$4 sm:$0xff]   ;;  %v10765_v0 = vld [vmem:[%s15502_s1 + $0xd64] ss:$16 sps:$4 sm:$0xff]  }
 0x170   :  { %7133 = vmatprep.subr.bf16.mxu0 %v10673_v1  ;;  %7871 = vmatprep.subr.bf16.mxu1 %v10676_v2  ;;  %v10768_v1 = vld [vmem:[%s15502_s1 + $0xd6c] ss:$16 sps:$4 sm:$0xff]   ;;  %v10763_v2 = vld [vmem:[%s15502_s1 + $0xd60] ss:$16 sps:$4 sm:$0xff]  }
 0x173   :  { %7134 = vmatpush1.bf16.msra.mxu0 %v10671_v3  ;;  %7872 = vmatpush1.bf16.msra.mxu1 %v10674_v4  ;;  %v10766_v3 = vld [vmem:[%s15502_s1 + $0xd68] ss:$16 sps:$4 sm:$0xff]   ;;  %v10771_v4 = vld [vmem:[%s15502_s1 + $0xd84] ss:$16 sps:$4 sm:$0xff]  }
 0x174   :  { %7135 = vmatprep.subr.bf16.mxu0 %v10679_v5  ;;  %7873 = vmatprep.subr.bf16.mxu1 %v10682_v6  ;;  %v10774_v5 = vld [vmem:[%s15502_s1 + $0xd8c] ss:$16 sps:$4 sm:$0xff]   ;;  %v10769_v6 = vld [vmem:[%s15502_s1 + $0xd80] ss:$16 sps:$4 sm:$0xff]  }
 0x177   :  { %7136 = vmatpush1.bf16.msra.mxu0 %v10677_v7  ;;  %7874 = vmatpush1.bf16.msra.mxu1 %v10680_v8  ;;  %v10772_v7 = vld [vmem:[%s15502_s1 + $0xd88] ss:$16 sps:$4 sm:$0xff]   ;;  %v10777_v8 = vld [vmem:[%s15502_s1 + $0xda4] ss:$16 sps:$4 sm:$0xff]  }
 0x178   :  { %7137 = vmatprep.subr.bf16.mxu0 %v10685_v9  ;;  %7875 = vmatprep.subr.bf16.mxu1 %v10688_v10  ;;  %v10780_v9 = vld [vmem:[%s15502_s1 + $0xdac] ss:$16 sps:$4 sm:$0xff]   ;;  %v10775_v10 = vld [vmem:[%s15502_s1 + $0xda0] ss:$16 sps:$4 sm:$0xff]  }
 0x17b   :  { %7138 = vmatpush1.bf16.msra.mxu0 %v10683_v12  ;;  %7876 = vmatpush1.bf16.msra.mxu1 %v10686_v13  ;;  %v10778_v12 = vld [vmem:[%s15502_s1 + $0xda8] ss:$16 sps:$4 sm:$0xff]   ;;  %v10783_v13 = vld [vmem:[%s15502_s1 + $0xdc4] ss:$16 sps:$4 sm:$0xff]  }
 0x17c   :  { %7139 = vmatprep.subr.bf16.mxu0 %v10691_v15  ;;  %7877 = vmatprep.subr.bf16.mxu1 %v10694_v11  ;;  %v10786_v15 = vld [vmem:[%s15502_s1 + $0xdcc] ss:$16 sps:$4 sm:$0xff]   ;;  %v10781_v11 = vld [vmem:[%s15502_s1 + $0xdc0] ss:$16 sps:$4 sm:$0xff]  }
 0x17f   :  { %7140 = vmatpush1.bf16.msra.mxu0 %v10689_v17  ;;  %7878 = vmatpush1.bf16.msra.mxu1 %v10692_v14  ;;  %v10784_v17 = vld [vmem:[%s15502_s1 + $0xdc8] ss:$16 sps:$4 sm:$0xff]   ;;  %v10789_v14 = vld [vmem:[%s15502_s1 + $0xde4] ss:$16 sps:$4 sm:$0xff]  }
 0x180   :  { %7150 = vmatprep.subr.bf16.mxu0 %v10699_v19  ;;  %7888 = vmatprep.subr.bf16.mxu1 %v10702_v20  ;;  %v10792_v19 = vld [vmem:[%s15502_s1 + $0xdec] ss:$16 sps:$4 sm:$0xff]   ;;  %v10787_v20 = vld [vmem:[%s15502_s1 + $0xde0] ss:$16 sps:$4 sm:$0xff]  }
 0x182   :  { %7142 = vmatmul.mubr.bf16.vlgmr.msra.gmra.mrb[0].mxu0 %v8746_v16  ;;  %7880 = vmatmul.mubr.bf16.vlgmr.msra.gmra.mrb[0].mxu1 %v8746_v16  ;;  %v10790_v16 = vld [vmem:[%s15502_s1 + $0xde8] ss:$16 sps:$4 sm:$0xff]  }
 0x183   :  { %7151 = vmatpush1.bf16.msra.mxu0 %v10697_v22  ;;  %7889 = vmatpush1.bf16.msra.mxu1 %v10700_v23  ;;  %v10797_v22 = vld [vmem:[%s15502_s1 + $0xe04] ss:$16 sps:$4 sm:$0xff]   ;;  %v10800_v23 = vld [vmem:[%s15502_s1 + $0xe0c] ss:$16 sps:$4 sm:$0xff]  }
 0x184   :  { %7152 = vmatprep.subr.bf16.mxu0 %v10705_v24  ;;  %7890 = vmatprep.subr.bf16.mxu1 %v10708_v18  ;;  %v13295_v24 = vld [vmem:[%s15503_s0 + $0x38] sm:$0xff]  ;;  %v8748_v18 = vcombine.low %v13094_v21, %v13094_v21 }
 0x185   :  { %7182 = vmatprep.mubr.bf16.mxu0 %v8749_v25  ;;  %7920 = vmatprep.mubr.bf16.mxu1 %v8749_v25  ;;  %v10795_v25 = vld [vmem:[%s15502_s1 + $0xe00] ss:$16 sps:$4 sm:$0xff]   ;;  %v10806_v21 = vld [vmem:[%s15502_s1 + $0xe2c] ss:$16 sps:$4 sm:$0xff]  }
 0x187   :  { %7153 = vmatpush1.bf16.msra.mxu0 %v10703_v26  ;;  %7891 = vmatpush1.bf16.msra.mxu1 %v10706_v27  ;;  %v10798_v26 = vld [vmem:[%s15502_s1 + $0xe08] ss:$16 sps:$4 sm:$0xff]   ;;  %v10803_v27 = vld [vmem:[%s15502_s1 + $0xe24] ss:$16 sps:$4 sm:$0xff]  }
 0x188   :  { %7154 = vmatprep.subr.bf16.mxu0 %v10711_v28  ;;  %7892 = vmatprep.subr.bf16.mxu1 %v10714_v29  ;;  %v8751_v28 = vcombine.high %v13295_v24, %v13295_v24  ;;  %v10801_v29 = vld [vmem:[%s15502_s1 + $0xe20] ss:$16 sps:$4 sm:$0xff]  }
 0x18b   :  { %7155 = vmatpush1.bf16.msra.mxu0 %v10709_v30  ;;  %7893 = vmatpush1.bf16.msra.mxu1 %v10712_v31  ;;  %v10804_v30 = vld [vmem:[%s15502_s1 + $0xe28] ss:$16 sps:$4 sm:$0xff]   ;;  %v10809_v31 = vld [vmem:[%s15502_s1 + $0xe44] ss:$16 sps:$4 sm:$0xff]  }
 0x18c   :  { %7156 = vmatprep.subr.bf16.mxu0 %v10717_v32  ;;  %7894 = vmatprep.subr.bf16.mxu1 %v10720_v33  ;;  %v10812_v32 = vld [vmem:[%s15502_s1 + $0xe4c] ss:$16 sps:$4 sm:$0xff]   ;;  %v10807_v33 = vld [vmem:[%s15502_s1 + $0xe40] ss:$16 sps:$4 sm:$0xff]  }
 0x18f   :  { %7157 = vmatpush1.bf16.msra.mxu0 %v10715_v34  ;;  %7895 = vmatpush1.bf16.msra.mxu1 %v10718_v35  ;;  %v10810_v34 = vld [vmem:[%s15502_s1 + $0xe48] ss:$16 sps:$4 sm:$0xff]   ;;  %v10815_v35 = vld [vmem:[%s15502_s1 + $0xe64] ss:$16 sps:$4 sm:$0xff]  }
 0x190   :  { %7158 = vmatprep.subr.bf16.mxu0 %v10723_v36  ;;  %7896 = vmatprep.subr.bf16.mxu1 %v10726_v37  ;;  %v10818_v36 = vld [vmem:[%s15502_s1 + $0xe6c] ss:$16 sps:$4 sm:$0xff]   ;;  %v10813_v37 = vld [vmem:[%s15502_s1 + $0xe60] ss:$16 sps:$4 sm:$0xff]  }
 0x193   :  { %7159 = vmatpush1.bf16.msra.mxu0 %v10721_v38  ;;  %7897 = vmatpush1.bf16.msra.mxu1 %v10724_v39  ;;  %v10816_v38 = vld [vmem:[%s15502_s1 + $0xe68] ss:$16 sps:$4 sm:$0xff]   ;;  %v10821_v39 = vld [vmem:[%s15502_s1 + $0xe84] ss:$16 sps:$4 sm:$0xff]  }
 0x194   :  { %7160 = vmatprep.subr.bf16.mxu0 %v10729_v40  ;;  %7898 = vmatprep.subr.bf16.mxu1 %v10732_v41  ;;  %v10824_v40 = vld [vmem:[%s15502_s1 + $0xe8c] ss:$16 sps:$4 sm:$0xff]   ;;  %v10819_v41 = vld [vmem:[%s15502_s1 + $0xe80] ss:$16 sps:$4 sm:$0xff]  }
 0x197   :  { %7161 = vmatpush1.bf16.msra.mxu0 %v10727_v42  ;;  %7899 = vmatpush1.bf16.msra.mxu1 %v10730_v43  ;;  %v10822_v42 = vld [vmem:[%s15502_s1 + $0xe88] ss:$16 sps:$4 sm:$0xff]   ;;  %v10827_v43 = vld [vmem:[%s15502_s1 + $0xea4] ss:$16 sps:$4 sm:$0xff]  }
 0x198   :  { %7162 = vmatprep.subr.bf16.mxu0 %v10735_v44  ;;  %7900 = vmatprep.subr.bf16.mxu1 %v10738_v45  ;;  %v10830_v44 = vld [vmem:[%s15502_s1 + $0xeac] ss:$16 sps:$4 sm:$0xff]   ;;  %v10825_v45 = vld [vmem:[%s15502_s1 + $0xea0] ss:$16 sps:$4 sm:$0xff]  }
 0x19b   :  { %7163 = vmatpush1.bf16.msra.mxu0 %v10733_v46  ;;  %7901 = vmatpush1.bf16.msra.mxu1 %v10736_v47  ;;  %v10828_v46 = vld [vmem:[%s15502_s1 + $0xea8] ss:$16 sps:$4 sm:$0xff]   ;;  %v10833_v47 = vld [vmem:[%s15502_s1 + $0xec4] ss:$16 sps:$4 sm:$0xff]  }
 0x19c   :  { %7164 = vmatprep.subr.bf16.mxu0 %v10741_v48  ;;  %7902 = vmatprep.subr.bf16.mxu1 %v10744_v49  ;;  %v10836_v48 = vld [vmem:[%s15502_s1 + $0xecc] ss:$16 sps:$4 sm:$0xff]   ;;  %v10831_v49 = vld [vmem:[%s15502_s1 + $0xec0] ss:$16 sps:$4 sm:$0xff]  }
 0x19f   :  { %7165 = vmatpush1.bf16.msra.mxu0 %v10739_v50  ;;  %7903 = vmatpush1.bf16.msra.mxu1 %v10742_v51  ;;  %v10834_v50 = vld [vmem:[%s15502_s1 + $0xec8] ss:$16 sps:$4 sm:$0xff]   ;;  %v10839_v51 = vld [vmem:[%s15502_s1 + $0xee4] ss:$16 sps:$4 sm:$0xff]  }
 0x1a0   :  { %7166 = vmatprep.subr.bf16.mxu0 %v10747_v52  ;;  %7904 = vmatprep.subr.bf16.mxu1 %v10750_v53  ;;  %v10842_v52 = vld [vmem:[%s15502_s1 + $0xeec] ss:$16 sps:$4 sm:$0xff]   ;;  %v10837_v53 = vld [vmem:[%s15502_s1 + $0xee0] ss:$16 sps:$4 sm:$0xff]  }
 0x1a3   :  { %7167 = vmatpush1.bf16.msra.mxu0 %v10745_v54  ;;  %7905 = vmatpush1.bf16.msra.mxu1 %v10748_v55  ;;  %v10840_v54 = vld [vmem:[%s15502_s1 + $0xee8] ss:$16 sps:$4 sm:$0xff]   ;;  %v10845_v55 = vld [vmem:[%s15502_s1 + $0xf04] ss:$16 sps:$4 sm:$0xff]  }
 0x1a4   :  { %7168 = vmatprep.subr.bf16.mxu0 %v10753_v56  ;;  %7906 = vmatprep.subr.bf16.mxu1 %v10756_v57  ;;  %v10848_v56 = vld [vmem:[%s15502_s1 + $0xf0c] ss:$16 sps:$4 sm:$0xff]   ;;  %v10843_v57 = vld [vmem:[%s15502_s1 + $0xf00] ss:$16 sps:$4 sm:$0xff]  }
 0x1a7   :  { %7169 = vmatpush1.bf16.msra.mxu0 %v10751_v58  ;;  %7907 = vmatpush1.bf16.msra.mxu1 %v10754_v59  ;;  %v10846_v58 = vld [vmem:[%s15502_s1 + $0xf08] ss:$16 sps:$4 sm:$0xff]   ;;  %v10851_v59 = vld [vmem:[%s15502_s1 + $0xf24] ss:$16 sps:$4 sm:$0xff]  }
 0x1a8   :  { %7170 = vmatprep.subr.bf16.mxu0 %v10759_v60  ;;  %7908 = vmatprep.subr.bf16.mxu1 %v10762_v61  ;;  %v10854_v60 = vld [vmem:[%s15502_s1 + $0xf2c] ss:$16 sps:$4 sm:$0xff]   ;;  %v10849_v61 = vld [vmem:[%s15502_s1 + $0xf20] ss:$16 sps:$4 sm:$0xff]  }
 0x1ab   :  { %7171 = vmatpush1.bf16.msra.mxu0 %v10757_v62  ;;  %7909 = vmatpush1.bf16.msra.mxu1 %v10760_v63  ;;  %v10852_v62 = vld [vmem:[%s15502_s1 + $0xf28] ss:$16 sps:$4 sm:$0xff]   ;;  %v10857_v63 = vld [vmem:[%s15502_s1 + $0xf44] ss:$16 sps:$4 sm:$0xff]  }
 0x1ac   :  { %7172 = vmatprep.subr.bf16.mxu0 %v10765_v0  ;;  %7910 = vmatprep.subr.bf16.mxu1 %v10768_v1  ;;  %v10860_v0 = vld [vmem:[%s15502_s1 + $0xf4c] ss:$16 sps:$4 sm:$0xff]   ;;  %v10855_v1 = vld [vmem:[%s15502_s1 + $0xf40] ss:$16 sps:$4 sm:$0xff]  }
 0x1af   :  { %7173 = vmatpush1.bf16.msra.mxu0 %v10763_v2  ;;  %7911 = vmatpush1.bf16.msra.mxu1 %v10766_v3  ;;  %v10858_v2 = vld [vmem:[%s15502_s1 + $0xf48] ss:$16 sps:$4 sm:$0xff]   ;;  %v10863_v3 = vld [vmem:[%s15502_s1 + $0xf64] ss:$16 sps:$4 sm:$0xff]  }
 0x1b0   :  { %7174 = vmatprep.subr.bf16.mxu0 %v10771_v4  ;;  %7912 = vmatprep.subr.bf16.mxu1 %v10774_v5  ;;  %v10866_v4 = vld [vmem:[%s15502_s1 + $0xf6c] ss:$16 sps:$4 sm:$0xff]   ;;  %v10861_v5 = vld [vmem:[%s15502_s1 + $0xf60] ss:$16 sps:$4 sm:$0xff]  }
 0x1b3   :  { %7175 = vmatpush1.bf16.msra.mxu0 %v10769_v6  ;;  %7913 = vmatpush1.bf16.msra.mxu1 %v10772_v7  ;;  %v10864_v6 = vld [vmem:[%s15502_s1 + $0xf68] ss:$16 sps:$4 sm:$0xff]   ;;  %v10869_v7 = vld [vmem:[%s15502_s1 + $0xf84] ss:$16 sps:$4 sm:$0xff]  }
 0x1b4   :  { %7176 = vmatprep.subr.bf16.mxu0 %v10777_v8  ;;  %7914 = vmatprep.subr.bf16.mxu1 %v10780_v9  ;;  %v10872_v8 = vld [vmem:[%s15502_s1 + $0xf8c] ss:$16 sps:$4 sm:$0xff]   ;;  %v10867_v9 = vld [vmem:[%s15502_s1 + $0xf80] ss:$16 sps:$4 sm:$0xff]  }
 0x1b7   :  { %7177 = vmatpush1.bf16.msra.mxu0 %v10775_v10  ;;  %7915 = vmatpush1.bf16.msra.mxu1 %v10778_v12  ;;  %v10870_v10 = vld [vmem:[%s15502_s1 + $0xf88] ss:$16 sps:$4 sm:$0xff]   ;;  %v10875_v12 = vld [vmem:[%s15502_s1 + $0xfa4] ss:$16 sps:$4 sm:$0xff]  }
 0x1b8   :  { %7178 = vmatprep.subr.bf16.mxu0 %v10783_v13  ;;  %7916 = vmatprep.subr.bf16.mxu1 %v10786_v15  ;;  %v10878_v13 = vld [vmem:[%s15502_s1 + $0xfac] ss:$16 sps:$4 sm:$0xff]   ;;  %v10873_v15 = vld [vmem:[%s15502_s1 + $0xfa0] ss:$16 sps:$4 sm:$0xff]  }
 0x1bb   :  { %7179 = vmatpush1.bf16.msra.mxu0 %v10781_v11  ;;  %7917 = vmatpush1.bf16.msra.mxu1 %v10784_v17  ;;  %v10876_v11 = vld [vmem:[%s15502_s1 + $0xfa8] ss:$16 sps:$4 sm:$0xff]   ;;  %v10881_v17 = vld [vmem:[%s15502_s1 + $0xfc4] ss:$16 sps:$4 sm:$0xff]  }
 0x1bc   :  { %7180 = vmatprep.subr.bf16.mxu0 %v10789_v14  ;;  %7918 = vmatprep.subr.bf16.mxu1 %v10792_v19  ;;  %v10884_v14 = vld [vmem:[%s15502_s1 + $0xfcc] ss:$16 sps:$4 sm:$0xff]   ;;  %v10879_v19 = vld [vmem:[%s15502_s1 + $0xfc0] ss:$16 sps:$4 sm:$0xff]  }
 0x1bf   :  { %7181 = vmatpush1.bf16.msra.mxu0 %v10787_v20  ;;  %7919 = vmatpush1.bf16.msra.mxu1 %v10790_v16  ;;  %v10882_v20 = vld [vmem:[%s15502_s1 + $0xfc8] ss:$16 sps:$4 sm:$0xff]   ;;  %v10887_v16 = vld [vmem:[%s15502_s1 + $0xfe4] ss:$16 sps:$4 sm:$0xff]  }
 0x1c0   :  { %7191 = vmatprep.subr.bf16.mxu0 %v10797_v22  ;;  %7929 = vmatprep.subr.bf16.mxu1 %v10800_v23  ;;  %v10890_v22 = vld [vmem:[%s15502_s1 + $0xfec] ss:$16 sps:$4 sm:$0xff]   ;;  %v10885_v23 = vld [vmem:[%s15502_s1 + $0xfe0] ss:$16 sps:$4 sm:$0xff]  }
 0x1c2   :  { %7183 = vmatmul.mubr.bf16.vlgmr.msra.gmra.mrb[0].mxu0 %v8748_v18  ;;  %7921 = vmatmul.mubr.bf16.vlgmr.msra.gmra.mrb[0].mxu1 %v8748_v18  ;;  %v10888_v18 = vld [vmem:[%s15502_s1 + $0xfe8] ss:$16 sps:$4 sm:$0xff]  }
 0x1c3   :  { %7192 = vmatpush1.bf16.msra.mxu0 %v10795_v25  ;;  %7930 = vmatpush1.bf16.msra.mxu1 %v10798_v26  ;;  %v10895_v25 = vld [vmem:[%s15502_s1 + $0x1004] ss:$16 sps:$4 sm:$0xff]   ;;  %v10898_v26 = vld [vmem:[%s15502_s1 + $0x100c] ss:$16 sps:$4 sm:$0xff]  }
 0x1c4   :  { %7193 = vmatprep.subr.bf16.mxu0 %v10803_v27  ;;  %7931 = vmatprep.subr.bf16.mxu1 %v10806_v21  ;;  %v13496_v27 = vld [vmem:[%s15503_s0 + $0x40] sm:$0xff]  ;;  %v8750_v21 = vcombine.low %v13295_v24, %v13295_v24  ;;  %v10904_v24 = vld [vmem:[%s15502_s1 + $0x102c] ss:$16 sps:$4 sm:$0xff]  }
 0x1c5   :  { %7223 = vmatprep.mubr.bf16.mxu0 %v8751_v28  ;;  %7961 = vmatprep.mubr.bf16.mxu1 %v8751_v28  ;;  %v10893_v28 = vld [vmem:[%s15502_s1 + $0x1000] ss:$16 sps:$4 sm:$0xff]  }
 0x1c7   :  { %7194 = vmatpush1.bf16.msra.mxu0 %v10801_v29  ;;  %7932 = vmatpush1.bf16.msra.mxu1 %v10804_v30  ;;  %v10896_v29 = vld [vmem:[%s15502_s1 + $0x1008] ss:$16 sps:$4 sm:$0xff]   ;;  %v10901_v30 = vld [vmem:[%s15502_s1 + $0x1024] ss:$16 sps:$4 sm:$0xff]  }
 0x1c8   :  { %7195 = vmatprep.subr.bf16.mxu0 %v10809_v31  ;;  %7933 = vmatprep.subr.bf16.mxu1 %v10812_v32  ;;  %v8753_v31 = vcombine.high %v13496_v27, %v13496_v27  ;;  %v10899_v32 = vld [vmem:[%s15502_s1 + $0x1020] ss:$16 sps:$4 sm:$0xff]  }
 0x1cb   :  { %7196 = vmatpush1.bf16.msra.mxu0 %v10807_v33  ;;  %7934 = vmatpush1.bf16.msra.mxu1 %v10810_v34  ;;  %v10902_v33 = vld [vmem:[%s15502_s1 + $0x1028] ss:$16 sps:$4 sm:$0xff]   ;;  %v10907_v34 = vld [vmem:[%s15502_s1 + $0x1044] ss:$16 sps:$4 sm:$0xff]  }
 0x1cc   :  { %7197 = vmatprep.subr.bf16.mxu0 %v10815_v35  ;;  %7935 = vmatprep.subr.bf16.mxu1 %v10818_v36  ;;  %v10910_v35 = vld [vmem:[%s15502_s1 + $0x104c] ss:$16 sps:$4 sm:$0xff]   ;;  %v10905_v36 = vld [vmem:[%s15502_s1 + $0x1040] ss:$16 sps:$4 sm:$0xff]  }
 0x1cf   :  { %7198 = vmatpush1.bf16.msra.mxu0 %v10813_v37  ;;  %7936 = vmatpush1.bf16.msra.mxu1 %v10816_v38  ;;  %v10908_v37 = vld [vmem:[%s15502_s1 + $0x1048] ss:$16 sps:$4 sm:$0xff]   ;;  %v10913_v38 = vld [vmem:[%s15502_s1 + $0x1064] ss:$16 sps:$4 sm:$0xff]  }
 0x1d0   :  { %7199 = vmatprep.subr.bf16.mxu0 %v10821_v39  ;;  %7937 = vmatprep.subr.bf16.mxu1 %v10824_v40  ;;  %v10916_v39 = vld [vmem:[%s15502_s1 + $0x106c] ss:$16 sps:$4 sm:$0xff]   ;;  %v10911_v40 = vld [vmem:[%s15502_s1 + $0x1060] ss:$16 sps:$4 sm:$0xff]  }
 0x1d3   :  { %7200 = vmatpush1.bf16.msra.mxu0 %v10819_v41  ;;  %7938 = vmatpush1.bf16.msra.mxu1 %v10822_v42  ;;  %v10914_v41 = vld [vmem:[%s15502_s1 + $0x1068] ss:$16 sps:$4 sm:$0xff]   ;;  %v10919_v42 = vld [vmem:[%s15502_s1 + $0x1084] ss:$16 sps:$4 sm:$0xff]  }
 0x1d4   :  { %7201 = vmatprep.subr.bf16.mxu0 %v10827_v43  ;;  %7939 = vmatprep.subr.bf16.mxu1 %v10830_v44  ;;  %v10922_v43 = vld [vmem:[%s15502_s1 + $0x108c] ss:$16 sps:$4 sm:$0xff]   ;;  %v10917_v44 = vld [vmem:[%s15502_s1 + $0x1080] ss:$16 sps:$4 sm:$0xff]  }
 0x1d7   :  { %7202 = vmatpush1.bf16.msra.mxu0 %v10825_v45  ;;  %7940 = vmatpush1.bf16.msra.mxu1 %v10828_v46  ;;  %v10920_v45 = vld [vmem:[%s15502_s1 + $0x1088] ss:$16 sps:$4 sm:$0xff]   ;;  %v10925_v46 = vld [vmem:[%s15502_s1 + $0x10a4] ss:$16 sps:$4 sm:$0xff]  }
 0x1d8   :  { %7203 = vmatprep.subr.bf16.mxu0 %v10833_v47  ;;  %7941 = vmatprep.subr.bf16.mxu1 %v10836_v48  ;;  %v10928_v47 = vld [vmem:[%s15502_s1 + $0x10ac] ss:$16 sps:$4 sm:$0xff]   ;;  %v10923_v48 = vld [vmem:[%s15502_s1 + $0x10a0] ss:$16 sps:$4 sm:$0xff]  }
 0x1db   :  { %7204 = vmatpush1.bf16.msra.mxu0 %v10831_v49  ;;  %7942 = vmatpush1.bf16.msra.mxu1 %v10834_v50  ;;  %v10926_v49 = vld [vmem:[%s15502_s1 + $0x10a8] ss:$16 sps:$4 sm:$0xff]   ;;  %v10931_v50 = vld [vmem:[%s15502_s1 + $0x10c4] ss:$16 sps:$4 sm:$0xff]  }
 0x1dc   :  { %7205 = vmatprep.subr.bf16.mxu0 %v10839_v51  ;;  %7943 = vmatprep.subr.bf16.mxu1 %v10842_v52  ;;  %v10934_v51 = vld [vmem:[%s15502_s1 + $0x10cc] ss:$16 sps:$4 sm:$0xff]   ;;  %v10929_v52 = vld [vmem:[%s15502_s1 + $0x10c0] ss:$16 sps:$4 sm:$0xff]  }
 0x1df   :  { %7206 = vmatpush1.bf16.msra.mxu0 %v10837_v53  ;;  %7944 = vmatpush1.bf16.msra.mxu1 %v10840_v54  ;;  %v10932_v53 = vld [vmem:[%s15502_s1 + $0x10c8] ss:$16 sps:$4 sm:$0xff]   ;;  %v10937_v54 = vld [vmem:[%s15502_s1 + $0x10e4] ss:$16 sps:$4 sm:$0xff]  }
 0x1e0   :  { %7207 = vmatprep.subr.bf16.mxu0 %v10845_v55  ;;  %7945 = vmatprep.subr.bf16.mxu1 %v10848_v56  ;;  %v10940_v55 = vld [vmem:[%s15502_s1 + $0x10ec] ss:$16 sps:$4 sm:$0xff]   ;;  %v10935_v56 = vld [vmem:[%s15502_s1 + $0x10e0] ss:$16 sps:$4 sm:$0xff]  }
 0x1e3   :  { %7208 = vmatpush1.bf16.msra.mxu0 %v10843_v57  ;;  %7946 = vmatpush1.bf16.msra.mxu1 %v10846_v58  ;;  %v10938_v57 = vld [vmem:[%s15502_s1 + $0x10e8] ss:$16 sps:$4 sm:$0xff]   ;;  %v10943_v58 = vld [vmem:[%s15502_s1 + $0x1104] ss:$16 sps:$4 sm:$0xff]  }
 0x1e4   :  { %7209 = vmatprep.subr.bf16.mxu0 %v10851_v59  ;;  %7947 = vmatprep.subr.bf16.mxu1 %v10854_v60  ;;  %v10946_v59 = vld [vmem:[%s15502_s1 + $0x110c] ss:$16 sps:$4 sm:$0xff]   ;;  %v10941_v60 = vld [vmem:[%s15502_s1 + $0x1100] ss:$16 sps:$4 sm:$0xff]  }
 0x1e7   :  { %7210 = vmatpush1.bf16.msra.mxu0 %v10849_v61  ;;  %7948 = vmatpush1.bf16.msra.mxu1 %v10852_v62  ;;  %v10944_v61 = vld [vmem:[%s15502_s1 + $0x1108] ss:$16 sps:$4 sm:$0xff]   ;;  %v10949_v62 = vld [vmem:[%s15502_s1 + $0x1124] ss:$16 sps:$4 sm:$0xff]  }
 0x1e8   :  { %7211 = vmatprep.subr.bf16.mxu0 %v10857_v63  ;;  %7949 = vmatprep.subr.bf16.mxu1 %v10860_v0  ;;  %v10952_v63 = vld [vmem:[%s15502_s1 + $0x112c] ss:$16 sps:$4 sm:$0xff]   ;;  %v10947_v0 = vld [vmem:[%s15502_s1 + $0x1120] ss:$16 sps:$4 sm:$0xff]  }
 0x1eb   :  { %7212 = vmatpush1.bf16.msra.mxu0 %v10855_v1  ;;  %7950 = vmatpush1.bf16.msra.mxu1 %v10858_v2  ;;  %v10950_v1 = vld [vmem:[%s15502_s1 + $0x1128] ss:$16 sps:$4 sm:$0xff]   ;;  %v10955_v2 = vld [vmem:[%s15502_s1 + $0x1144] ss:$16 sps:$4 sm:$0xff]  }
 0x1ec   :  { %7213 = vmatprep.subr.bf16.mxu0 %v10863_v3  ;;  %7951 = vmatprep.subr.bf16.mxu1 %v10866_v4  ;;  %v10958_v3 = vld [vmem:[%s15502_s1 + $0x114c] ss:$16 sps:$4 sm:$0xff]   ;;  %v10953_v4 = vld [vmem:[%s15502_s1 + $0x1140] ss:$16 sps:$4 sm:$0xff]  }
 0x1ef   :  { %7214 = vmatpush1.bf16.msra.mxu0 %v10861_v5  ;;  %7952 = vmatpush1.bf16.msra.mxu1 %v10864_v6  ;;  %v10956_v5 = vld [vmem:[%s15502_s1 + $0x1148] ss:$16 sps:$4 sm:$0xff]   ;;  %v10961_v6 = vld [vmem:[%s15502_s1 + $0x1164] ss:$16 sps:$4 sm:$0xff]  }
 0x1f0   :  { %7215 = vmatprep.subr.bf16.mxu0 %v10869_v7  ;;  %7953 = vmatprep.subr.bf16.mxu1 %v10872_v8  ;;  %v10964_v7 = vld [vmem:[%s15502_s1 + $0x116c] ss:$16 sps:$4 sm:$0xff]   ;;  %v10959_v8 = vld [vmem:[%s15502_s1 + $0x1160] ss:$16 sps:$4 sm:$0xff]  }
 0x1f3   :  { %7216 = vmatpush1.bf16.msra.mxu0 %v10867_v9  ;;  %7954 = vmatpush1.bf16.msra.mxu1 %v10870_v10  ;;  %v10962_v9 = vld [vmem:[%s15502_s1 + $0x1168] ss:$16 sps:$4 sm:$0xff]   ;;  %v10967_v10 = vld [vmem:[%s15502_s1 + $0x1184] ss:$16 sps:$4 sm:$0xff]  }
 0x1f4   :  { %7217 = vmatprep.subr.bf16.mxu0 %v10875_v12  ;;  %7955 = vmatprep.subr.bf16.mxu1 %v10878_v13  ;;  %v10970_v12 = vld [vmem:[%s15502_s1 + $0x118c] ss:$16 sps:$4 sm:$0xff]   ;;  %v10965_v13 = vld [vmem:[%s15502_s1 + $0x1180] ss:$16 sps:$4 sm:$0xff]  }
 0x1f7   :  { %7218 = vmatpush1.bf16.msra.mxu0 %v10873_v15  ;;  %7956 = vmatpush1.bf16.msra.mxu1 %v10876_v11  ;;  %v10968_v15 = vld [vmem:[%s15502_s1 + $0x1188] ss:$16 sps:$4 sm:$0xff]   ;;  %v10973_v11 = vld [vmem:[%s15502_s1 + $0x11a4] ss:$16 sps:$4 sm:$0xff]  }
 0x1f8   :  { %7219 = vmatprep.subr.bf16.mxu0 %v10881_v17  ;;  %7957 = vmatprep.subr.bf16.mxu1 %v10884_v14  ;;  %v10976_v17 = vld [vmem:[%s15502_s1 + $0x11ac] ss:$16 sps:$4 sm:$0xff]   ;;  %v10971_v14 = vld [vmem:[%s15502_s1 + $0x11a0] ss:$16 sps:$4 sm:$0xff]  }
 0x1fb   :  { %7220 = vmatpush1.bf16.msra.mxu0 %v10879_v19  ;;  %7958 = vmatpush1.bf16.msra.mxu1 %v10882_v20  ;;  %v10974_v19 = vld [vmem:[%s15502_s1 + $0x11a8] ss:$16 sps:$4 sm:$0xff]   ;;  %v10979_v20 = vld [vmem:[%s15502_s1 + $0x11c4] ss:$16 sps:$4 sm:$0xff]  }
 0x1fc   :  { %7221 = vmatprep.subr.bf16.mxu0 %v10887_v16  ;;  %7959 = vmatprep.subr.bf16.mxu1 %v10890_v22  ;;  %v10982_v16 = vld [vmem:[%s15502_s1 + $0x11cc] ss:$16 sps:$4 sm:$0xff]   ;;  %v10977_v22 = vld [vmem:[%s15502_s1 + $0x11c0] ss:$16 sps:$4 sm:$0xff]  }
 0x1ff   :  { %7222 = vmatpush1.bf16.msra.mxu0 %v10885_v23  ;;  %7960 = vmatpush1.bf16.msra.mxu1 %v10888_v18  ;;  %v10980_v23 = vld [vmem:[%s15502_s1 + $0x11c8] ss:$16 sps:$4 sm:$0xff]   ;;  %v10985_v18 = vld [vmem:[%s15502_s1 + $0x11e4] ss:$16 sps:$4 sm:$0xff]  }
 0x200   :  { %7232 = vmatprep.subr.bf16.mxu0 %v10895_v25  ;;  %7970 = vmatprep.subr.bf16.mxu1 %v10898_v26  ;;  %v10988_v25 = vld [vmem:[%s15502_s1 + $0x11ec] ss:$16 sps:$4 sm:$0xff]   ;;  %v10983_v26 = vld [vmem:[%s15502_s1 + $0x11e0] ss:$16 sps:$4 sm:$0xff]  }
 0x202   :  { %7224 = vmatmul.mubr.bf16.vlgmr.msra.gmra.mrb[0].mxu0 %v8750_v21  ;;  %7962 = vmatmul.mubr.bf16.vlgmr.msra.gmra.mrb[0].mxu1 %v8750_v21  ;;  %v10986_v21 = vld [vmem:[%s15502_s1 + $0x11e8] ss:$16 sps:$4 sm:$0xff]  }
 0x203   :  { %7233 = vmatpush1.bf16.msra.mxu0 %v10893_v28  ;;  %7971 = vmatpush1.bf16.msra.mxu1 %v10896_v29  ;;  %v10993_v28 = vld [vmem:[%s15502_s1 + $0x1204] ss:$16 sps:$4 sm:$0xff]   ;;  %v10996_v29 = vld [vmem:[%s15502_s1 + $0x120c] ss:$16 sps:$4 sm:$0xff]  }
 0x204   :  { %7234 = vmatprep.subr.bf16.mxu0 %v10901_v30  ;;  %7972 = vmatprep.subr.bf16.mxu1 %v10904_v24  ;;  %v13697_v30 = vld [vmem:[%s15503_s0 + $0x48] sm:$0xff]  ;;  %v8752_v24 = vcombine.low %v13496_v27, %v13496_v27 }
 0x205   :  { %7264 = vmatprep.mubr.bf16.mxu0 %v8753_v31  ;;  %8002 = vmatprep.mubr.bf16.mxu1 %v8753_v31  ;;  %v10991_v31 = vld [vmem:[%s15502_s1 + $0x1200] ss:$16 sps:$4 sm:$0xff]   ;;  %v11002_v27 = vld [vmem:[%s15502_s1 + $0x122c] ss:$16 sps:$4 sm:$0xff]  }
 0x207   :  { %7235 = vmatpush1.bf16.msra.mxu0 %v10899_v32  ;;  %7973 = vmatpush1.bf16.msra.mxu1 %v10902_v33  ;;  %v10994_v32 = vld [vmem:[%s15502_s1 + $0x1208] ss:$16 sps:$4 sm:$0xff]   ;;  %v10999_v33 = vld [vmem:[%s15502_s1 + $0x1224] ss:$16 sps:$4 sm:$0xff]  }
 0x208   :  { %7236 = vmatprep.subr.bf16.mxu0 %v10907_v34  ;;  %7974 = vmatprep.subr.bf16.mxu1 %v10910_v35  ;;  %v8755_v34 = vcombine.high %v13697_v30, %v13697_v30  ;;  %v10997_v35 = vld [vmem:[%s15502_s1 + $0x1220] ss:$16 sps:$4 sm:$0xff]  }
 0x20b   :  { %7237 = vmatpush1.bf16.msra.mxu0 %v10905_v36  ;;  %7975 = vmatpush1.bf16.msra.mxu1 %v10908_v37  ;;  %v11000_v36 = vld [vmem:[%s15502_s1 + $0x1228] ss:$16 sps:$4 sm:$0xff]   ;;  %v11005_v37 = vld [vmem:[%s15502_s1 + $0x1244] ss:$16 sps:$4 sm:$0xff]  }
 0x20c   :  { %7238 = vmatprep.subr.bf16.mxu0 %v10913_v38  ;;  %7976 = vmatprep.subr.bf16.mxu1 %v10916_v39  ;;  %v11008_v38 = vld [vmem:[%s15502_s1 + $0x124c] ss:$16 sps:$4 sm:$0xff]   ;;  %v11003_v39 = vld [vmem:[%s15502_s1 + $0x1240] ss:$16 sps:$4 sm:$0xff]  }
 0x20f   :  { %7239 = vmatpush1.bf16.msra.mxu0 %v10911_v40  ;;  %7977 = vmatpush1.bf16.msra.mxu1 %v10914_v41  ;;  %v11006_v40 = vld [vmem:[%s15502_s1 + $0x1248] ss:$16 sps:$4 sm:$0xff]   ;;  %v11011_v41 = vld [vmem:[%s15502_s1 + $0x1264] ss:$16 sps:$4 sm:$0xff]  }
 0x210   :  { %7240 = vmatprep.subr.bf16.mxu0 %v10919_v42  ;;  %7978 = vmatprep.subr.bf16.mxu1 %v10922_v43  ;;  %v11014_v42 = vld [vmem:[%s15502_s1 + $0x126c] ss:$16 sps:$4 sm:$0xff]   ;;  %v11009_v43 = vld [vmem:[%s15502_s1 + $0x1260] ss:$16 sps:$4 sm:$0xff]  }
 0x213   :  { %7241 = vmatpush1.bf16.msra.mxu0 %v10917_v44  ;;  %7979 = vmatpush1.bf16.msra.mxu1 %v10920_v45  ;;  %v11012_v44 = vld [vmem:[%s15502_s1 + $0x1268] ss:$16 sps:$4 sm:$0xff]   ;;  %v11017_v45 = vld [vmem:[%s15502_s1 + $0x1284] ss:$16 sps:$4 sm:$0xff]  }
 0x214   :  { %7242 = vmatprep.subr.bf16.mxu0 %v10925_v46  ;;  %7980 = vmatprep.subr.bf16.mxu1 %v10928_v47  ;;  %v11020_v46 = vld [vmem:[%s15502_s1 + $0x128c] ss:$16 sps:$4 sm:$0xff]   ;;  %v11015_v47 = vld [vmem:[%s15502_s1 + $0x1280] ss:$16 sps:$4 sm:$0xff]  }
 0x217   :  { %7243 = vmatpush1.bf16.msra.mxu0 %v10923_v48  ;;  %7981 = vmatpush1.bf16.msra.mxu1 %v10926_v49  ;;  %v11018_v48 = vld [vmem:[%s15502_s1 + $0x1288] ss:$16 sps:$4 sm:$0xff]   ;;  %v11023_v49 = vld [vmem:[%s15502_s1 + $0x12a4] ss:$16 sps:$4 sm:$0xff]  }
 0x218   :  { %7244 = vmatprep.subr.bf16.mxu0 %v10931_v50  ;;  %7982 = vmatprep.subr.bf16.mxu1 %v10934_v51  ;;  %v11026_v50 = vld [vmem:[%s15502_s1 + $0x12ac] ss:$16 sps:$4 sm:$0xff]   ;;  %v11021_v51 = vld [vmem:[%s15502_s1 + $0x12a0] ss:$16 sps:$4 sm:$0xff]  }
 0x21b   :  { %7245 = vmatpush1.bf16.msra.mxu0 %v10929_v52  ;;  %7983 = vmatpush1.bf16.msra.mxu1 %v10932_v53  ;;  %v11024_v52 = vld [vmem:[%s15502_s1 + $0x12a8] ss:$16 sps:$4 sm:$0xff]   ;;  %v11029_v53 = vld [vmem:[%s15502_s1 + $0x12c4] ss:$16 sps:$4 sm:$0xff]  }
 0x21c   :  { %7246 = vmatprep.subr.bf16.mxu0 %v10937_v54  ;;  %7984 = vmatprep.subr.bf16.mxu1 %v10940_v55  ;;  %v11032_v54 = vld [vmem:[%s15502_s1 + $0x12cc] ss:$16 sps:$4 sm:$0xff]   ;;  %v11027_v55 = vld [vmem:[%s15502_s1 + $0x12c0] ss:$16 sps:$4 sm:$0xff]  }
 0x21f   :  { %7247 = vmatpush1.bf16.msra.mxu0 %v10935_v56  ;;  %7985 = vmatpush1.bf16.msra.mxu1 %v10938_v57  ;;  %v11030_v56 = vld [vmem:[%s15502_s1 + $0x12c8] ss:$16 sps:$4 sm:$0xff]   ;;  %v11035_v57 = vld [vmem:[%s15502_s1 + $0x12e4] ss:$16 sps:$4 sm:$0xff]  }
 0x220   :  { %7248 = vmatprep.subr.bf16.mxu0 %v10943_v58  ;;  %7986 = vmatprep.subr.bf16.mxu1 %v10946_v59  ;;  %v11038_v58 = vld [vmem:[%s15502_s1 + $0x12ec] ss:$16 sps:$4 sm:$0xff]   ;;  %v11033_v59 = vld [vmem:[%s15502_s1 + $0x12e0] ss:$16 sps:$4 sm:$0xff]  }
 0x223   :  { %7249 = vmatpush1.bf16.msra.mxu0 %v10941_v60  ;;  %7987 = vmatpush1.bf16.msra.mxu1 %v10944_v61  ;;  %v11036_v60 = vld [vmem:[%s15502_s1 + $0x12e8] ss:$16 sps:$4 sm:$0xff]   ;;  %v11041_v61 = vld [vmem:[%s15502_s1 + $0x1304] ss:$16 sps:$4 sm:$0xff]  }
 0x224   :  { %7250 = vmatprep.subr.bf16.mxu0 %v10949_v62  ;;  %7988 = vmatprep.subr.bf16.mxu1 %v10952_v63  ;;  %v11044_v62 = vld [vmem:[%s15502_s1 + $0x130c] ss:$16 sps:$4 sm:$0xff]   ;;  %v11039_v63 = vld [vmem:[%s15502_s1 + $0x1300] ss:$16 sps:$4 sm:$0xff]  }
 0x227   :  { %7251 = vmatpush1.bf16.msra.mxu0 %v10947_v0  ;;  %7989 = vmatpush1.bf16.msra.mxu1 %v10950_v1  ;;  %v11042_v0 = vld [vmem:[%s15502_s1 + $0x1308] ss:$16 sps:$4 sm:$0xff]   ;;  %v11047_v1 = vld [vmem:[%s15502_s1 + $0x1324] ss:$16 sps:$4 sm:$0xff]  }
 0x228   :  { %7252 = vmatprep.subr.bf16.mxu0 %v10955_v2  ;;  %7990 = vmatprep.subr.bf16.mxu1 %v10958_v3  ;;  %v11050_v2 = vld [vmem:[%s15502_s1 + $0x132c] ss:$16 sps:$4 sm:$0xff]   ;;  %v11045_v3 = vld [vmem:[%s15502_s1 + $0x1320] ss:$16 sps:$4 sm:$0xff]  }
 0x22b   :  { %7253 = vmatpush1.bf16.msra.mxu0 %v10953_v4  ;;  %7991 = vmatpush1.bf16.msra.mxu1 %v10956_v5  ;;  %v11048_v4 = vld [vmem:[%s15502_s1 + $0x1328] ss:$16 sps:$4 sm:$0xff]   ;;  %v11053_v5 = vld [vmem:[%s15502_s1 + $0x1344] ss:$16 sps:$4 sm:$0xff]  }
 0x22c   :  { %7254 = vmatprep.subr.bf16.mxu0 %v10961_v6  ;;  %7992 = vmatprep.subr.bf16.mxu1 %v10964_v7  ;;  %v11056_v6 = vld [vmem:[%s15502_s1 + $0x134c] ss:$16 sps:$4 sm:$0xff]   ;;  %v11051_v7 = vld [vmem:[%s15502_s1 + $0x1340] ss:$16 sps:$4 sm:$0xff]  }
 0x22f   :  { %7255 = vmatpush1.bf16.msra.mxu0 %v10959_v8  ;;  %7993 = vmatpush1.bf16.msra.mxu1 %v10962_v9  ;;  %v11054_v8 = vld [vmem:[%s15502_s1 + $0x1348] ss:$16 sps:$4 sm:$0xff]   ;;  %v11059_v9 = vld [vmem:[%s15502_s1 + $0x1364] ss:$16 sps:$4 sm:$0xff]  }
 0x230   :  { %7256 = vmatprep.subr.bf16.mxu0 %v10967_v10  ;;  %7994 = vmatprep.subr.bf16.mxu1 %v10970_v12  ;;  %v11062_v10 = vld [vmem:[%s15502_s1 + $0x136c] ss:$16 sps:$4 sm:$0xff]   ;;  %v11057_v12 = vld [vmem:[%s15502_s1 + $0x1360] ss:$16 sps:$4 sm:$0xff]  }
 0x233   :  { %7257 = vmatpush1.bf16.msra.mxu0 %v10965_v13  ;;  %7995 = vmatpush1.bf16.msra.mxu1 %v10968_v15  ;;  %v11060_v13 = vld [vmem:[%s15502_s1 + $0x1368] ss:$16 sps:$4 sm:$0xff]   ;;  %v11065_v15 = vld [vmem:[%s15502_s1 + $0x1384] ss:$16 sps:$4 sm:$0xff]  }
 0x234   :  { %7258 = vmatprep.subr.bf16.mxu0 %v10973_v11  ;;  %7996 = vmatprep.subr.bf16.mxu1 %v10976_v17  ;;  %v11068_v11 = vld [vmem:[%s15502_s1 + $0x138c] ss:$16 sps:$4 sm:$0xff]   ;;  %v11063_v17 = vld [vmem:[%s15502_s1 + $0x1380] ss:$16 sps:$4 sm:$0xff]  }
 0x237   :  { %7259 = vmatpush1.bf16.msra.mxu0 %v10971_v14  ;;  %7997 = vmatpush1.bf16.msra.mxu1 %v10974_v19  ;;  %v11066_v14 = vld [vmem:[%s15502_s1 + $0x1388] ss:$16 sps:$4 sm:$0xff]   ;;  %v11071_v19 = vld [vmem:[%s15502_s1 + $0x13a4] ss:$16 sps:$4 sm:$0xff]  }
 0x238   :  { %7260 = vmatprep.subr.bf16.mxu0 %v10979_v20  ;;  %7998 = vmatprep.subr.bf16.mxu1 %v10982_v16  ;;  %v11074_v20 = vld [vmem:[%s15502_s1 + $0x13ac] ss:$16 sps:$4 sm:$0xff]   ;;  %v11069_v16 = vld [vmem:[%s15502_s1 + $0x13a0] ss:$16 sps:$4 sm:$0xff]  }
 0x23b   :  { %7261 = vmatpush1.bf16.msra.mxu0 %v10977_v22  ;;  %7999 = vmatpush1.bf16.msra.mxu1 %v10980_v23  ;;  %v11072_v22 = vld [vmem:[%s15502_s1 + $0x13a8] ss:$16 sps:$4 sm:$0xff]   ;;  %v11077_v23 = vld [vmem:[%s15502_s1 + $0x13c4] ss:$16 sps:$4 sm:$0xff]  }
 0x23c   :  { %7262 = vmatprep.subr.bf16.mxu0 %v10985_v18  ;;  %8000 = vmatprep.subr.bf16.mxu1 %v10988_v25  ;;  %v11080_v18 = vld [vmem:[%s15502_s1 + $0x13cc] ss:$16 sps:$4 sm:$0xff]   ;;  %v11075_v25 = vld [vmem:[%s15502_s1 + $0x13c0] ss:$16 sps:$4 sm:$0xff]  }
 0x23f   :  { %7263 = vmatpush1.bf16.msra.mxu0 %v10983_v26  ;;  %8001 = vmatpush1.bf16.msra.mxu1 %v10986_v21  ;;  %v11078_v26 = vld [vmem:[%s15502_s1 + $0x13c8] ss:$16 sps:$4 sm:$0xff]   ;;  %v11083_v21 = vld [vmem:[%s15502_s1 + $0x13e4] ss:$16 sps:$4 sm:$0xff]  }
 0x240   :  { %7273 = vmatprep.subr.bf16.mxu0 %v10993_v28  ;;  %8011 = vmatprep.subr.bf16.mxu1 %v10996_v29  ;;  %v11086_v28 = vld [vmem:[%s15502_s1 + $0x13ec] ss:$16 sps:$4 sm:$0xff]   ;;  %v11081_v29 = vld [vmem:[%s15502_s1 + $0x13e0] ss:$16 sps:$4 sm:$0xff]  }
 0x242   :  { %7265 = vmatmul.mubr.bf16.vlgmr.msra.gmra.mrb[0].mxu0 %v8752_v24  ;;  %8003 = vmatmul.mubr.bf16.vlgmr.msra.gmra.mrb[0].mxu1 %v8752_v24  ;;  %v11084_v24 = vld [vmem:[%s15502_s1 + $0x13e8] ss:$16 sps:$4 sm:$0xff]  }
 0x243   :  { %7274 = vmatpush1.bf16.msra.mxu0 %v10991_v31  ;;  %8012 = vmatpush1.bf16.msra.mxu1 %v10994_v32  ;;  %v11091_v31 = vld [vmem:[%s15502_s1 + $0x1404] ss:$16 sps:$4 sm:$0xff]   ;;  %v11094_v32 = vld [vmem:[%s15502_s1 + $0x140c] ss:$16 sps:$4 sm:$0xff]  }
 0x244   :  { %7275 = vmatprep.subr.bf16.mxu0 %v10999_v33  ;;  %8013 = vmatprep.subr.bf16.mxu1 %v11002_v27  ;;  %v8754_v33 = vcombine.low %v13697_v30, %v13697_v30  ;;  %v13900_v27 = vld [vmem:[%s15503_s0 + $0x50] sm:$0xff] }
 0x245   :  { %7305 = vmatprep.mubr.bf16.mxu0 %v8755_v34  ;;  %8043 = vmatprep.mubr.bf16.mxu1 %v8755_v34  ;;  %v11089_v34 = vld [vmem:[%s15502_s1 + $0x1400] ss:$16 sps:$4 sm:$0xff]   ;;  %v11097_v30 = vld [vmem:[%s15502_s1 + $0x1424] ss:$16 sps:$4 sm:$0xff]  }
 0x247   :  { %7276 = vmatpush1.bf16.msra.mxu0 %v10997_v35  ;;  %8014 = vmatpush1.bf16.msra.mxu1 %v11000_v36  ;;  %v11092_v35 = vld [vmem:[%s15502_s1 + $0x1408] ss:$16 sps:$4 sm:$0xff]   ;;  %v11100_v36 = vld [vmem:[%s15502_s1 + $0x142c] ss:$16 sps:$4 sm:$0xff]  }
 0x248   :  { %7277 = vmatprep.subr.bf16.mxu0 %v11005_v37  ;;  %8015 = vmatprep.subr.bf16.mxu1 %v11008_v38  ;;  %v8757_v37 = vcombine.high %v13900_v27, %v13900_v27  ;;  %v11095_v38 = vld [vmem:[%s15502_s1 + $0x1420] ss:$16 sps:$4 sm:$0xff]  }
 0x24b   :  { %7278 = vmatpush1.bf16.msra.mxu0 %v11003_v39  ;;  %8016 = vmatpush1.bf16.msra.mxu1 %v11006_v40  ;;  %v11098_v39 = vld [vmem:[%s15502_s1 + $0x1428] ss:$16 sps:$4 sm:$0xff]   ;;  %v11103_v40 = vld [vmem:[%s15502_s1 + $0x1444] ss:$16 sps:$4 sm:$0xff]  }
 0x24c   :  { %7279 = vmatprep.subr.bf16.mxu0 %v11011_v41  ;;  %8017 = vmatprep.subr.bf16.mxu1 %v11014_v42  ;;  %v11106_v41 = vld [vmem:[%s15502_s1 + $0x144c] ss:$16 sps:$4 sm:$0xff]   ;;  %v11101_v42 = vld [vmem:[%s15502_s1 + $0x1440] ss:$16 sps:$4 sm:$0xff]  }
 0x24f   :  { %7280 = vmatpush1.bf16.msra.mxu0 %v11009_v43  ;;  %8018 = vmatpush1.bf16.msra.mxu1 %v11012_v44  ;;  %v11104_v43 = vld [vmem:[%s15502_s1 + $0x1448] ss:$16 sps:$4 sm:$0xff]   ;;  %v11109_v44 = vld [vmem:[%s15502_s1 + $0x1464] ss:$16 sps:$4 sm:$0xff]  }
 0x250   :  { %7281 = vmatprep.subr.bf16.mxu0 %v11017_v45  ;;  %8019 = vmatprep.subr.bf16.mxu1 %v11020_v46  ;;  %v11112_v45 = vld [vmem:[%s15502_s1 + $0x146c] ss:$16 sps:$4 sm:$0xff]   ;;  %v11107_v46 = vld [vmem:[%s15502_s1 + $0x1460] ss:$16 sps:$4 sm:$0xff]  }
 0x253   :  { %7282 = vmatpush1.bf16.msra.mxu0 %v11015_v47  ;;  %8020 = vmatpush1.bf16.msra.mxu1 %v11018_v48  ;;  %v11110_v47 = vld [vmem:[%s15502_s1 + $0x1468] ss:$16 sps:$4 sm:$0xff]   ;;  %v11115_v48 = vld [vmem:[%s15502_s1 + $0x1484] ss:$16 sps:$4 sm:$0xff]  }
 0x254   :  { %7283 = vmatprep.subr.bf16.mxu0 %v11023_v49  ;;  %8021 = vmatprep.subr.bf16.mxu1 %v11026_v50  ;;  %v11118_v49 = vld [vmem:[%s15502_s1 + $0x148c] ss:$16 sps:$4 sm:$0xff]   ;;  %v11113_v50 = vld [vmem:[%s15502_s1 + $0x1480] ss:$16 sps:$4 sm:$0xff]  }
 0x257   :  { %7284 = vmatpush1.bf16.msra.mxu0 %v11021_v51  ;;  %8022 = vmatpush1.bf16.msra.mxu1 %v11024_v52  ;;  %v11116_v51 = vld [vmem:[%s15502_s1 + $0x1488] ss:$16 sps:$4 sm:$0xff]   ;;  %v11121_v52 = vld [vmem:[%s15502_s1 + $0x14a4] ss:$16 sps:$4 sm:$0xff]  }
 0x258   :  { %7285 = vmatprep.subr.bf16.mxu0 %v11029_v53  ;;  %8023 = vmatprep.subr.bf16.mxu1 %v11032_v54  ;;  %v11124_v53 = vld [vmem:[%s15502_s1 + $0x14ac] ss:$16 sps:$4 sm:$0xff]   ;;  %v11119_v54 = vld [vmem:[%s15502_s1 + $0x14a0] ss:$16 sps:$4 sm:$0xff]  }
 0x25b   :  { %7286 = vmatpush1.bf16.msra.mxu0 %v11027_v55  ;;  %8024 = vmatpush1.bf16.msra.mxu1 %v11030_v56  ;;  %v11122_v55 = vld [vmem:[%s15502_s1 + $0x14a8] ss:$16 sps:$4 sm:$0xff]   ;;  %v11127_v56 = vld [vmem:[%s15502_s1 + $0x14c4] ss:$16 sps:$4 sm:$0xff]  }
 0x25c   :  { %7287 = vmatprep.subr.bf16.mxu0 %v11035_v57  ;;  %8025 = vmatprep.subr.bf16.mxu1 %v11038_v58  ;;  %v11130_v57 = vld [vmem:[%s15502_s1 + $0x14cc] ss:$16 sps:$4 sm:$0xff]   ;;  %v11125_v58 = vld [vmem:[%s15502_s1 + $0x14c0] ss:$16 sps:$4 sm:$0xff]  }
 0x25f   :  { %7288 = vmatpush1.bf16.msra.mxu0 %v11033_v59  ;;  %8026 = vmatpush1.bf16.msra.mxu1 %v11036_v60  ;;  %v11128_v59 = vld [vmem:[%s15502_s1 + $0x14c8] ss:$16 sps:$4 sm:$0xff]   ;;  %v11133_v60 = vld [vmem:[%s15502_s1 + $0x14e4] ss:$16 sps:$4 sm:$0xff]  }
 0x260   :  { %7289 = vmatprep.subr.bf16.mxu0 %v11041_v61  ;;  %8027 = vmatprep.subr.bf16.mxu1 %v11044_v62  ;;  %v11136_v61 = vld [vmem:[%s15502_s1 + $0x14ec] ss:$16 sps:$4 sm:$0xff]   ;;  %v11131_v62 = vld [vmem:[%s15502_s1 + $0x14e0] ss:$16 sps:$4 sm:$0xff]  }
 0x263   :  { %7290 = vmatpush1.bf16.msra.mxu0 %v11039_v63  ;;  %8028 = vmatpush1.bf16.msra.mxu1 %v11042_v0  ;;  %v11134_v63 = vld [vmem:[%s15502_s1 + $0x14e8] ss:$16 sps:$4 sm:$0xff]   ;;  %v11139_v0 = vld [vmem:[%s15502_s1 + $0x1504] ss:$16 sps:$4 sm:$0xff]  }
 0x264   :  { %7291 = vmatprep.subr.bf16.mxu0 %v11047_v1  ;;  %8029 = vmatprep.subr.bf16.mxu1 %v11050_v2  ;;  %v11142_v1 = vld [vmem:[%s15502_s1 + $0x150c] ss:$16 sps:$4 sm:$0xff]   ;;  %v11137_v2 = vld [vmem:[%s15502_s1 + $0x1500] ss:$16 sps:$4 sm:$0xff]  }
 0x267   :  { %7292 = vmatpush1.bf16.msra.mxu0 %v11045_v3  ;;  %8030 = vmatpush1.bf16.msra.mxu1 %v11048_v4  ;;  %v11140_v3 = vld [vmem:[%s15502_s1 + $0x1508] ss:$16 sps:$4 sm:$0xff]   ;;  %v11145_v4 = vld [vmem:[%s15502_s1 + $0x1524] ss:$16 sps:$4 sm:$0xff]  }
 0x268   :  { %7293 = vmatprep.subr.bf16.mxu0 %v11053_v5  ;;  %8031 = vmatprep.subr.bf16.mxu1 %v11056_v6  ;;  %v11148_v5 = vld [vmem:[%s15502_s1 + $0x152c] ss:$16 sps:$4 sm:$0xff]   ;;  %v11143_v6 = vld [vmem:[%s15502_s1 + $0x1520] ss:$16 sps:$4 sm:$0xff]  }
 0x26b   :  { %7294 = vmatpush1.bf16.msra.mxu0 %v11051_v7  ;;  %8032 = vmatpush1.bf16.msra.mxu1 %v11054_v8  ;;  %v11146_v7 = vld [vmem:[%s15502_s1 + $0x1528] ss:$16 sps:$4 sm:$0xff]   ;;  %v11151_v8 = vld [vmem:[%s15502_s1 + $0x1544] ss:$16 sps:$4 sm:$0xff]  }
 0x26c   :  { %7295 = vmatprep.subr.bf16.mxu0 %v11059_v9  ;;  %8033 = vmatprep.subr.bf16.mxu1 %v11062_v10  ;;  %v11154_v9 = vld [vmem:[%s15502_s1 + $0x154c] ss:$16 sps:$4 sm:$0xff]   ;;  %v11149_v10 = vld [vmem:[%s15502_s1 + $0x1540] ss:$16 sps:$4 sm:$0xff]  }
 0x26f   :  { %7296 = vmatpush1.bf16.msra.mxu0 %v11057_v12  ;;  %8034 = vmatpush1.bf16.msra.mxu1 %v11060_v13  ;;  %v11152_v12 = vld [vmem:[%s15502_s1 + $0x1548] ss:$16 sps:$4 sm:$0xff]   ;;  %v11157_v13 = vld [vmem:[%s15502_s1 + $0x1564] ss:$16 sps:$4 sm:$0xff]  }
 0x270   :  { %7297 = vmatprep.subr.bf16.mxu0 %v11065_v15  ;;  %8035 = vmatprep.subr.bf16.mxu1 %v11068_v11  ;;  %v11160_v15 = vld [vmem:[%s15502_s1 + $0x156c] ss:$16 sps:$4 sm:$0xff]   ;;  %v11155_v11 = vld [vmem:[%s15502_s1 + $0x1560] ss:$16 sps:$4 sm:$0xff]  }
 0x273   :  { %7298 = vmatpush1.bf16.msra.mxu0 %v11063_v17  ;;  %8036 = vmatpush1.bf16.msra.mxu1 %v11066_v14  ;;  %v11158_v17 = vld [vmem:[%s15502_s1 + $0x1568] ss:$16 sps:$4 sm:$0xff]   ;;  %v11163_v14 = vld [vmem:[%s15502_s1 + $0x1584] ss:$16 sps:$4 sm:$0xff]  }
 0x274   :  { %7299 = vmatprep.subr.bf16.mxu0 %v11071_v19  ;;  %8037 = vmatprep.subr.bf16.mxu1 %v11074_v20  ;;  %v11166_v19 = vld [vmem:[%s15502_s1 + $0x158c] ss:$16 sps:$4 sm:$0xff]   ;;  %v11161_v20 = vld [vmem:[%s15502_s1 + $0x1580] ss:$16 sps:$4 sm:$0xff]  }
 0x277   :  { %7300 = vmatpush1.bf16.msra.mxu0 %v11069_v16  ;;  %8038 = vmatpush1.bf16.msra.mxu1 %v11072_v22  ;;  %v11164_v16 = vld [vmem:[%s15502_s1 + $0x1588] ss:$16 sps:$4 sm:$0xff]   ;;  %v11169_v22 = vld [vmem:[%s15502_s1 + $0x15a4] ss:$16 sps:$4 sm:$0xff]  }
 0x278   :  { %7301 = vmatprep.subr.bf16.mxu0 %v11077_v23  ;;  %8039 = vmatprep.subr.bf16.mxu1 %v11080_v18  ;;  %v11172_v23 = vld [vmem:[%s15502_s1 + $0x15ac] ss:$16 sps:$4 sm:$0xff]   ;;  %v11167_v18 = vld [vmem:[%s15502_s1 + $0x15a0] ss:$16 sps:$4 sm:$0xff]  }
 0x27b   :  { %7302 = vmatpush1.bf16.msra.mxu0 %v11075_v25  ;;  %8040 = vmatpush1.bf16.msra.mxu1 %v11078_v26  ;;  %v11170_v25 = vld [vmem:[%s15502_s1 + $0x15a8] ss:$16 sps:$4 sm:$0xff]   ;;  %v11175_v26 = vld [vmem:[%s15502_s1 + $0x15c4] ss:$16 sps:$4 sm:$0xff]  }
 0x27c   :  { %7303 = vmatprep.subr.bf16.mxu0 %v11083_v21  ;;  %8041 = vmatprep.subr.bf16.mxu1 %v11086_v28  ;;  %v11178_v21 = vld [vmem:[%s15502_s1 + $0x15cc] ss:$16 sps:$4 sm:$0xff]   ;;  %v11173_v28 = vld [vmem:[%s15502_s1 + $0x15c0] ss:$16 sps:$4 sm:$0xff]  }
 0x27f   :  { %7304 = vmatpush1.bf16.msra.mxu0 %v11081_v29  ;;  %8042 = vmatpush1.bf16.msra.mxu1 %v11084_v24  ;;  %v11176_v29 = vld [vmem:[%s15502_s1 + $0x15c8] ss:$16 sps:$4 sm:$0xff]   ;;  %v11181_v24 = vld [vmem:[%s15502_s1 + $0x15e4] ss:$16 sps:$4 sm:$0xff]  }
 0x280   :  { %7314 = vmatprep.subr.bf16.mxu0 %v11091_v31  ;;  %8052 = vmatprep.subr.bf16.mxu1 %v11094_v32  ;;  %v11184_v31 = vld [vmem:[%s15502_s1 + $0x15ec] ss:$16 sps:$4 sm:$0xff]   ;;  %v11179_v32 = vld [vmem:[%s15502_s1 + $0x15e0] ss:$16 sps:$4 sm:$0xff]  }
 0x282   :  { %7306 = vmatmul.mubr.bf16.vlgmr.msra.gmra.mrb[0].mxu0 %v8754_v33  ;;  %8044 = vmatmul.mubr.bf16.vlgmr.msra.gmra.mrb[0].mxu1 %v8754_v33  ;;  %v11182_v33 = vld [vmem:[%s15502_s1 + $0x15e8] ss:$16 sps:$4 sm:$0xff]  }
 0x283   :  { %7315 = vmatpush1.bf16.msra.mxu0 %v11089_v34  ;;  %8053 = vmatpush1.bf16.msra.mxu1 %v11092_v35  ;;  %v11189_v34 = vld [vmem:[%s15502_s1 + $0x1604] ss:$16 sps:$4 sm:$0xff]   ;;  %v11192_v35 = vld [vmem:[%s15502_s1 + $0x160c] ss:$16 sps:$4 sm:$0xff]  }
 0x284   :  { %7316 = vmatprep.subr.bf16.mxu0 %v11097_v30  ;;  %8054 = vmatprep.subr.bf16.mxu1 %v11100_v36  ;;  %v8756_v30 = vcombine.low %v13900_v27, %v13900_v27  ;;  %v14101_v36 = vld [vmem:[%s15503_s0 + $0x58] sm:$0xff]  ;;  %v11195_v27 = vld [vmem:[%s15502_s1 + $0x1624] ss:$16 sps:$4 sm:$0xff]  }
 0x285   :  { %7346 = vmatprep.mubr.bf16.mxu0 %v8757_v37  ;;  %8084 = vmatprep.mubr.bf16.mxu1 %v8757_v37  ;;  %v11187_v37 = vld [vmem:[%s15502_s1 + $0x1600] ss:$16 sps:$4 sm:$0xff]  }
 0x287   :  { %7317 = vmatpush1.bf16.msra.mxu0 %v11095_v38  ;;  %8055 = vmatpush1.bf16.msra.mxu1 %v11098_v39  ;;  %v11190_v38 = vld [vmem:[%s15502_s1 + $0x1608] ss:$16 sps:$4 sm:$0xff]   ;;  %v11198_v39 = vld [vmem:[%s15502_s1 + $0x162c] ss:$16 sps:$4 sm:$0xff]  }
 0x288   :  { %7318 = vmatprep.subr.bf16.mxu0 %v11103_v40  ;;  %8056 = vmatprep.subr.bf16.mxu1 %v11106_v41  ;;  %v8759_v40 = vcombine.high %v14101_v36, %v14101_v36  ;;  %v11193_v41 = vld [vmem:[%s15502_s1 + $0x1620] ss:$16 sps:$4 sm:$0xff]  }
 0x28b   :  { %7319 = vmatpush1.bf16.msra.mxu0 %v11101_v42  ;;  %8057 = vmatpush1.bf16.msra.mxu1 %v11104_v43  ;;  %v11196_v42 = vld [vmem:[%s15502_s1 + $0x1628] ss:$16 sps:$4 sm:$0xff]   ;;  %v11201_v43 = vld [vmem:[%s15502_s1 + $0x1644] ss:$16 sps:$4 sm:$0xff]  }
 0x28c   :  { %7320 = vmatprep.subr.bf16.mxu0 %v11109_v44  ;;  %8058 = vmatprep.subr.bf16.mxu1 %v11112_v45  ;;  %v11204_v44 = vld [vmem:[%s15502_s1 + $0x164c] ss:$16 sps:$4 sm:$0xff]   ;;  %v11199_v45 = vld [vmem:[%s15502_s1 + $0x1640] ss:$16 sps:$4 sm:$0xff]  }
 0x28f   :  { %7321 = vmatpush1.bf16.msra.mxu0 %v11107_v46  ;;  %8059 = vmatpush1.bf16.msra.mxu1 %v11110_v47  ;;  %v11202_v46 = vld [vmem:[%s15502_s1 + $0x1648] ss:$16 sps:$4 sm:$0xff]   ;;  %v11207_v47 = vld [vmem:[%s15502_s1 + $0x1664] ss:$16 sps:$4 sm:$0xff]  }
 0x290   :  { %7322 = vmatprep.subr.bf16.mxu0 %v11115_v48  ;;  %8060 = vmatprep.subr.bf16.mxu1 %v11118_v49  ;;  %v11210_v48 = vld [vmem:[%s15502_s1 + $0x166c] ss:$16 sps:$4 sm:$0xff]   ;;  %v11205_v49 = vld [vmem:[%s15502_s1 + $0x1660] ss:$16 sps:$4 sm:$0xff]  }
 0x293   :  { %7323 = vmatpush1.bf16.msra.mxu0 %v11113_v50  ;;  %8061 = vmatpush1.bf16.msra.mxu1 %v11116_v51  ;;  %v11208_v50 = vld [vmem:[%s15502_s1 + $0x1668] ss:$16 sps:$4 sm:$0xff]   ;;  %v11213_v51 = vld [vmem:[%s15502_s1 + $0x1684] ss:$16 sps:$4 sm:$0xff]  }
 0x294   :  { %7324 = vmatprep.subr.bf16.mxu0 %v11121_v52  ;;  %8062 = vmatprep.subr.bf16.mxu1 %v11124_v53  ;;  %v11216_v52 = vld [vmem:[%s15502_s1 + $0x168c] ss:$16 sps:$4 sm:$0xff]   ;;  %v11211_v53 = vld [vmem:[%s15502_s1 + $0x1680] ss:$16 sps:$4 sm:$0xff]  }
 0x297   :  { %7325 = vmatpush1.bf16.msra.mxu0 %v11119_v54  ;;  %8063 = vmatpush1.bf16.msra.mxu1 %v11122_v55  ;;  %v11214_v54 = vld [vmem:[%s15502_s1 + $0x1688] ss:$16 sps:$4 sm:$0xff]   ;;  %v11219_v55 = vld [vmem:[%s15502_s1 + $0x16a4] ss:$16 sps:$4 sm:$0xff]  }
 0x298   :  { %7326 = vmatprep.subr.bf16.mxu0 %v11127_v56  ;;  %8064 = vmatprep.subr.bf16.mxu1 %v11130_v57  ;;  %v11222_v56 = vld [vmem:[%s15502_s1 + $0x16ac] ss:$16 sps:$4 sm:$0xff]   ;;  %v11217_v57 = vld [vmem:[%s15502_s1 + $0x16a0] ss:$16 sps:$4 sm:$0xff]  }
 0x29b   :  { %7327 = vmatpush1.bf16.msra.mxu0 %v11125_v58  ;;  %8065 = vmatpush1.bf16.msra.mxu1 %v11128_v59  ;;  %v11220_v58 = vld [vmem:[%s15502_s1 + $0x16a8] ss:$16 sps:$4 sm:$0xff]   ;;  %v11225_v59 = vld [vmem:[%s15502_s1 + $0x16c4] ss:$16 sps:$4 sm:$0xff]  }
 0x29c   :  { %7328 = vmatprep.subr.bf16.mxu0 %v11133_v60  ;;  %8066 = vmatprep.subr.bf16.mxu1 %v11136_v61  ;;  %v11228_v60 = vld [vmem:[%s15502_s1 + $0x16cc] ss:$16 sps:$4 sm:$0xff]   ;;  %v11223_v61 = vld [vmem:[%s15502_s1 + $0x16c0] ss:$16 sps:$4 sm:$0xff]  }
 0x29f   :  { %7329 = vmatpush1.bf16.msra.mxu0 %v11131_v62  ;;  %8067 = vmatpush1.bf16.msra.mxu1 %v11134_v63  ;;  %v11226_v62 = vld [vmem:[%s15502_s1 + $0x16c8] ss:$16 sps:$4 sm:$0xff]   ;;  %v11231_v63 = vld [vmem:[%s15502_s1 + $0x16e4] ss:$16 sps:$4 sm:$0xff]  }
 0x2a0   :  { %7330 = vmatprep.subr.bf16.mxu0 %v11139_v0  ;;  %8068 = vmatprep.subr.bf16.mxu1 %v11142_v1  ;;  %v11234_v0 = vld [vmem:[%s15502_s1 + $0x16ec] ss:$16 sps:$4 sm:$0xff]   ;;  %v11229_v1 = vld [vmem:[%s15502_s1 + $0x16e0] ss:$16 sps:$4 sm:$0xff]  }
 0x2a3   :  { %7331 = vmatpush1.bf16.msra.mxu0 %v11137_v2  ;;  %8069 = vmatpush1.bf16.msra.mxu1 %v11140_v3  ;;  %v11232_v2 = vld [vmem:[%s15502_s1 + $0x16e8] ss:$16 sps:$4 sm:$0xff]   ;;  %v11237_v3 = vld [vmem:[%s15502_s1 + $0x1704] ss:$16 sps:$4 sm:$0xff]  }
 0x2a4   :  { %7332 = vmatprep.subr.bf16.mxu0 %v11145_v4  ;;  %8070 = vmatprep.subr.bf16.mxu1 %v11148_v5  ;;  %v11240_v4 = vld [vmem:[%s15502_s1 + $0x170c] ss:$16 sps:$4 sm:$0xff]   ;;  %v11235_v5 = vld [vmem:[%s15502_s1 + $0x1700] ss:$16 sps:$4 sm:$0xff]  }
 0x2a7   :  { %7333 = vmatpush1.bf16.msra.mxu0 %v11143_v6  ;;  %8071 = vmatpush1.bf16.msra.mxu1 %v11146_v7  ;;  %v11238_v6 = vld [vmem:[%s15502_s1 + $0x1708] ss:$16 sps:$4 sm:$0xff]   ;;  %v11243_v7 = vld [vmem:[%s15502_s1 + $0x1724] ss:$16 sps:$4 sm:$0xff]  }
 0x2a8   :  { %7334 = vmatprep.subr.bf16.mxu0 %v11151_v8  ;;  %8072 = vmatprep.subr.bf16.mxu1 %v11154_v9  ;;  %v11246_v8 = vld [vmem:[%s15502_s1 + $0x172c] ss:$16 sps:$4 sm:$0xff]   ;;  %v11241_v9 = vld [vmem:[%s15502_s1 + $0x1720] ss:$16 sps:$4 sm:$0xff]  }
 0x2ab   :  { %7335 = vmatpush1.bf16.msra.mxu0 %v11149_v10  ;;  %8073 = vmatpush1.bf16.msra.mxu1 %v11152_v12  ;;  %v11244_v10 = vld [vmem:[%s15502_s1 + $0x1728] ss:$16 sps:$4 sm:$0xff]   ;;  %v11249_v12 = vld [vmem:[%s15502_s1 + $0x1744] ss:$16 sps:$4 sm:$0xff]  }
 0x2ac   :  { %7336 = vmatprep.subr.bf16.mxu0 %v11157_v13  ;;  %8074 = vmatprep.subr.bf16.mxu1 %v11160_v15  ;;  %v11252_v13 = vld [vmem:[%s15502_s1 + $0x174c] ss:$16 sps:$4 sm:$0xff]   ;;  %v11247_v15 = vld [vmem:[%s15502_s1 + $0x1740] ss:$16 sps:$4 sm:$0xff]  }
 0x2af   :  { %7337 = vmatpush1.bf16.msra.mxu0 %v11155_v11  ;;  %8075 = vmatpush1.bf16.msra.mxu1 %v11158_v17  ;;  %v11250_v11 = vld [vmem:[%s15502_s1 + $0x1748] ss:$16 sps:$4 sm:$0xff]   ;;  %v11255_v17 = vld [vmem:[%s15502_s1 + $0x1764] ss:$16 sps:$4 sm:$0xff]  }
 0x2b0   :  { %7338 = vmatprep.subr.bf16.mxu0 %v11163_v14  ;;  %8076 = vmatprep.subr.bf16.mxu1 %v11166_v19  ;;  %v11258_v14 = vld [vmem:[%s15502_s1 + $0x176c] ss:$16 sps:$4 sm:$0xff]   ;;  %v11253_v19 = vld [vmem:[%s15502_s1 + $0x1760] ss:$16 sps:$4 sm:$0xff]  }
 0x2b3   :  { %7339 = vmatpush1.bf16.msra.mxu0 %v11161_v20  ;;  %8077 = vmatpush1.bf16.msra.mxu1 %v11164_v16  ;;  %v11256_v20 = vld [vmem:[%s15502_s1 + $0x1768] ss:$16 sps:$4 sm:$0xff]   ;;  %v11261_v16 = vld [vmem:[%s15502_s1 + $0x1784] ss:$16 sps:$4 sm:$0xff]  }
 0x2b4   :  { %7340 = vmatprep.subr.bf16.mxu0 %v11169_v22  ;;  %8078 = vmatprep.subr.bf16.mxu1 %v11172_v23  ;;  %v11264_v22 = vld [vmem:[%s15502_s1 + $0x178c] ss:$16 sps:$4 sm:$0xff]   ;;  %v11259_v23 = vld [vmem:[%s15502_s1 + $0x1780] ss:$16 sps:$4 sm:$0xff]  }
 0x2b7   :  { %7341 = vmatpush1.bf16.msra.mxu0 %v11167_v18  ;;  %8079 = vmatpush1.bf16.msra.mxu1 %v11170_v25  ;;  %v11262_v18 = vld [vmem:[%s15502_s1 + $0x1788] ss:$16 sps:$4 sm:$0xff]   ;;  %v11267_v25 = vld [vmem:[%s15502_s1 + $0x17a4] ss:$16 sps:$4 sm:$0xff]  }
 0x2b8   :  { %7342 = vmatprep.subr.bf16.mxu0 %v11175_v26  ;;  %8080 = vmatprep.subr.bf16.mxu1 %v11178_v21  ;;  %v11270_v26 = vld [vmem:[%s15502_s1 + $0x17ac] ss:$16 sps:$4 sm:$0xff]   ;;  %v11265_v21 = vld [vmem:[%s15502_s1 + $0x17a0] ss:$16 sps:$4 sm:$0xff]  }
 0x2bb   :  { %7343 = vmatpush1.bf16.msra.mxu0 %v11173_v28  ;;  %8081 = vmatpush1.bf16.msra.mxu1 %v11176_v29  ;;  %v11268_v28 = vld [vmem:[%s15502_s1 + $0x17a8] ss:$16 sps:$4 sm:$0xff]   ;;  %v11273_v29 = vld [vmem:[%s15502_s1 + $0x17c4] ss:$16 sps:$4 sm:$0xff]  }
 0x2bc   :  { %7344 = vmatprep.subr.bf16.mxu0 %v11181_v24  ;;  %8082 = vmatprep.subr.bf16.mxu1 %v11184_v31  ;;  %v11276_v24 = vld [vmem:[%s15502_s1 + $0x17cc] ss:$16 sps:$4 sm:$0xff]   ;;  %v11271_v31 = vld [vmem:[%s15502_s1 + $0x17c0] ss:$16 sps:$4 sm:$0xff]  }
 0x2bf   :  { %7345 = vmatpush1.bf16.msra.mxu0 %v11179_v32  ;;  %8083 = vmatpush1.bf16.msra.mxu1 %v11182_v33  ;;  %v11274_v32 = vld [vmem:[%s15502_s1 + $0x17c8] ss:$16 sps:$4 sm:$0xff]   ;;  %v11279_v33 = vld [vmem:[%s15502_s1 + $0x17e4] ss:$16 sps:$4 sm:$0xff]  }
 0x2c0   :  { %7355 = vmatprep.subr.bf16.mxu0 %v11189_v34  ;;  %8093 = vmatprep.subr.bf16.mxu1 %v11192_v35  ;;  %v11282_v34 = vld [vmem:[%s15502_s1 + $0x17ec] ss:$16 sps:$4 sm:$0xff]   ;;  %v11277_v35 = vld [vmem:[%s15502_s1 + $0x17e0] ss:$16 sps:$4 sm:$0xff]  }
 0x2c2   :  { %7347 = vmatmul.mubr.bf16.vlgmr.msra.gmra.mrb[0].mxu0 %v8756_v30  ;;  %8085 = vmatmul.mubr.bf16.vlgmr.msra.gmra.mrb[0].mxu1 %v8756_v30  ;;  %v11280_v30 = vld [vmem:[%s15502_s1 + $0x17e8] ss:$16 sps:$4 sm:$0xff]  }
 0x2c3   :  { %7356 = vmatpush1.bf16.msra.mxu0 %v11187_v37  ;;  %8094 = vmatpush1.bf16.msra.mxu1 %v11190_v38  ;;  %v11287_v37 = vld [vmem:[%s15502_s1 + $0x1804] ss:$16 sps:$4 sm:$0xff]   ;;  %v11290_v38 = vld [vmem:[%s15502_s1 + $0x180c] ss:$16 sps:$4 sm:$0xff]  }
 0x2c4   :  { %7357 = vmatprep.subr.bf16.mxu0 %v11195_v27  ;;  %8095 = vmatprep.subr.bf16.mxu1 %v11198_v39  ;;  %v8758_v27 = vcombine.low %v14101_v36, %v14101_v36  ;;  %v14302_v39 = vld [vmem:[%s15503_s0 + $0x60] sm:$0xff] }
 0x2c5   :  { %7387 = vmatprep.mubr.bf16.mxu0 %v8759_v40  ;;  %8125 = vmatprep.mubr.bf16.mxu1 %v8759_v40  ;;  %v11285_v40 = vld [vmem:[%s15502_s1 + $0x1800] ss:$16 sps:$4 sm:$0xff]   ;;  %v11293_v36 = vld [vmem:[%s15502_s1 + $0x1824] ss:$16 sps:$4 sm:$0xff]  }
 0x2c7   :  { %7358 = vmatpush1.bf16.msra.mxu0 %v11193_v41  ;;  %8096 = vmatpush1.bf16.msra.mxu1 %v11196_v42  ;;  %v11288_v41 = vld [vmem:[%s15502_s1 + $0x1808] ss:$16 sps:$4 sm:$0xff]   ;;  %v11296_v42 = vld [vmem:[%s15502_s1 + $0x182c] ss:$16 sps:$4 sm:$0xff]  }
 0x2c8   :  { %7359 = vmatprep.subr.bf16.mxu0 %v11201_v43  ;;  %8097 = vmatprep.subr.bf16.mxu1 %v11204_v44  ;;  %v8761_v43 = vcombine.high %v14302_v39, %v14302_v39  ;;  %v11291_v44 = vld [vmem:[%s15502_s1 + $0x1820] ss:$16 sps:$4 sm:$0xff]  }
 0x2cb   :  { %7360 = vmatpush1.bf16.msra.mxu0 %v11199_v45  ;;  %8098 = vmatpush1.bf16.msra.mxu1 %v11202_v46  ;;  %v11294_v45 = vld [vmem:[%s15502_s1 + $0x1828] ss:$16 sps:$4 sm:$0xff]   ;;  %v11299_v46 = vld [vmem:[%s15502_s1 + $0x1844] ss:$16 sps:$4 sm:$0xff]  }
 0x2cc   :  { %7361 = vmatprep.subr.bf16.mxu0 %v11207_v47  ;;  %8099 = vmatprep.subr.bf16.mxu1 %v11210_v48  ;;  %v11302_v47 = vld [vmem:[%s15502_s1 + $0x184c] ss:$16 sps:$4 sm:$0xff]   ;;  %v11297_v48 = vld [vmem:[%s15502_s1 + $0x1840] ss:$16 sps:$4 sm:$0xff]  }
 0x2cf   :  { %7362 = vmatpush1.bf16.msra.mxu0 %v11205_v49  ;;  %8100 = vmatpush1.bf16.msra.mxu1 %v11208_v50  ;;  %v11300_v49 = vld [vmem:[%s15502_s1 + $0x1848] ss:$16 sps:$4 sm:$0xff]   ;;  %v11305_v50 = vld [vmem:[%s15502_s1 + $0x1864] ss:$16 sps:$4 sm:$0xff]  }
 0x2d0   :  { %7363 = vmatprep.subr.bf16.mxu0 %v11213_v51  ;;  %8101 = vmatprep.subr.bf16.mxu1 %v11216_v52  ;;  %v11308_v51 = vld [vmem:[%s15502_s1 + $0x186c] ss:$16 sps:$4 sm:$0xff]   ;;  %v11303_v52 = vld [vmem:[%s15502_s1 + $0x1860] ss:$16 sps:$4 sm:$0xff]  }
 0x2d3   :  { %7364 = vmatpush1.bf16.msra.mxu0 %v11211_v53  ;;  %8102 = vmatpush1.bf16.msra.mxu1 %v11214_v54  ;;  %v11306_v53 = vld [vmem:[%s15502_s1 + $0x1868] ss:$16 sps:$4 sm:$0xff]   ;;  %v11311_v54 = vld [vmem:[%s15502_s1 + $0x1884] ss:$16 sps:$4 sm:$0xff]  }
 0x2d4   :  { %7365 = vmatprep.subr.bf16.mxu0 %v11219_v55  ;;  %8103 = vmatprep.subr.bf16.mxu1 %v11222_v56  ;;  %v11314_v55 = vld [vmem:[%s15502_s1 + $0x188c] ss:$16 sps:$4 sm:$0xff]   ;;  %v11309_v56 = vld [vmem:[%s15502_s1 + $0x1880] ss:$16 sps:$4 sm:$0xff]  }
 0x2d7   :  { %7366 = vmatpush1.bf16.msra.mxu0 %v11217_v57  ;;  %8104 = vmatpush1.bf16.msra.mxu1 %v11220_v58  ;;  %v11312_v57 = vld [vmem:[%s15502_s1 + $0x1888] ss:$16 sps:$4 sm:$0xff]   ;;  %v11317_v58 = vld [vmem:[%s15502_s1 + $0x18a4] ss:$16 sps:$4 sm:$0xff]  }
 0x2d8   :  { %7367 = vmatprep.subr.bf16.mxu0 %v11225_v59  ;;  %8105 = vmatprep.subr.bf16.mxu1 %v11228_v60  ;;  %v11320_v59 = vld [vmem:[%s15502_s1 + $0x18ac] ss:$16 sps:$4 sm:$0xff]   ;;  %v11315_v60 = vld [vmem:[%s15502_s1 + $0x18a0] ss:$16 sps:$4 sm:$0xff]  }
 0x2db   :  { %7368 = vmatpush1.bf16.msra.mxu0 %v11223_v61  ;;  %8106 = vmatpush1.bf16.msra.mxu1 %v11226_v62  ;;  %v11318_v61 = vld [vmem:[%s15502_s1 + $0x18a8] ss:$16 sps:$4 sm:$0xff]   ;;  %v11323_v62 = vld [vmem:[%s15502_s1 + $0x18c4] ss:$16 sps:$4 sm:$0xff]  }
 0x2dc   :  { %7369 = vmatprep.subr.bf16.mxu0 %v11231_v63  ;;  %8107 = vmatprep.subr.bf16.mxu1 %v11234_v0  ;;  %v11326_v63 = vld [vmem:[%s15502_s1 + $0x18cc] ss:$16 sps:$4 sm:$0xff]   ;;  %v11321_v0 = vld [vmem:[%s15502_s1 + $0x18c0] ss:$16 sps:$4 sm:$0xff]  }
 0x2df   :  { %7370 = vmatpush1.bf16.msra.mxu0 %v11229_v1  ;;  %8108 = vmatpush1.bf16.msra.mxu1 %v11232_v2  ;;  %v11324_v1 = vld [vmem:[%s15502_s1 + $0x18c8] ss:$16 sps:$4 sm:$0xff]   ;;  %v11329_v2 = vld [vmem:[%s15502_s1 + $0x18e4] ss:$16 sps:$4 sm:$0xff]  }
 0x2e0   :  { %7371 = vmatprep.subr.bf16.mxu0 %v11237_v3  ;;  %8109 = vmatprep.subr.bf16.mxu1 %v11240_v4  ;;  %v11332_v3 = vld [vmem:[%s15502_s1 + $0x18ec] ss:$16 sps:$4 sm:$0xff]   ;;  %v11327_v4 = vld [vmem:[%s15502_s1 + $0x18e0] ss:$16 sps:$4 sm:$0xff]  }
 0x2e3   :  { %7372 = vmatpush1.bf16.msra.mxu0 %v11235_v5  ;;  %8110 = vmatpush1.bf16.msra.mxu1 %v11238_v6  ;;  %v11330_v5 = vld [vmem:[%s15502_s1 + $0x18e8] ss:$16 sps:$4 sm:$0xff]   ;;  %v11335_v6 = vld [vmem:[%s15502_s1 + $0x1904] ss:$16 sps:$4 sm:$0xff]  }
 0x2e4   :  { %7373 = vmatprep.subr.bf16.mxu0 %v11243_v7  ;;  %8111 = vmatprep.subr.bf16.mxu1 %v11246_v8  ;;  %v11338_v7 = vld [vmem:[%s15502_s1 + $0x190c] ss:$16 sps:$4 sm:$0xff]   ;;  %v11333_v8 = vld [vmem:[%s15502_s1 + $0x1900] ss:$16 sps:$4 sm:$0xff]  }
 0x2e7   :  { %7374 = vmatpush1.bf16.msra.mxu0 %v11241_v9  ;;  %8112 = vmatpush1.bf16.msra.mxu1 %v11244_v10  ;;  %v11336_v9 = vld [vmem:[%s15502_s1 + $0x1908] ss:$16 sps:$4 sm:$0xff]   ;;  %v11341_v10 = vld [vmem:[%s15502_s1 + $0x1924] ss:$16 sps:$4 sm:$0xff]  }
 0x2e8   :  { %7375 = vmatprep.subr.bf16.mxu0 %v11249_v12  ;;  %8113 = vmatprep.subr.bf16.mxu1 %v11252_v13  ;;  %v11344_v12 = vld [vmem:[%s15502_s1 + $0x192c] ss:$16 sps:$4 sm:$0xff]   ;;  %v11339_v13 = vld [vmem:[%s15502_s1 + $0x1920] ss:$16 sps:$4 sm:$0xff]  }
 0x2eb   :  { %7376 = vmatpush1.bf16.msra.mxu0 %v11247_v15  ;;  %8114 = vmatpush1.bf16.msra.mxu1 %v11250_v11  ;;  %v11342_v15 = vld [vmem:[%s15502_s1 + $0x1928] ss:$16 sps:$4 sm:$0xff]   ;;  %v11347_v11 = vld [vmem:[%s15502_s1 + $0x1944] ss:$16 sps:$4 sm:$0xff]  }
 0x2ec   :  { %7377 = vmatprep.subr.bf16.mxu0 %v11255_v17  ;;  %8115 = vmatprep.subr.bf16.mxu1 %v11258_v14  ;;  %v11350_v17 = vld [vmem:[%s15502_s1 + $0x194c] ss:$16 sps:$4 sm:$0xff]   ;;  %v11345_v14 = vld [vmem:[%s15502_s1 + $0x1940] ss:$16 sps:$4 sm:$0xff]  }
 0x2ef   :  { %7378 = vmatpush1.bf16.msra.mxu0 %v11253_v19  ;;  %8116 = vmatpush1.bf16.msra.mxu1 %v11256_v20  ;;  %v11348_v19 = vld [vmem:[%s15502_s1 + $0x1948] ss:$16 sps:$4 sm:$0xff]   ;;  %v11353_v20 = vld [vmem:[%s15502_s1 + $0x1964] ss:$16 sps:$4 sm:$0xff]  }
 0x2f0   :  { %7379 = vmatprep.subr.bf16.mxu0 %v11261_v16  ;;  %8117 = vmatprep.subr.bf16.mxu1 %v11264_v22  ;;  %v11356_v16 = vld [vmem:[%s15502_s1 + $0x196c] ss:$16 sps:$4 sm:$0xff]   ;;  %v11351_v22 = vld [vmem:[%s15502_s1 + $0x1960] ss:$16 sps:$4 sm:$0xff]  }
 0x2f3   :  { %7380 = vmatpush1.bf16.msra.mxu0 %v11259_v23  ;;  %8118 = vmatpush1.bf16.msra.mxu1 %v11262_v18  ;;  %v11354_v23 = vld [vmem:[%s15502_s1 + $0x1968] ss:$16 sps:$4 sm:$0xff]   ;;  %v11359_v18 = vld [vmem:[%s15502_s1 + $0x1984] ss:$16 sps:$4 sm:$0xff]  }
 0x2f4   :  { %7381 = vmatprep.subr.bf16.mxu0 %v11267_v25  ;;  %8119 = vmatprep.subr.bf16.mxu1 %v11270_v26  ;;  %v11362_v25 = vld [vmem:[%s15502_s1 + $0x198c] ss:$16 sps:$4 sm:$0xff]   ;;  %v11357_v26 = vld [vmem:[%s15502_s1 + $0x1980] ss:$16 sps:$4 sm:$0xff]  }
 0x2f7   :  { %7382 = vmatpush1.bf16.msra.mxu0 %v11265_v21  ;;  %8120 = vmatpush1.bf16.msra.mxu1 %v11268_v28  ;;  %v11360_v21 = vld [vmem:[%s15502_s1 + $0x1988] ss:$16 sps:$4 sm:$0xff]   ;;  %v11365_v28 = vld [vmem:[%s15502_s1 + $0x19a4] ss:$16 sps:$4 sm:$0xff]  }
 0x2f8   :  { %7383 = vmatprep.subr.bf16.mxu0 %v11273_v29  ;;  %8121 = vmatprep.subr.bf16.mxu1 %v11276_v24  ;;  %v11368_v29 = vld [vmem:[%s15502_s1 + $0x19ac] ss:$16 sps:$4 sm:$0xff]   ;;  %v11363_v24 = vld [vmem:[%s15502_s1 + $0x19a0] ss:$16 sps:$4 sm:$0xff]  }
 0x2fb   :  { %7384 = vmatpush1.bf16.msra.mxu0 %v11271_v31  ;;  %8122 = vmatpush1.bf16.msra.mxu1 %v11274_v32  ;;  %v11366_v31 = vld [vmem:[%s15502_s1 + $0x19a8] ss:$16 sps:$4 sm:$0xff]   ;;  %v11371_v32 = vld [vmem:[%s15502_s1 + $0x19c4] ss:$16 sps:$4 sm:$0xff]  }
 0x2fc   :  { %7385 = vmatprep.subr.bf16.mxu0 %v11279_v33  ;;  %8123 = vmatprep.subr.bf16.mxu1 %v11282_v34  ;;  %v11374_v33 = vld [vmem:[%s15502_s1 + $0x19cc] ss:$16 sps:$4 sm:$0xff]   ;;  %v11369_v34 = vld [vmem:[%s15502_s1 + $0x19c0] ss:$16 sps:$4 sm:$0xff]  }
 0x2ff   :  { %7386 = vmatpush1.bf16.msra.mxu0 %v11277_v35  ;;  %8124 = vmatpush1.bf16.msra.mxu1 %v11280_v30  ;;  %v11372_v35 = vld [vmem:[%s15502_s1 + $0x19c8] ss:$16 sps:$4 sm:$0xff]   ;;  %v11377_v30 = vld [vmem:[%s15502_s1 + $0x19e4] ss:$16 sps:$4 sm:$0xff]  }
 0x300   :  { %7396 = vmatprep.subr.bf16.mxu0 %v11287_v37  ;;  %8134 = vmatprep.subr.bf16.mxu1 %v11290_v38  ;;  %v11380_v37 = vld [vmem:[%s15502_s1 + $0x19ec] ss:$16 sps:$4 sm:$0xff]   ;;  %v11375_v38 = vld [vmem:[%s15502_s1 + $0x19e0] ss:$16 sps:$4 sm:$0xff]  }
 0x302   :  { %7388 = vmatmul.mubr.bf16.vlgmr.msra.gmra.mrb[0].mxu0 %v8758_v27  ;;  %8126 = vmatmul.mubr.bf16.vlgmr.msra.gmra.mrb[0].mxu1 %v8758_v27  ;;  %v11378_v27 = vld [vmem:[%s15502_s1 + $0x19e8] ss:$16 sps:$4 sm:$0xff]  }
 0x303   :  { %7397 = vmatpush1.bf16.msra.mxu0 %v11285_v40  ;;  %8135 = vmatpush1.bf16.msra.mxu1 %v11288_v41  ;;  %v11385_v40 = vld [vmem:[%s15502_s1 + $0x1a04] ss:$16 sps:$4 sm:$0xff]   ;;  %v11388_v41 = vld [vmem:[%s15502_s1 + $0x1a0c] ss:$16 sps:$4 sm:$0xff]  }
 0x304   :  { %7398 = vmatprep.subr.bf16.mxu0 %v11293_v36  ;;  %8136 = vmatprep.subr.bf16.mxu1 %v11296_v42  ;;  %v8760_v36 = vcombine.low %v14302_v39, %v14302_v39  ;;  %v14503_v42 = vld [vmem:[%s15503_s0 + $0x68] sm:$0xff]  ;;  %v11391_v39 = vld [vmem:[%s15502_s1 + $0x1a24] ss:$16 sps:$4 sm:$0xff]  }
 0x305   :  { %7428 = vmatprep.mubr.bf16.mxu0 %v8761_v43  ;;  %8166 = vmatprep.mubr.bf16.mxu1 %v8761_v43  ;;  %v11383_v43 = vld [vmem:[%s15502_s1 + $0x1a00] ss:$16 sps:$4 sm:$0xff]  }
 0x307   :  { %7399 = vmatpush1.bf16.msra.mxu0 %v11291_v44  ;;  %8137 = vmatpush1.bf16.msra.mxu1 %v11294_v45  ;;  %v11386_v44 = vld [vmem:[%s15502_s1 + $0x1a08] ss:$16 sps:$4 sm:$0xff]   ;;  %v11394_v45 = vld [vmem:[%s15502_s1 + $0x1a2c] ss:$16 sps:$4 sm:$0xff]  }
 0x308   :  { %7400 = vmatprep.subr.bf16.mxu0 %v11299_v46  ;;  %8138 = vmatprep.subr.bf16.mxu1 %v11302_v47  ;;  %v8763_v46 = vcombine.high %v14503_v42, %v14503_v42  ;;  %v11389_v47 = vld [vmem:[%s15502_s1 + $0x1a20] ss:$16 sps:$4 sm:$0xff]  }
 0x30b   :  { %7401 = vmatpush1.bf16.msra.mxu0 %v11297_v48  ;;  %8139 = vmatpush1.bf16.msra.mxu1 %v11300_v49  ;;  %v11392_v48 = vld [vmem:[%s15502_s1 + $0x1a28] ss:$16 sps:$4 sm:$0xff]   ;;  %v11397_v49 = vld [vmem:[%s15502_s1 + $0x1a44] ss:$16 sps:$4 sm:$0xff]  }
 0x30c   :  { %7402 = vmatprep.subr.bf16.mxu0 %v11305_v50  ;;  %8140 = vmatprep.subr.bf16.mxu1 %v11308_v51  ;;  %v11400_v50 = vld [vmem:[%s15502_s1 + $0x1a4c] ss:$16 sps:$4 sm:$0xff]   ;;  %v11395_v51 = vld [vmem:[%s15502_s1 + $0x1a40] ss:$16 sps:$4 sm:$0xff]  }
 0x30f   :  { %7403 = vmatpush1.bf16.msra.mxu0 %v11303_v52  ;;  %8141 = vmatpush1.bf16.msra.mxu1 %v11306_v53  ;;  %v11398_v52 = vld [vmem:[%s15502_s1 + $0x1a48] ss:$16 sps:$4 sm:$0xff]   ;;  %v11403_v53 = vld [vmem:[%s15502_s1 + $0x1a64] ss:$16 sps:$4 sm:$0xff]  }
 0x310   :  { %7404 = vmatprep.subr.bf16.mxu0 %v11311_v54  ;;  %8142 = vmatprep.subr.bf16.mxu1 %v11314_v55  ;;  %v11406_v54 = vld [vmem:[%s15502_s1 + $0x1a6c] ss:$16 sps:$4 sm:$0xff]   ;;  %v11401_v55 = vld [vmem:[%s15502_s1 + $0x1a60] ss:$16 sps:$4 sm:$0xff]  }
 0x313   :  { %7405 = vmatpush1.bf16.msra.mxu0 %v11309_v56  ;;  %8143 = vmatpush1.bf16.msra.mxu1 %v11312_v57  ;;  %v11404_v56 = vld [vmem:[%s15502_s1 + $0x1a68] ss:$16 sps:$4 sm:$0xff]   ;;  %v11409_v57 = vld [vmem:[%s15502_s1 + $0x1a84] ss:$16 sps:$4 sm:$0xff]  }
 0x314   :  { %7406 = vmatprep.subr.bf16.mxu0 %v11317_v58  ;;  %8144 = vmatprep.subr.bf16.mxu1 %v11320_v59  ;;  %v11412_v58 = vld [vmem:[%s15502_s1 + $0x1a8c] ss:$16 sps:$4 sm:$0xff]   ;;  %v11407_v59 = vld [vmem:[%s15502_s1 + $0x1a80] ss:$16 sps:$4 sm:$0xff]  }
 0x317   :  { %7407 = vmatpush1.bf16.msra.mxu0 %v11315_v60  ;;  %8145 = vmatpush1.bf16.msra.mxu1 %v11318_v61  ;;  %v11410_v60 = vld [vmem:[%s15502_s1 + $0x1a88] ss:$16 sps:$4 sm:$0xff]   ;;  %v11415_v61 = vld [vmem:[%s15502_s1 + $0x1aa4] ss:$16 sps:$4 sm:$0xff]  }
 0x318   :  { %7408 = vmatprep.subr.bf16.mxu0 %v11323_v62  ;;  %8146 = vmatprep.subr.bf16.mxu1 %v11326_v63  ;;  %v11418_v62 = vld [vmem:[%s15502_s1 + $0x1aac] ss:$16 sps:$4 sm:$0xff]   ;;  %v11413_v63 = vld [vmem:[%s15502_s1 + $0x1aa0] ss:$16 sps:$4 sm:$0xff]  }
 0x31b   :  { %7409 = vmatpush1.bf16.msra.mxu0 %v11321_v0  ;;  %8147 = vmatpush1.bf16.msra.mxu1 %v11324_v1  ;;  %v11416_v0 = vld [vmem:[%s15502_s1 + $0x1aa8] ss:$16 sps:$4 sm:$0xff]   ;;  %v11421_v1 = vld [vmem:[%s15502_s1 + $0x1ac4] ss:$16 sps:$4 sm:$0xff]  }
 0x31c   :  { %7410 = vmatprep.subr.bf16.mxu0 %v11329_v2  ;;  %8148 = vmatprep.subr.bf16.mxu1 %v11332_v3  ;;  %v11424_v2 = vld [vmem:[%s15502_s1 + $0x1acc] ss:$16 sps:$4 sm:$0xff]   ;;  %v11419_v3 = vld [vmem:[%s15502_s1 + $0x1ac0] ss:$16 sps:$4 sm:$0xff]  }
 0x31f   :  { %7411 = vmatpush1.bf16.msra.mxu0 %v11327_v4  ;;  %8149 = vmatpush1.bf16.msra.mxu1 %v11330_v5  ;;  %v11422_v4 = vld [vmem:[%s15502_s1 + $0x1ac8] ss:$16 sps:$4 sm:$0xff]   ;;  %v11427_v5 = vld [vmem:[%s15502_s1 + $0x1ae4] ss:$16 sps:$4 sm:$0xff]  }
 0x320   :  { %7412 = vmatprep.subr.bf16.mxu0 %v11335_v6  ;;  %8150 = vmatprep.subr.bf16.mxu1 %v11338_v7  ;;  %v11430_v6 = vld [vmem:[%s15502_s1 + $0x1aec] ss:$16 sps:$4 sm:$0xff]   ;;  %v11425_v7 = vld [vmem:[%s15502_s1 + $0x1ae0] ss:$16 sps:$4 sm:$0xff]  }
 0x323   :  { %7413 = vmatpush1.bf16.msra.mxu0 %v11333_v8  ;;  %8151 = vmatpush1.bf16.msra.mxu1 %v11336_v9  ;;  %v11428_v8 = vld [vmem:[%s15502_s1 + $0x1ae8] ss:$16 sps:$4 sm:$0xff]   ;;  %v11433_v9 = vld [vmem:[%s15502_s1 + $0x1b04] ss:$16 sps:$4 sm:$0xff]  }
 0x324   :  { %7414 = vmatprep.subr.bf16.mxu0 %v11341_v10  ;;  %8152 = vmatprep.subr.bf16.mxu1 %v11344_v12  ;;  %v11436_v10 = vld [vmem:[%s15502_s1 + $0x1b0c] ss:$16 sps:$4 sm:$0xff]   ;;  %v11431_v12 = vld [vmem:[%s15502_s1 + $0x1b00] ss:$16 sps:$4 sm:$0xff]  }
 0x327   :  { %7415 = vmatpush1.bf16.msra.mxu0 %v11339_v13  ;;  %8153 = vmatpush1.bf16.msra.mxu1 %v11342_v15  ;;  %v11434_v13 = vld [vmem:[%s15502_s1 + $0x1b08] ss:$16 sps:$4 sm:$0xff]   ;;  %v11439_v15 = vld [vmem:[%s15502_s1 + $0x1b24] ss:$16 sps:$4 sm:$0xff]  }
 0x328   :  { %7416 = vmatprep.subr.bf16.mxu0 %v11347_v11  ;;  %8154 = vmatprep.subr.bf16.mxu1 %v11350_v17  ;;  %v11442_v11 = vld [vmem:[%s15502_s1 + $0x1b2c] ss:$16 sps:$4 sm:$0xff]   ;;  %v11437_v17 = vld [vmem:[%s15502_s1 + $0x1b20] ss:$16 sps:$4 sm:$0xff]  }
 0x32b   :  { %7417 = vmatpush1.bf16.msra.mxu0 %v11345_v14  ;;  %8155 = vmatpush1.bf16.msra.mxu1 %v11348_v19  ;;  %v11440_v14 = vld [vmem:[%s15502_s1 + $0x1b28] ss:$16 sps:$4 sm:$0xff]   ;;  %v11445_v19 = vld [vmem:[%s15502_s1 + $0x1b44] ss:$16 sps:$4 sm:$0xff]  }
 0x32c   :  { %7418 = vmatprep.subr.bf16.mxu0 %v11353_v20  ;;  %8156 = vmatprep.subr.bf16.mxu1 %v11356_v16  ;;  %v11448_v20 = vld [vmem:[%s15502_s1 + $0x1b4c] ss:$16 sps:$4 sm:$0xff]   ;;  %v11443_v16 = vld [vmem:[%s15502_s1 + $0x1b40] ss:$16 sps:$4 sm:$0xff]  }
 0x32f   :  { %7419 = vmatpush1.bf16.msra.mxu0 %v11351_v22  ;;  %8157 = vmatpush1.bf16.msra.mxu1 %v11354_v23  ;;  %v11446_v22 = vld [vmem:[%s15502_s1 + $0x1b48] ss:$16 sps:$4 sm:$0xff]   ;;  %v11451_v23 = vld [vmem:[%s15502_s1 + $0x1b64] ss:$16 sps:$4 sm:$0xff]  }
 0x330   :  { %7420 = vmatprep.subr.bf16.mxu0 %v11359_v18  ;;  %8158 = vmatprep.subr.bf16.mxu1 %v11362_v25  ;;  %v11454_v18 = vld [vmem:[%s15502_s1 + $0x1b6c] ss:$16 sps:$4 sm:$0xff]   ;;  %v11449_v25 = vld [vmem:[%s15502_s1 + $0x1b60] ss:$16 sps:$4 sm:$0xff]  }
 0x333   :  { %7421 = vmatpush1.bf16.msra.mxu0 %v11357_v26  ;;  %8159 = vmatpush1.bf16.msra.mxu1 %v11360_v21  ;;  %v11452_v26 = vld [vmem:[%s15502_s1 + $0x1b68] ss:$16 sps:$4 sm:$0xff]   ;;  %v11457_v21 = vld [vmem:[%s15502_s1 + $0x1b84] ss:$16 sps:$4 sm:$0xff]  }
 0x334   :  { %7422 = vmatprep.subr.bf16.mxu0 %v11365_v28  ;;  %8160 = vmatprep.subr.bf16.mxu1 %v11368_v29  ;;  %v11460_v28 = vld [vmem:[%s15502_s1 + $0x1b8c] ss:$16 sps:$4 sm:$0xff]   ;;  %v11455_v29 = vld [vmem:[%s15502_s1 + $0x1b80] ss:$16 sps:$4 sm:$0xff]  }
 0x337   :  { %7423 = vmatpush1.bf16.msra.mxu0 %v11363_v24  ;;  %8161 = vmatpush1.bf16.msra.mxu1 %v11366_v31  ;;  %v11458_v24 = vld [vmem:[%s15502_s1 + $0x1b88] ss:$16 sps:$4 sm:$0xff]   ;;  %v11463_v31 = vld [vmem:[%s15502_s1 + $0x1ba4] ss:$16 sps:$4 sm:$0xff]  }
 0x338   :  { %7424 = vmatprep.subr.bf16.mxu0 %v11371_v32  ;;  %8162 = vmatprep.subr.bf16.mxu1 %v11374_v33  ;;  %v11466_v32 = vld [vmem:[%s15502_s1 + $0x1bac] ss:$16 sps:$4 sm:$0xff]   ;;  %v11461_v33 = vld [vmem:[%s15502_s1 + $0x1ba0] ss:$16 sps:$4 sm:$0xff]  }
 0x33b   :  { %7425 = vmatpush1.bf16.msra.mxu0 %v11369_v34  ;;  %8163 = vmatpush1.bf16.msra.mxu1 %v11372_v35  ;;  %v11464_v34 = vld [vmem:[%s15502_s1 + $0x1ba8] ss:$16 sps:$4 sm:$0xff]   ;;  %v11469_v35 = vld [vmem:[%s15502_s1 + $0x1bc4] ss:$16 sps:$4 sm:$0xff]  }
 0x33c   :  { %7426 = vmatprep.subr.bf16.mxu0 %v11377_v30  ;;  %8164 = vmatprep.subr.bf16.mxu1 %v11380_v37  ;;  %v11472_v30 = vld [vmem:[%s15502_s1 + $0x1bcc] ss:$16 sps:$4 sm:$0xff]   ;;  %v11467_v37 = vld [vmem:[%s15502_s1 + $0x1bc0] ss:$16 sps:$4 sm:$0xff]  }
 0x33f   :  { %7427 = vmatpush1.bf16.msra.mxu0 %v11375_v38  ;;  %8165 = vmatpush1.bf16.msra.mxu1 %v11378_v27  ;;  %v11470_v38 = vld [vmem:[%s15502_s1 + $0x1bc8] ss:$16 sps:$4 sm:$0xff]   ;;  %v11475_v27 = vld [vmem:[%s15502_s1 + $0x1be4] ss:$16 sps:$4 sm:$0xff]  }
 0x340   :  { %7437 = vmatprep.subr.bf16.mxu0 %v11385_v40  ;;  %8175 = vmatprep.subr.bf16.mxu1 %v11388_v41  ;;  %v11478_v40 = vld [vmem:[%s15502_s1 + $0x1bec] ss:$16 sps:$4 sm:$0xff]   ;;  %v11473_v41 = vld [vmem:[%s15502_s1 + $0x1be0] ss:$16 sps:$4 sm:$0xff]  }
 0x342   :  { %7429 = vmatmul.mubr.bf16.vlgmr.msra.gmra.mrb[0].mxu0 %v8760_v36  ;;  %8167 = vmatmul.mubr.bf16.vlgmr.msra.gmra.mrb[0].mxu1 %v8760_v36  ;;  %v11476_v36 = vld [vmem:[%s15502_s1 + $0x1be8] ss:$16 sps:$4 sm:$0xff]  }
 0x343   :  { %7438 = vmatpush1.bf16.msra.mxu0 %v11383_v43  ;;  %8176 = vmatpush1.bf16.msra.mxu1 %v11386_v44  ;;  %v11483_v43 = vld [vmem:[%s15502_s1 + $0x1c04] ss:$16 sps:$4 sm:$0xff]   ;;  %v11486_v44 = vld [vmem:[%s15502_s1 + $0x1c0c] ss:$16 sps:$4 sm:$0xff]  }
 0x344   :  { %7439 = vmatprep.subr.bf16.mxu0 %v11391_v39  ;;  %8177 = vmatprep.subr.bf16.mxu1 %v11394_v45  ;;  %v8762_v39 = vcombine.low %v14503_v42, %v14503_v42  ;;  %v14704_v45 = vld [vmem:[%s15503_s0 + $0x70] sm:$0xff] }
 0x345   :  { %7469 = vmatprep.mubr.bf16.mxu0 %v8763_v46  ;;  %8207 = vmatprep.mubr.bf16.mxu1 %v8763_v46  ;;  %v11481_v46 = vld [vmem:[%s15502_s1 + $0x1c00] ss:$16 sps:$4 sm:$0xff]   ;;  %v11489_v42 = vld [vmem:[%s15502_s1 + $0x1c24] ss:$16 sps:$4 sm:$0xff]  }
 0x347   :  { %7440 = vmatpush1.bf16.msra.mxu0 %v11389_v47  ;;  %8178 = vmatpush1.bf16.msra.mxu1 %v11392_v48  ;;  %v11484_v47 = vld [vmem:[%s15502_s1 + $0x1c08] ss:$16 sps:$4 sm:$0xff]   ;;  %v11492_v48 = vld [vmem:[%s15502_s1 + $0x1c2c] ss:$16 sps:$4 sm:$0xff]  }
 0x348   :  { %7441 = vmatprep.subr.bf16.mxu0 %v11397_v49  ;;  %8179 = vmatprep.subr.bf16.mxu1 %v11400_v50  ;;  %v8765_v49 = vcombine.high %v14704_v45, %v14704_v45  ;;  %v11487_v50 = vld [vmem:[%s15502_s1 + $0x1c20] ss:$16 sps:$4 sm:$0xff]  }
 0x34b   :  { %7442 = vmatpush1.bf16.msra.mxu0 %v11395_v51  ;;  %8180 = vmatpush1.bf16.msra.mxu1 %v11398_v52  ;;  %v11490_v51 = vld [vmem:[%s15502_s1 + $0x1c28] ss:$16 sps:$4 sm:$0xff]   ;;  %v11495_v52 = vld [vmem:[%s15502_s1 + $0x1c44] ss:$16 sps:$4 sm:$0xff]  }
 0x34c   :  { %7443 = vmatprep.subr.bf16.mxu0 %v11403_v53  ;;  %8181 = vmatprep.subr.bf16.mxu1 %v11406_v54  ;;  %v11498_v53 = vld [vmem:[%s15502_s1 + $0x1c4c] ss:$16 sps:$4 sm:$0xff]   ;;  %v11493_v54 = vld [vmem:[%s15502_s1 + $0x1c40] ss:$16 sps:$4 sm:$0xff]  }
 0x34f   :  { %7444 = vmatpush1.bf16.msra.mxu0 %v11401_v55  ;;  %8182 = vmatpush1.bf16.msra.mxu1 %v11404_v56  ;;  %v11496_v55 = vld [vmem:[%s15502_s1 + $0x1c48] ss:$16 sps:$4 sm:$0xff]   ;;  %v11501_v56 = vld [vmem:[%s15502_s1 + $0x1c64] ss:$16 sps:$4 sm:$0xff]  }
 0x350   :  { %7445 = vmatprep.subr.bf16.mxu0 %v11409_v57  ;;  %8183 = vmatprep.subr.bf16.mxu1 %v11412_v58  ;;  %v11504_v57 = vld [vmem:[%s15502_s1 + $0x1c6c] ss:$16 sps:$4 sm:$0xff]   ;;  %v11499_v58 = vld [vmem:[%s15502_s1 + $0x1c60] ss:$16 sps:$4 sm:$0xff]  }
 0x353   :  { %7446 = vmatpush1.bf16.msra.mxu0 %v11407_v59  ;;  %8184 = vmatpush1.bf16.msra.mxu1 %v11410_v60  ;;  %v11502_v59 = vld [vmem:[%s15502_s1 + $0x1c68] ss:$16 sps:$4 sm:$0xff]   ;;  %v11507_v60 = vld [vmem:[%s15502_s1 + $0x1c84] ss:$16 sps:$4 sm:$0xff]  }
 0x354   :  { %7447 = vmatprep.subr.bf16.mxu0 %v11415_v61  ;;  %8185 = vmatprep.subr.bf16.mxu1 %v11418_v62  ;;  %v11510_v61 = vld [vmem:[%s15502_s1 + $0x1c8c] ss:$16 sps:$4 sm:$0xff]   ;;  %v11505_v62 = vld [vmem:[%s15502_s1 + $0x1c80] ss:$16 sps:$4 sm:$0xff]  }
 0x357   :  { %7448 = vmatpush1.bf16.msra.mxu0 %v11413_v63  ;;  %8186 = vmatpush1.bf16.msra.mxu1 %v11416_v0  ;;  %v11508_v63 = vld [vmem:[%s15502_s1 + $0x1c88] ss:$16 sps:$4 sm:$0xff]   ;;  %v11513_v0 = vld [vmem:[%s15502_s1 + $0x1ca4] ss:$16 sps:$4 sm:$0xff]  }
 0x358   :  { %7449 = vmatprep.subr.bf16.mxu0 %v11421_v1  ;;  %8187 = vmatprep.subr.bf16.mxu1 %v11424_v2  ;;  %v11516_v1 = vld [vmem:[%s15502_s1 + $0x1cac] ss:$16 sps:$4 sm:$0xff]   ;;  %v11511_v2 = vld [vmem:[%s15502_s1 + $0x1ca0] ss:$16 sps:$4 sm:$0xff]  }
 0x35b   :  { %7450 = vmatpush1.bf16.msra.mxu0 %v11419_v3  ;;  %8188 = vmatpush1.bf16.msra.mxu1 %v11422_v4  ;;  %v11514_v3 = vld [vmem:[%s15502_s1 + $0x1ca8] ss:$16 sps:$4 sm:$0xff]   ;;  %v11519_v4 = vld [vmem:[%s15502_s1 + $0x1cc4] ss:$16 sps:$4 sm:$0xff]  }
 0x35c   :  { %7451 = vmatprep.subr.bf16.mxu0 %v11427_v5  ;;  %8189 = vmatprep.subr.bf16.mxu1 %v11430_v6  ;;  %v11522_v5 = vld [vmem:[%s15502_s1 + $0x1ccc] ss:$16 sps:$4 sm:$0xff]   ;;  %v11517_v6 = vld [vmem:[%s15502_s1 + $0x1cc0] ss:$16 sps:$4 sm:$0xff]  }
 0x35f   :  { %7452 = vmatpush1.bf16.msra.mxu0 %v11425_v7  ;;  %8190 = vmatpush1.bf16.msra.mxu1 %v11428_v8  ;;  %v11520_v7 = vld [vmem:[%s15502_s1 + $0x1cc8] ss:$16 sps:$4 sm:$0xff]   ;;  %v11525_v8 = vld [vmem:[%s15502_s1 + $0x1ce4] ss:$16 sps:$4 sm:$0xff]  }
 0x360   :  { %7453 = vmatprep.subr.bf16.mxu0 %v11433_v9  ;;  %8191 = vmatprep.subr.bf16.mxu1 %v11436_v10  ;;  %v11528_v9 = vld [vmem:[%s15502_s1 + $0x1cec] ss:$16 sps:$4 sm:$0xff]   ;;  %v11523_v10 = vld [vmem:[%s15502_s1 + $0x1ce0] ss:$16 sps:$4 sm:$0xff]  }
 0x363   :  { %7454 = vmatpush1.bf16.msra.mxu0 %v11431_v12  ;;  %8192 = vmatpush1.bf16.msra.mxu1 %v11434_v13  ;;  %v11526_v12 = vld [vmem:[%s15502_s1 + $0x1ce8] ss:$16 sps:$4 sm:$0xff]   ;;  %v11531_v13 = vld [vmem:[%s15502_s1 + $0x1d04] ss:$16 sps:$4 sm:$0xff]  }
 0x364   :  { %7455 = vmatprep.subr.bf16.mxu0 %v11439_v15  ;;  %8193 = vmatprep.subr.bf16.mxu1 %v11442_v11  ;;  %v11534_v15 = vld [vmem:[%s15502_s1 + $0x1d0c] ss:$16 sps:$4 sm:$0xff]   ;;  %v11529_v11 = vld [vmem:[%s15502_s1 + $0x1d00] ss:$16 sps:$4 sm:$0xff]  }
 0x367   :  { %7456 = vmatpush1.bf16.msra.mxu0 %v11437_v17  ;;  %8194 = vmatpush1.bf16.msra.mxu1 %v11440_v14  ;;  %v11532_v17 = vld [vmem:[%s15502_s1 + $0x1d08] ss:$16 sps:$4 sm:$0xff]   ;;  %v11537_v14 = vld [vmem:[%s15502_s1 + $0x1d24] ss:$16 sps:$4 sm:$0xff]  }
 0x368   :  { %7457 = vmatprep.subr.bf16.mxu0 %v11445_v19  ;;  %8195 = vmatprep.subr.bf16.mxu1 %v11448_v20  ;;  %v11540_v19 = vld [vmem:[%s15502_s1 + $0x1d2c] ss:$16 sps:$4 sm:$0xff]   ;;  %v11535_v20 = vld [vmem:[%s15502_s1 + $0x1d20] ss:$16 sps:$4 sm:$0xff]  }
 0x36b   :  { %7458 = vmatpush1.bf16.msra.mxu0 %v11443_v16  ;;  %8196 = vmatpush1.bf16.msra.mxu1 %v11446_v22  ;;  %v11538_v16 = vld [vmem:[%s15502_s1 + $0x1d28] ss:$16 sps:$4 sm:$0xff]   ;;  %v11543_v22 = vld [vmem:[%s15502_s1 + $0x1d44] ss:$16 sps:$4 sm:$0xff]  }
 0x36c   :  { %7459 = vmatprep.subr.bf16.mxu0 %v11451_v23  ;;  %8197 = vmatprep.subr.bf16.mxu1 %v11454_v18  ;;  %v11546_v23 = vld [vmem:[%s15502_s1 + $0x1d4c] ss:$16 sps:$4 sm:$0xff]   ;;  %v11541_v18 = vld [vmem:[%s15502_s1 + $0x1d40] ss:$16 sps:$4 sm:$0xff]  }
 0x36f   :  { %7460 = vmatpush1.bf16.msra.mxu0 %v11449_v25  ;;  %8198 = vmatpush1.bf16.msra.mxu1 %v11452_v26  ;;  %v11544_v25 = vld [vmem:[%s15502_s1 + $0x1d48] ss:$16 sps:$4 sm:$0xff]   ;;  %v11549_v26 = vld [vmem:[%s15502_s1 + $0x1d64] ss:$16 sps:$4 sm:$0xff]  }
 0x370   :  { %7461 = vmatprep.subr.bf16.mxu0 %v11457_v21  ;;  %8199 = vmatprep.subr.bf16.mxu1 %v11460_v28  ;;  %v11552_v21 = vld [vmem:[%s15502_s1 + $0x1d6c] ss:$16 sps:$4 sm:$0xff]   ;;  %v11547_v28 = vld [vmem:[%s15502_s1 + $0x1d60] ss:$16 sps:$4 sm:$0xff]  }
 0x373   :  { %7462 = vmatpush1.bf16.msra.mxu0 %v11455_v29  ;;  %8200 = vmatpush1.bf16.msra.mxu1 %v11458_v24  ;;  %v11550_v29 = vld [vmem:[%s15502_s1 + $0x1d68] ss:$16 sps:$4 sm:$0xff]   ;;  %v11555_v24 = vld [vmem:[%s15502_s1 + $0x1d84] ss:$16 sps:$4 sm:$0xff]  }
 0x374   :  { %7463 = vmatprep.subr.bf16.mxu0 %v11463_v31  ;;  %8201 = vmatprep.subr.bf16.mxu1 %v11466_v32  ;;  %v11558_v31 = vld [vmem:[%s15502_s1 + $0x1d8c] ss:$16 sps:$4 sm:$0xff]   ;;  %v11553_v32 = vld [vmem:[%s15502_s1 + $0x1d80] ss:$16 sps:$4 sm:$0xff]  }
 0x377   :  { %7464 = vmatpush1.bf16.msra.mxu0 %v11461_v33  ;;  %8202 = vmatpush1.bf16.msra.mxu1 %v11464_v34  ;;  %v11556_v33 = vld [vmem:[%s15502_s1 + $0x1d88] ss:$16 sps:$4 sm:$0xff]   ;;  %v11561_v34 = vld [vmem:[%s15502_s1 + $0x1da4] ss:$16 sps:$4 sm:$0xff]  }
 0x378   :  { %7465 = vmatprep.subr.bf16.mxu0 %v11469_v35  ;;  %8203 = vmatprep.subr.bf16.mxu1 %v11472_v30  ;;  %v11564_v35 = vld [vmem:[%s15502_s1 + $0x1dac] ss:$16 sps:$4 sm:$0xff]   ;;  %v11559_v30 = vld [vmem:[%s15502_s1 + $0x1da0] ss:$16 sps:$4 sm:$0xff]  }
 0x37b   :  { %7466 = vmatpush1.bf16.msra.mxu0 %v11467_v37  ;;  %8204 = vmatpush1.bf16.msra.mxu1 %v11470_v38  ;;  %v11562_v37 = vld [vmem:[%s15502_s1 + $0x1da8] ss:$16 sps:$4 sm:$0xff]   ;;  %v11567_v38 = vld [vmem:[%s15502_s1 + $0x1dc4] ss:$16 sps:$4 sm:$0xff]  }
 0x37c   :  { %7467 = vmatprep.subr.bf16.mxu0 %v11475_v27  ;;  %8205 = vmatprep.subr.bf16.mxu1 %v11478_v40  ;;  %v11570_v27 = vld [vmem:[%s15502_s1 + $0x1dcc] ss:$16 sps:$4 sm:$0xff]   ;;  %v11565_v40 = vld [vmem:[%s15502_s1 + $0x1dc0] ss:$16 sps:$4 sm:$0xff]  }
 0x37f   :  { %7468 = vmatpush1.bf16.msra.mxu0 %v11473_v41  ;;  %8206 = vmatpush1.bf16.msra.mxu1 %v11476_v36  ;;  %v11568_v41 = vld [vmem:[%s15502_s1 + $0x1dc8] ss:$16 sps:$4 sm:$0xff]   ;;  %v11573_v36 = vld [vmem:[%s15502_s1 + $0x1de4] ss:$16 sps:$4 sm:$0xff]  }
 0x380   :  { %7478 = vmatprep.subr.bf16.mxu0 %v11483_v43  ;;  %8216 = vmatprep.subr.bf16.mxu1 %v11486_v44  ;;  %v11576_v43 = vld [vmem:[%s15502_s1 + $0x1dec] ss:$16 sps:$4 sm:$0xff]   ;;  %v11571_v44 = vld [vmem:[%s15502_s1 + $0x1de0] ss:$16 sps:$4 sm:$0xff]  }
 0x382   :  { %7470 = vmatmul.mubr.bf16.vlgmr.msra.gmra.mrb[0].mxu0 %v8762_v39  ;;  %8208 = vmatmul.mubr.bf16.vlgmr.msra.gmra.mrb[0].mxu1 %v8762_v39  ;;  %v11574_v39 = vld [vmem:[%s15502_s1 + $0x1de8] ss:$16 sps:$4 sm:$0xff]  }
 0x383   :  { %7479 = vmatpush1.bf16.msra.mxu0 %v11481_v46  ;;  %8217 = vmatpush1.bf16.msra.mxu1 %v11484_v47  ;;  %v11581_v46 = vld [vmem:[%s15502_s1 + $0x1e04] ss:$16 sps:$4 sm:$0xff]   ;;  %v11584_v47 = vld [vmem:[%s15502_s1 + $0x1e0c] ss:$16 sps:$4 sm:$0xff]  }
 0x384   :  { %7480 = vmatprep.subr.bf16.mxu0 %v11489_v42  ;;  %8218 = vmatprep.subr.bf16.mxu1 %v11492_v48  ;;  %v8764_v42 = vcombine.low %v14704_v45, %v14704_v45  ;;  %v14905_v48 = vld [vmem:[%s15503_s0 + $0x78] sm:$0xff]  ;;  %v11587_v45 = vld [vmem:[%s15502_s1 + $0x1e24] ss:$16 sps:$4 sm:$0xff]  }
 0x385   :  { %7510 = vmatprep.mubr.bf16.mxu0 %v8765_v49  ;;  %8248 = vmatprep.mubr.bf16.mxu1 %v8765_v49  ;;  %v11579_v49 = vld [vmem:[%s15502_s1 + $0x1e00] ss:$16 sps:$4 sm:$0xff]  }
 0x387   :  { %7481 = vmatpush1.bf16.msra.mxu0 %v11487_v50  ;;  %8219 = vmatpush1.bf16.msra.mxu1 %v11490_v51  ;;  %v11582_v50 = vld [vmem:[%s15502_s1 + $0x1e08] ss:$16 sps:$4 sm:$0xff]   ;;  %v11590_v51 = vld [vmem:[%s15502_s1 + $0x1e2c] ss:$16 sps:$4 sm:$0xff]  }
 0x388   :  { %7482 = vmatprep.subr.bf16.mxu0 %v11495_v52  ;;  %8220 = vmatprep.subr.bf16.mxu1 %v11498_v53  ;;  %v8767_v52 = vcombine.high %v14905_v48, %v14905_v48  ;;  %v11585_v53 = vld [vmem:[%s15502_s1 + $0x1e20] ss:$16 sps:$4 sm:$0xff]  }
 0x38b   :  { %7483 = vmatpush1.bf16.msra.mxu0 %v11493_v54  ;;  %8221 = vmatpush1.bf16.msra.mxu1 %v11496_v55  ;;  %v11588_v54 = vld [vmem:[%s15502_s1 + $0x1e28] ss:$16 sps:$4 sm:$0xff]   ;;  %v11593_v55 = vld [vmem:[%s15502_s1 + $0x1e44] ss:$16 sps:$4 sm:$0xff]  }
 0x38c   :  { %7484 = vmatprep.subr.bf16.mxu0 %v11501_v56  ;;  %8222 = vmatprep.subr.bf16.mxu1 %v11504_v57  ;;  %v11596_v56 = vld [vmem:[%s15502_s1 + $0x1e4c] ss:$16 sps:$4 sm:$0xff]   ;;  %v11591_v57 = vld [vmem:[%s15502_s1 + $0x1e40] ss:$16 sps:$4 sm:$0xff]  }
 0x38f   :  { %7485 = vmatpush1.bf16.msra.mxu0 %v11499_v58  ;;  %8223 = vmatpush1.bf16.msra.mxu1 %v11502_v59  ;;  %v11594_v58 = vld [vmem:[%s15502_s1 + $0x1e48] ss:$16 sps:$4 sm:$0xff]   ;;  %v11599_v59 = vld [vmem:[%s15502_s1 + $0x1e64] ss:$16 sps:$4 sm:$0xff]  }
 0x390   :  { %7486 = vmatprep.subr.bf16.mxu0 %v11507_v60  ;;  %8224 = vmatprep.subr.bf16.mxu1 %v11510_v61  ;;  %v11602_v60 = vld [vmem:[%s15502_s1 + $0x1e6c] ss:$16 sps:$4 sm:$0xff]   ;;  %v11597_v61 = vld [vmem:[%s15502_s1 + $0x1e60] ss:$16 sps:$4 sm:$0xff]  }
 0x393   :  { %7487 = vmatpush1.bf16.msra.mxu0 %v11505_v62  ;;  %8225 = vmatpush1.bf16.msra.mxu1 %v11508_v63  ;;  %v11600_v62 = vld [vmem:[%s15502_s1 + $0x1e68] ss:$16 sps:$4 sm:$0xff]   ;;  %v11605_v63 = vld [vmem:[%s15502_s1 + $0x1e84] ss:$16 sps:$4 sm:$0xff]  }
 0x394   :  { %7488 = vmatprep.subr.bf16.mxu0 %v11513_v0  ;;  %8226 = vmatprep.subr.bf16.mxu1 %v11516_v1  ;;  %v11608_v0 = vld [vmem:[%s15502_s1 + $0x1e8c] ss:$16 sps:$4 sm:$0xff]   ;;  %v11603_v1 = vld [vmem:[%s15502_s1 + $0x1e80] ss:$16 sps:$4 sm:$0xff]  }
 0x397   :  { %7489 = vmatpush1.bf16.msra.mxu0 %v11511_v2  ;;  %8227 = vmatpush1.bf16.msra.mxu1 %v11514_v3  ;;  %v11606_v2 = vld [vmem:[%s15502_s1 + $0x1e88] ss:$16 sps:$4 sm:$0xff]   ;;  %v11611_v3 = vld [vmem:[%s15502_s1 + $0x1ea4] ss:$16 sps:$4 sm:$0xff]  }
 0x398   :  { %7490 = vmatprep.subr.bf16.mxu0 %v11519_v4  ;;  %8228 = vmatprep.subr.bf16.mxu1 %v11522_v5  ;;  %v11614_v4 = vld [vmem:[%s15502_s1 + $0x1eac] ss:$16 sps:$4 sm:$0xff]   ;;  %v11609_v5 = vld [vmem:[%s15502_s1 + $0x1ea0] ss:$16 sps:$4 sm:$0xff]  }
 0x39b   :  { %7491 = vmatpush1.bf16.msra.mxu0 %v11517_v6  ;;  %8229 = vmatpush1.bf16.msra.mxu1 %v11520_v7  ;;  %v11612_v6 = vld [vmem:[%s15502_s1 + $0x1ea8] ss:$16 sps:$4 sm:$0xff]   ;;  %v11617_v7 = vld [vmem:[%s15502_s1 + $0x1ec4] ss:$16 sps:$4 sm:$0xff]  }
 0x39c   :  { %7492 = vmatprep.subr.bf16.mxu0 %v11525_v8  ;;  %8230 = vmatprep.subr.bf16.mxu1 %v11528_v9  ;;  %v11620_v8 = vld [vmem:[%s15502_s1 + $0x1ecc] ss:$16 sps:$4 sm:$0xff]   ;;  %v11615_v9 = vld [vmem:[%s15502_s1 + $0x1ec0] ss:$16 sps:$4 sm:$0xff]  }
 0x39f   :  { %7493 = vmatpush1.bf16.msra.mxu0 %v11523_v10  ;;  %8231 = vmatpush1.bf16.msra.mxu1 %v11526_v12  ;;  %v11618_v10 = vld [vmem:[%s15502_s1 + $0x1ec8] ss:$16 sps:$4 sm:$0xff]   ;;  %v11623_v12 = vld [vmem:[%s15502_s1 + $0x1ee4] ss:$16 sps:$4 sm:$0xff]  }
 0x3a0   :  { %7494 = vmatprep.subr.bf16.mxu0 %v11531_v13  ;;  %8232 = vmatprep.subr.bf16.mxu1 %v11534_v15  ;;  %v11626_v13 = vld [vmem:[%s15502_s1 + $0x1eec] ss:$16 sps:$4 sm:$0xff]   ;;  %v11621_v15 = vld [vmem:[%s15502_s1 + $0x1ee0] ss:$16 sps:$4 sm:$0xff]  }
 0x3a3   :  { %7495 = vmatpush1.bf16.msra.mxu0 %v11529_v11  ;;  %8233 = vmatpush1.bf16.msra.mxu1 %v11532_v17  ;;  %v11624_v11 = vld [vmem:[%s15502_s1 + $0x1ee8] ss:$16 sps:$4 sm:$0xff]   ;;  %v11629_v17 = vld [vmem:[%s15502_s1 + $0x1f04] ss:$16 sps:$4 sm:$0xff]  }
 0x3a4   :  { %7496 = vmatprep.subr.bf16.mxu0 %v11537_v14  ;;  %8234 = vmatprep.subr.bf16.mxu1 %v11540_v19  ;;  %v11632_v14 = vld [vmem:[%s15502_s1 + $0x1f0c] ss:$16 sps:$4 sm:$0xff]   ;;  %v11627_v19 = vld [vmem:[%s15502_s1 + $0x1f00] ss:$16 sps:$4 sm:$0xff]  }
 0x3a7   :  { %7497 = vmatpush1.bf16.msra.mxu0 %v11535_v20  ;;  %8235 = vmatpush1.bf16.msra.mxu1 %v11538_v16  ;;  %v11630_v20 = vld [vmem:[%s15502_s1 + $0x1f08] ss:$16 sps:$4 sm:$0xff]   ;;  %v11635_v16 = vld [vmem:[%s15502_s1 + $0x1f24] ss:$16 sps:$4 sm:$0xff]  }
 0x3a8   :  { %7498 = vmatprep.subr.bf16.mxu0 %v11543_v22  ;;  %8236 = vmatprep.subr.bf16.mxu1 %v11546_v23  ;;  %v11638_v22 = vld [vmem:[%s15502_s1 + $0x1f2c] ss:$16 sps:$4 sm:$0xff]   ;;  %v11633_v23 = vld [vmem:[%s15502_s1 + $0x1f20] ss:$16 sps:$4 sm:$0xff]  }
 0x3ab   :  { %7499 = vmatpush1.bf16.msra.mxu0 %v11541_v18  ;;  %8237 = vmatpush1.bf16.msra.mxu1 %v11544_v25  ;;  %v11636_v18 = vld [vmem:[%s15502_s1 + $0x1f28] ss:$16 sps:$4 sm:$0xff]   ;;  %v11641_v25 = vld [vmem:[%s15502_s1 + $0x1f44] ss:$16 sps:$4 sm:$0xff]  }
 0x3ac   :  { %7500 = vmatprep.subr.bf16.mxu0 %v11549_v26  ;;  %8238 = vmatprep.subr.bf16.mxu1 %v11552_v21  ;;  %v11644_v26 = vld [vmem:[%s15502_s1 + $0x1f4c] ss:$16 sps:$4 sm:$0xff]   ;;  %v11639_v21 = vld [vmem:[%s15502_s1 + $0x1f40] ss:$16 sps:$4 sm:$0xff]  }
 0x3af   :  { %7501 = vmatpush1.bf16.msra.mxu0 %v11547_v28  ;;  %8239 = vmatpush1.bf16.msra.mxu1 %v11550_v29  ;;  %v11642_v28 = vld [vmem:[%s15502_s1 + $0x1f48] ss:$16 sps:$4 sm:$0xff]   ;;  %v11647_v29 = vld [vmem:[%s15502_s1 + $0x1f64] ss:$16 sps:$4 sm:$0xff]  }
 0x3b0   :  { %7502 = vmatprep.subr.bf16.mxu0 %v11555_v24  ;;  %8240 = vmatprep.subr.bf16.mxu1 %v11558_v31  ;;  %v11650_v24 = vld [vmem:[%s15502_s1 + $0x1f6c] ss:$16 sps:$4 sm:$0xff]   ;;  %v11645_v31 = vld [vmem:[%s15502_s1 + $0x1f60] ss:$16 sps:$4 sm:$0xff]  }
 0x3b3   :  { %7503 = vmatpush1.bf16.msra.mxu0 %v11553_v32  ;;  %8241 = vmatpush1.bf16.msra.mxu1 %v11556_v33  ;;  %v11648_v32 = vld [vmem:[%s15502_s1 + $0x1f68] ss:$16 sps:$4 sm:$0xff]   ;;  %v11653_v33 = vld [vmem:[%s15502_s1 + $0x1f84] ss:$16 sps:$4 sm:$0xff]  }
 0x3b4   :  { %7504 = vmatprep.subr.bf16.mxu0 %v11561_v34  ;;  %8242 = vmatprep.subr.bf16.mxu1 %v11564_v35  ;;  %v11656_v34 = vld [vmem:[%s15502_s1 + $0x1f8c] ss:$16 sps:$4 sm:$0xff]   ;;  %v11651_v35 = vld [vmem:[%s15502_s1 + $0x1f80] ss:$16 sps:$4 sm:$0xff]  }
 0x3b7   :  { %7505 = vmatpush1.bf16.msra.mxu0 %v11559_v30  ;;  %8243 = vmatpush1.bf16.msra.mxu1 %v11562_v37  ;;  %v11654_v30 = vld [vmem:[%s15502_s1 + $0x1f88] ss:$16 sps:$4 sm:$0xff]   ;;  %v11659_v37 = vld [vmem:[%s15502_s1 + $0x1fa4] ss:$16 sps:$4 sm:$0xff]  }
 0x3b8   :  { %7506 = vmatprep.subr.bf16.mxu0 %v11567_v38  ;;  %8244 = vmatprep.subr.bf16.mxu1 %v11570_v27  ;;  %v11662_v38 = vld [vmem:[%s15502_s1 + $0x1fac] ss:$16 sps:$4 sm:$0xff]   ;;  %v11657_v27 = vld [vmem:[%s15502_s1 + $0x1fa0] ss:$16 sps:$4 sm:$0xff]  }
 0x3bb   :  { %7507 = vmatpush1.bf16.msra.mxu0 %v11565_v40  ;;  %8245 = vmatpush1.bf16.msra.mxu1 %v11568_v41  ;;  %v11660_v40 = vld [vmem:[%s15502_s1 + $0x1fa8] ss:$16 sps:$4 sm:$0xff]   ;;  %v11665_v41 = vld [vmem:[%s15502_s1 + $0x1fc4] ss:$16 sps:$4 sm:$0xff]  }
 0x3bc   :  { %7508 = vmatprep.subr.bf16.mxu0 %v11573_v36  ;;  %8246 = vmatprep.subr.bf16.mxu1 %v11576_v43  ;;  %v11668_v36 = vld [vmem:[%s15502_s1 + $0x1fcc] ss:$16 sps:$4 sm:$0xff]   ;;  %v11663_v43 = vld [vmem:[%s15502_s1 + $0x1fc0] ss:$16 sps:$4 sm:$0xff]  }
 0x3bf   :  { %7509 = vmatpush1.bf16.msra.mxu0 %v11571_v44  ;;  %8247 = vmatpush1.bf16.msra.mxu1 %v11574_v39  ;;  %v11666_v44 = vld [vmem:[%s15502_s1 + $0x1fc8] ss:$16 sps:$4 sm:$0xff]   ;;  %v11671_v39 = vld [vmem:[%s15502_s1 + $0x1fe4] ss:$16 sps:$4 sm:$0xff]  }
 0x3c0   :  { %7519 = vmatprep.subr.bf16.mxu0 %v11581_v46  ;;  %8257 = vmatprep.subr.bf16.mxu1 %v11584_v47  ;;  %v11674_v46 = vld [vmem:[%s15502_s1 + $0x1fec] ss:$16 sps:$4 sm:$0xff]   ;;  %v11669_v47 = vld [vmem:[%s15502_s1 + $0x1fe0] ss:$16 sps:$4 sm:$0xff]  }
 0x3c2   :  { %7511 = vmatmul.mubr.bf16.vlgmr.msra.gmra.mrb[0].mxu0 %v8764_v42  ;;  %8249 = vmatmul.mubr.bf16.vlgmr.msra.gmra.mrb[0].mxu1 %v8764_v42  ;;  %v11672_v42 = vld [vmem:[%s15502_s1 + $0x1fe8] ss:$16 sps:$4 sm:$0xff]  }
 0x3c3   :  { %7520 = vmatpush1.bf16.msra.mxu0 %v11579_v49  ;;  %8258 = vmatpush1.bf16.msra.mxu1 %v11582_v50  ;;  %v11679_v49 = vld [vmem:[%s15502_s1 + $0x2004] ss:$16 sps:$4 sm:$0xff]   ;;  %v11682_v50 = vld [vmem:[%s15502_s1 + $0x200c] ss:$16 sps:$4 sm:$0xff]  }
 0x3c4   :  { %7521 = vmatprep.subr.bf16.mxu0 %v11587_v45  ;;  %8259 = vmatprep.subr.bf16.mxu1 %v11590_v51  ;;  %v15104_v45 = vld [vmem:[%s15503_s0 + $0x80] sm:$0xff] }
 0x3c5   :  { %7551 = vmatprep.mubr.bf16.mxu0 %v8767_v52  ;;  %8289 = vmatprep.mubr.bf16.mxu1 %v8767_v52  ;;  %v11677_v51 = vld [vmem:[%s15502_s1 + $0x2000] ss:$16 sps:$4 sm:$0xff]   ;;  %v11680_v52 = vld [vmem:[%s15502_s1 + $0x2008] ss:$16 sps:$4 sm:$0xff]  }
 0x3c7   :  { %7522 = vmatpush1.bf16.msra.mxu0 %v11585_v53  ;;  %8260 = vmatpush1.bf16.msra.mxu1 %v11588_v54  ;;  %v8766_v53 = vcombine.low %v14905_v48, %v14905_v48  ;;  %v11685_v54 = vld [vmem:[%s15502_s1 + $0x2024] ss:$16 sps:$4 sm:$0xff]   ;;  %v11683_v48 = vld [vmem:[%s15502_s1 + $0x2020] ss:$16 sps:$4 sm:$0xff]  }
 0x3c8   :  { %7523 = vmatprep.subr.bf16.mxu0 %v11593_v55  ;;  %8261 = vmatprep.subr.bf16.mxu1 %v11596_v56  ;;  %v11688_v55 = vld [vmem:[%s15502_s1 + $0x202c] ss:$16 sps:$4 sm:$0xff]   ;;  %v8769_v56 = vcombine.high %v15104_v45, %v15104_v45 }
 0x3cb   :  { %7524 = vmatpush1.bf16.msra.mxu0 %v11591_v57  ;;  %8262 = vmatpush1.bf16.msra.mxu1 %v11594_v58  ;;  %v11686_v57 = vld [vmem:[%s15502_s1 + $0x2028] ss:$16 sps:$4 sm:$0xff]   ;;  %v11691_v58 = vld [vmem:[%s15502_s1 + $0x2044] ss:$16 sps:$4 sm:$0xff]  }
 0x3cc   :  { %7525 = vmatprep.subr.bf16.mxu0 %v11599_v59  ;;  %8263 = vmatprep.subr.bf16.mxu1 %v11602_v60  ;;  %v11694_v59 = vld [vmem:[%s15502_s1 + $0x204c] ss:$16 sps:$4 sm:$0xff]   ;;  %v11689_v60 = vld [vmem:[%s15502_s1 + $0x2040] ss:$16 sps:$4 sm:$0xff]  }
 0x3cf   :  { %7526 = vmatpush1.bf16.msra.mxu0 %v11597_v61  ;;  %8264 = vmatpush1.bf16.msra.mxu1 %v11600_v62  ;;  %v11692_v61 = vld [vmem:[%s15502_s1 + $0x2048] ss:$16 sps:$4 sm:$0xff]   ;;  %v11697_v62 = vld [vmem:[%s15502_s1 + $0x2064] ss:$16 sps:$4 sm:$0xff]  }
 0x3d0   :  { %7527 = vmatprep.subr.bf16.mxu0 %v11605_v63  ;;  %8265 = vmatprep.subr.bf16.mxu1 %v11608_v0  ;;  %v11700_v63 = vld [vmem:[%s15502_s1 + $0x206c] ss:$16 sps:$4 sm:$0xff]   ;;  %v11695_v0 = vld [vmem:[%s15502_s1 + $0x2060] ss:$16 sps:$4 sm:$0xff]  }
 0x3d3   :  { %7528 = vmatpush1.bf16.msra.mxu0 %v11603_v1  ;;  %8266 = vmatpush1.bf16.msra.mxu1 %v11606_v2  ;;  %v11698_v1 = vld [vmem:[%s15502_s1 + $0x2068] ss:$16 sps:$4 sm:$0xff]   ;;  %v11703_v2 = vld [vmem:[%s15502_s1 + $0x2084] ss:$16 sps:$4 sm:$0xff]  }
 0x3d4   :  { %7529 = vmatprep.subr.bf16.mxu0 %v11611_v3  ;;  %8267 = vmatprep.subr.bf16.mxu1 %v11614_v4  ;;  %v11706_v3 = vld [vmem:[%s15502_s1 + $0x208c] ss:$16 sps:$4 sm:$0xff]   ;;  %v11701_v4 = vld [vmem:[%s15502_s1 + $0x2080] ss:$16 sps:$4 sm:$0xff]  }
 0x3d7   :  { %7530 = vmatpush1.bf16.msra.mxu0 %v11609_v5  ;;  %8268 = vmatpush1.bf16.msra.mxu1 %v11612_v6  ;;  %v11704_v5 = vld [vmem:[%s15502_s1 + $0x2088] ss:$16 sps:$4 sm:$0xff]   ;;  %v11709_v6 = vld [vmem:[%s15502_s1 + $0x20a4] ss:$16 sps:$4 sm:$0xff]  }
 0x3d8   :  { %7531 = vmatprep.subr.bf16.mxu0 %v11617_v7  ;;  %8269 = vmatprep.subr.bf16.mxu1 %v11620_v8  ;;  %v11712_v7 = vld [vmem:[%s15502_s1 + $0x20ac] ss:$16 sps:$4 sm:$0xff]   ;;  %v11707_v8 = vld [vmem:[%s15502_s1 + $0x20a0] ss:$16 sps:$4 sm:$0xff]  }
 0x3db   :  { %7532 = vmatpush1.bf16.msra.mxu0 %v11615_v9  ;;  %8270 = vmatpush1.bf16.msra.mxu1 %v11618_v10  ;;  %v11710_v9 = vld [vmem:[%s15502_s1 + $0x20a8] ss:$16 sps:$4 sm:$0xff]   ;;  %v11715_v10 = vld [vmem:[%s15502_s1 + $0x20c4] ss:$16 sps:$4 sm:$0xff]  }
 0x3dc   :  { %7533 = vmatprep.subr.bf16.mxu0 %v11623_v12  ;;  %8271 = vmatprep.subr.bf16.mxu1 %v11626_v13  ;;  %v11718_v12 = vld [vmem:[%s15502_s1 + $0x20cc] ss:$16 sps:$4 sm:$0xff]   ;;  %v11713_v13 = vld [vmem:[%s15502_s1 + $0x20c0] ss:$16 sps:$4 sm:$0xff]  }
 0x3df   :  { %7534 = vmatpush1.bf16.msra.mxu0 %v11621_v15  ;;  %8272 = vmatpush1.bf16.msra.mxu1 %v11624_v11  ;;  %v11716_v15 = vld [vmem:[%s15502_s1 + $0x20c8] ss:$16 sps:$4 sm:$0xff]   ;;  %v11721_v11 = vld [vmem:[%s15502_s1 + $0x20e4] ss:$16 sps:$4 sm:$0xff]  }
 0x3e0   :  { %7535 = vmatprep.subr.bf16.mxu0 %v11629_v17  ;;  %8273 = vmatprep.subr.bf16.mxu1 %v11632_v14  ;;  %v11724_v17 = vld [vmem:[%s15502_s1 + $0x20ec] ss:$16 sps:$4 sm:$0xff]   ;;  %v11719_v14 = vld [vmem:[%s15502_s1 + $0x20e0] ss:$16 sps:$4 sm:$0xff]  }
 0x3e3   :  { %7536 = vmatpush1.bf16.msra.mxu0 %v11627_v19  ;;  %8274 = vmatpush1.bf16.msra.mxu1 %v11630_v20  ;;  %v11722_v19 = vld [vmem:[%s15502_s1 + $0x20e8] ss:$16 sps:$4 sm:$0xff]   ;;  %v11727_v20 = vld [vmem:[%s15502_s1 + $0x2104] ss:$16 sps:$4 sm:$0xff]  }
 0x3e4   :  { %7537 = vmatprep.subr.bf16.mxu0 %v11635_v16  ;;  %8275 = vmatprep.subr.bf16.mxu1 %v11638_v22  ;;  %v11730_v16 = vld [vmem:[%s15502_s1 + $0x210c] ss:$16 sps:$4 sm:$0xff]   ;;  %v11725_v22 = vld [vmem:[%s15502_s1 + $0x2100] ss:$16 sps:$4 sm:$0xff]  }
 0x3e7   :  { %7538 = vmatpush1.bf16.msra.mxu0 %v11633_v23  ;;  %8276 = vmatpush1.bf16.msra.mxu1 %v11636_v18  ;;  %v11728_v23 = vld [vmem:[%s15502_s1 + $0x2108] ss:$16 sps:$4 sm:$0xff]   ;;  %v11733_v18 = vld [vmem:[%s15502_s1 + $0x2124] ss:$16 sps:$4 sm:$0xff]  }
 0x3e8   :  { %7539 = vmatprep.subr.bf16.mxu0 %v11641_v25  ;;  %8277 = vmatprep.subr.bf16.mxu1 %v11644_v26  ;;  %v11736_v25 = vld [vmem:[%s15502_s1 + $0x212c] ss:$16 sps:$4 sm:$0xff]   ;;  %v11731_v26 = vld [vmem:[%s15502_s1 + $0x2120] ss:$16 sps:$4 sm:$0xff]  }
 0x3eb   :  { %7540 = vmatpush1.bf16.msra.mxu0 %v11639_v21  ;;  %8278 = vmatpush1.bf16.msra.mxu1 %v11642_v28  ;;  %v11734_v21 = vld [vmem:[%s15502_s1 + $0x2128] ss:$16 sps:$4 sm:$0xff]   ;;  %v11739_v28 = vld [vmem:[%s15502_s1 + $0x2144] ss:$16 sps:$4 sm:$0xff]  }
 0x3ec   :  { %7541 = vmatprep.subr.bf16.mxu0 %v11647_v29  ;;  %8279 = vmatprep.subr.bf16.mxu1 %v11650_v24  ;;  %v11742_v29 = vld [vmem:[%s15502_s1 + $0x214c] ss:$16 sps:$4 sm:$0xff]   ;;  %v11737_v24 = vld [vmem:[%s15502_s1 + $0x2140] ss:$16 sps:$4 sm:$0xff]  }
 0x3ef   :  { %7542 = vmatpush1.bf16.msra.mxu0 %v11645_v31  ;;  %8280 = vmatpush1.bf16.msra.mxu1 %v11648_v32  ;;  %v11740_v31 = vld [vmem:[%s15502_s1 + $0x2148] ss:$16 sps:$4 sm:$0xff]   ;;  %v11745_v32 = vld [vmem:[%s15502_s1 + $0x2164] ss:$16 sps:$4 sm:$0xff]  }
 0x3f0   :  { %7543 = vmatprep.subr.bf16.mxu0 %v11653_v33  ;;  %8281 = vmatprep.subr.bf16.mxu1 %v11656_v34  ;;  %v11748_v33 = vld [vmem:[%s15502_s1 + $0x216c] ss:$16 sps:$4 sm:$0xff]   ;;  %v11743_v34 = vld [vmem:[%s15502_s1 + $0x2160] ss:$16 sps:$4 sm:$0xff]  }
 0x3f3   :  { %7544 = vmatpush1.bf16.msra.mxu0 %v11651_v35  ;;  %8282 = vmatpush1.bf16.msra.mxu1 %v11654_v30  ;;  %v11746_v35 = vld [vmem:[%s15502_s1 + $0x2168] ss:$16 sps:$4 sm:$0xff]   ;;  %v11751_v30 = vld [vmem:[%s15502_s1 + $0x2184] ss:$16 sps:$4 sm:$0xff]  }
 0x3f4   :  { %7545 = vmatprep.subr.bf16.mxu0 %v11659_v37  ;;  %8283 = vmatprep.subr.bf16.mxu1 %v11662_v38  ;;  %v11754_v37 = vld [vmem:[%s15502_s1 + $0x218c] ss:$16 sps:$4 sm:$0xff]   ;;  %v11749_v38 = vld [vmem:[%s15502_s1 + $0x2180] ss:$16 sps:$4 sm:$0xff]  }
 0x3f7   :  { %7546 = vmatpush1.bf16.msra.mxu0 %v11657_v27  ;;  %8284 = vmatpush1.bf16.msra.mxu1 %v11660_v40  ;;  %v11752_v27 = vld [vmem:[%s15502_s1 + $0x2188] ss:$16 sps:$4 sm:$0xff]   ;;  %v11757_v40 = vld [vmem:[%s15502_s1 + $0x21a4] ss:$16 sps:$4 sm:$0xff]  }
 0x3f8   :  { %7547 = vmatprep.subr.bf16.mxu0 %v11665_v41  ;;  %8285 = vmatprep.subr.bf16.mxu1 %v11668_v36  ;;  %v11760_v41 = vld [vmem:[%s15502_s1 + $0x21ac] ss:$16 sps:$4 sm:$0xff]   ;;  %v11755_v36 = vld [vmem:[%s15502_s1 + $0x21a0] ss:$16 sps:$4 sm:$0xff]  }
 0x3fb   :  { %7548 = vmatpush1.bf16.msra.mxu0 %v11663_v43  ;;  %8286 = vmatpush1.bf16.msra.mxu1 %v11666_v44  ;;  %v11758_v43 = vld [vmem:[%s15502_s1 + $0x21a8] ss:$16 sps:$4 sm:$0xff]   ;;  %v11763_v44 = vld [vmem:[%s15502_s1 + $0x21c4] ss:$16 sps:$4 sm:$0xff]  }
 0x3fc   :  { %7549 = vmatprep.subr.bf16.mxu0 %v11671_v39  ;;  %8287 = vmatprep.subr.bf16.mxu1 %v11674_v46  ;;  %v11766_v39 = vld [vmem:[%s15502_s1 + $0x21cc] ss:$16 sps:$4 sm:$0xff]   ;;  %v11761_v46 = vld [vmem:[%s15502_s1 + $0x21c0] ss:$16 sps:$4 sm:$0xff]  }
 0x3ff   :  { %7550 = vmatpush1.bf16.msra.mxu0 %v11669_v47  ;;  %8288 = vmatpush1.bf16.msra.mxu1 %v11672_v42  ;;  %v11764_v47 = vld [vmem:[%s15502_s1 + $0x21c8] ss:$16 sps:$4 sm:$0xff]   ;;  %v11769_v42 = vld [vmem:[%s15502_s1 + $0x21e4] ss:$16 sps:$4 sm:$0xff]  }
 0x400   :  { %7560 = vmatprep.subr.bf16.mxu0 %v11679_v49  ;;  %8298 = vmatprep.subr.bf16.mxu1 %v11682_v50  ;;  %v11772_v49 = vld [vmem:[%s15502_s1 + $0x21ec] ss:$16 sps:$4 sm:$0xff]   ;;  %v11767_v50 = vld [vmem:[%s15502_s1 + $0x21e0] ss:$16 sps:$4 sm:$0xff]  }
 0x402   :  { %7552 = vmatmul.mubr.bf16.vlgmr.msra.gmra.mrb[0].mxu0 %v8766_v53  ;;  %8290 = vmatmul.mubr.bf16.vlgmr.msra.gmra.mrb[0].mxu1 %v8766_v53  ;;  %v11780_v53 = vld [vmem:[%s15502_s1 + $0x220c] ss:$16 sps:$4 sm:$0xff]  }
 0x403   :  { %7561 = vmatpush1.bf16.msra.mxu0 %v11677_v51  ;;  %8299 = vmatpush1.bf16.msra.mxu1 %v11680_v52  ;;  %v11770_v51 = vld [vmem:[%s15502_s1 + $0x21e8] ss:$16 sps:$4 sm:$0xff]   ;;  %v11777_v52 = vld [vmem:[%s15502_s1 + $0x2204] ss:$16 sps:$4 sm:$0xff]  }
 0x404   :  { %7562 = vmatprep.subr.bf16.mxu0 %v11685_v54  ;;  %8300 = vmatprep.subr.bf16.mxu1 %v11688_v55  ;;  %v8768_v54 = vcombine.low %v15104_v45, %v15104_v45  ;;  %v11775_v55 = vld [vmem:[%s15502_s1 + $0x2200] ss:$16 sps:$4 sm:$0xff]   ;;  %v11786_v45 = vld [vmem:[%s15502_s1 + $0x222c] ss:$16 sps:$4 sm:$0xff]  }
 0x405   :  { %7592 = vmatprep.mubr.bf16.mxu0 %v8769_v56  ;;  %8330 = vmatprep.mubr.bf16.mxu1 %v8769_v56  ;;  %v11778_v56 = vld [vmem:[%s15502_s1 + $0x2208] ss:$16 sps:$4 sm:$0xff]  }
 0x407   :  { %7563 = vmatpush1.bf16.msra.mxu0 %v11683_v48  ;;  %8301 = vmatpush1.bf16.msra.mxu1 %v11686_v57  ;;  %v11783_v48 = vld [vmem:[%s15502_s1 + $0x2224] ss:$16 sps:$4 sm:$0xff]   ;;  %v11781_v57 = vld [vmem:[%s15502_s1 + $0x2220] ss:$16 sps:$4 sm:$0xff]  }
 0x408   :  { %7564 = vmatprep.subr.bf16.mxu0 %v11691_v58  ;;  %8302 = vmatprep.subr.bf16.mxu1 %v11694_v59  ;;  %v11784_v58 = vld [vmem:[%s15502_s1 + $0x2228] ss:$16 sps:$4 sm:$0xff]   ;;  %v11789_v59 = vld [vmem:[%s15502_s1 + $0x2244] ss:$16 sps:$4 sm:$0xff]  }
 0x40b   :  { %7565 = vmatpush1.bf16.msra.mxu0 %v11689_v60  ;;  %8303 = vmatpush1.bf16.msra.mxu1 %v11692_v61  ;;  %v11792_v60 = vld [vmem:[%s15502_s1 + $0x224c] ss:$16 sps:$4 sm:$0xff]   ;;  %v11856_v61 = vmov 0  }
 0x40c   :  { %7566 = vmatprep.subr.bf16.mxu0 %v11697_v62  ;;  %8304 = vmatprep.subr.bf16.mxu1 %v11700_v63  ;;  %v11787_v62 = vld [vmem:[%s15502_s1 + $0x2240] ss:$16 sps:$4 sm:$0xff]   ;;  %v11790_v63 = vld [vmem:[%s15502_s1 + $0x2248] ss:$16 sps:$4 sm:$0xff]  }
 0x40f   :  { %7567 = vmatpush1.bf16.msra.mxu0 %v11695_v0  ;;  %8305 = vmatpush1.bf16.msra.mxu1 %v11698_v1  ;;  %v11795_v0 = vld [vmem:[%s15502_s1 + $0x2264] ss:$16 sps:$4 sm:$0xff]   ;;  %v11798_v1 = vld [vmem:[%s15502_s1 + $0x226c] ss:$16 sps:$4 sm:$0xff]  }
 0x410   :  { %7568 = vmatprep.subr.bf16.mxu0 %v11703_v2  ;;  %8306 = vmatprep.subr.bf16.mxu1 %v11706_v3  ;;  %v11793_v2 = vld [vmem:[%s15502_s1 + $0x2260] ss:$16 sps:$4 sm:$0xff]   ;;  %v11796_v3 = vld [vmem:[%s15502_s1 + $0x2268] ss:$16 sps:$4 sm:$0xff]  }
 0x413   :  { %7569 = vmatpush1.bf16.msra.mxu0 %v11701_v4  ;;  %8307 = vmatpush1.bf16.msra.mxu1 %v11704_v5  ;;  %v11801_v4 = vld [vmem:[%s15502_s1 + $0x2284] ss:$16 sps:$4 sm:$0xff]   ;;  %v11804_v5 = vld [vmem:[%s15502_s1 + $0x228c] ss:$16 sps:$4 sm:$0xff]  }
 0x414   :  { %7570 = vmatprep.subr.bf16.mxu0 %v11709_v6  ;;  %8308 = vmatprep.subr.bf16.mxu1 %v11712_v7  ;;  %v11799_v6 = vld [vmem:[%s15502_s1 + $0x2280] ss:$16 sps:$4 sm:$0xff]   ;;  %v11802_v7 = vld [vmem:[%s15502_s1 + $0x2288] ss:$16 sps:$4 sm:$0xff]  }
 0x417   :  { %7571 = vmatpush1.bf16.msra.mxu0 %v11707_v8  ;;  %8309 = vmatpush1.bf16.msra.mxu1 %v11710_v9  ;;  %v11807_v8 = vld [vmem:[%s15502_s1 + $0x22a4] ss:$16 sps:$4 sm:$0xff]   ;;  %v11810_v9 = vld [vmem:[%s15502_s1 + $0x22ac] ss:$16 sps:$4 sm:$0xff]  }
 0x418   :  { %7572 = vmatprep.subr.bf16.mxu0 %v11715_v10  ;;  %8310 = vmatprep.subr.bf16.mxu1 %v11718_v12  ;;  %v11805_v10 = vld [vmem:[%s15502_s1 + $0x22a0] ss:$16 sps:$4 sm:$0xff]   ;;  %v11808_v12 = vld [vmem:[%s15502_s1 + $0x22a8] ss:$16 sps:$4 sm:$0xff]  }
 0x41b   :  { %7573 = vmatpush1.bf16.msra.mxu0 %v11713_v13  ;;  %8311 = vmatpush1.bf16.msra.mxu1 %v11716_v15  ;;  %v11813_v13 = vld [vmem:[%s15502_s1 + $0x22c4] ss:$16 sps:$4 sm:$0xff]   ;;  %v11816_v15 = vld [vmem:[%s15502_s1 + $0x22cc] ss:$16 sps:$4 sm:$0xff]  }
 0x41c   :  { %7574 = vmatprep.subr.bf16.mxu0 %v11721_v11  ;;  %8312 = vmatprep.subr.bf16.mxu1 %v11724_v17  ;;  %v11811_v11 = vld [vmem:[%s15502_s1 + $0x22c0] ss:$16 sps:$4 sm:$0xff]   ;;  %v11814_v17 = vld [vmem:[%s15502_s1 + $0x22c8] ss:$16 sps:$4 sm:$0xff]  }
 0x41f   :  { %7575 = vmatpush1.bf16.msra.mxu0 %v11719_v14  ;;  %8313 = vmatpush1.bf16.msra.mxu1 %v11722_v19  ;;  %v11819_v14 = vld [vmem:[%s15502_s1 + $0x22e4] ss:$16 sps:$4 sm:$0xff]   ;;  %v11822_v19 = vld [vmem:[%s15502_s1 + $0x22ec] ss:$16 sps:$4 sm:$0xff]  }
 0x420   :  { %7576 = vmatprep.subr.bf16.mxu0 %v11727_v20  ;;  %8314 = vmatprep.subr.bf16.mxu1 %v11730_v16  ;;  %v11817_v20 = vld [vmem:[%s15502_s1 + $0x22e0] ss:$16 sps:$4 sm:$0xff]   ;;  %v11820_v16 = vld [vmem:[%s15502_s1 + $0x22e8] ss:$16 sps:$4 sm:$0xff]  }
 0x423   :  { %7577 = vmatpush1.bf16.msra.mxu0 %v11725_v22  ;;  %8315 = vmatpush1.bf16.msra.mxu1 %v11728_v23  ;;  %v11824_v22 = vld [vmem:[%s15504_s3 + $0x40] sm:$0xff]  }
 0x424   :  { %7578 = vmatprep.subr.bf16.mxu0 %v11733_v18  ;;  %8316 = vmatprep.subr.bf16.mxu1 %v11736_v25  ;;  %v11825_v23 = vld [vmem:[%s15504_s3 + $0xc0] sm:$0xff]   ;;  %v11823_v18 = vld [vmem:[%s15503_s0 + $0x88] ss:$0 sps:$4 sm:$0xff]  }
 0x425   :  { %v11826_v25 = vld [vmem:[%s15504_s3] sm:$0xff]  }
 0x427   :  { %7579 = vmatpush1.bf16.msra.mxu0 %v11731_v26  ;;  %8317 = vmatpush1.bf16.msra.mxu1 %v11734_v21  ;;  %v11827_v26 = vld [vmem:[%s15504_s3 + $0x80] sm:$0xff]   ;;  %v11828_v21 = vld [vmem:[%s15504_s3 + $0x48] sm:$0xff]  }
 0x428   :  { %7580 = vmatprep.subr.bf16.mxu0 %v11739_v28  ;;  %8318 = vmatprep.subr.bf16.mxu1 %v11742_v29  ;;  %v11829_v28 = vld [vmem:[%s15504_s3 + $0xc8] sm:$0xff]  }
 0x429   :  { %v11830_v29 = vld [vmem:[%s15504_s3 + $0x8] sm:$0xff]  }
 0x42b   :  { %7581 = vmatpush1.bf16.msra.mxu0 %v11737_v24  ;;  %8319 = vmatpush1.bf16.msra.mxu1 %v11740_v31  ;;  %v11831_v24 = vld [vmem:[%s15504_s3 + $0x88] sm:$0xff]   ;;  %v11832_v31 = vld [vmem:[%s15504_s3 + $0x50] sm:$0xff]  }
 0x42c   :  { %7582 = vmatprep.subr.bf16.mxu0 %v11745_v32  ;;  %8320 = vmatprep.subr.bf16.mxu1 %v11748_v33  ;;  %v11833_v32 = vld [vmem:[%s15504_s3 + $0xd0] sm:$0xff]  }
 0x42d   :  { %v11834_v33 = vld [vmem:[%s15504_s3 + $0x10] sm:$0xff]  }
 0x42f   :  { %7583 = vmatpush1.bf16.msra.mxu0 %v11743_v34  ;;  %8321 = vmatpush1.bf16.msra.mxu1 %v11746_v35  ;;  %v11835_v34 = vld [vmem:[%s15504_s3 + $0x90] sm:$0xff]   ;;  %v11836_v35 = vld [vmem:[%s15504_s3 + $0x58] sm:$0xff]  }
 0x430   :  { %7584 = vmatprep.subr.bf16.mxu0 %v11751_v30  ;;  %8322 = vmatprep.subr.bf16.mxu1 %v11754_v37  ;;  %v11837_v30 = vld [vmem:[%s15504_s3 + $0xd8] sm:$0xff]  }
 0x431   :  { %v11838_v37 = vld [vmem:[%s15504_s3 + $0x18] sm:$0xff]  }
 0x433   :  { %7585 = vmatpush1.bf16.msra.mxu0 %v11749_v38  ;;  %8323 = vmatpush1.bf16.msra.mxu1 %v11752_v27  ;;  %v11839_v38 = vld [vmem:[%s15504_s3 + $0x98] sm:$0xff]   ;;  %v11840_v27 = vld [vmem:[%s15504_s3 + $0x60] sm:$0xff]  }
 0x434   :  { %7586 = vmatprep.subr.bf16.mxu0 %v11757_v40  ;;  %8324 = vmatprep.subr.bf16.mxu1 %v11760_v41  ;;  %v11841_v40 = vld [vmem:[%s15504_s3 + $0xe0] sm:$0xff]  }
 0x435   :  { %v11842_v41 = vld [vmem:[%s15504_s3 + $0x20] sm:$0xff]  }
 0x437   :  { %7587 = vmatpush1.bf16.msra.mxu0 %v11755_v36  ;;  %8325 = vmatpush1.bf16.msra.mxu1 %v11758_v43  ;;  %v11843_v36 = vld [vmem:[%s15504_s3 + $0xa0] sm:$0xff]   ;;  %v11844_v43 = vld [vmem:[%s15504_s3 + $0x68] sm:$0xff]  }
 0x438   :  { %7588 = vmatprep.subr.bf16.mxu0 %v11763_v44  ;;  %8326 = vmatprep.subr.bf16.mxu1 %v11766_v39  ;;  %v11845_v44 = vld [vmem:[%s15504_s3 + $0xe8] sm:$0xff]  }
 0x439   :  { %v11846_v39 = vld [vmem:[%s15504_s3 + $0x28] sm:$0xff]  }
 0x43b   :  { %7589 = vmatpush1.bf16.msra.mxu0 %v11761_v46  ;;  %8327 = vmatpush1.bf16.msra.mxu1 %v11764_v47  ;;  %v11847_v46 = vld [vmem:[%s15504_s3 + $0xa8] sm:$0xff]   ;;  %v11848_v47 = vld [vmem:[%s15504_s3 + $0x70] sm:$0xff]  }
 0x43c   :  { %7590 = vmatprep.subr.bf16.mxu0 %v11769_v42  ;;  %8328 = vmatprep.subr.bf16.mxu1 %v11772_v49  ;;  %v11849_v42 = vld [vmem:[%s15504_s3 + $0xf0] sm:$0xff]  }
 0x43d   :  { %v11850_v49 = vld [vmem:[%s15504_s3 + $0x30] sm:$0xff]  }
 0x43f   :  { %7591 = vmatpush1.bf16.msra.mxu0 %v11767_v50  ;;  %8329 = vmatpush1.bf16.msra.mxu1 %v11770_v51  ;;  %v11851_v50 = vld [vmem:[%s15504_s3 + $0xb0] sm:$0xff]   ;;  %v11852_v51 = vld [vmem:[%s15504_s3 + $0x78] sm:$0xff]  }
 0x440   :  { %7601 = vmatprep.subr.bf16.mxu0 %v11777_v52  ;;  %8339 = vmatprep.subr.bf16.mxu1 %v11780_v53  ;;  %v11853_v52 = vld [vmem:[%s15504_s3 + $0xf8] sm:$0xff]  }
 0x441   :  { %v11854_v53 = vld [vmem:[%s15504_s3 + $0x38] sm:$0xff]  }
 0x442   :  { %7593 = vmatmul.mubr.bf16.vlgmr.msra.gmra.mrb[0].mxu0 %v8768_v54  ;;  %8331 = vmatmul.mubr.bf16.vlgmr.msra.gmra.mrb[0].mxu1 %v8768_v54  ;;  %v11855_v54 = vld [vmem:[%s15504_s3 + $0xb8] sm:$0xff]  }
 0x443   :  { %7602 = vmatpush1.bf16.msra.mxu0 %v11775_v55  ;;  %8340 = vmatpush1.bf16.msra.mxu1 %v11778_v56  ;;  %v1161_v55 = vlaneseq }
 0x444   :  { %7603 = vmatprep.subr.bf16.mxu0 %v11783_v48  ;;  %8341 = vmatprep.subr.bf16.mxu1 %v11786_v45 }
 0x445   :  { %7633 = vmatprep.mubr.bf16.mxu0 %v11856_v61  ;;  %8371 = vmatprep.mubr.bf16.mxu1 %v11856_v61  ;;  %v1162_v56 = vshrl.u32 %v1161_v55, 7 }
 0x447   :  { %7604 = vmatpush1.bf16.msra.mxu0 %v11781_v57  ;;  %8342 = vmatpush1.bf16.msra.mxu1 %v11784_v58  ;;  %v1163_v48 = vsub.s32 0, %v1162_v56  ;;  %v1171_v45 = vsub.s32 2, %v1162_v56  ;;  %v1159_v57 = vld [vmem:[%s15505_s2] sm:$0xf]  ;;  %v1167_v58 = vsub.s32 1, %v1162_v56 }
 0x448   :  { %7605 = vmatprep.subr.bf16.mxu0 %v11789_v59  ;;  %8343 = vmatprep.subr.bf16.mxu1 %v11792_v60  ;;  %v1175_v59 = vsub.s32 3, %v1162_v56 }
 0x449   :  { %v1164_v60 = vrot.slane %v1159_v57, %v1163_v48  ;;  %v1172_v61 = vrot.slane %v1159_v57, %v1171_v45 }
 0x44b   :  { %7606 = vmatpush1.bf16.msra.mxu0 %v11787_v62  ;;  %8344 = vmatpush1.bf16.msra.mxu1 %v11790_v63  ;;  %v1168_v62 = vrot.slane %v1159_v57, %v1167_v58  ;;  %v1176_v63 = vrot.slane %v1159_v57, %v1175_v59 }
 0x44c   :  { %7607 = vmatprep.subr.bf16.mxu0 %v11795_v0  ;;  %8345 = vmatprep.subr.bf16.mxu1 %v11798_v1 }
 0x44f   :  { %7608 = vmatpush1.bf16.msra.mxu0 %v11793_v2  ;;  %8346 = vmatpush1.bf16.msra.mxu1 %v11796_v3 }
 0x450   :  { %7609 = vmatprep.subr.bf16.mxu0 %v11801_v4  ;;  %8347 = vmatprep.subr.bf16.mxu1 %v11804_v5 }
 0x453   :  { %7610 = vmatpush1.bf16.msra.mxu0 %v11799_v6  ;;  %8348 = vmatpush1.bf16.msra.mxu1 %v11802_v7 }
 0x454   :  { %7611 = vmatprep.subr.bf16.mxu0 %v11807_v8  ;;  %8349 = vmatprep.subr.bf16.mxu1 %v11810_v9 }
 0x457   :  { %7612 = vmatpush1.bf16.msra.mxu0 %v11805_v10  ;;  %8350 = vmatpush1.bf16.msra.mxu1 %v11808_v12 }
 0x458   :  { %7613 = vmatprep.subr.bf16.mxu0 %v11813_v13  ;;  %8351 = vmatprep.subr.bf16.mxu1 %v11816_v15 }
 0x45b   :  { %7614 = vmatpush1.bf16.msra.mxu0 %v11811_v11  ;;  %8352 = vmatpush1.bf16.msra.mxu1 %v11814_v17 }
 0x45c   :  { %7615 = vmatprep.subr.bf16.mxu0 %v11819_v14  ;;  %8353 = vmatprep.subr.bf16.mxu1 %v11822_v19 }
 0x45f   :  { %7616 = vmatpush1.bf16.msra.mxu0 %v11817_v20  ;;  %8354 = vmatpush1.bf16.msra.mxu1 %v11820_v16 }
 0x460   :  { %9924 = vmatprep.subr.bf16.mxu0 %v11824_v22  ;;  %9946 = vmatprep.subr.bf16.mxu1 %v11825_v23 }
 0x462   :  { %7634 = vmatmul.mubr.bf16.vlgmr.msra.gmra.mrb[0].mxu0 %v11823_v18  ;;  %8372 = vmatmul.mubr.bf16.vlgmr.msra.gmra.mrb[0].mxu1 %v11823_v18  ;;  %v9891_v18 = vld [vmem:[%s15506_s4] ss:$0 sm:$0xff] }
 0x463   :  { %9925 = vmatpush3.bf16.msra.mxu0 %v11826_v25  ;;  %9947 = vmatpush3.bf16.msra.mxu1 %v11827_v26 }
 0x464   :  { %9926 = vmatprep.subr.bf16.mxu0 %v11828_v21  ;;  %9948 = vmatprep.subr.bf16.mxu1 %v11829_v28 }
 0x467   :  { %9927 = vmatpush3.bf16.msra.mxu0 %v11830_v29  ;;  %9949 = vmatpush3.bf16.msra.mxu1 %v11831_v24 }
 0x468   :  { %9928 = vmatprep.subr.bf16.mxu0 %v11832_v31  ;;  %9950 = vmatprep.subr.bf16.mxu1 %v11833_v32 }
 0x46b   :  { %9929 = vmatpush3.bf16.msra.mxu0 %v11834_v33  ;;  %9951 = vmatpush3.bf16.msra.mxu1 %v11835_v34 }
 0x46c   :  { %9930 = vmatprep.subr.bf16.mxu0 %v11836_v35  ;;  %9952 = vmatprep.subr.bf16.mxu1 %v11837_v30 }
 0x46f   :  { %9931 = vmatpush3.bf16.msra.mxu0 %v11838_v37  ;;  %9953 = vmatpush3.bf16.msra.mxu1 %v11839_v38 }
 0x470   :  { %9932 = vmatprep.subr.bf16.mxu0 %v11840_v27  ;;  %9954 = vmatprep.subr.bf16.mxu1 %v11841_v40 }
 0x473   :  { %9933 = vmatpush3.bf16.msra.mxu0 %v11842_v41  ;;  %9955 = vmatpush3.bf16.msra.mxu1 %v11843_v36 }
 0x474   :  { %9934 = vmatprep.subr.bf16.mxu0 %v11844_v43  ;;  %9956 = vmatprep.subr.bf16.mxu1 %v11845_v44 }
 0x477   :  { %9935 = vmatpush3.bf16.msra.mxu0 %v11846_v39  ;;  %9957 = vmatpush3.bf16.msra.mxu1 %v11847_v46 }
 0x478   :  { %9936 = vmatprep.subr.bf16.mxu0 %v11848_v47  ;;  %9958 = vmatprep.subr.bf16.mxu1 %v11849_v42 }
 0x47b   :  { %9937 = vmatpush3.bf16.msra.mxu0 %v11850_v49  ;;  %9959 = vmatpush3.bf16.msra.mxu1 %v11851_v50 }
 0x47c   :  { %9938 = vmatprep.subr.bf16.mxu0 %v11852_v51  ;;  %9960 = vmatprep.subr.bf16.mxu1 %v11853_v52 }
 0x47f   :  { %9939 = vmatpush3.bf16.msra.mxu0 %v11854_v53  ;;  %9961 = vmatpush3.bf16.msra.mxu1 %v11855_v54 }
 0x535   :  { %v7635_v0 = vpop.f32.mrb[0].mxu0  ;;  %v8373_v1 = vpop.f32.mrb[0].mxu1 }
 0x536   :  { %v9968_v2 = vadd.f32 %v7635_v0, %v1164_v60  ;;  %v9970_v3 = vadd.f32 %v8373_v1, %v1172_v61  ;;  %v7637_v4 = vpop.f32.mrb[1].mxu0  ;;  %v8375_v5 = vpop.f32.mrb[1].mxu1 }
 0x537   :  { %v9969_v6 = vadd.f32 %v7637_v4, %v1168_v62  ;;  %v9971_v7 = vadd.f32 %v8375_v5, %v1176_v63  ;;  %v7639_v8 = vpop.f32.mrb[2].mxu0  ;;  %v8377_v9 = vpop.f32.mrb[2].mxu1 }
 0x538   :  { %v8380_v10 = vmax.f32 %v9968_v2, 0.0  ;;  %v8382_v12 = vmax.f32 %v9970_v3, 0.0  ;;  %v7640_v13 = vpop.f32.mrb[3].mxu0  ;;  %v8378_v15 = vpop.f32.mrb[3].mxu1 }
 0x539   :  { %v8381_v11 = vmax.f32 %v9969_v6, 0.0  ;;  %v8383_v17 = vmax.f32 %v9971_v7, 0.0 }
 0x53a   :  { %v8384_v20 = vpack.c.bf16 %v8380_v10, %v8380_v10  ;;  %v8386_v16 = vpack.c.bf16 %v8382_v12, %v8382_v12 }
 0x53b   :  { %v8385_v14 = vpack.c.bf16 %v8381_v11, %v8381_v11  ;;  %v8387_v19 = vpack.c.bf16 %v8383_v17, %v8383_v17 }
 0x53d   :  { %8683 = vmatprep.mubr.bf16.mxu0 %v8385_v14  ;;  %8723 = vmatprep.mubr.bf16.mxu1 %v8387_v19 }
 0x53e   :  { %8684 = vmatmul.mubr.bf16.vlgmr.msra.gmra.mrb[4].mxu0 %v8384_v20  ;;  %8724 = vmatmul.mubr.bf16.vlgmr.msra.gmra.mrb[4].mxu1 %v8386_v16 }
 0x611   :  { %v9940_v22 = vpop.f32.mrb[4].mxu0  ;;  %v9962_v23 = vpop.f32.mrb[4].mxu1 }
 0x612   :  { %v9941_v25 = vpop.f32.mrb[5].mxu0  ;;  %v9963_v26 = vpop.f32.mrb[5].mxu1 }
 0x613   :  { %v9942_v21 = vadd.f32 %v9941_v25, %v9940_v22  ;;  %v9964_v28 = vadd.f32 %v9963_v26, %v9962_v23  ;;  %v9943_v29 = vpop.f32.mrb[6].mxu0  ;;  %v9965_v24 = vpop.f32.mrb[6].mxu1 }
 0x614   :  { %v9944_v31 = vpop.f32.mrb[7].mxu0  ;;  %v9966_v32 = vpop.f32.mrb[7].mxu1 }
 0x615   :  { %v8686_v33 = vadd.f32 %v9942_v21, %v9891_v18 }
 0x617   :  { %v8726_v34 = vadd.f32 %v9964_v28, %v8686_v33 }
 0x619   :  { %8731 = vst [vmem:[%s15507_s5] sm:$0xff] %v8726_v34 }

</bundles_post_ra>
